<compile_context>
chip_gen: v6e
topology: v6e:2x2x1
jax: 0.10.0
libtpu: 0.0.40
codegen_flags: <defaults>
</compile_context>

<pallas_src>
import functools
import math

import jax
import jax.numpy as jnp
from jax.experimental import pallas as pl
from jax.experimental.pallas import tpu as pltpu

_SQRT_HALF = 0.7071067811865476

# MXU-native input dtype on v5e/v6e/v7x; accumulation stays f32 in every dot.
WEIGHT_DTYPE = jnp.bfloat16


def _round_up(x, m):
    return ((x + m - 1) // m) * m


@functools.lru_cache(maxsize=1)
def _device_kind():
    try:
        return jax.devices()[0].device_kind.lower()
    except Exception:
        return ""


@functools.lru_cache(maxsize=1)
def _vmem_limit_bytes():
    kind = _device_kind()
    if "v7" in kind:
        return 48 * 1024 * 1024          # 64 MiB physical VMEM on v7x
    if "v5" in kind or "v6" in kind:
        return 96 * 1024 * 1024          # 128 MiB physical VMEM
    return 64 * 1024 * 1024              # conservative fallback


def _default_m_tile():
    # v5e MXU is 128 wide; 256-row tiles only help on v6e/v7x (2x256x256 MXU).
    return 128 if "v5" in _device_kind() else 256


def _cparams(sem):
    return pltpu.CompilerParams(dimension_semantics=sem,
                                vmem_limit_bytes=_vmem_limit_bytes())


def _const_spec(shape):
    n = len(shape)
    return pl.BlockSpec(shape, lambda *_: (0,) * n)


# ---------------------------------------------------------------------------
# In-kernel math helpers
# ---------------------------------------------------------------------------
def _erf_approx(z):
    # Abramowitz & Stegun 7.1.26 rational approximation (|err| < 1.5e-7),
    # reproducing PyTorch's exact-erf GELU to float32 precision.
    a1, a2, a3, a4, a5 = (0.254829592, -0.284496736, 1.421413741,
                          -1.453152027, 1.061405429)
    p = 0.3275911
    az = jnp.abs(z)
    t = 1.0 / (1.0 + p * az)
    poly = t * (a1 + t * (a2 + t * (a3 + t * (a4 + t * a5))))
    y = 1.0 - poly * jnp.exp(-az * az)
    return jnp.where(z >= 0, y, -y)


def _gelu_exact(x):
    return 0.5 * x * (1.0 + _erf_approx(x * _SQRT_HALF))


def _layernorm(x, w, b, eps=1e-5):
    mu = jnp.mean(x, axis=-1, keepdims=True)
    xc = x - mu
    var = jnp.mean(xc * xc, axis=-1, keepdims=True)
    return xc * jax.lax.rsqrt(var + eps) * w + b    # rsqrt -> EUP slot


# ---------------------------------------------------------------------------
# Kernels
# ---------------------------------------------------------------------------
def _embed_kernel(p_ref, w_ref, add_ref, o_ref):
    # p_ref: (1, TS, K)  w_ref: (K, D)  add_ref: (TS, D)  o_ref: (1, TS, D)
    # `add` already folds conv bias + pos_embed + cls token (fused epilogue).
    x = p_ref[0].astype(w_ref.dtype)
    o_ref[0] = (jnp.dot(x, w_ref[...], preferred_element_type=jnp.float32)
                + add_ref[...]).astype(o_ref.dtype)


def _attn_kernel(x_ref, wqkv_ref, bqkv_ref, wo_ref, bo_ref, kbias_ref,
                 ln1w_ref, ln1b_ref, o_ref, *, num_heads):
    # x_ref: (1, S_pad, D) -- full (padded) sequence for one batch element, so the
    # QKV projection below runs exactly once per image.
    x = x_ref[0]                                   # (S_pad, D) f32
    S, D = x.shape
    hd = D // num_heads
    scale = 1.0 / math.sqrt(hd)
    cdt = wqkv_ref.dtype                           # bf16 compute dtype
    xc = x.astype(cdt)
    kbias = kbias_ref[...]                         # (1, S_pad) additive 0 / -1e30

    # Single full-width QKV projection (3D-wide MXU output, computed once).
    qkv = (jnp.dot(xc, wqkv_ref[...], preferred_element_type=jnp.float32)
           + bqkv_ref[...])                        # (S_pad, 3D) f32

    wo = wo_ref[...]                               # (D, D) bf16
    attn = jnp.zeros((S, D), jnp.float32)
    for h in range(num_heads):
        a = h * hd
        q = (qkv[:, a:a + hd] * scale).astype(cdt)             # (S, hd)
        k = qkv[:, D + a:D + a + hd].astype(cdt)               # (S, hd)
        v = qkv[:, 2 * D + a:2 * D + a + hd].astype(cdt)       # (S, hd)
        # scores contract hd with no materialized transpose of k.
        s = jax.lax.dot_general(q, k, (((1,), (1,)), ((), ())),
                                preferred_element_type=jnp.float32) + kbias
        m = jnp.max(s, axis=-1, keepdims=True)
        e = jnp.exp(s - m)
        p = e * pl.reciprocal(jnp.sum(e, axis=-1, keepdims=True), approx=True)
        ctx = jnp.dot(p.astype(cdt), v, preferred_element_type=jnp.float32)
        # Output projection accumulated per head directly into full-D layout
        # (no masked hd-wide stores, no (TQ, D) gather scratch).
        attn = attn + jnp.dot(ctx.astype(cdt), wo[a:a + hd, :],
                              preferred_element_type=jnp.float32)

    attn = attn + bo_ref[...]
    # Post-norm residual (nn.TransformerEncoderLayer, norm_first=False).
    # TODO(synk): dropout layers (default p=0.1) are treated as inference-mode identity.
    o_ref[0] = _layernorm(x + attn, ln1w_ref[...], ln1b_ref[...]).astype(o_ref.dtype)


def _ffn_kernel(y_ref, w1_ref, b1_ref, w2_ref, b2_ref, ln2w_ref, ln2b_ref,
                o_ref, acc_ref):
    # Grid: (row tiles, Dff tiles).  Dff is a reduction axis -> f32 accumulator.
    f = pl.program_id(1)
    y = y_ref[...]                       # (TM, D) f32

    @pl.when(f == 0)
    def _():
        acc_ref[...] = y + b2_ref[...]   # residual + final bias folded in once

    w1 = w1_ref[...]
    cdt = w1.dtype
    h1 = jnp.dot(y.astype(cdt), w1, preferred_element_type=jnp.float32) + b1_ref[...]
    h1 = _gelu_exact(h1)                 # f32 elementwise (v5e-safe)
    acc_ref[...] += jnp.dot(h1.astype(cdt), w2_ref[...],
                            preferred_element_type=jnp.float32)

    @pl.when(f == pl.num_programs(1) - 1)
    def _():
        o_ref[...] = _layernorm(acc_ref[...], ln2w_ref[...],
                                ln2b_ref[...]).astype(o_ref.dtype)


def _head_kernel(x_ref, lnw_ref, lnb_ref, wh_ref, bh_ref, o_ref):
    x = _layernorm(x_ref[...], lnw_ref[...], lnb_ref[...])
    o_ref[...] = (jnp.dot(x.astype(wh_ref.dtype), wh_ref[...],
                          preferred_element_type=jnp.float32)
                  + bh_ref[...]).astype(o_ref.dtype)


# ---------------------------------------------------------------------------
# Wrappers around pallas_call
# ---------------------------------------------------------------------------
def embed_tokens(patches_pad, w, add, *, token_tile=128):
    B, S_pad, K = patches_pad.shape
    D = w.shape[1]
    TS = token_tile if S_pad % token_tile == 0 else 128
    TS = min(TS, S_pad)
    return pl.pallas_call(
        _embed_kernel,
        out_shape=jax.ShapeDtypeStruct((B, S_pad, D), jnp.float32),
        grid=(B, S_pad // TS),
        in_specs=[
            pl.BlockSpec((1, TS, K), lambda b, t: (b, t, 0)),
            _const_spec((K, D)),
            pl.BlockSpec((TS, D), lambda b, t: (t, 0)),
        ],
        out_specs=pl.BlockSpec((1, TS, D), lambda b, t: (b, t, 0)),
        compiler_params=_cparams(("parallel", "parallel")),
    )(patches_pad, w, add)


def attention_block(x, wqkv, bqkv, wo, bo, kbias, ln1w, ln1b, *, num_heads):
    B, S_pad, D = x.shape
    kernel = functools.partial(_attn_kernel, num_heads=num_heads)
    return pl.pallas_call(
        kernel,
        out_shape=jax.ShapeDtypeStruct((B, S_pad, D), jnp.float32),
        grid=(B,),
        in_specs=[
            pl.BlockSpec((1, S_pad, D), lambda b: (b, 0, 0)),   # full seq / image
            _const_spec((D, 3 * D)), _const_spec((1, 3 * D)),
            _const_spec((D, D)), _const_spec((1, D)),
            _const_spec((1, S_pad)),                            # key-pad bias
            _const_spec((1, D)), _const_spec((1, D)),
        ],
        out_specs=pl.BlockSpec((1, S_pad, D), lambda b: (b, 0, 0)),
        compiler_params=_cparams(("parallel",)),
    )(x, wqkv, bqkv, wo, bo, kbias, ln1w, ln1b)


def ffn_block(y2d, w1, b1, w2, b2, ln2w, ln2b, *, m_tile=None, dff_tile=1024):
    M, D = y2d.shape
    Dff = w1.shape[1]
    if m_tile is None:
        m_tile = _default_m_tile()
    TM = m_tile if M % m_tile == 0 else 128
    TM = min(TM, M)
    # Collapse the Dff reduction axis entirely when the weights fit a single tile.
    if Dff <= dff_tile or Dff % dff_tile != 0:
        TF = Dff
    else:
        TF = dff_tile
    return pl.pallas_call(
        _ffn_kernel,
        out_shape=jax.ShapeDtypeStruct((M, D), jnp.float32),
        grid=(M // TM, Dff // TF),
        in_specs=[
            pl.BlockSpec((TM, D), lambda m, f: (m, 0)),
            pl.BlockSpec((D, TF), lambda m, f: (0, f)),
            pl.BlockSpec((1, TF), lambda m, f: (0, f)),
            pl.BlockSpec((TF, D), lambda m, f: (f, 0)),
            _const_spec((1, D)), _const_spec((1, D)), _const_spec((1, D)),
        ],
        out_specs=pl.BlockSpec((TM, D), lambda m, f: (m, 0)),
        scratch_shapes=[pltpu.VMEM((TM, D), jnp.float32)],
        compiler_params=_cparams(("parallel", "arbitrary")),
    )(y2d, w1, b1, w2, b2, ln2w, ln2b)


def norm_head(cls_x, lnw, lnb, wh_pad, bh_pad):
    B, D = cls_x.shape
    Cp = wh_pad.shape[1]
    TB = B if B < 128 else 128
    return pl.pallas_call(
        _head_kernel,
        out_shape=jax.ShapeDtypeStruct((B, Cp), jnp.float32),
        grid=(pl.cdiv(B, TB),),
        in_specs=[
            pl.BlockSpec((TB, D), lambda i: (i, 0)),
            _const_spec((1, D)), _const_spec((1, D)),
            _const_spec((D, Cp)), _const_spec((1, Cp)),
        ],
        out_specs=pl.BlockSpec((TB, Cp), lambda i: (i, 0)),
        compiler_params=_cparams(("parallel",)),
    )(cls_x, lnw, lnb, wh_pad, bh_pad)


# ---------------------------------------------------------------------------
# Parameters (deterministic synthetic init mirroring the PyTorch shapes)
# ---------------------------------------------------------------------------
def _xavier_uniform(key, fan_in, fan_out, shape):
    bound = math.sqrt(6.0 / (fan_in + fan_out))
    return jax.random.uniform(key, shape, jnp.float32, -bound, bound)


def _trunc_normal(key, shape, std=0.02):
    return jnp.clip(jax.random.normal(key, shape, jnp.float32), -2.0, 2.0) * std


def init_vit_params(key, *, img_size, patch_size, num_classes,
                    embed_dim, depth, num_heads, mlp_ratio=4.0):
    assert img_size % patch_size == 0, "Image size must be divisible by patch size"
    assert embed_dim % num_heads == 0
    num_patches = (img_size // patch_size) ** 2
    D = embed_dim
    Dff = int(embed_dim * mlp_ratio)
    patch_dim = 3 * patch_size * patch_size

    keys = iter(jax.random.split(key, 8 + 4 * depth))
    params = {
        # conv weight stored pre-flattened/transposed: (3*P*P, D)
        "patch_w": _xavier_uniform(next(keys), patch_dim,
                                   D * patch_size * patch_size, (patch_dim, D)),
        "patch_b": jnp.zeros((1, D), jnp.float32),
        "cls_token": _trunc_normal(next(keys), (1, 1, D)),
        "pos_embed": _trunc_normal(next(keys), (1, num_patches + 1, D)),
        "ln_w": jnp.ones((1, D), jnp.float32),
        "ln_b": jnp.zeros((1, D), jnp.float32),
        "head_w": _xavier_uniform(next(keys), D, num_classes, (D, num_classes)),
        "head_b": jnp.zeros((1, num_classes), jnp.float32),
        "layers": [],
    }
    for _ in range(depth):
        params["layers"].append({
            "wqkv": _xavier_uniform(next(keys), D, 3 * D, (D, 3 * D)),
            "bqkv": jnp.zeros((1, 3 * D), jnp.float32),
            "wo": _xavier_uniform(next(keys), D, D, (D, D)),
            "bo": jnp.zeros((1, D), jnp.float32),
            "ln1w": jnp.ones((1, D), jnp.float32),
            "ln1b": jnp.zeros((1, D), jnp.float32),
            "w1": _xavier_uniform(next(keys), D, Dff, (D, Dff)),
            "b1": jnp.zeros((1, Dff), jnp.float32),
            "w2": _xavier_uniform(next(keys), Dff, D, (Dff, D)),
            "b2": jnp.zeros((1, D), jnp.float32),
            "ln2w": jnp.ones((1, D), jnp.float32),
            "ln2b": jnp.zeros((1, D), jnp.float32),
        })
    return params


# ---------------------------------------------------------------------------
# Forward pass (layout glue in plain JAX, hot paths inside Pallas kernels)
# ---------------------------------------------------------------------------
def vit_forward(x_nchw, params, *, patch_size, num_heads,
                m_tile=None, dff_tile=1024, token_tile=128):
    B, C, H, W = x_nchw.shape
    P = patch_size
    nH, nW = H // P, W // P
    N = nH * nW
    S = N + 1
    D = params["patch_w"].shape[1]
    num_classes = params["head_w"].shape[1]

    # Pad sequence to a multiple of 128 -> lane-dense (S,S) scores & stores.
    S_pad = _round_up(S, 128)
    patch_dim = C * P * P

    # ---- patch extraction (layout glue; conv with stride==kernel == matmul) ----
    patches = (x_nchw.reshape(B, C, nH, P, nW, P)
               .transpose(0, 2, 4, 1, 3, 5)
               .reshape(B, N, patch_dim))
    # Pad only the token axis (cls row 0 + tail up to S_pad); no contraction-dim
    # padding copy of the activation -- ViT-B/L patch_dim is already a multiple of
    # 128 and smaller cases are padded internally by the compiler.
    patches_pad = jnp.zeros((B, S_pad, patch_dim), jnp.float32)
    patches_pad = patches_pad.at[:, 1:N + 1, :].set(patches)

    w_embed = params["patch_w"].astype(WEIGHT_DTYPE)
    add = jnp.zeros((S_pad, D), jnp.float32)
    add = add.at[0].set(params["cls_token"][0, 0] + params["pos_embed"][0, 0])
    add = add.at[1:N + 1].set(params["patch_b"][0] + params["pos_embed"][0, 1:S])
    # pos_drop has p=0.0 -> identity.

    seq = embed_tokens(patches_pad, w_embed, add, token_tile=token_tile)

    # Additive key-padding bias hoisted out of the kernels (shared by all layers).
    kbias = jnp.where(jnp.arange(S_pad)[None, :] < S,
                      0.0, -1e30).astype(jnp.float32)

    for lp in params["layers"]:
        seq = attention_block(
            seq,
            lp["wqkv"].astype(WEIGHT_DTYPE), lp["bqkv"],
            lp["wo"].astype(WEIGHT_DTYPE), lp["bo"],
            kbias, lp["ln1w"], lp["ln1b"],
            num_heads=num_heads)
        y2 = ffn_block(
            seq.reshape(B * S_pad, D),
            lp["w1"].astype(WEIGHT_DTYPE), lp["b1"],
            lp["w2"].astype(WEIGHT_DTYPE), lp["b2"],
            lp["ln2w"], lp["ln2b"],
            m_tile=m_tile, dff_tile=dff_tile)
        seq = y2.reshape(B, S_pad, D)

    cls_final = seq[:, 0, :]                                   # (B, D)
    Cp = _round_up(num_classes, 128)
    head_w_pad = jnp.zeros((D, Cp), jnp.float32).at[:, :num_classes].set(
        params["head_w"]).astype(WEIGHT_DTYPE)
    head_b_pad = jnp.zeros((1, Cp), jnp.float32).at[:, :num_classes].set(
        params["head_b"])
    logits_pad = norm_head(cls_final, params["ln_w"], params["ln_b"],
                           head_w_pad, head_b_pad)
    return logits_pad[:, :num_classes]


if __name__ == "__main__":
    img_size, patch_size = 16, 4
    embed_dim, depth, num_heads, num_classes = 32, 2, 4, 10
    batch = 2

    root = jax.random.PRNGKey(0)
    k_params, k_x = jax.random.split(root)
    params = init_vit_params(k_params, img_size=img_size, patch_size=patch_size,
                             num_classes=num_classes, embed_dim=embed_dim,
                             depth=depth, num_heads=num_heads, mlp_ratio=4.0)
    x = jax.random.normal(k_x, (batch, 3, img_size, img_size), jnp.float32)

    fwd = jax.jit(functools.partial(vit_forward, patch_size=patch_size,
                                    num_heads=num_heads))
    logits = fwd(x, params)
    jax.block_until_ready(logits)
    assert logits.shape == (batch, num_classes)
    assert bool(jnp.all(jnp.isfinite(logits)))
    print("KERNEL_OK")
</pallas_src>

<mosaic_0001>
module attributes {stable_mosaic.version = 11 : i64} {
  func.func @_embed_kernel(%arg0: i32, %arg1: i32, %arg2: memref<1x128x48xf32, #tpu.memory_space<vmem>>, %arg3: memref<48x32xbf16, #tpu.memory_space<vmem>>, %arg4: memref<128x32xf32, #tpu.memory_space<vmem>>, %arg5: memref<1x128x32xf32, #tpu.memory_space<vmem>>) attributes {dimension_semantics = [#tpu.dimension_semantics<parallel>, #tpu.dimension_semantics<parallel>], iteration_bounds = array<i64: 2, 1>, scalar_prefetch = 0 : i64, scratch_operands = 0 : i64, tpu.core_type = #tpu.core_type<tc>, window_params = [{transform_indices = @transform_0, window_bounds = array<i64: 1, 128, 48>}, {pipeline_mode = #tpu.pipeline_mode<synchronous>, transform_indices = @transform_1, window_bounds = array<i64: 48, 32>}, {transform_indices = @transform_2, window_bounds = array<i64: 128, 32>}, {transform_indices = @transform_3, window_bounds = array<i64: 1, 128, 32>}]} {
    %c0 = arith.constant 0 : index
    %c0_0 = arith.constant 0 : index
    %c0_1 = arith.constant 0 : index
    %0 = vector.load %arg2[%c0, %c0_0, %c0_1] : memref<1x128x48xf32, #tpu.memory_space<vmem>>, vector<1x128x48xf32>
    %1 = vector.shape_cast %0 : vector<1x128x48xf32> to vector<128x48xf32>
    %2 = arith.truncf %1 : vector<128x48xf32> to vector<128x48xbf16>
    %c0_2 = arith.constant 0 : index
    %c0_3 = arith.constant 0 : index
    %3 = vector.load %arg3[%c0_2, %c0_3] : memref<48x32xbf16, #tpu.memory_space<vmem>>, vector<48x32xbf16>
    %cst = arith.constant dense<0.000000e+00> : vector<128x32xf32>
    %4 = tpu.matmul %2, %3, %cst {dimension_numbers = #tpu.dot_dimension_numbers<[1], [0], [0], [1], [0, 0, 1, 1], [], []>} : vector<128x48xbf16>, vector<48x32xbf16>, vector<128x32xf32> -> vector<128x32xf32>
    %c0_4 = arith.constant 0 : index
    %c0_5 = arith.constant 0 : index
    %5 = vector.load %arg4[%c0_4, %c0_5] : memref<128x32xf32, #tpu.memory_space<vmem>>, vector<128x32xf32>
    %6 = arith.addf %4, %5 : vector<128x32xf32>
    %c0_6 = arith.constant 0 : index
    %c0_7 = arith.constant 0 : index
    %c0_8 = arith.constant 0 : index
    %7 = vector.load %arg5[%c0_6, %c0_7, %c0_8] : memref<1x128x32xf32, #tpu.memory_space<vmem>>, vector<1x128x32xf32>
    %8 = vector.shape_cast %7 : vector<1x128x32xf32> to vector<128x32xf32>
    %9 = vector.shape_cast %6 : vector<128x32xf32> to vector<1x128x32xf32>
    tpu.vector_store %arg5[%c0_6, %c0_7, %c0_8], %9 {strides = array<i32>} : memref<1x128x32xf32, #tpu.memory_space<vmem>>, vector<1x128x32xf32>,
    return
  }
  func.func @transform_0(%arg0: i32, %arg1: i32) -> (i32, i32, i32) {
    %c0_i32 = arith.constant 0 : i32
    %c0_i32_0 = arith.constant 0 : i32
    return %arg0, %arg1, %c0_i32 : i32, i32, i32
  }
  func.func @transform_1(%arg0: i32, %arg1: i32) -> (i32, i32) {
    %c0_i32 = arith.constant 0 : i32
    %c0_i32_0 = arith.constant 0 : i32
    %c0_i32_1 = arith.constant 0 : i32
    return %c0_i32, %c0_i32_0 : i32, i32
  }
  func.func @transform_2(%arg0: i32, %arg1: i32) -> (i32, i32) {
    %c0_i32 = arith.constant 0 : i32
    %c0_i32_0 = arith.constant 0 : i32
    return %arg1, %c0_i32 : i32, i32
  }
  func.func @transform_3(%arg0: i32, %arg1: i32) -> (i32, i32, i32) {
    %c0_i32 = arith.constant 0 : i32
    %c0_i32_0 = arith.constant 0 : i32
    return %arg0, %arg1, %c0_i32 : i32, i32, i32
  }
}

module attributes {stable_mosaic.version = 11 : i64} {
  func.func @_attn_kernel(%arg0: i32, %arg1: memref<1x128x32xf32, #tpu.memory_space<vmem>>, %arg2: memref<32x96xbf16, #tpu.memory_space<vmem>>, %arg3: memref<1x96xf32, #tpu.memory_space<vmem>>, %arg4: memref<32x32xbf16, #tpu.memory_space<vmem>>, %arg5: memref<1x32xf32, #tpu.memory_space<vmem>>, %arg6: memref<1x128xf32, #tpu.memory_space<vmem>>, %arg7: memref<1x32xf32, #tpu.memory_space<vmem>>, %arg8: memref<1x32xf32, #tpu.memory_space<vmem>>, %arg9: memref<1x128x32xf32, #tpu.memory_space<vmem>>) attributes {dimension_semantics = [#tpu.dimension_semantics<parallel>], iteration_bounds = array<i64: 2>, scalar_prefetch = 0 : i64, scratch_operands = 0 : i64, tpu.core_type = #tpu.core_type<tc>, window_params = [{transform_indices = @transform_0, window_bounds = array<i64: 1, 128, 32>}, {pipeline_mode = #tpu.pipeline_mode<synchronous>, transform_indices = @transform_1, window_bounds = array<i64: 32, 96>}, {pipeline_mode = #tpu.pipeline_mode<synchronous>, transform_indices = @transform_2, window_bounds = array<i64: 1, 96>}, {pipeline_mode = #tpu.pipeline_mode<synchronous>, transform_indices = @transform_3, window_bounds = array<i64: 32, 32>}, {pipeline_mode = #tpu.pipeline_mode<synchronous>, transform_indices = @transform_4, window_bounds = array<i64: 1, 32>}, {pipeline_mode = #tpu.pipeline_mode<synchronous>, transform_indices = @transform_5, window_bounds = array<i64: 1, 128>}, {pipeline_mode = #tpu.pipeline_mode<synchronous>, transform_indices = @transform_6, window_bounds = array<i64: 1, 32>}, {pipeline_mode = #tpu.pipeline_mode<synchronous>, transform_indices = @transform_7, window_bounds = array<i64: 1, 32>}, {transform_indices = @transform_8, window_bounds = array<i64: 1, 128, 32>}]} {
    %c0 = arith.constant 0 : index
    %c0_0 = arith.constant 0 : index
    %c0_1 = arith.constant 0 : index
    %0 = vector.load %arg1[%c0, %c0_0, %c0_1] : memref<1x128x32xf32, #tpu.memory_space<vmem>>, vector<1x128x32xf32>
    %1 = vector.shape_cast %0 : vector<1x128x32xf32> to vector<128x32xf32>
    %2 = arith.truncf %1 : vector<128x32xf32> to vector<128x32xbf16>
    %c0_2 = arith.constant 0 : index
    %c0_3 = arith.constant 0 : index
    %3 = vector.load %arg6[%c0_2, %c0_3] : memref<1x128xf32, #tpu.memory_space<vmem>>, vector<1x128xf32>
    %c0_4 = arith.constant 0 : index
    %c0_5 = arith.constant 0 : index
    %4 = vector.load %arg2[%c0_4, %c0_5] : memref<32x96xbf16, #tpu.memory_space<vmem>>, vector<32x96xbf16>
    %cst = arith.constant dense<0.000000e+00> : vector<128x96xf32>
    %5 = tpu.matmul %2, %4, %cst {dimension_numbers = #tpu.dot_dimension_numbers<[1], [0], [0], [1], [0, 0, 1, 1], [], []>} : vector<128x32xbf16>, vector<32x96xbf16>, vector<128x96xf32> -> vector<128x96xf32>
    %c0_6 = arith.constant 0 : index
    %c0_7 = arith.constant 0 : index
    %6 = vector.load %arg3[%c0_6, %c0_7] : memref<1x96xf32, #tpu.memory_space<vmem>>, vector<1x96xf32>
    %7 = vector.broadcast %6 : vector<1x96xf32> to vector<128x96xf32>
    %8 = arith.addf %5, %7 : vector<128x96xf32>
    %c0_8 = arith.constant 0 : index
    %c0_9 = arith.constant 0 : index
    %9 = vector.load %arg4[%c0_8, %c0_9] : memref<32x32xbf16, #tpu.memory_space<vmem>>, vector<32x32xbf16>
    %cst_10 = arith.constant 0.000000e+00 : f32
    %10 = vector.broadcast %cst_10 : f32 to vector<128x32xf32>
    %11 = vector.extract_strided_slice %8 {offsets = [0, 0], sizes = [128, 8], strides = [1, 1]} : vector<128x96xf32> to vector<128x8xf32>
    %cst_11 = arith.constant 0.353553385 : f32
    %12 = vector.broadcast %cst_11 : f32 to vector<128x8xf32>
    %13 = arith.mulf %11, %12 : vector<128x8xf32>
    %14 = arith.truncf %13 : vector<128x8xf32> to vector<128x8xbf16>
    %15 = vector.extract_strided_slice %8 {offsets = [0, 32], sizes = [128, 8], strides = [1, 1]} : vector<128x96xf32> to vector<128x8xf32>
    %16 = arith.truncf %15 : vector<128x8xf32> to vector<128x8xbf16>
    %17 = vector.extract_strided_slice %8 {offsets = [0, 64], sizes = [128, 8], strides = [1, 1]} : vector<128x96xf32> to vector<128x8xf32>
    %18 = arith.truncf %17 : vector<128x8xf32> to vector<128x8xbf16>
    %cst_12 = arith.constant dense<0.000000e+00> : vector<128x128xf32>
    %19 = tpu.matmul %14, %16, %cst_12 {dimension_numbers = #tpu.dot_dimension_numbers<[1], [1], [0], [0], [0, 0, 1, 0], [], []>} : vector<128x8xbf16>, vector<128x8xbf16>, vector<128x128xf32> -> vector<128x128xf32>
    %20 = vector.broadcast %3 : vector<1x128xf32> to vector<128x128xf32>
    %21 = arith.addf %19, %20 : vector<128x128xf32>
    %cst_13 = arith.constant dense<0xFF800000> : vector<128xf32>
    %22 = vector.multi_reduction <maximumf>, %21, %cst_13 [1] : vector<128x128xf32> to vector<128xf32>
    %23 = vector.shape_cast %22 : vector<128xf32> to vector<128x1xf32>
    %24 = vector.broadcast %23 : vector<128x1xf32> to vector<128x128xf32>
    %25 = arith.subf %21, %24 : vector<128x128xf32>
    %26 = math.exp %25 : vector<128x128xf32>
    %cst_14 = arith.constant dense<0.000000e+00> : vector<128xf32>
    %27 = vector.multi_reduction <add>, %26, %cst_14 [1] : vector<128x128xf32> to vector<128xf32>
    %28 = vector.shape_cast %27 : vector<128xf32> to vector<128x1xf32>
    %29 = tpu.reciprocal %28 {approx = true} : vector<128x1xf32> -> vector<128x1xf32>
    %30 = vector.broadcast %29 : vector<128x1xf32> to vector<128x128xf32>
    %31 = arith.mulf %26, %30 : vector<128x128xf32>
    %32 = arith.truncf %31 : vector<128x128xf32> to vector<128x128xbf16>
    %cst_15 = arith.constant dense<0.000000e+00> : vector<128x8xf32>
    %33 = tpu.matmul %32, %18, %cst_15 {dimension_numbers = #tpu.dot_dimension_numbers<[1], [0], [0], [1], [0, 0, 1, 1], [], []>} : vector<128x128xbf16>, vector<128x8xbf16>, vector<128x8xf32> -> vector<128x8xf32>
    %34 = arith.truncf %33 : vector<128x8xf32> to vector<128x8xbf16>
    %35 = vector.extract_strided_slice %9 {offsets = [0, 0], sizes = [8, 32], strides = [1, 1]} : vector<32x32xbf16> to vector<8x32xbf16>
    %cst_16 = arith.constant dense<0.000000e+00> : vector<128x32xf32>
    %36 = tpu.matmul %34, %35, %cst_16 {dimension_numbers = #tpu.dot_dimension_numbers<[1], [0], [0], [1], [0, 0, 1, 1], [], []>} : vector<128x8xbf16>, vector<8x32xbf16>, vector<128x32xf32> -> vector<128x32xf32>
    %37 = arith.addf %10, %36 : vector<128x32xf32>
    %38 = vector.extract_strided_slice %8 {offsets = [0, 8], sizes = [128, 8], strides = [1, 1]} : vector<128x96xf32> to vector<128x8xf32>
    %cst_17 = arith.constant 0.353553385 : f32
    %39 = vector.broadcast %cst_17 : f32 to vector<128x8xf32>
    %40 = arith.mulf %38, %39 : vector<128x8xf32>
    %41 = arith.truncf %40 : vector<128x8xf32> to vector<128x8xbf16>
    %42 = vector.extract_strided_slice %8 {offsets = [0, 40], sizes = [128, 8], strides = [1, 1]} : vector<128x96xf32> to vector<128x8xf32>
    %43 = arith.truncf %42 : vector<128x8xf32> to vector<128x8xbf16>
    %44 = vector.extract_strided_slice %8 {offsets = [0, 72], sizes = [128, 8], strides = [1, 1]} : vector<128x96xf32> to vector<128x8xf32>
    %45 = arith.truncf %44 : vector<128x8xf32> to vector<128x8xbf16>
    %cst_18 = arith.constant dense<0.000000e+00> : vector<128x128xf32>
    %46 = tpu.matmul %41, %43, %cst_18 {dimension_numbers = #tpu.dot_dimension_numbers<[1], [1], [0], [0], [0, 0, 1, 0], [], []>} : vector<128x8xbf16>, vector<128x8xbf16>, vector<128x128xf32> -> vector<128x128xf32>
    %47 = vector.broadcast %3 : vector<1x128xf32> to vector<128x128xf32>
    %48 = arith.addf %46, %47 : vector<128x128xf32>
    %cst_19 = arith.constant dense<0xFF800000> : vector<128xf32>
    %49 = vector.multi_reduction <maximumf>, %48, %cst_19 [1] : vector<128x128xf32> to vector<128xf32>
    %50 = vector.shape_cast %49 : vector<128xf32> to vector<128x1xf32>
    %51 = vector.broadcast %50 : vector<128x1xf32> to vector<128x128xf32>
    %52 = arith.subf %48, %51 : vector<128x128xf32>
    %53 = math.exp %52 : vector<128x128xf32>
    %cst_20 = arith.constant dense<0.000000e+00> : vector<128xf32>
    %54 = vector.multi_reduction <add>, %53, %cst_20 [1] : vector<128x128xf32> to vector<128xf32>
    %55 = vector.shape_cast %54 : vector<128xf32> to vector<128x1xf32>
    %56 = tpu.reciprocal %55 {approx = true} : vector<128x1xf32> -> vector<128x1xf32>
    %57 = vector.broadcast %56 : vector<128x1xf32> to vector<128x128xf32>
    %58 = arith.mulf %53, %57 : vector<128x128xf32>
    %59 = arith.truncf %58 : vector<128x128xf32> to vector<128x128xbf16>
    %cst_21 = arith.constant dense<0.000000e+00> : vector<128x8xf32>
    %60 = tpu.matmul %59, %45, %cst_21 {dimension_numbers = #tpu.dot_dimension_numbers<[1], [0], [0], [1], [0, 0, 1, 1], [], []>} : vector<128x128xbf16>, vector<128x8xbf16>, vector<128x8xf32> -> vector<128x8xf32>
    %61 = arith.truncf %60 : vector<128x8xf32> to vector<128x8xbf16>
    %62 = vector.extract_strided_slice %9 {offsets = [8, 0], sizes = [8, 32], strides = [1, 1]} : vector<32x32xbf16> to vector<8x32xbf16>
    %cst_22 = arith.constant dense<0.000000e+00> : vector<128x32xf32>
    %63 = tpu.matmul %61, %62, %cst_22 {dimension_numbers = #tpu.dot_dimension_numbers<[1], [0], [0], [1], [0, 0, 1, 1], [], []>} : vector<128x8xbf16>, vector<8x32xbf16>, vector<128x32xf32> -> vector<128x32xf32>
    %64 = arith.addf %37, %63 : vector<128x32xf32>
    %65 = vector.extract_strided_slice %8 {offsets = [0, 16], sizes = [128, 8], strides = [1, 1]} : vector<128x96xf32> to vector<128x8xf32>
    %cst_23 = arith.constant 0.353553385 : f32
    %66 = vector.broadcast %cst_23 : f32 to vector<128x8xf32>
    %67 = arith.mulf %65, %66 : vector<128x8xf32>
    %68 = arith.truncf %67 : vector<128x8xf32> to vector<128x8xbf16>
    %69 = vector.extract_strided_slice %8 {offsets = [0, 48], sizes = [128, 8], strides = [1, 1]} : vector<128x96xf32> to vector<128x8xf32>
    %70 = arith.truncf %69 : vector<128x8xf32> to vector<128x8xbf16>
    %71 = vector.extract_strided_slice %8 {offsets = [0, 80], sizes = [128, 8], strides = [1, 1]} : vector<128x96xf32> to vector<128x8xf32>
    %72 = arith.truncf %71 : vector<128x8xf32> to vector<128x8xbf16>
    %cst_24 = arith.constant dense<0.000000e+00> : vector<128x128xf32>
    %73 = tpu.matmul %68, %70, %cst_24 {dimension_numbers = #tpu.dot_dimension_numbers<[1], [1], [0], [0], [0, 0, 1, 0], [], []>} : vector<128x8xbf16>, vector<128x8xbf16>, vector<128x128xf32> -> vector<128x128xf32>
    %74 = vector.broadcast %3 : vector<1x128xf32> to vector<128x128xf32>
    %75 = arith.addf %73, %74 : vector<128x128xf32>
    %cst_25 = arith.constant dense<0xFF800000> : vector<128xf32>
    %76 = vector.multi_reduction <maximumf>, %75, %cst_25 [1] : vector<128x128xf32> to vector<128xf32>
    %77 = vector.shape_cast %76 : vector<128xf32> to vector<128x1xf32>
    %78 = vector.broadcast %77 : vector<128x1xf32> to vector<128x128xf32>
    %79 = arith.subf %75, %78 : vector<128x128xf32>
    %80 = math.exp %79 : vector<128x128xf32>
    %cst_26 = arith.constant dense<0.000000e+00> : vector<128xf32>
    %81 = vector.multi_reduction <add>, %80, %cst_26 [1] : vector<128x128xf32> to vector<128xf32>
    %82 = vector.shape_cast %81 : vector<128xf32> to vector<128x1xf32>
    %83 = tpu.reciprocal %82 {approx = true} : vector<128x1xf32> -> vector<128x1xf32>
    %84 = vector.broadcast %83 : vector<128x1xf32> to vector<128x128xf32>
    %85 = arith.mulf %80, %84 : vector<128x128xf32>
    %86 = arith.truncf %85 : vector<128x128xf32> to vector<128x128xbf16>
    %cst_27 = arith.constant dense<0.000000e+00> : vector<128x8xf32>
    %87 = tpu.matmul %86, %72, %cst_27 {dimension_numbers = #tpu.dot_dimension_numbers<[1], [0], [0], [1], [0, 0, 1, 1], [], []>} : vector<128x128xbf16>, vector<128x8xbf16>, vector<128x8xf32> -> vector<128x8xf32>
    %88 = arith.truncf %87 : vector<128x8xf32> to vector<128x8xbf16>
    %89 = vector.extract_strided_slice %9 {offsets = [16, 0], sizes = [8, 32], strides = [1, 1]} : vector<32x32xbf16> to vector<8x32xbf16>
    %cst_28 = arith.constant dense<0.000000e+00> : vector<128x32xf32>
    %90 = tpu.matmul %88, %89, %cst_28 {dimension_numbers = #tpu.dot_dimension_numbers<[1], [0], [0], [1], [0, 0, 1, 1], [], []>} : vector<128x8xbf16>, vector<8x32xbf16>, vector<128x32xf32> -> vector<128x32xf32>
    %91 = arith.addf %64, %90 : vector<128x32xf32>
    %92 = vector.extract_strided_slice %8 {offsets = [0, 24], sizes = [128, 8], strides = [1, 1]} : vector<128x96xf32> to vector<128x8xf32>
    %cst_29 = arith.constant 0.353553385 : f32
    %93 = vector.broadcast %cst_29 : f32 to vector<128x8xf32>
    %94 = arith.mulf %92, %93 : vector<128x8xf32>
    %95 = arith.truncf %94 : vector<128x8xf32> to vector<128x8xbf16>
    %96 = vector.extract_strided_slice %8 {offsets = [0, 56], sizes = [128, 8], strides = [1, 1]} : vector<128x96xf32> to vector<128x8xf32>
    %97 = arith.truncf %96 : vector<128x8xf32> to vector<128x8xbf16>
    %98 = vector.extract_strided_slice %8 {offsets = [0, 88], sizes = [128, 8], strides = [1, 1]} : vector<128x96xf32> to vector<128x8xf32>
    %99 = arith.truncf %98 : vector<128x8xf32> to vector<128x8xbf16>
    %cst_30 = arith.constant dense<0.000000e+00> : vector<128x128xf32>
    %100 = tpu.matmul %95, %97, %cst_30 {dimension_numbers = #tpu.dot_dimension_numbers<[1], [1], [0], [0], [0, 0, 1, 0], [], []>} : vector<128x8xbf16>, vector<128x8xbf16>, vector<128x128xf32> -> vector<128x128xf32>
    %101 = vector.broadcast %3 : vector<1x128xf32> to vector<128x128xf32>
    %102 = arith.addf %100, %101 : vector<128x128xf32>
    %cst_31 = arith.constant dense<0xFF800000> : vector<128xf32>
    %103 = vector.multi_reduction <maximumf>, %102, %cst_31 [1] : vector<128x128xf32> to vector<128xf32>
    %104 = vector.shape_cast %103 : vector<128xf32> to vector<128x1xf32>
    %105 = vector.broadcast %104 : vector<128x1xf32> to vector<128x128xf32>
    %106 = arith.subf %102, %105 : vector<128x128xf32>
    %107 = math.exp %106 : vector<128x128xf32>
    %cst_32 = arith.constant dense<0.000000e+00> : vector<128xf32>
    %108 = vector.multi_reduction <add>, %107, %cst_32 [1] : vector<128x128xf32> to vector<128xf32>
    %109 = vector.shape_cast %108 : vector<128xf32> to vector<128x1xf32>
    %110 = tpu.reciprocal %109 {approx = true} : vector<128x1xf32> -> vector<128x1xf32>
    %111 = vector.broadcast %110 : vector<128x1xf32> to vector<128x128xf32>
    %112 = arith.mulf %107, %111 : vector<128x128xf32>
    %113 = arith.truncf %112 : vector<128x128xf32> to vector<128x128xbf16>
    %cst_33 = arith.constant dense<0.000000e+00> : vector<128x8xf32>
    %114 = tpu.matmul %113, %99, %cst_33 {dimension_numbers = #tpu.dot_dimension_numbers<[1], [0], [0], [1], [0, 0, 1, 1], [], []>} : vector<128x128xbf16>, vector<128x8xbf16>, vector<128x8xf32> -> vector<128x8xf32>
    %115 = arith.truncf %114 : vector<128x8xf32> to vector<128x8xbf16>
    %116 = vector.extract_strided_slice %9 {offsets = [24, 0], sizes = [8, 32], strides = [1, 1]} : vector<32x32xbf16> to vector<8x32xbf16>
    %cst_34 = arith.constant dense<0.000000e+00> : vector<128x32xf32>
    %117 = tpu.matmul %115, %116, %cst_34 {dimension_numbers = #tpu.dot_dimension_numbers<[1], [0], [0], [1], [0, 0, 1, 1], [], []>} : vector<128x8xbf16>, vector<8x32xbf16>, vector<128x32xf32> -> vector<128x32xf32>
    %118 = arith.addf %91, %117 : vector<128x32xf32>
    %c0_35 = arith.constant 0 : index
    %c0_36 = arith.constant 0 : index
    %119 = vector.load %arg5[%c0_35, %c0_36] : memref<1x32xf32, #tpu.memory_space<vmem>>, vector<1x32xf32>
    %120 = vector.broadcast %119 : vector<1x32xf32> to vector<128x32xf32>
    %121 = arith.addf %118, %120 : vector<128x32xf32>
    %122 = arith.addf %1, %121 : vector<128x32xf32>
    %c0_37 = arith.constant 0 : index
    %c0_38 = arith.constant 0 : index
    %123 = vector.load %arg7[%c0_37, %c0_38] : memref<1x32xf32, #tpu.memory_space<vmem>>, vector<1x32xf32>
    %c0_39 = arith.constant 0 : index
    %c0_40 = arith.constant 0 : index
    %124 = vector.load %arg8[%c0_39, %c0_40] : memref<1x32xf32, #tpu.memory_space<vmem>>, vector<1x32xf32>
    %cst_41 = arith.constant dense<0.000000e+00> : vector<128xf32>
    %125 = vector.multi_reduction <add>, %122, %cst_41 [1] : vector<128x32xf32> to vector<128xf32>
    %126 = vector.shape_cast %125 : vector<128xf32> to vector<128x1xf32>
    %cst_42 = arith.constant 3.200000e+01 : f32
    %127 = vector.broadcast %cst_42 : f32 to vector<128x1xf32>
    %128 = arith.divf %126, %127 : vector<128x1xf32>
    %129 = vector.broadcast %128 : vector<128x1xf32> to vector<128x32xf32>
    %130 = arith.subf %122, %129 : vector<128x32xf32>
    %131 = arith.mulf %130, %130 : vector<128x32xf32>
    %cst_43 = arith.constant dense<0.000000e+00> : vector<128xf32>
    %132 = vector.multi_reduction <add>, %131, %cst_43 [1] : vector<128x32xf32> to vector<128xf32>
    %133 = vector.shape_cast %132 : vector<128xf32> to vector<128x1xf32>
    %cst_44 = arith.constant 3.200000e+01 : f32
    %134 = vector.broadcast %cst_44 : f32 to vector<128x1xf32>
    %135 = arith.divf %133, %134 : vector<128x1xf32>
    %cst_45 = arith.constant 9.99999974E-6 : f32
    %136 = vector.broadcast %cst_45 : f32 to vector<128x1xf32>
    %137 = arith.addf %135, %136 : vector<128x1xf32>
    %138 = math.rsqrt %137 : vector<128x1xf32>
    %139 = vector.broadcast %138 : vector<128x1xf32> to vector<128x32xf32>
    %140 = arith.mulf %130, %139 : vector<128x32xf32>
    %141 = vector.broadcast %123 : vector<1x32xf32> to vector<128x32xf32>
    %142 = arith.mulf %140, %141 : vector<128x32xf32>
    %143 = vector.broadcast %124 : vector<1x32xf32> to vector<128x32xf32>
    %144 = arith.addf %142, %143 : vector<128x32xf32>
    %c0_46 = arith.constant 0 : index
    %c0_47 = arith.constant 0 : index
    %c0_48 = arith.constant 0 : index
    %145 = vector.load %arg9[%c0_46, %c0_47, %c0_48] : memref<1x128x32xf32, #tpu.memory_space<vmem>>, vector<1x128x32xf32>
    %146 = vector.shape_cast %145 : vector<1x128x32xf32> to vector<128x32xf32>
    %147 = vector.shape_cast %144 : vector<128x32xf32> to vector<1x128x32xf32>
    tpu.vector_store %arg9[%c0_46, %c0_47, %c0_48], %147 {strides = array<i32>} : memref<1x128x32xf32, #tpu.memory_space<vmem>>, vector<1x128x32xf32>,
    return
  }
  func.func @transform_0(%arg0: i32) -> (i32, i32, i32) {
    %c0_i32 = arith.constant 0 : i32
    %c0_i32_0 = arith.constant 0 : i32
    %c0_i32_1 = arith.constant 0 : i32
    return %arg0, %c0_i32, %c0_i32_0 : i32, i32, i32
  }
  func.func @transform_1(%arg0: i32) -> (i32, i32) {
    %c0_i32 = arith.constant 0 : i32
    %c0_i32_0 = arith.constant 0 : i32
    %c0_i32_1 = arith.constant 0 : i32
    return %c0_i32, %c0_i32_0 : i32, i32
  }
  func.func @transform_2(%arg0: i32) -> (i32, i32) {
    %c0_i32 = arith.constant 0 : i32
    %c0_i32_0 = arith.constant 0 : i32
    %c0_i32_1 = arith.constant 0 : i32
    return %c0_i32, %c0_i32_0 : i32, i32
  }
  func.func @transform_3(%arg0: i32) -> (i32, i32) {
    %c0_i32 = arith.constant 0 : i32
    %c0_i32_0 = arith.constant 0 : i32
    %c0_i32_1 = arith.constant 0 : i32
    return %c0_i32, %c0_i32_0 : i32, i32
  }
  func.func @transform_4(%arg0: i32) -> (i32, i32) {
    %c0_i32 = arith.constant 0 : i32
    %c0_i32_0 = arith.constant 0 : i32
    %c0_i32_1 = arith.constant 0 : i32
    return %c0_i32, %c0_i32_0 : i32, i32
  }
  func.func @transform_5(%arg0: i32) -> (i32, i32) {
    %c0_i32 = arith.constant 0 : i32
    %c0_i32_0 = arith.constant 0 : i32
    %c0_i32_1 = arith.constant 0 : i32
    return %c0_i32, %c0_i32_0 : i32, i32
  }
  func.func @transform_6(%arg0: i32) -> (i32, i32) {
    %c0_i32 = arith.constant 0 : i32
    %c0_i32_0 = arith.constant 0 : i32
    %c0_i32_1 = arith.constant 0 : i32
    return %c0_i32, %c0_i32_0 : i32, i32
  }
  func.func @transform_7(%arg0: i32) -> (i32, i32) {
    %c0_i32 = arith.constant 0 : i32
    %c0_i32_0 = arith.constant 0 : i32
    %c0_i32_1 = arith.constant 0 : i32
    return %c0_i32, %c0_i32_0 : i32, i32
  }
  func.func @transform_8(%arg0: i32) -> (i32, i32, i32) {
    %c0_i32 = arith.constant 0 : i32
    %c0_i32_0 = arith.constant 0 : i32
    %c0_i32_1 = arith.constant 0 : i32
    return %arg0, %c0_i32, %c0_i32_0 : i32, i32, i32
  }
}

module attributes {stable_mosaic.version = 11 : i64} {
  func.func @_ffn_kernel(%arg0: i32, %arg1: i32, %arg2: memref<256x32xf32, #tpu.memory_space<vmem>>, %arg3: memref<32x128xbf16, #tpu.memory_space<vmem>>, %arg4: memref<1x128xf32, #tpu.memory_space<vmem>>, %arg5: memref<128x32xbf16, #tpu.memory_space<vmem>>, %arg6: memref<1x32xf32, #tpu.memory_space<vmem>>, %arg7: memref<1x32xf32, #tpu.memory_space<vmem>>, %arg8: memref<1x32xf32, #tpu.memory_space<vmem>>, %arg9: memref<256x32xf32, #tpu.memory_space<vmem>>, %arg10: memref<256x32xf32, #tpu.memory_space<vmem>>) attributes {dimension_semantics = [#tpu.dimension_semantics<parallel>, #tpu.dimension_semantics<arbitrary>], iteration_bounds = array<i64: 1, 1>, scalar_prefetch = 0 : i64, scratch_operands = 1 : i64, tpu.core_type = #tpu.core_type<tc>, window_params = [{transform_indices = @transform_0, window_bounds = array<i64: 256, 32>}, {transform_indices = @transform_1, window_bounds = array<i64: 32, 128>}, {transform_indices = @transform_2, window_bounds = array<i64: 1, 128>}, {transform_indices = @transform_3, window_bounds = array<i64: 128, 32>}, {pipeline_mode = #tpu.pipeline_mode<synchronous>, transform_indices = @transform_4, window_bounds = array<i64: 1, 32>}, {pipeline_mode = #tpu.pipeline_mode<synchronous>, transform_indices = @transform_5, window_bounds = array<i64: 1, 32>}, {pipeline_mode = #tpu.pipeline_mode<synchronous>, transform_indices = @transform_6, window_bounds = array<i64: 1, 32>}, {transform_indices = @transform_7, window_bounds = array<i64: 256, 32>}]} {
    %c0 = arith.constant 0 : index
    %c0_0 = arith.constant 0 : index
    %0 = vector.load %arg2[%c0, %c0_0] : memref<256x32xf32, #tpu.memory_space<vmem>>, vector<256x32xf32>
    %c0_i32 = arith.constant 0 : i32
    %1 = arith.cmpi eq, %arg1, %c0_i32 : i32
    %2 = arith.extui %1 : i1 to i32
    %c0_i32_1 = arith.constant 0 : i32
    %3 = arith.cmpi ne, %2, %c0_i32_1 : i32
    scf.if %3 {
      %c0_30 = arith.constant 0 : index
      %c0_31 = arith.constant 0 : index
      %59 = vector.load %arg6[%c0_30, %c0_31] : memref<1x32xf32, #tpu.memory_space<vmem>>, vector<1x32xf32>
      %60 = vector.broadcast %59 : vector<1x32xf32> to vector<256x32xf32>
      %61 = arith.addf %0, %60 : vector<256x32xf32>
      %c0_32 = arith.constant 0 : index
      %c0_33 = arith.constant 0 : index
      %62 = vector.load %arg10[%c0_32, %c0_33] : memref<256x32xf32, #tpu.memory_space<vmem>>, vector<256x32xf32>
      tpu.vector_store %arg10[%c0_32, %c0_33], %61 {strides = array<i32>} : memref<256x32xf32, #tpu.memory_space<vmem>>, vector<256x32xf32>,
    } else {
    }
    %c0_2 = arith.constant 0 : index
    %c0_3 = arith.constant 0 : index
    %4 = vector.load %arg3[%c0_2, %c0_3] : memref<32x128xbf16, #tpu.memory_space<vmem>>, vector<32x128xbf16>
    %5 = arith.truncf %0 : vector<256x32xf32> to vector<256x32xbf16>
    %cst = arith.constant dense<0.000000e+00> : vector<256x128xf32>
    %6 = tpu.matmul %5, %4, %cst {dimension_numbers = #tpu.dot_dimension_numbers<[1], [0], [0], [1], [0, 0, 1, 1], [], []>} : vector<256x32xbf16>, vector<32x128xbf16>, vector<256x128xf32> -> vector<256x128xf32>
    %c0_4 = arith.constant 0 : index
    %c0_5 = arith.constant 0 : index
    %7 = vector.load %arg4[%c0_4, %c0_5] : memref<1x128xf32, #tpu.memory_space<vmem>>, vector<1x128xf32>
    %8 = vector.broadcast %7 : vector<1x128xf32> to vector<256x128xf32>
    %9 = arith.addf %6, %8 : vector<256x128xf32>
    %cst_6 = arith.constant 5.000000e-01 : f32
    %10 = vector.broadcast %cst_6 : f32 to vector<256x128xf32>
    %11 = arith.mulf %10, %9 : vector<256x128xf32>
    %cst_7 = arith.constant 0.707106769 : f32
    %12 = vector.broadcast %cst_7 : f32 to vector<256x128xf32>
    %13 = arith.mulf %9, %12 : vector<256x128xf32>
    %14 = math.absf %13 : vector<256x128xf32>
    %cst_8 = arith.constant 0.327591091 : f32
    %15 = vector.broadcast %cst_8 : f32 to vector<256x128xf32>
    %16 = arith.mulf %15, %14 : vector<256x128xf32>
    %cst_9 = arith.constant 1.000000e+00 : f32
    %17 = vector.broadcast %cst_9 : f32 to vector<256x128xf32>
    %18 = arith.addf %17, %16 : vector<256x128xf32>
    %cst_10 = arith.constant 1.000000e+00 : f32
    %19 = vector.broadcast %cst_10 : f32 to vector<256x128xf32>
    %20 = arith.divf %19, %18 : vector<256x128xf32>
    %cst_11 = arith.constant 1.06140542 : f32
    %21 = vector.broadcast %cst_11 : f32 to vector<256x128xf32>
    %22 = arith.mulf %20, %21 : vector<256x128xf32>
    %cst_12 = arith.constant -1.45315206 : f32
    %23 = vector.broadcast %cst_12 : f32 to vector<256x128xf32>
    %24 = arith.addf %23, %22 : vector<256x128xf32>
    %25 = arith.mulf %20, %24 : vector<256x128xf32>
    %cst_13 = arith.constant 1.42141378 : f32
    %26 = vector.broadcast %cst_13 : f32 to vector<256x128xf32>
    %27 = arith.addf %26, %25 : vector<256x128xf32>
    %28 = arith.mulf %20, %27 : vector<256x128xf32>
    %cst_14 = arith.constant -0.284496725 : f32
    %29 = vector.broadcast %cst_14 : f32 to vector<256x128xf32>
    %30 = arith.addf %29, %28 : vector<256x128xf32>
    %31 = arith.mulf %20, %30 : vector<256x128xf32>
    %cst_15 = arith.constant 0.254829586 : f32
    %32 = vector.broadcast %cst_15 : f32 to vector<256x128xf32>
    %33 = arith.addf %32, %31 : vector<256x128xf32>
    %34 = arith.mulf %20, %33 : vector<256x128xf32>
    %cst_16 = arith.constant 0.000000e+00 : f32
    %35 = vector.broadcast %cst_16 : f32 to vector<256x128xf32>
    %36 = arith.subf %35, %14 : vector<256x128xf32>
    %37 = arith.mulf %36, %14 : vector<256x128xf32>
    %38 = math.exp %37 : vector<256x128xf32>
    %39 = arith.mulf %34, %38 : vector<256x128xf32>
    %cst_17 = arith.constant 1.000000e+00 : f32
    %40 = vector.broadcast %cst_17 : f32 to vector<256x128xf32>
    %41 = arith.subf %40, %39 : vector<256x128xf32>
    %cst_18 = arith.constant 0.000000e+00 : f32
    %42 = vector.broadcast %cst_18 : f32 to vector<256x128xf32>
    %43 = arith.cmpf oge, %13, %42 : vector<256x128xf32>
    %cst_19 = arith.constant 0.000000e+00 : f32
    %44 = vector.broadcast %cst_19 : f32 to vector<256x128xf32>
    %45 = arith.subf %44, %41 : vector<256x128xf32>
    %46 = arith.select %43, %41, %45 : vector<256x128xi1>, vector<256x128xf32>
    %cst_20 = arith.constant 1.000000e+00 : f32
    %47 = vector.broadcast %cst_20 : f32 to vector<256x128xf32>
    %48 = arith.addf %47, %46 : vector<256x128xf32>
    %49 = arith.mulf %11, %48 : vector<256x128xf32>
    %c0_21 = arith.constant 0 : index
    %c0_22 = arith.constant 0 : index
    %50 = vector.load %arg10[%c0_21, %c0_22] : memref<256x32xf32, #tpu.memory_space<vmem>>, vector<256x32xf32>
    %51 = arith.truncf %49 : vector<256x128xf32> to vector<256x128xbf16>
    %c0_23 = arith.constant 0 : index
    %c0_24 = arith.constant 0 : index
    %52 = vector.load %arg5[%c0_23, %c0_24] : memref<128x32xbf16, #tpu.memory_space<vmem>>, vector<128x32xbf16>
    %cst_25 = arith.constant dense<0.000000e+00> : vector<256x32xf32>
    %53 = tpu.matmul %51, %52, %cst_25 {dimension_numbers = #tpu.dot_dimension_numbers<[1], [0], [0], [1], [0, 0, 1, 1], [], []>} : vector<256x128xbf16>, vector<128x32xbf16>, vector<256x32xf32> -> vector<256x32xf32>
    %54 = arith.addf %50, %53 : vector<256x32xf32>
    %c0_26 = arith.constant 0 : index
    %c0_27 = arith.constant 0 : index
    %55 = vector.load %arg10[%c0_26, %c0_27] : memref<256x32xf32, #tpu.memory_space<vmem>>, vector<256x32xf32>
    tpu.vector_store %arg10[%c0_26, %c0_27], %54 {strides = array<i32>} : memref<256x32xf32, #tpu.memory_space<vmem>>, vector<256x32xf32>,
    %c0_i32_28 = arith.constant 0 : i32
    %56 = arith.cmpi eq, %arg1, %c0_i32_28 : i32
    %57 = arith.extui %56 : i1 to i32
    %c0_i32_29 = arith.constant 0 : i32
    %58 = arith.cmpi ne, %57, %c0_i32_29 : i32
    scf.if %58 {
      %c0_30 = arith.constant 0 : index
      %c0_31 = arith.constant 0 : index
      %59 = vector.load %arg10[%c0_30, %c0_31] : memref<256x32xf32, #tpu.memory_space<vmem>>, vector<256x32xf32>
      %c0_32 = arith.constant 0 : index
      %c0_33 = arith.constant 0 : index
      %60 = vector.load %arg7[%c0_32, %c0_33] : memref<1x32xf32, #tpu.memory_space<vmem>>, vector<1x32xf32>
      %c0_34 = arith.constant 0 : index
      %c0_35 = arith.constant 0 : index
      %61 = vector.load %arg8[%c0_34, %c0_35] : memref<1x32xf32, #tpu.memory_space<vmem>>, vector<1x32xf32>
      %cst_36 = arith.constant dense<0.000000e+00> : vector<256xf32>
      %62 = vector.multi_reduction <add>, %59, %cst_36 [1] : vector<256x32xf32> to vector<256xf32>
      %63 = vector.shape_cast %62 : vector<256xf32> to vector<256x1xf32>
      %cst_37 = arith.constant 3.200000e+01 : f32
      %64 = vector.broadcast %cst_37 : f32 to vector<256x1xf32>
      %65 = arith.divf %63, %64 : vector<256x1xf32>
      %66 = vector.broadcast %65 : vector<256x1xf32> to vector<256x32xf32>
      %67 = arith.subf %59, %66 : vector<256x32xf32>
      %68 = arith.mulf %67, %67 : vector<256x32xf32>
      %cst_38 = arith.constant dense<0.000000e+00> : vector<256xf32>
      %69 = vector.multi_reduction <add>, %68, %cst_38 [1] : vector<256x32xf32> to vector<256xf32>
      %70 = vector.shape_cast %69 : vector<256xf32> to vector<256x1xf32>
      %cst_39 = arith.constant 3.200000e+01 : f32
      %71 = vector.broadcast %cst_39 : f32 to vector<256x1xf32>
      %72 = arith.divf %70, %71 : vector<256x1xf32>
      %cst_40 = arith.constant 9.99999974E-6 : f32
      %73 = vector.broadcast %cst_40 : f32 to vector<256x1xf32>
      %74 = arith.addf %72, %73 : vector<256x1xf32>
      %75 = math.rsqrt %74 : vector<256x1xf32>
      %76 = vector.broadcast %75 : vector<256x1xf32> to vector<256x32xf32>
      %77 = arith.mulf %67, %76 : vector<256x32xf32>
      %78 = vector.broadcast %60 : vector<1x32xf32> to vector<256x32xf32>
      %79 = arith.mulf %77, %78 : vector<256x32xf32>
      %80 = vector.broadcast %61 : vector<1x32xf32> to vector<256x32xf32>
      %81 = arith.addf %79, %80 : vector<256x32xf32>
      %c0_41 = arith.constant 0 : index
      %c0_42 = arith.constant 0 : index
      %82 = vector.load %arg9[%c0_41, %c0_42] : memref<256x32xf32, #tpu.memory_space<vmem>>, vector<256x32xf32>
      tpu.vector_store %arg9[%c0_41, %c0_42], %81 {strides = array<i32>} : memref<256x32xf32, #tpu.memory_space<vmem>>, vector<256x32xf32>,
    } else {
    }
    return
  }
  func.func @transform_0(%arg0: i32, %arg1: i32) -> (i32, i32) {
    %c0_i32 = arith.constant 0 : i32
    %c0_i32_0 = arith.constant 0 : i32
    return %arg0, %c0_i32 : i32, i32
  }
  func.func @transform_1(%arg0: i32, %arg1: i32) -> (i32, i32) {
    %c0_i32 = arith.constant 0 : i32
    %c0_i32_0 = arith.constant 0 : i32
    return %c0_i32, %arg1 : i32, i32
  }
  func.func @transform_2(%arg0: i32, %arg1: i32) -> (i32, i32) {
    %c0_i32 = arith.constant 0 : i32
    %c0_i32_0 = arith.constant 0 : i32
    return %c0_i32, %arg1 : i32, i32
  }
  func.func @transform_3(%arg0: i32, %arg1: i32) -> (i32, i32) {
    %c0_i32 = arith.constant 0 : i32
    %c0_i32_0 = arith.constant 0 : i32
    return %arg1, %c0_i32 : i32, i32
  }
  func.func @transform_4(%arg0: i32, %arg1: i32) -> (i32, i32) {
    %c0_i32 = arith.constant 0 : i32
    %c0_i32_0 = arith.constant 0 : i32
    %c0_i32_1 = arith.constant 0 : i32
    return %c0_i32, %c0_i32_0 : i32, i32
  }
  func.func @transform_5(%arg0: i32, %arg1: i32) -> (i32, i32) {
    %c0_i32 = arith.constant 0 : i32
    %c0_i32_0 = arith.constant 0 : i32
    %c0_i32_1 = arith.constant 0 : i32
    return %c0_i32, %c0_i32_0 : i32, i32
  }
  func.func @transform_6(%arg0: i32, %arg1: i32) -> (i32, i32) {
    %c0_i32 = arith.constant 0 : i32
    %c0_i32_0 = arith.constant 0 : i32
    %c0_i32_1 = arith.constant 0 : i32
    return %c0_i32, %c0_i32_0 : i32, i32
  }
  func.func @transform_7(%arg0: i32, %arg1: i32) -> (i32, i32) {
    %c0_i32 = arith.constant 0 : i32
    %c0_i32_0 = arith.constant 0 : i32
    return %arg0, %c0_i32 : i32, i32
  }
}

module attributes {stable_mosaic.version = 11 : i64} {
  func.func @_head_kernel(%arg0: i32, %arg1: memref<2x32xf32, #tpu.memory_space<vmem>>, %arg2: memref<1x32xf32, #tpu.memory_space<vmem>>, %arg3: memref<1x32xf32, #tpu.memory_space<vmem>>, %arg4: memref<32x128xbf16, #tpu.memory_space<vmem>>, %arg5: memref<1x128xf32, #tpu.memory_space<vmem>>, %arg6: memref<2x128xf32, #tpu.memory_space<vmem>>) attributes {dimension_semantics = [#tpu.dimension_semantics<parallel>], iteration_bounds = array<i64: 1>, scalar_prefetch = 0 : i64, scratch_operands = 0 : i64, tpu.core_type = #tpu.core_type<tc>, window_params = [{transform_indices = @transform_0, window_bounds = array<i64: 2, 32>}, {pipeline_mode = #tpu.pipeline_mode<synchronous>, transform_indices = @transform_1, window_bounds = array<i64: 1, 32>}, {pipeline_mode = #tpu.pipeline_mode<synchronous>, transform_indices = @transform_2, window_bounds = array<i64: 1, 32>}, {pipeline_mode = #tpu.pipeline_mode<synchronous>, transform_indices = @transform_3, window_bounds = array<i64: 32, 128>}, {pipeline_mode = #tpu.pipeline_mode<synchronous>, transform_indices = @transform_4, window_bounds = array<i64: 1, 128>}, {transform_indices = @transform_5, window_bounds = array<i64: 2, 128>}]} {
    %c0 = arith.constant 0 : index
    %c0_0 = arith.constant 0 : index
    %0 = vector.load %arg1[%c0, %c0_0] : memref<2x32xf32, #tpu.memory_space<vmem>>, vector<2x32xf32>
    %c0_1 = arith.constant 0 : index
    %c0_2 = arith.constant 0 : index
    %1 = vector.load %arg2[%c0_1, %c0_2] : memref<1x32xf32, #tpu.memory_space<vmem>>, vector<1x32xf32>
    %c0_3 = arith.constant 0 : index
    %c0_4 = arith.constant 0 : index
    %2 = vector.load %arg3[%c0_3, %c0_4] : memref<1x32xf32, #tpu.memory_space<vmem>>, vector<1x32xf32>
    %cst = arith.constant dense<0.000000e+00> : vector<2xf32>
    %3 = vector.multi_reduction <add>, %0, %cst [1] : vector<2x32xf32> to vector<2xf32>
    %4 = vector.shape_cast %3 : vector<2xf32> to vector<2x1xf32>
    %cst_5 = arith.constant 3.200000e+01 : f32
    %5 = vector.broadcast %cst_5 : f32 to vector<2x1xf32>
    %6 = arith.divf %4, %5 : vector<2x1xf32>
    %7 = vector.broadcast %6 : vector<2x1xf32> to vector<2x32xf32>
    %8 = arith.subf %0, %7 : vector<2x32xf32>
    %9 = arith.mulf %8, %8 : vector<2x32xf32>
    %cst_6 = arith.constant dense<0.000000e+00> : vector<2xf32>
    %10 = vector.multi_reduction <add>, %9, %cst_6 [1] : vector<2x32xf32> to vector<2xf32>
    %11 = vector.shape_cast %10 : vector<2xf32> to vector<2x1xf32>
    %cst_7 = arith.constant 3.200000e+01 : f32
    %12 = vector.broadcast %cst_7 : f32 to vector<2x1xf32>
    %13 = arith.divf %11, %12 : vector<2x1xf32>
    %cst_8 = arith.constant 9.99999974E-6 : f32
    %14 = vector.broadcast %cst_8 : f32 to vector<2x1xf32>
    %15 = arith.addf %13, %14 : vector<2x1xf32>
    %16 = math.rsqrt %15 : vector<2x1xf32>
    %17 = vector.broadcast %16 : vector<2x1xf32> to vector<2x32xf32>
    %18 = arith.mulf %8, %17 : vector<2x32xf32>
    %19 = vector.broadcast %1 : vector<1x32xf32> to vector<2x32xf32>
    %20 = arith.mulf %18, %19 : vector<2x32xf32>
    %21 = vector.broadcast %2 : vector<1x32xf32> to vector<2x32xf32>
    %22 = arith.addf %20, %21 : vector<2x32xf32>
    %23 = arith.truncf %22 : vector<2x32xf32> to vector<2x32xbf16>
    %c0_9 = arith.constant 0 : index
    %c0_10 = arith.constant 0 : index
    %24 = vector.load %arg4[%c0_9, %c0_10] : memref<32x128xbf16, #tpu.memory_space<vmem>>, vector<32x128xbf16>
    %cst_11 = arith.constant dense<0.000000e+00> : vector<2x128xf32>
    %25 = tpu.matmul %23, %24, %cst_11 {dimension_numbers = #tpu.dot_dimension_numbers<[1], [0], [0], [1], [0, 0, 1, 1], [], []>} : vector<2x32xbf16>, vector<32x128xbf16>, vector<2x128xf32> -> vector<2x128xf32>
    %c0_12 = arith.constant 0 : index
    %c0_13 = arith.constant 0 : index
    %26 = vector.load %arg5[%c0_12, %c0_13] : memref<1x128xf32, #tpu.memory_space<vmem>>, vector<1x128xf32>
    %27 = vector.broadcast %26 : vector<1x128xf32> to vector<2x128xf32>
    %28 = arith.addf %25, %27 : vector<2x128xf32>
    %c0_14 = arith.constant 0 : index
    %c0_15 = arith.constant 0 : index
    %29 = vector.load %arg6[%c0_14, %c0_15] : memref<2x128xf32, #tpu.memory_space<vmem>>, vector<2x128xf32>
    tpu.vector_store %arg6[%c0_14, %c0_15], %28 {strides = array<i32>} : memref<2x128xf32, #tpu.memory_space<vmem>>, vector<2x128xf32>,
    return
  }
  func.func @transform_0(%arg0: i32) -> (i32, i32) {
    %c0_i32 = arith.constant 0 : i32
    %c0_i32_0 = arith.constant 0 : i32
    return %arg0, %c0_i32 : i32, i32
  }
  func.func @transform_1(%arg0: i32) -> (i32, i32) {
    %c0_i32 = arith.constant 0 : i32
    %c0_i32_0 = arith.constant 0 : i32
    %c0_i32_1 = arith.constant 0 : i32
    return %c0_i32, %c0_i32_0 : i32, i32
  }
  func.func @transform_2(%arg0: i32) -> (i32, i32) {
    %c0_i32 = arith.constant 0 : i32
    %c0_i32_0 = arith.constant 0 : i32
    %c0_i32_1 = arith.constant 0 : i32
    return %c0_i32, %c0_i32_0 : i32, i32
  }
  func.func @transform_3(%arg0: i32) -> (i32, i32) {
    %c0_i32 = arith.constant 0 : i32
    %c0_i32_0 = arith.constant 0 : i32
    %c0_i32_1 = arith.constant 0 : i32
    return %c0_i32, %c0_i32_0 : i32, i32
  }
  func.func @transform_4(%arg0: i32) -> (i32, i32) {
    %c0_i32 = arith.constant 0 : i32
    %c0_i32_0 = arith.constant 0 : i32
    %c0_i32_1 = arith.constant 0 : i32
    return %c0_i32, %c0_i32_0 : i32, i32
  }
  func.func @transform_5(%arg0: i32) -> (i32, i32) {
    %c0_i32 = arith.constant 0 : i32
    %c0_i32_0 = arith.constant 0 : i32
    return %arg0, %c0_i32 : i32, i32
  }
}

</mosaic_0001>

<bundles_post_ra>
// kernel: vit_forward.6
= control target key start
LH: loop header
LB: loop body
LE: loop exit
PB: predicated region body
PF: predicated region fallthrough
CT: control target
= control target key end

     0   :  { %s673_s12 = smov 0   ;;  %s675_s13 = smov 0   ;;  %s830_s0 = inlined_call_operand.vmem [shape: f32[2,128,48], index: 0, kind: input, shape index: {}]   ;;  %s831_s1 = inlined_call_operand.vmem [shape: bf16[48,32], index: 1, kind: input, shape index: {}]   ;;  %s832_s2 = inlined_call_operand.vmem [shape: f32[128,32], index: 2, kind: input, shape index: {}]   ;;  %s833_s3 = inlined_call_operand.vmem [shape: f32[2,128,32], index: 3, kind: output, shape index: {}]  }
   0x1   :  { %s677_s14 = smov 0  }
   0x2 LB: > { %s25_s15 = sadd.s32 1, %s647_s13  ;;  %p543_p0 = scmp.ge.s32.totalorder %s651_s14, 1  ;;  %s651_s14 = sphi %s677_s14, %s13_s14   ;;  %s647_s13 = sphi %s675_s13, %s835_s13   ;;  %s643_s12 = sphi %s673_s12, %s834_s12  }
   0x3   : > { %p27_p1 = scmp.ge.s32.totalorder %s25_s15, 2  ;;  %p169_p2 = scmp.lt.s32.totalorder %s651_s14, 3 }
   0x5   : > { %s837_s15 = smov (%p27_p1, %s25_s15), 0  ;;  %p170_p3 = pnand %p543_p0, %p169_p2 }
   0x6   : > { %p207_p4 = scmp.lt.s32.totalorder (!%p170_p3), %s643_s12, 1 }
   0x7   : > { %173 = sbr.rel (%p170_p3) target bundleno = 235 (0xeb), region = 32 }
   0xc   : > { %v626_v0 = vld [vmem:[%s831_s1 + $0x10] sm:$0xff]   ;;  %v627_v1 = vld [vmem:[%s831_s1 + $0x8] sm:$0xff]   ;;  %s839_s12 = smov (!%p207_p4, %s643_s12), 1  ;;  %v628_v2 = vld [vmem:[%s831_s1] sm:$0xff]   ;;  %vm297_vm0 = vcmask 392192   ;;  %vm419_vm1 = vcmask 261120  }
   0xd   : > { %574 = vmatprep.subr.bf16.mxu0 %v626_v0  ;;  %596 = vmatprep.subr.bf16.mxu1 %v626_v0  ;;  %s561_s22 = sshll.u32 %s839_s12, 7  ;;  %v265_v27 = vld [vmem:[%s832_s2 + $0x10] sm:$0xff]  ;;  %v263_v31 = vld [vmem:[%s832_s2] sm:$0xff]  ;;  %v266_v37 = vld [vmem:[%s832_s2 + $0x18] sm:$0xff] }
   0xe   : > { %575 = vmatpush3.bf16.msra.mxu0 %v626_v0  ;;  %599 = vmatpush3.bf16.msra.mxu1 %v626_v0  ;;  %s708_s25 = scalar_lea.vmem %s830_s0, %s561_s22  ;;  %v273_v28 = vld [vmem:[%s832_s2 + $0x50] sm:$0xff]  ;;  %s745_s5 = scalar_lea.vmem %s833_s3, %s561_s22  ;;  %v271_v32 = vld [vmem:[%s832_s2 + $0x40] sm:$0xff]  ;;  %v274_v38 = vld [vmem:[%s832_s2 + $0x58] sm:$0xff] }
   0xf   : > { %576 = vmatprep.subr.bf16.mxu0 %v627_v1  ;;  %597 = vmatprep.subr.bf16.mxu1 %v627_v1  ;;  %v233_v3 = vld [vmem:[%s708_s25] sm:$0xff]  ;;  %v234_v4 = vld [vmem:[%s708_s25 + $0x8] sm:$0xff]  ;;  %v235_v8 = vld [vmem:[%s708_s25 + $0x10] sm:$0xff] }
  0x10   : > { %v241_v5 = vld [vmem:[%s708_s25 + $0x40] sm:$0xff]  ;;  %v249_v6 = vpack.c.bf16 %v234_v4, %v233_v3  ;;  %v242_v7 = vld [vmem:[%s708_s25 + $0x48] sm:$0xff]  ;;  %v236_v9 = vld [vmem:[%s708_s25 + $0x18] sm:$0xff] }
  0x11   : > { %v253_v10 = vpack.c.bf16 %v242_v7, %v241_v5  ;;  %v243_v11 = vld [vmem:[%s708_s25 + $0x50] sm:$0xff]  ;;  %v244_v12 = vld [vmem:[%s708_s25 + $0x58] sm:$0xff]  ;;  %v237_v13 = vld [vmem:[%s708_s25 + $0x20] sm:$0xff]  ;;  %v250_v17 = vpack.c.bf16 %v236_v9, %v235_v8 }
  0x12   : > { %577 = vmatpush3.bf16.msra.mxu0 %v627_v1  ;;  %600 = vmatpush3.bf16.msra.mxu1 %v627_v1  ;;  %v238_v14 = vld [vmem:[%s708_s25 + $0x28] sm:$0xff]  ;;  %v245_v15 = vld [vmem:[%s708_s25 + $0x60] sm:$0xff]  ;;  %v254_v18 = vpack.c.bf16 %v244_v12, %v243_v11  ;;  %v239_v21 = vld [vmem:[%s708_s25 + $0x30] sm:$0xff] }
  0x13   : > { %578 = vmatprep.subr.bf16.mxu0 %v628_v2  ;;  %598 = vmatprep.subr.bf16.mxu1 %v628_v2  ;;  %v246_v16 = vld [vmem:[%s708_s25 + $0x68] sm:$0xff]  ;;  %v251_v19 = vpack.c.bf16 %v238_v14, %v237_v13  ;;  %v240_v22 = vld [vmem:[%s708_s25 + $0x38] sm:$0xff]  ;;  %v247_v23 = vld [vmem:[%s708_s25 + $0x70] sm:$0xff] }
  0x14   : > { %580 = vmatprep.mubr.msk.bf16.mxu0 %vm297_vm0, %v249_v6  ;;  %588 = vmatprep.mubr.msk.bf16.mxu1 %vm297_vm0, %v253_v10  ;;  %v255_v20 = vpack.c.bf16 %v246_v16, %v245_v15  ;;  %v248_v24 = vld [vmem:[%s708_s25 + $0x78] sm:$0xff]  ;;  %v252_v25 = vpack.c.bf16 %v240_v22, %v239_v21  ;;  %v264_v43 = vld [vmem:[%s832_s2 + $0x8] sm:$0xff]  ;;  %v269_v49 = vld [vmem:[%s832_s2 + $0x30] sm:$0xff] }
  0x15   : > { %v256_v26 = vpack.c.bf16 %v248_v24, %v247_v23  ;;  %v272_v44 = vld [vmem:[%s832_s2 + $0x48] sm:$0xff]  ;;  %v277_v50 = vld [vmem:[%s832_s2 + $0x70] sm:$0xff]  ;;  %v267_v55 = vld [vmem:[%s832_s2 + $0x20] sm:$0xff] }
  0x16   : > { %579 = vmatpush3.bf16.msra.mxu0 %v628_v2  ;;  %601 = vmatpush3.bf16.msra.mxu1 %v628_v2  ;;  %v275_v56 = vld [vmem:[%s832_s2 + $0x60] sm:$0xff]  ;;  %v270_v61 = vld [vmem:[%s832_s2 + $0x38] sm:$0xff]  ;;  %v268_v3 = vld [vmem:[%s832_s2 + $0x28] sm:$0xff] }
  0x17   : > { %v278_v62 = vld [vmem:[%s832_s2 + $0x78] sm:$0xff]  ;;  %v276_v4 = vld [vmem:[%s832_s2 + $0x68] sm:$0xff] }
  0x19   : > { %581 = vmatmul.mubr.msk.bf16.vlgmr.msra.gmra.mxu0 %vm297_vm0, %v250_v17  ;;  %589 = vmatmul.mubr.msk.bf16.vlgmr.msra.gmra.mxu1 %vm297_vm0, %v254_v18 }
  0x1a   : > { %584 = vmatprep.mubr.msk.bf16.mxu0 %vm297_vm0, %v251_v19  ;;  %592 = vmatprep.mubr.msk.bf16.mxu1 %vm297_vm0, %v255_v20 }
  0x21   : > { %585 = vmatmul.mubr.msk.bf16.gmra.mxu0 %vm297_vm0, %v252_v25  ;;  %593 = vmatmul.mubr.msk.bf16.gmra.mxu1 %vm297_vm0, %v256_v26 }
  0xd9   : > { %v582_v29 = vpop.f32.mrf.mxu0  ;;  %v590_v30 = vpop.f32.mrf.mxu1 }
  0xda   : > { %v365_v33 = vadd.f32 %v582_v29, %v265_v27  ;;  %v397_v34 = vadd.f32 %v590_v30, %v273_v28 }
  0xdb   : > { %v356_v35 = vpop.f32.mrf.mxu0  ;;  %v388_v36 = vpop.f32.mrf.mxu1 }
  0xdc   : > { %422 = vst.msk [vmem:[%s745_s5 + $0x10] sm:$0xff] %vm419_vm1, %v365_v33  ;;  %430 = vst.msk [vmem:[%s745_s5 + $0x50] sm:$0xff] %vm419_vm1, %v397_v34  ;;  %v357_v39 = vadd.f32 %v356_v35, %v263_v31  ;;  %v389_v40 = vadd.f32 %v388_v36, %v271_v32 }
  0xdd   : > { %v583_v41 = vpop.f32.mrf.mxu0  ;;  %v591_v42 = vpop.f32.mrf.mxu1 }
  0xde   : > { %420 = vst.msk [vmem:[%s745_s5] sm:$0xff] %vm419_vm1, %v357_v39  ;;  %428 = vst.msk [vmem:[%s745_s5 + $0x40] sm:$0xff] %vm419_vm1, %v389_v40  ;;  %v368_v45 = vadd.f32 %v583_v41, %v266_v37  ;;  %v400_v46 = vadd.f32 %v591_v42, %v274_v38 }
  0xdf   : > { %v359_v47 = vpop.f32.mrf.mxu0  ;;  %v391_v48 = vpop.f32.mrf.mxu1 }
  0xe0   : > { %423 = vst.msk [vmem:[%s745_s5 + $0x18] sm:$0xff] %vm419_vm1, %v368_v45  ;;  %431 = vst.msk [vmem:[%s745_s5 + $0x58] sm:$0xff] %vm419_vm1, %v400_v46  ;;  %v360_v51 = vadd.f32 %v359_v47, %v264_v43  ;;  %v392_v52 = vadd.f32 %v391_v48, %v272_v44 }
  0xe1   : > { %v586_v53 = vpop.f32.mrf.mxu0  ;;  %v594_v54 = vpop.f32.mrf.mxu1 }
  0xe2   : > { %421 = vst.msk [vmem:[%s745_s5 + $0x8] sm:$0xff] %vm419_vm1, %v360_v51  ;;  %429 = vst.msk [vmem:[%s745_s5 + $0x48] sm:$0xff] %vm419_vm1, %v392_v52  ;;  %v381_v57 = vadd.f32 %v586_v53, %v269_v49  ;;  %v413_v58 = vadd.f32 %v594_v54, %v277_v50 }
  0xe3   : > { %v372_v59 = vpop.f32.mrf.mxu0  ;;  %v404_v60 = vpop.f32.mrf.mxu1 }
  0xe4   : > { %426 = vst.msk [vmem:[%s745_s5 + $0x30] sm:$0xff] %vm419_vm1, %v381_v57  ;;  %434 = vst.msk [vmem:[%s745_s5 + $0x70] sm:$0xff] %vm419_vm1, %v413_v58  ;;  %v373_v63 = vadd.f32 %v372_v59, %v267_v55  ;;  %v405_v0 = vadd.f32 %v404_v60, %v275_v56 }
  0xe5   : > { %v587_v1 = vpop.f32.mrf.mxu0  ;;  %v595_v2 = vpop.f32.mrf.mxu1 }
  0xe6   : > { %424 = vst.msk [vmem:[%s745_s5 + $0x20] sm:$0xff] %vm419_vm1, %v373_v63  ;;  %432 = vst.msk [vmem:[%s745_s5 + $0x60] sm:$0xff] %vm419_vm1, %v405_v0  ;;  %v384_v5 = vadd.f32 %v587_v1, %v270_v61  ;;  %v416_v6 = vadd.f32 %v595_v2, %v278_v62 }
  0xe7   : > { %v375_v7 = vpop.f32.mrf.mxu0  ;;  %v407_v8 = vpop.f32.mrf.mxu1 }
  0xe8   : > { %427 = vst.msk [vmem:[%s745_s5 + $0x38] sm:$0xff] %vm419_vm1, %v384_v5  ;;  %435 = vst.msk [vmem:[%s745_s5 + $0x78] sm:$0xff] %vm419_vm1, %v416_v6  ;;  %v376_v9 = vadd.f32 %v375_v7, %v268_v3  ;;  %v408_v10 = vadd.f32 %v407_v8, %v276_v4 }
  0xea   : > { %425 = vst.msk [vmem:[%s745_s5 + $0x28] sm:$0xff] %vm419_vm1, %v376_v9  ;;  %433 = vst.msk [vmem:[%s745_s5 + $0x68] sm:$0xff] %vm419_vm1, %v408_v10 }
  0xeb PF: > { %s13_s14 = sadd.s32 1, %s651_s14   ;;  %s834_s12 = smov %s647_s13 }
  0xec   : > { %p10_p5 = scmp.ge.s32.totalorder %s13_s14, 4   ;;  %s835_s13 = smov %s837_s15 }
  0xee   :  { %12 = sbr.rel (!%p10_p5) target bundleno = 2 (0x2), region = 65 }

// kernel: vit_forward.11
= control target key start
LH: loop header
LB: loop body
LE: loop exit
PB: predicated region body
PF: predicated region fallthrough
CT: control target
= control target key end

     0   :  { %vm25_vm0 = vcmask 254976   ;;  %s237_s0 = inlined_call_operand.vmem [shape: f32[2,32], index: 0, kind: input, shape index: {}]   ;;  %s238_s1 = inlined_call_operand.vmem [shape: f32[1,32], index: 1, kind: input, shape index: {}]   ;;  %s239_s2 = inlined_call_operand.vmem [shape: f32[1,32], index: 2, kind: input, shape index: {}]   ;;  %s240_s3 = inlined_call_operand.vmem [shape: bf16[32,128], index: 3, kind: input, shape index: {}]   ;;  %s241_s4 = inlined_call_operand.vmem [shape: f32[1,128], index: 4, kind: input, shape index: {}]   ;;  %s242_s5 = inlined_call_operand.hbm [shape: f32[2,128], index: 5, kind: output, shape index: {}]  }
   0x1   :  { %v22_v0 = vld [vmem:[%s237_s0] sm:$0x3] }
   0x2   :  { %v26_v1 = vsel %vm25_vm0, %v22_v0, 0.0 }
   0x3   :  { %27 = vadd.xlane.f32.xlu0 %v26_v1 }
   0x4   :  { %10 = vsyncpa [#allocation3], 0  ;;  %v157_v7 = vld [vmem:[%s240_s3 + $0x8] sm:$0xff]   ;;  %v183_v8 = vmov 0.0   ;;  %vm184_vm1 = vmmov 0   ;;  %v158_v9 = vld [vmem:[%s240_s3] sm:$0xff]  }
   0x5   :  { %146 = vmatprep.subr.bf16.mxu0 %v183_v8  ;;  %150 = vmatprep.mubr.msk.bf16.mxu0 %vm184_vm1, %v183_v8  ;;  %v137_v14 = vld [vmem:[%s238_s1] ss:$0 sm:$0xff]  ;;  %vm78_vm2 = vcmask 261120   ;;  %s185_s28 = smov [#allocation2]  }
   0x6   :  { %147 = vmatpush3.bf16.msra.mxu0 %v157_v7  ;;  %v138_v16 = vld [vmem:[%s239_s2] ss:$0 sm:$0xff]  ;;  %s129_s29 = sshll.u32 %s185_s28, 4  ;;  %s130_s29 = int_to_ptr.vmem [resolvable:$true] %s129_s29 }
   0x7   :  { %148 = vmatprep.subr.bf16.mxu0 %v183_v8  ;;  %v139_v20 = vld [vmem:[%s241_s4] ss:$0 sm:$0xff]  ;;  %s161_s1 = scalar_lea.vmem %s130_s29, 32  ;;  %p166_p1 = scmp.lt.s32.totalorder %s130_s29, %s130_s29 }
   0x8   :  { %p162_p0 = scmp.ne.s32.totalorder %s130_s29, %s161_s1  ;;  %p167_p2 = scmp.lt.s32.totalorder %s161_s1, %s161_s1 }
   0xa   :  { %149 = vmatpush3.bf16.msra.mxu0 %v158_v9  ;;  %p168_p3 = por %p167_p2, %p166_p1 }
   0xc   :  { %p169_p4 = pnand %p168_p3, %p162_p0 }
  0x8c   :  { %v28_v2 = vpop.xlane.xlu0 %27 }
  0x8d   :  { %v30_v3 = vmul.f32 0.03125, %v28_v2 }
  0x8f   :  { %v31_v4 = vsub.f32 %v22_v0, %v30_v3 }
  0x91   :  { %v32_v5 = vmul.f32 %v31_v4, %v31_v4 }
  0x93   :  { %v33_v6 = vsel %vm25_vm0, %v32_v5, 0.0 }
  0x94   :  { %34 = vadd.xlane.f32.xlu0 %v33_v6 }
 0x11d   :  { %v35_v10 = vpop.xlane.xlu0 %34 }
 0x11e   :  { %v36_v11 = vmul.f32 0.03125, %v35_v10 }
 0x120   :  { %v37_v12 = vadd.f32 1e-05, %v36_v11 }
 0x122   :  { %159 = vrsqrt.f32 %v37_v12 }
 0x12f   :  { %v160_v13 = vpop.eup %159 }
 0x130   :  { %v39_v15 = vmul.f32 %v160_v13, %v31_v4 }
 0x132   :  { %v46_v17 = vmul.f32 %v137_v14, %v39_v15 }
 0x134   :  { %v53_v18 = vadd.f32 %v138_v16, %v46_v17 }
 0x136   :  { %v54_v19 = vpack.c.bf16 %v53_v18, %v53_v18 }
 0x138   :  { %151 = vmatmul.mubr.msk.bf16.vlgmr.msra.gmra.mxu0 %vm78_vm2, %v54_v19 }
 0x1f8   :  { %v116_v21 = vpop.f32.mrf.mxu0 }
 0x1f9   :  { %v117_v22 = vadd.f32 %v139_v20, %v116_v21 }
 0x1fa   :  { %v152_v23 = vpop.f32.mrf.mxu0 }
 0x1fb   :  { %122 = vst [vmem:[#allocation2] sm:$0x3] %v117_v22 }
 0x1fc   :  { %v119_v24 = vpop.f32.mrf.mxu0 }
 0x1fd   :  { %172 = shalt.err (!%p169_p4)
}
 0x1fe   :  { %132 = dma.vmem_to_hbm [thread:$0]  %s130_s29, 32, %s242_s5, [#allocation3]   ;;  %v153_v25 = vpop.f32.mrf.mxu0 }
 0x1ff   :  { %181 = dma.done.wait [#allocation3], 32  }
 0x200   :  { %182 = vsyncadd [#allocation3], 4294967264 }
 0x201   :  { %136 = vsyncpa [#allocation3], 1 }

// kernel: vit_forward.7
= control target key start
LH: loop header
LB: loop body
LE: loop exit
PB: predicated region body
PF: predicated region fallthrough
CT: control target
= control target key end

     0   :  { %s4286_s27 = smov 0   ;;  %s5748_s0 = inlined_call_operand.vmem [shape: f32[2,128,32], index: 0, kind: input, shape index: {}]   ;;  %s5749_s1 = inlined_call_operand.vmem [shape: bf16[32,96], index: 1, kind: input, shape index: {}]   ;;  %s5750_s2 = inlined_call_operand.vmem [shape: f32[1,96], index: 2, kind: input, shape index: {}]   ;;  %s5751_s3 = inlined_call_operand.vmem [shape: bf16[32,32], index: 3, kind: input, shape index: {}]   ;;  %s5752_s4 = inlined_call_operand.vmem [shape: f32[1,32], index: 4, kind: input, shape index: {}]   ;;  %s5753_s5 = inlined_call_operand.vmem [shape: f32[1,128], index: 5, kind: input, shape index: {}]   ;;  %s5754_s6 = inlined_call_operand.vmem [shape: f32[1,32], index: 6, kind: input, shape index: {}]   ;;  %s5755_s7 = inlined_call_operand.vmem [shape: f32[1,32], index: 7, kind: input, shape index: {}]   ;;  %s5756_s8 = inlined_call_operand.vmem [shape: f32[2,128,32], index: 8, kind: output, shape index: {}]  }
   0x1 LB: > { %s3246_s28 = sadd.s32 4294967295, %s4228_s27   ;;  %p3250_p0 = scmp.ge.s32.totalorder %s4228_s27, 1  ;;  %s4228_s27 = sphi %s4286_s27, %s18_s27  }
   0x2   : > { %p262_p1 = scmp.lt.s32.totalorder %s4228_s27, 3 }
   0x4   : > { %p263_p2 = pnand %p3250_p0, %p262_p1 }
   0x6   : > { %266 = sbr.rel (%p263_p2) target bundleno = 3453 (0xd7d), region = 52 }
   0xb   : > { %v3915_v0 = vld [vmem:[%s5749_s1 + $0x8] sm:$0xff]   ;;  %p296_p3 = scmp.lt.s32.totalorder %s3246_s28, 1  ;;  %v3916_v1 = vld [vmem:[%s5749_s1] sm:$0xff]   ;;  %vm355_vm0 = vcmask 261120   ;;  %vm543_vm1 = vcmask 64512   ;;  %s4230_s17 = smov 96  }
   0xc   : > { %3512 = vmatprep.subr.bf16.mxu0 %v3915_v0  ;;  %v3255_v27 = vld [vmem:[%s5750_s2] ss:$0 sm:$0xff]  ;;  %s4231_s18 = smov 64   ;;  %s4232_s21 = smov 88   ;;  %vm1460_vm2 = vcmask 1043456  }
   0xd   : > { %s5772_s28 = smov (!%p296_p3, %s3246_s28), 1  ;;  %3513 = vmatpush3.bf16.msra.mxu0 %v3915_v0  ;;  %s4233_s22 = smov 120  }
   0xe   : > { %3514 = vmatprep.subr.bf16.mxu0 %v3916_v1  ;;  %s3336_s11 = sshll.u32 %s5772_s28, 7  ;;  %s4234_s25 = smov 56  }
   0xf   : > { %s4308_s14 = scalar_lea.vmem %s5748_s0, %s3336_s11  ;;  %s4235_s26 = smov 80  }
  0x10   : > { %v307_v2 = vld [vmem:[%s4308_s14] sm:$0xff]  ;;  %v308_v3 = vld [vmem:[%s4308_s14 + $0x8] sm:$0xff]  ;;  %v309_v4 = vld [vmem:[%s4308_s14 + $0x10] sm:$0xff]  ;;  %s4236_s29 = smov 112   ;;  %s4237_s30 = smov 72  }
  0x11   : > { %3515 = vmatpush3.bf16.msra.mxu0 %v3916_v1  ;;  %v323_v5 = vpack.c.bf16 %v308_v3, %v307_v2  ;;  %v310_v6 = vld [vmem:[%s4308_s14 + $0x18] sm:$0xff]  ;;  %v311_v7 = vld [vmem:[%s4308_s14 + $0x20] sm:$0xff]  ;;  %v312_v8 = vld [vmem:[%s4308_s14 + $0x28] sm:$0xff]  ;;  %s4238_s9 = smov 104   ;;  %s4239_s13 = smov 48  }
  0x12   : > { %v324_v9 = vpack.c.bf16 %v310_v6, %v309_v4  ;;  %v325_v10 = vpack.c.bf16 %v312_v8, %v311_v7  ;;  %v313_v11 = vld [vmem:[%s4308_s14 + $0x30] sm:$0xff]  ;;  %v314_v12 = vld [vmem:[%s4308_s14 + $0x38] sm:$0xff]  ;;  %v315_v13 = vld [vmem:[%s4308_s14 + $0x40] sm:$0xff] }
  0x13   : > { %3516 = vmatprep.mubr.msk.bf16.mxu0 %vm355_vm0, %v323_v5  ;;  %v316_v14 = vld [vmem:[%s4308_s14 + $0x48] sm:$0xff]  ;;  %v326_v15 = vpack.c.bf16 %v314_v12, %v313_v11  ;;  %v317_v17 = vld [vmem:[%s4308_s14 + $0x50] sm:$0xff]  ;;  %v318_v18 = vld [vmem:[%s4308_s14 + $0x58] sm:$0xff] }
  0x14   : > { %3517 = vmatmul.mubr.msk.bf16.vlgmr.msra.gmra.mxu0 %vm355_vm0, %v324_v9  ;;  %v327_v16 = vpack.c.bf16 %v316_v14, %v315_v13  ;;  %v319_v19 = vld [vmem:[%s4308_s14 + $0x60] sm:$0xff]  ;;  %v320_v20 = vld [vmem:[%s4308_s14 + $0x68] sm:$0xff]  ;;  %v328_v21 = vpack.c.bf16 %v318_v18, %v317_v17  ;;  %v321_v23 = vld [vmem:[%s4308_s14 + $0x70] sm:$0xff] }
  0x15   : > { %3520 = vmatprep.mubr.msk.bf16.mxu0 %vm355_vm0, %v325_v10  ;;  %v329_v22 = vpack.c.bf16 %v320_v20, %v319_v19  ;;  %v322_v24 = vld [vmem:[%s4308_s14 + $0x78] sm:$0xff] }
  0x16   : > { %v330_v25 = vpack.c.bf16 %v322_v24, %v321_v23 }
  0x1c   : > { %3521 = vmatmul.mubr.msk.bf16.gmra.mxu0 %vm355_vm0, %v326_v15 }
  0x1d   : > { %3524 = vmatprep.mubr.msk.bf16.mxu0 %vm355_vm0, %v327_v16 }
  0x24   : > { %3525 = vmatmul.mubr.msk.bf16.gmra.mxu0 %vm355_vm0, %v328_v21 }
  0x25   : > { %3528 = vmatprep.mubr.msk.bf16.mxu0 %vm355_vm0, %v329_v22 }
  0x2c   : > { %3529 = vmatmul.mubr.msk.bf16.gmra.mxu0 %vm355_vm0, %v330_v25 }
  0xd4   : > { %v3518_v26 = vpop.f32.mrf.mxu0 }
  0xd5   : > { %v4337_v29 = vadd.f32 %v3518_v26, %v3255_v27 }
  0xd6   : > { %v414_v28 = vpop.f32.mrf.mxu0 }
  0xd7   : > { %v415_v31 = vadd.f32 %v3255_v27, %v414_v28  ;;  %v483_v34 = vmul.f32 0.35355338, %v4337_v29 }
  0xd8   : > { %v3519_v30 = vpop.f32.mrf.mxu0 }
  0xd9   : > { %v4339_v32 = vadd.f32 %v3519_v30, %v3255_v27  ;;  %v481_v38 = vmul.f32 0.35355338, %v415_v31 }
  0xda   : > { %v417_v33 = vpop.f32.mrf.mxu0 }
  0xdb   : > { %v484_v35 = vmul.f32 0.35355338, %v4339_v32  ;;  %v418_v36 = vadd.f32 %v3255_v27, %v417_v33  ;;  %v4392_v26 = vpack.c.bf16 %v4339_v32, %v4337_v29 }
  0xdc   : > { %v3522_v37 = vpop.f32.mrf.mxu0 }
  0xdd   : > { %v4343_v39 = vpack.c.bf16 %v484_v35, %v483_v34  ;;  %v482_v40 = vmul.f32 0.35355338, %v418_v36  ;;  %v439_v43 = vadd.f32 %v3522_v37, %v3255_v27  ;;  %v4375_v22 = vpack.c.bf16 %v418_v36, %v415_v31 }
  0xde   : > { %v430_v41 = vpop.f32.mrf.mxu0 }
  0xdf   : > { %v4345_v42 = vpack.c.bf16 %v482_v40, %v481_v38  ;;  %v431_v45 = vadd.f32 %v3255_v27, %v430_v41  ;;  %v487_v48 = vmul.f32 0.35355338, %v439_v43 }
  0xe0   : > { %v3523_v44 = vpop.f32.mrf.mxu0 }
  0xe1   : > { %v442_v46 = vadd.f32 %v3523_v44, %v3255_v27  ;;  %3548 = vmatprep.mubr.msk.bf16.mxu1 %vm543_vm1, %v4345_v42  ;;  %v485_v52 = vmul.f32 0.35355338, %v431_v45 }
  0xe2   : > { %v433_v47 = vpop.f32.mrf.mxu0 }
  0xe3   : > { %v488_v49 = vmul.f32 0.35355338, %v442_v46  ;;  %v434_v50 = vadd.f32 %v3255_v27, %v433_v47  ;;  %v4385_v25 = vpack.c.bf16 %v442_v46, %v439_v43 }
  0xe4   : > { %v3526_v51 = vpop.f32.mrf.mxu0 }
  0xe5   : > { %v4349_v53 = vpack.c.bf16 %v488_v49, %v487_v48  ;;  %v486_v54 = vmul.f32 0.35355338, %v434_v50  ;;  %v455_v57 = vadd.f32 %v3526_v51, %v3255_v27  ;;  %v4365_v13 = vpack.c.bf16 %v434_v50, %v431_v45 }
  0xe6   : > { %v446_v55 = vpop.f32.mrf.mxu0 }
  0xe7   : > { %v4351_v56 = vpack.c.bf16 %v486_v54, %v485_v52  ;;  %v447_v59 = vadd.f32 %v3255_v27, %v446_v55  ;;  %v491_v62 = vmul.f32 0.35355338, %v455_v57  ;;  %v4436_v54 = vld [vmem:[%s5753_s5] ss:$0 sm:$0xff] }
  0xe8   : > { %v3527_v58 = vpop.f32.mrf.mxu0 }
  0xe9   : > { %v458_v60 = vadd.f32 %v3527_v58, %v3255_v27  ;;  %v489_v3 = vmul.f32 0.35355338, %v447_v59 }
  0xea   : > { %v449_v61 = vpop.f32.mrf.mxu0 }
  0xeb   : > { %v492_v63 = vmul.f32 0.35355338, %v458_v60  ;;  %v4353_v0 = vpack.c.bf16 %v458_v60, %v455_v57  ;;  %v450_v1 = vadd.f32 %v3255_v27, %v449_v61 }
  0xec   : > { %v3530_v2 = vpop.f32.mrf.mxu0 }
  0xed   : > { %v4355_v4 = vpack.c.bf16 %v492_v63, %v491_v62  ;;  %v490_v5 = vmul.f32 0.35355338, %v450_v1  ;;  %537 = vrot.lane.b32.xlu1 %v4353_v0, %s4230_s17  ;;  %v4361_v8 = vpack.c.bf16 %v450_v1, %v447_v59  ;;  %v471_v9 = vadd.f32 %v3530_v2, %v3255_v27 }
  0xee   : > { %v462_v6 = vpop.f32.mrf.mxu0 }
  0xef   : > { %v4359_v7 = vpack.c.bf16 %v490_v5, %v489_v3  ;;  %v463_v11 = vadd.f32 %v3255_v27, %v462_v6  ;;  %v495_v15 = vmul.f32 0.35355338, %v471_v9 }
  0xf0   : > { %v3531_v10 = vpop.f32.mrf.mxu0 }
  0xf1   : > { %v474_v12 = vadd.f32 %v3531_v10, %v3255_v27  ;;  %535 = vrot.lane.b32.xlu1 %v4361_v8, %s4230_s17  ;;  %v493_v19 = vmul.f32 0.35355338, %v463_v11 }
  0xf2   : > { %v465_v14 = vpop.f32.mrf.mxu0 }
  0xf3   : > { %v496_v16 = vmul.f32 0.35355338, %v474_v12  ;;  %v4367_v17 = vpack.c.bf16 %v474_v12, %v471_v9  ;;  %v466_v18 = vadd.f32 %v3255_v27, %v465_v14 }
  0xf5   : > { %v4369_v20 = vpack.c.bf16 %v496_v16, %v495_v15  ;;  %v494_v21 = vmul.f32 0.35355338, %v466_v18  ;;  %541 = vrot.lane.b32.xlu0 %v4367_v17, %s4230_s17  ;;  %531 = vrot.lane.b32.xlu1 %v4365_v13, %s4230_s17  ;;  %v4379_v24 = vpack.c.bf16 %v466_v18, %v463_v11 }
  0xf7   : > { %v4377_v23 = vpack.c.bf16 %v494_v21, %v493_v19 }
  0xf9   : > { %539 = vrot.lane.b32.xlu0 %v4379_v24, %s4230_s17  ;;  %527 = vrot.lane.b32.xlu1 %v4375_v22, %s4230_s17 }
  0xfd   : > { %533 = vrot.lane.b32.xlu0 %v4385_v25, %s4230_s17  ;;  %855 = vrot.lane.b32.xlu1 %v4367_v17, %s4231_s18 }
 0x101   : > { %529 = vrot.lane.b32.xlu0 %v4392_v26, %s4230_s17  ;;  %849 = vrot.lane.b32.xlu1 %v4361_v8, %s4231_s18  ;;  %s4240_s17 = smov 40  }
 0x105   : > { %851 = vrot.lane.b32.xlu0 %v4353_v0, %s4231_s18  ;;  %847 = vrot.lane.b32.xlu1 %v4385_v25, %s4231_s18 }
 0x109   : > { %845 = vrot.lane.b32.xlu1 %v4365_v13, %s4231_s18 }
 0x10d   : > { %843 = vrot.lane.b32.xlu1 %v4392_v26, %s4231_s18 }
 0x111   : > { %841 = vrot.lane.b32.xlu1 %v4375_v22, %s4231_s18 }
 0x115   : > { %853 = vrot.lane.b32.xlu1 %v4379_v24, %s4231_s18 }
 0x15f   : > { %v538_v27 = vpop.permute.xlu1 %537 }
 0x160   : > { %v584_v38 = vsel %vm543_vm1, %v538_v27, 0 }
 0x163   : > { %v536_v28 = vpop.permute.xlu1 %535 }
 0x164   : > { %v581_v44 = vsel %vm543_vm1, %v536_v28, 0 }
 0x167   : > { %v542_v29 = vpop.permute.xlu0 %541  ;;  %v532_v30 = vpop.permute.xlu1 %531 }
 0x168   : > { %3860 = vmatprep.subr.msk.bf16.mxu1 %vm543_vm1, %v542_v29  ;;  %v590_v31 = vsel %vm543_vm1, %v542_v29, 0  ;;  %v575_v50 = vsel %vm543_vm1, %v532_v30, 0 }
 0x169   : > { %3533 = vmatpush3.bf16.xpose.msra.mxu1 %v590_v31 }
 0x16b   : > { %v540_v32 = vpop.permute.xlu0 %539  ;;  %v528_v33 = vpop.permute.xlu1 %527 }
 0x16c   : > { %3861 = vmatprep.subr.msk.bf16.mxu1 %vm543_vm1, %v540_v32  ;;  %v587_v35 = vsel %vm543_vm1, %v540_v32, 0  ;;  %v569_v52 = vsel %vm543_vm1, %v528_v33, 0 }
 0x16f   : > { %v856_v34 = vpop.permute.xlu1 %855  ;;  %v534_v41 = vpop.permute.xlu0 %533 }
 0x170   : > { %3564 = vmatprep.subr.bf16.mxu0 %v856_v34  ;;  %v578_v48 = vsel %vm543_vm1, %v534_v41, 0 }
 0x171   : > { %3535 = vmatpush3.bf16.xpose.msra.mxu1 %v587_v35  ;;  %3565 = vmatpush3.bf16.msra.mxu0 %v856_v34 }
 0x172   : > { %3862 = vmatprep.subr.msk.bf16.mxu1 %vm543_vm1, %v538_v27 }
 0x173   : > { %v850_v36 = vpop.permute.xlu1 %849  ;;  %v530_v45 = vpop.permute.xlu0 %529 }
 0x174   : > { %v572_v51 = vsel %vm543_vm1, %v530_v45, 0 }
 0x177   : > { %v848_v37 = vpop.permute.xlu1 %847  ;;  %v852_v49 = vpop.permute.xlu0 %851 }
 0x179   : > { %3537 = vmatpush3.bf16.xpose.msra.mxu1 %v584_v38 }
 0x17a   : > { %3863 = vmatprep.subr.msk.bf16.mxu1 %vm543_vm1, %v536_v28 }
 0x17b   : > { %v846_v40 = vpop.permute.xlu1 %845 }
 0x17f   : > { %v844_v43 = vpop.permute.xlu1 %843 }
 0x181   : > { %3539 = vmatpush3.bf16.xpose.msra.mxu1 %v581_v44 }
 0x182   : > { %3864 = vmatprep.subr.msk.bf16.mxu1 %vm543_vm1, %v534_v41 }
 0x183   : > { %v842_v46 = vpop.permute.xlu1 %841 }
 0x187   : > { %v854_v47 = vpop.permute.xlu1 %853 }
 0x188   : > { %3566 = vmatprep.subr.bf16.mxu0 %v854_v47 }
 0x189   : > { %3541 = vmatpush3.bf16.xpose.msra.mxu1 %v578_v48  ;;  %3567 = vmatpush3.bf16.msra.mxu0 %v854_v47 }
 0x18a   : > { %3865 = vmatprep.subr.msk.bf16.mxu1 %vm543_vm1, %v532_v30  ;;  %3568 = vmatprep.subr.bf16.mxu0 %v852_v49 }
 0x18d   : > { %3569 = vmatpush3.bf16.msra.mxu0 %v852_v49 }
 0x18e   : > { %3570 = vmatprep.subr.bf16.mxu0 %v850_v36 }
 0x191   : > { %3543 = vmatpush3.bf16.xpose.msra.mxu1 %v575_v50  ;;  %3571 = vmatpush3.bf16.msra.mxu0 %v850_v36 }
 0x192   : > { %3866 = vmatprep.subr.msk.bf16.mxu1 %vm543_vm1, %v530_v45  ;;  %3572 = vmatprep.subr.bf16.mxu0 %v848_v37 }
 0x195   : > { %3573 = vmatpush3.bf16.msra.mxu0 %v848_v37 }
 0x196   : > { %3574 = vmatprep.subr.bf16.mxu0 %v846_v40 }
 0x199   : > { %3545 = vmatpush3.bf16.xpose.msra.mxu1 %v572_v51  ;;  %3575 = vmatpush3.bf16.msra.mxu0 %v846_v40 }
 0x19a   : > { %3867 = vmatprep.subr.msk.bf16.mxu1 %vm543_vm1, %v528_v33  ;;  %3576 = vmatprep.subr.bf16.mxu0 %v844_v43 }
 0x19d   : > { %3577 = vmatpush3.bf16.msra.mxu0 %v844_v43 }
 0x19e   : > { %3578 = vmatprep.subr.bf16.mxu0 %v842_v46 }
 0x1a1   : > { %3547 = vmatpush3.bf16.xpose.msra.mxu1 %v569_v52  ;;  %3579 = vmatpush3.bf16.msra.mxu0 %v842_v46 }
 0x1a8   : > { %3549 = vmatmul.mubr.msk.bf16.vlgmr.msra.gmra.mxu1 %vm543_vm1, %v4343_v39 }
 0x1a9   : > { %3552 = vmatprep.mubr.msk.bf16.mxu1 %vm543_vm1, %v4351_v56 }
 0x1b0   : > { %3553 = vmatmul.mubr.msk.bf16.gmra.mxu1 %vm543_vm1, %v4349_v53 }
 0x1b1   : > { %3556 = vmatprep.mubr.msk.bf16.mxu1 %vm543_vm1, %v4359_v7 }
 0x1b8   : > { %3557 = vmatmul.mubr.msk.bf16.gmra.mxu1 %vm543_vm1, %v4355_v4 }
 0x1b9   : > { %3560 = vmatprep.mubr.msk.bf16.mxu1 %vm543_vm1, %v4377_v23 }
 0x1c0   : > { %3561 = vmatmul.mubr.msk.bf16.gmra.mxu1 %vm543_vm1, %v4369_v20 }
 0x268   : > { %v3550_v55 = vpop.f32.mrf.mxu1 }
 0x269   : > { %v635_v57 = vadd.f32 %v3550_v55, %v4436_v54 }
 0x26a   : > { %v626_v58 = vpop.f32.mrf.mxu1 }
 0x26b   : > { %693 = vmax.xlane.f32.xlu0 %v635_v57  ;;  %v627_v60 = vadd.f32 %v4436_v54, %v626_v58 }
 0x26c   : > { %v3551_v59 = vpop.f32.mrf.mxu1 }
 0x26d   : > { %v638_v63 = vadd.f32 %v3551_v59, %v4436_v54 }
 0x26e   : > { %v629_v61 = vpop.f32.mrf.mxu1 }
 0x26f   : > { %v630_v62 = vadd.f32 %v4436_v54, %v629_v61  ;;  %689 = vmax.xlane.f32.xlu0 %v627_v60 }
 0x270   : > { %v3554_v1 = vpop.f32.mrf.mxu1 }
 0x271   : > { %691 = vmax.xlane.f32.xlu1 %v630_v62  ;;  %v651_v11 = vadd.f32 %v3554_v1, %v4436_v54 }
 0x272   : > { %v642_v2 = vpop.f32.mrf.mxu1 }
 0x273   : > { %695 = vmax.xlane.f32.xlu0 %v638_v63  ;;  %v643_v15 = vadd.f32 %v4436_v54, %v642_v2 }
 0x274   : > { %v3555_v3 = vpop.f32.mrf.mxu1 }
 0x275   : > { %v4448_v12 = vadd.f32 %v3555_v3, %v4436_v54 }
 0x276   : > { %v645_v5 = vpop.f32.mrf.mxu1 }
 0x277   : > { %v4453_v16 = vadd.f32 %v4436_v54, %v645_v5 }
 0x278   : > { %v3558_v6 = vpop.f32.mrf.mxu1 }
 0x279   : > { %v4456_v19 = vadd.f32 %v3558_v6, %v4436_v54 }
 0x27a   : > { %v658_v9 = vpop.f32.mrf.mxu1 }
 0x27b   : > { %v4464_v28 = vadd.f32 %v4436_v54, %v658_v9 }
 0x27c   : > { %v3559_v10 = vpop.f32.mrf.mxu1 }
 0x27d   : > { %v4460_v21 = vadd.f32 %v3559_v10, %v4436_v54 }
 0x27e   : > { %v661_v14 = vpop.f32.mrf.mxu1 }
 0x27f   : > { %v4468_v29 = vadd.f32 %v4436_v54, %v661_v14 }
 0x280   : > { %v3562_v18 = vpop.f32.mrf.mxu1 }
 0x281   : > { %v4472_v31 = vadd.f32 %v3562_v18, %v4436_v54 }
 0x282   : > { %1006 = vrot.lane.b32.xlu1 %v4379_v24, %s4232_s21  ;;  %v674_v27 = vpop.f32.mrf.mxu1 }
 0x283   : > { %v4480_v34 = vadd.f32 %v4436_v54, %v674_v27 }
 0x284   : > { %v3563_v30 = vpop.f32.mrf.mxu1 }
 0x285   : > { %v4476_v32 = vadd.f32 %v3563_v30, %v4436_v54 }
 0x286   : > { %v677_v33 = vpop.f32.mrf.mxu1 }
 0x287   : > { %v4484_v35 = vadd.f32 %v4436_v54, %v677_v33 }
 0x289   : > { %1008 = vrot.lane.b32.xlu0 %v4367_v17, %s4232_s21 }
 0x2a6   : > { %701 = vmax.xlane.f32.xlu1 %v651_v11 }
 0x2a8   : > { %703 = vmax.xlane.f32.xlu0 %v4448_v12 }
 0x2aa   : > { %697 = vmax.xlane.f32.xlu1 %v643_v15 }
 0x2ac   : > { %699 = vmax.xlane.f32.xlu0 %v4453_v16 }
 0x2ae   : > { %709 = vmax.xlane.f32.xlu1 %v4456_v19 }
 0x2b0   : > { %711 = vmax.xlane.f32.xlu0 %v4460_v21 }
 0x2b2   : > { %705 = vmax.xlane.f32.xlu1 %v4464_v28 }
 0x2b4   : > { %707 = vmax.xlane.f32.xlu0 %v4468_v29 }
 0x2b6   : > { %717 = vmax.xlane.f32.xlu1 %v4472_v31 }
 0x2b8   : > { %719 = vmax.xlane.f32.xlu0 %v4476_v32 }
 0x2ba   : > { %713 = vmax.xlane.f32.xlu1 %v4480_v34 }
 0x2bc   : > { %715 = vmax.xlane.f32.xlu0 %v4484_v35 }
 0x2cb   : > { %1004 = vrot.lane.b32.xlu1 %v4353_v0, %s4232_s21 }
 0x2f4   : > { %v694_v36 = vpop.xlane.xlu0 %693 }
 0x2f5   : > { %v723_v37 = vsub.f32 %v635_v57, %v694_v36 }
 0x2f7   : > { %v741_v38 = vmul.f32 1.442695, %v723_v37 }
 0x2f8   : > { %v690_v40 = vpop.xlane.xlu0 %689 }
 0x2f9   : > { %3917 = vpow2.f32 %v741_v38  ;;  %v721_v41 = vsub.f32 %v627_v60, %v690_v40 }
 0x2fa   : > { %v692_v43 = vpop.xlane.xlu1 %691 }
 0x2fb   : > { %v737_v44 = vmul.f32 1.442695, %v721_v41  ;;  %v722_v46 = vsub.f32 %v630_v62, %v692_v43 }
 0x2fc   : > { %v696_v45 = vpop.xlane.xlu0 %695 }
 0x2fd   : > { %3919 = vpow2.f32 %v737_v44  ;;  %v724_v47 = vsub.f32 %v638_v63, %v696_v45  ;;  %v739_v50 = vmul.f32 1.442695, %v722_v46 }
 0x2fe   : > { %v4506_v58 = vpop.permute.xlu1 %1006 }
 0x2ff   : > { %v743_v48 = vmul.f32 1.442695, %v724_v47 }
 0x300   : > { %v4490_v49 = vpop.permute.xlu0 %1008 }
 0x301   : > { %3921 = vpow2.f32 %v743_v48  ;;  %3868 = vmatprep.subr.msk.bf16.mxu0 %vm543_vm1, %v4490_v49 }
 0x302   : > { %3923 = vpow2.f32 %v739_v50 }
 0x306   : > { %v4494_v51 = vpop.eup %3917 }
 0x307   : > { %773 = vadd.xlane.f32.xlu0 %v4494_v51 }
 0x30a   : > { %v4497_v52 = vpop.eup %3919 }
 0x30b   : > { %769 = vadd.xlane.f32.xlu0 %v4497_v52 }
 0x30e   : > { %v4500_v55 = vpop.eup %3921 }
 0x30f   : > { %775 = vadd.xlane.f32.xlu0 %v4500_v55  ;;  %v4503_v57 = vpop.eup %3923 }
 0x313   : > { %771 = vadd.xlane.f32.xlu0 %v4503_v57 }
 0x32f   : > { %v702_v59 = vpop.xlane.xlu1 %701 }
 0x330   : > { %v727_v60 = vsub.f32 %v651_v11, %v702_v59 }
 0x331   : > { %v704_v61 = vpop.xlane.xlu0 %703 }
 0x332   : > { %v749_v62 = vmul.f32 1.442695, %v727_v60  ;;  %v728_v1 = vsub.f32 %v4448_v12, %v704_v61 }
 0x333   : > { %v698_v63 = vpop.xlane.xlu1 %697 }
 0x334   : > { %3925 = vpow2.f32 %v749_v62  ;;  %v725_v2 = vsub.f32 %v643_v15, %v698_v63  ;;  %v751_v9 = vmul.f32 1.442695, %v728_v1 }
 0x335   : > { %v700_v3 = vpop.xlane.xlu0 %699 }
 0x336   : > { %v745_v5 = vmul.f32 1.442695, %v725_v2  ;;  %v726_v6 = vsub.f32 %v4453_v16, %v700_v3 }
 0x337   : > { %v710_v36 = vpop.xlane.xlu1 %709 }
 0x338   : > { %3927 = vpow2.f32 %v745_v5  ;;  %v747_v10 = vmul.f32 1.442695, %v726_v6  ;;  %v731_v38 = vsub.f32 %v4456_v19, %v710_v36 }
 0x339   : > { %v712_v15 = vpop.xlane.xlu0 %711 }
 0x33a   : > { %3929 = vpow2.f32 %v747_v10  ;;  %v757_v41 = vmul.f32 1.442695, %v731_v38  ;;  %v732_v44 = vsub.f32 %v4460_v21, %v712_v15 }
 0x33b   : > { %3931 = vpow2.f32 %v751_v9  ;;  %v706_v40 = vpop.xlane.xlu1 %705 }
 0x33c   : > { %v729_v43 = vsub.f32 %v4464_v28, %v706_v40  ;;  %v759_v47 = vmul.f32 1.442695, %v732_v44 }
 0x33d   : > { %v708_v16 = vpop.xlane.xlu0 %707 }
 0x33e   : > { %v753_v45 = vmul.f32 1.442695, %v729_v43  ;;  %v730_v48 = vsub.f32 %v4468_v29, %v708_v16 }
 0x33f   : > { %v718_v46 = vpop.xlane.xlu1 %717 }
 0x340   : > { %v735_v19 = vsub.f32 %v4472_v31, %v718_v46 }
 0x341   : > { %v4510_v14 = vpop.eup %3925  ;;  %v720_v27 = vpop.xlane.xlu0 %719 }
 0x342   : > { %781 = vadd.xlane.f32.xlu0 %v4510_v14  ;;  %v765_v28 = vmul.f32 1.442695, %v735_v19  ;;  %v736_v29 = vsub.f32 %v4476_v32, %v720_v27 }
 0x343   : > { %v714_v59 = vpop.xlane.xlu1 %713 }
 0x344   : > { %v733_v60 = vsub.f32 %v4480_v34, %v714_v59  ;;  %v767_v31 = vmul.f32 1.442695, %v736_v29 }
 0x345   : > { %v4513_v11 = vpop.eup %3927  ;;  %v716_v30 = vpop.xlane.xlu0 %715 }
 0x346   : > { %777 = vadd.xlane.f32.xlu0 %v4513_v11  ;;  %v734_v33 = vsub.f32 %v4484_v35, %v716_v30  ;;  %v755_v35 = vmul.f32 1.442695, %v730_v48  ;;  %v761_v61 = vmul.f32 1.442695, %v733_v60 }
 0x347   : > { %v4516_v18 = vpop.eup %3929 }
 0x348   : > { %779 = vadd.xlane.f32.xlu1 %v4516_v18  ;;  %v4519_v12 = vpop.eup %3931  ;;  %v763_v37 = vmul.f32 1.442695, %v734_v33 }
 0x34a   : > { %783 = vadd.xlane.f32.xlu0 %v4519_v12  ;;  %3933 = vpow2.f32 %v763_v37 }
 0x34b   : > { %3935 = vpow2.f32 %v757_v41  ;;  %v1056_v41 = vsel %vm543_vm1, %v4490_v49, 0 }
 0x34c   : > { %3937 = vpow2.f32 %v753_v45 }
 0x34d   : > { %3939 = vpow2.f32 %v759_v47 }
 0x34e   : > { %3941 = vpow2.f32 %v755_v35 }
 0x34f   : > { %3943 = vpow2.f32 %v765_v28 }
 0x350   : > { %3945 = vpow2.f32 %v761_v61 }
 0x351   : > { %3947 = vpow2.f32 %v767_v31 }
 0x357   : > { %v4533_v50 = vpop.eup %3933 }
 0x358   : > { %v4538_v21 = vpop.eup %3935 }
 0x359   : > { %1002 = vrot.lane.b32.xlu1 %v4361_v8, %s4232_s21  ;;  %v4542_v62 = vpop.eup %3937 }
 0x35a   : > { %v4545_v63 = vpop.eup %3939 }
 0x35b   : > { %v4548_v34 = vpop.eup %3941 }
 0x35c   : > { %v4553_v1 = vpop.eup %3943 }
 0x35d   : > { %v4558_v3 = vpop.eup %3945 }
 0x35e   : > { %v4563_v6 = vpop.eup %3947 }
 0x360   : > { %1000 = vrot.lane.b32.xlu0 %v4385_v25, %s4232_s21 }
 0x364   : > { %998 = vrot.lane.b32.xlu0 %v4365_v13, %s4232_s21 }
 0x37d   : > { %795 = vadd.xlane.f32.xlu1 %v4533_v50 }
 0x383   : > { %789 = vadd.xlane.f32.xlu0 %v4538_v21 }
 0x387   : > { %785 = vadd.xlane.f32.xlu0 %v4542_v62 }
 0x38b   : > { %791 = vadd.xlane.f32.xlu0 %v4545_v63 }
 0x38e   : > { %994 = vrot.lane.b32.xlu1 %v4375_v22, %s4232_s21 }
 0x38f   : > { %787 = vadd.xlane.f32.xlu0 %v4548_v34 }
 0x390   : > { %v774_v32 = vpop.xlane.xlu0 %773 }
 0x392   : > { %986 = vrot.lane.b32.xlu1 %v4359_v7, %s4233_s22 }
 0x393   : > { %797 = vadd.xlane.f32.xlu0 %v4553_v1 }
 0x394   : > { %v770_v2 = vpop.xlane.xlu0 %769 }
 0x396   : > { %990 = vrot.lane.b32.xlu1 %v4377_v23, %s4233_s22 }
 0x397   : > { %793 = vadd.xlane.f32.xlu0 %v4558_v3 }
 0x398   : > { %v776_v5 = vpop.xlane.xlu0 %775 }
 0x399   : > { %3949 = vrcp.f32 %v776_v5 }
 0x39a   : > { %3951 = vrcp.f32 %v770_v2 }
 0x39b   : > { %799 = vadd.xlane.f32.xlu0 %v4563_v6  ;;  %3953 = vrcp.f32 %v774_v32 }
 0x39c   : > { %v772_v9 = vpop.xlane.xlu0 %771 }
 0x39d   : > { %3955 = vrcp.f32 %v772_v9 }
 0x3a6   : > { %v3950_v10 = vpop.eup %3949 }
 0x3a7   : > { %v3952_v15 = vpop.eup %3951  ;;  %v820_v30 = vmul.f32 %v3950_v10, %v4500_v55 }
 0x3a8   : > { %v3954_v16 = vpop.eup %3953  ;;  %v817_v33 = vmul.f32 %v3952_v15, %v4497_v52  ;;  %v1005_v52 = vpop.permute.xlu1 %1004 }
 0x3a9   : > { %v819_v37 = vmul.f32 %v3954_v16, %v4494_v51  ;;  %v1053_v51 = vsel %vm543_vm1, %v4506_v58, 0  ;;  %v1050_v49 = vsel %vm543_vm1, %v1005_v52, 0 }
 0x3aa   : > { %v3956_v27 = vpop.eup %3955 }
 0x3ab   : > { %v818_v36 = vmul.f32 %v3956_v27, %v4503_v57  ;;  %v834_v40 = vpack.c.bf16 %v820_v30, %v819_v37 }
 0x3ad   : > { %v833_v38 = vpack.c.bf16 %v818_v36, %v817_v33 }
 0x3af   : > { %3580 = vmatprep.mubr.bf16.mxu0 %v833_v38 }
 0x3b0   : > { %3581 = vmatmul.mubr.bf16.vlgmr.msra.gmra.mxu0 %v834_v40 }
 0x3b1   : > { %3597 = vmatpush3.bf16.xpose.msra.mxu0 %v1056_v41  ;;  %996 = vrot.lane.b32.xlu0 %v4392_v26, %s4232_s21 }
 0x3b2   : > { %3869 = vmatprep.subr.msk.bf16.mxu0 %vm543_vm1, %v4506_v58 }
 0x3b5   : > { %978 = vrot.lane.b32.xlu0 %v4345_v42, %s4233_s22 }
 0x3b9   : > { %3599 = vmatpush3.bf16.xpose.msra.mxu0 %v1053_v51  ;;  %980 = vrot.lane.b32.xlu0 %v4343_v39, %s4233_s22 }
 0x3ba   : > { %3870 = vmatprep.subr.msk.bf16.mxu0 %vm543_vm1, %v1005_v52 }
 0x3bd   : > { %982 = vrot.lane.b32.xlu0 %v4351_v56, %s4233_s22 }
 0x3c1   : > { %3601 = vmatpush3.bf16.xpose.msra.mxu0 %v1050_v49  ;;  %984 = vrot.lane.b32.xlu0 %v4349_v53, %s4233_s22 }
 0x3c5   : > { %988 = vrot.lane.b32.xlu0 %v4355_v4, %s4233_s22 }
 0x3c9   : > { %992 = vrot.lane.b32.xlu0 %v4369_v20, %s4233_s22 }
 0x3cb   : > { %v782_v55 = vpop.xlane.xlu0 %781 }
 0x3cf   : > { %v778_v57 = vpop.xlane.xlu0 %777 }
 0x3d0   : > { %3957 = vrcp.f32 %v778_v57 }
 0x3d1   : > { %3959 = vrcp.f32 %v782_v55  ;;  %v780_v58 = vpop.xlane.xlu1 %779 }
 0x3d2   : > { %3961 = vrcp.f32 %v780_v58 }
 0x3d3   : > { %v784_v43 = vpop.xlane.xlu0 %783 }
 0x3d4   : > { %3963 = vrcp.f32 %v784_v43 }
 0x3d5   : > { %v1003_v44 = vpop.permute.xlu1 %1002 }
 0x3d6   : > { %3871 = vmatprep.subr.msk.bf16.mxu0 %vm543_vm1, %v1003_v44  ;;  %v1047_v45 = vsel %vm543_vm1, %v1003_v44, 0 }
 0x3d7   : > { %3603 = vmatpush3.bf16.xpose.msra.mxu0 %v1047_v45  ;;  %v1001_v46 = vpop.permute.xlu0 %1000 }
 0x3d8   : > { %3872 = vmatprep.subr.msk.bf16.mxu0 %vm543_vm1, %v1001_v46  ;;  %v1044_v35 = vsel %vm543_vm1, %v1001_v46, 0 }
 0x3db   : > { %v999_v59 = vpop.permute.xlu0 %998 }
 0x3dc   : > { %v1041_v5 = vsel %vm543_vm1, %v999_v59, 0 }
 0x3dd   : > { %v3958_v47 = vpop.eup %3957 }
 0x3de   : > { %v3960_v48 = vpop.eup %3959  ;;  %v821_v28 = vmul.f32 %v3958_v47, %v4513_v11 }
 0x3df   : > { %v3962_v19 = vpop.eup %3961  ;;  %3605 = vmatpush3.bf16.xpose.msra.mxu0 %v1044_v35  ;;  %v823_v31 = vmul.f32 %v3960_v48, %v4510_v14 }
 0x3e0   : > { %3873 = vmatprep.subr.msk.bf16.mxu0 %vm543_vm1, %v999_v59  ;;  %v822_v60 = vmul.f32 %v3962_v19, %v4516_v18 }
 0x3e1   : > { %v3964_v29 = vpop.eup %3963 }
 0x3e2   : > { %v835_v61 = vpack.c.bf16 %v822_v60, %v821_v28  ;;  %v824_v32 = vmul.f32 %v3964_v29, %v4519_v12 }
 0x3e4   : > { %3584 = vmatprep.mubr.bf16.mxu0 %v835_v61  ;;  %v836_v2 = vpack.c.bf16 %v824_v32, %v823_v31 }
 0x3e6   : > { %3585 = vmatmul.mubr.bf16.gmra.mxu0 %v836_v2 }
 0x3e7   : > { %3607 = vmatpush3.bf16.xpose.msra.mxu0 %v1041_v5 }
 0x406   : > { %v796_v18 = vpop.xlane.xlu1 %795 }
 0x40a   : > { %v995_v55 = vpop.permute.xlu1 %994 }
 0x40b   : > { %v1035_v44 = vsel %vm543_vm1, %v995_v55, 0 }
 0x40c   : > { %v790_v9 = vpop.xlane.xlu0 %789 }
 0x40e   : > { %v987_v60 = vpop.permute.xlu1 %986 }
 0x410   : > { %v786_v10 = vpop.xlane.xlu0 %785 }
 0x414   : > { %v792_v15 = vpop.xlane.xlu0 %791 }
 0x415   : > { %3965 = vrcp.f32 %v792_v15 }
 0x416   : > { %3967 = vrcp.f32 %v786_v10 }
 0x417   : > { %3969 = vrcp.f32 %v790_v9 }
 0x418   : > { %v788_v11 = vpop.xlane.xlu0 %787 }
 0x419   : > { %3971 = vrcp.f32 %v788_v11 }
 0x41a   : > { %3973 = vrcp.f32 %v796_v18 }
 0x41c   : > { %v798_v16 = vpop.xlane.xlu0 %797 }
 0x420   : > { %v794_v14 = vpop.xlane.xlu0 %793 }
 0x421   : > { %3975 = vrcp.f32 %v794_v14 }
 0x422   : > { %v3966_v12 = vpop.eup %3965  ;;  %3977 = vrcp.f32 %v798_v16 }
 0x423   : > { %v3968_v27 = vpop.eup %3967  ;;  %v828_v37 = vmul.f32 %v3966_v12, %v4545_v63 }
 0x424   : > { %v800_v30 = vpop.xlane.xlu0 %799  ;;  %v3970_v33 = vpop.eup %3969  ;;  %v825_v38 = vmul.f32 %v3968_v27, %v4542_v62 }
 0x425   : > { %3979 = vrcp.f32 %v800_v30  ;;  %v827_v51 = vmul.f32 %v3970_v33, %v4538_v21  ;;  %v477_v21 = vld [vmem:[%s5751_s3] sm:$0xf] }
 0x426   : > { %v3972_v36 = vpop.eup %3971  ;;  %v1586_v19 = vsel %vm1460_vm2, %v477_v21, 0 }
 0x427   : > { %v826_v40 = vmul.f32 %v3972_v36, %v4548_v34  ;;  %v838_v57 = vpack.c.bf16 %v828_v37, %v827_v51  ;;  %v3974_v58 = vpop.eup %3973 }
 0x428   : > { %v997_v41 = vpop.permute.xlu0 %996  ;;  %v830_v34 = vmul.f32 %v3974_v58, %v4533_v50 }
 0x429   : > { %3874 = vmatprep.subr.msk.bf16.mxu0 %vm543_vm1, %v997_v41  ;;  %v1038_v52 = vsel %vm543_vm1, %v997_v41, 0  ;;  %v837_v49 = vpack.c.bf16 %v826_v40, %v825_v38 }
 0x42a   : > { %3609 = vmatpush3.bf16.xpose.msra.mxu0 %v1038_v52 }
 0x42b   : > { %3588 = vmatprep.mubr.bf16.mxu0 %v837_v49  ;;  %3875 = vmatprep.subr.msk.bf16.mxu0 %vm543_vm1, %v995_v55 }
 0x42c   : > { %3589 = vmatmul.mubr.bf16.gmra.mxu0 %v838_v57  ;;  %v979_v47 = vpop.permute.xlu0 %978 }
 0x42e   : > { %v3976_v63 = vpop.eup %3975 }
 0x42f   : > { %v829_v62 = vmul.f32 %v3976_v63, %v4558_v3  ;;  %v3978_v43 = vpop.eup %3977 }
 0x430   : > { %v831_v48 = vmul.f32 %v3978_v43, %v4553_v1  ;;  %v981_v3 = vpop.permute.xlu0 %980 }
 0x431   : > { %v839_v45 = vpack.c.bf16 %v830_v34, %v829_v62 }
 0x432   : > { %v3980_v46 = vpop.eup %3979  ;;  %3611 = vmatpush3.bf16.xpose.msra.mxu0 %v1035_v44 }
 0x433   : > { %3592 = vmatprep.mubr.bf16.mxu0 %v839_v45  ;;  %v832_v35 = vmul.f32 %v3980_v46, %v4563_v6  ;;  %3877 = vmatprep.subr.msk.bf16.mxu0 %vm1460_vm2, %v477_v21  ;;  %v991_v6 = vpop.permute.xlu1 %990 }
 0x434   : > { %v983_v59 = vpop.permute.xlu0 %982 }
 0x435   : > { %v840_v50 = vpack.c.bf16 %v832_v35, %v831_v48 }
 0x437   : > { %3593 = vmatmul.mubr.bf16.gmra.mxu0 %v840_v50 }
 0x438   : > { %3612 = vmatprep.mubr.msk.bf16.mxu0 %vm543_vm1, %v979_v47  ;;  %v985_v28 = vpop.permute.xlu0 %984 }
 0x43c   : > { %v989_v1 = vpop.permute.xlu0 %988 }
 0x43f   : > { %3613 = vmatmul.mubr.msk.bf16.vlgmr.msra.gmra.mxu0 %vm543_vm1, %v981_v3 }
 0x440   : > { %3616 = vmatprep.mubr.msk.bf16.mxu0 %vm543_vm1, %v983_v59  ;;  %3679 = vmatpush3.bf16.msra.mxu0 %v1586_v19  ;;  %v993_v29 = vpop.permute.xlu0 %992 }
 0x447   : > { %3617 = vmatmul.mubr.msk.bf16.gmra.mxu0 %vm543_vm1, %v985_v28 }
 0x448   : > { %3620 = vmatprep.mubr.msk.bf16.mxu0 %vm543_vm1, %v987_v60 }
 0x44f   : > { %3621 = vmatmul.mubr.msk.bf16.gmra.mxu0 %vm543_vm1, %v989_v1 }
 0x450   : > { %3624 = vmatprep.mubr.msk.bf16.mxu0 %vm543_vm1, %v991_v6 }
 0x457   : > { %3625 = vmatmul.mubr.msk.bf16.gmra.mxu0 %vm543_vm1, %v993_v29 }
 0x470   : > { %v3582_v61 = vpop.f32.mrf.mxu0 }
 0x472   : > { %v899_v31 = vpop.f32.mrf.mxu0 }
 0x474   : > { %v3583_v32 = vpop.f32.mrf.mxu0 }
 0x475   : > { %v963_v9 = vpack.c.bf16 %v3583_v32, %v3582_v61 }
 0x476   : > { %v902_v2 = vpop.f32.mrf.mxu0 }
 0x477   : > { %v962_v5 = vpack.c.bf16 %v902_v2, %v899_v31 }
 0x479   : > { %3680 = vmatprep.mubr.msk.bf16.mxu0 %vm543_vm1, %v962_v5 }
 0x47a   : > { %3681 = vmatmul.mubr.msk.bf16.vlgmr.msra.gmra.mxu0 %vm543_vm1, %v963_v9 }
 0x4a6   : > { %v3586_v10 = vpop.f32.mrf.mxu0 }
 0x4a8   : > { %v915_v15 = vpop.f32.mrf.mxu0 }
 0x4aa   : > { %v3587_v11 = vpop.f32.mrf.mxu0 }
 0x4ab   : > { %v965_v14 = vpack.c.bf16 %v3587_v11, %v3586_v10 }
 0x4ac   : > { %v918_v18 = vpop.f32.mrf.mxu0 }
 0x4ad   : > { %v964_v16 = vpack.c.bf16 %v918_v18, %v915_v15 }
 0x4af   : > { %3684 = vmatprep.mubr.msk.bf16.mxu0 %vm543_vm1, %v964_v16 }
 0x4b0   : > { %3685 = vmatmul.mubr.msk.bf16.gmra.mxu0 %vm543_vm1, %v965_v14 }
 0x4ec   : > { %v3590_v12 = vpop.f32.mrf.mxu0 }
 0x4ee   : > { %v931_v27 = vpop.f32.mrf.mxu0 }
 0x4f0   : > { %v3591_v30 = vpop.f32.mrf.mxu0 }
 0x4f1   : > { %v967_v37 = vpack.c.bf16 %v3591_v30, %v3590_v12 }
 0x4f2   : > { %v934_v33 = vpop.f32.mrf.mxu0 }
 0x4f3   : > { %v966_v36 = vpack.c.bf16 %v934_v33, %v931_v27 }
 0x4f5   : > { %3688 = vmatprep.mubr.msk.bf16.mxu0 %vm543_vm1, %v966_v36 }
 0x4f6   : > { %3689 = vmatmul.mubr.msk.bf16.gmra.mxu0 %vm543_vm1, %v967_v37 }
 0x4f7   : > { %v3594_v38 = vpop.f32.mrf.mxu0 }
 0x4f9   : > { %v947_v40 = vpop.f32.mrf.mxu0 }
 0x4fb   : > { %v3595_v41 = vpop.f32.mrf.mxu0 }
 0x4fc   : > { %v969_v49 = vpack.c.bf16 %v3595_v41, %v3594_v38 }
 0x4fd   : > { %v950_v51 = vpop.f32.mrf.mxu0 }
 0x4fe   : > { %v968_v52 = vpack.c.bf16 %v950_v51, %v947_v40 }
 0x4ff   : > { %v3614_v55 = vpop.f32.mrf.mxu0 }
 0x500   : > { %v1101_v57 = vadd.f32 %v3614_v55, %v4436_v54  ;;  %3692 = vmatprep.mubr.msk.bf16.mxu0 %vm543_vm1, %v968_v52 }
 0x501   : > { %v1092_v58 = vpop.f32.mrf.mxu0  ;;  %3693 = vmatmul.mubr.msk.bf16.gmra.mxu0 %vm543_vm1, %v969_v49 }
 0x502   : > { %v1093_v63 = vadd.f32 %v4436_v54, %v1092_v58  ;;  %1159 = vmax.xlane.f32.xlu0 %v1101_v57 }
 0x503   : > { %v3615_v62 = vpop.f32.mrf.mxu0 }
 0x504   : > { %1155 = vmax.xlane.f32.xlu1 %v1093_v63  ;;  %v1104_v43 = vadd.f32 %v3615_v62, %v4436_v54 }
 0x505   : > { %v1095_v34 = vpop.f32.mrf.mxu0 }
 0x506   : > { %v4639_v21 = vadd.f32 %v4436_v54, %v1095_v34 }
 0x507   : > { %v3618_v44 = vpop.f32.mrf.mxu0 }
 0x508   : > { %1157 = vmax.xlane.f32.xlu0 %v4639_v21  ;;  %1161 = vmax.xlane.f32.xlu1 %v1104_v43  ;;  %v4647_v3 = vadd.f32 %v3618_v44, %v4436_v54 }
 0x509   : > { %v1108_v45 = vpop.f32.mrf.mxu0 }
 0x50a   : > { %v4655_v28 = vadd.f32 %v4436_v54, %v1108_v45 }
 0x50b   : > { %v3619_v46 = vpop.f32.mrf.mxu0 }
 0x50c   : > { %v4650_v19 = vadd.f32 %v3619_v46, %v4436_v54 }
 0x50d   : > { %v1111_v47 = vpop.f32.mrf.mxu0 }
 0x50e   : > { %v4658_v60 = vadd.f32 %v4436_v54, %v1111_v47 }
 0x50f   : > { %v3622_v48 = vpop.f32.mrf.mxu0 }
 0x510   : > { %v4663_v6 = vadd.f32 %v3622_v48, %v4436_v54 }
 0x511   : > { %v1124_v35 = vpop.f32.mrf.mxu0 }
 0x512   : > { %v4671_v31 = vadd.f32 %v4436_v54, %v1124_v35 }
 0x513   : > { %v3623_v50 = vpop.f32.mrf.mxu0 }
 0x514   : > { %v4666_v29 = vadd.f32 %v3623_v50, %v4436_v54 }
 0x515   : > { %v1127_v59 = vpop.f32.mrf.mxu0 }
 0x516   : > { %v4674_v32 = vadd.f32 %v4436_v54, %v1127_v59 }
 0x517   : > { %v3626_v1 = vpop.f32.mrf.mxu0 }
 0x518   : > { %v4679_v5 = vadd.f32 %v3626_v1, %v4436_v54 }
 0x519   : > { %1319 = vrot.lane.b32.xlu1 %v4379_v24, %s4234_s25  ;;  %v1140_v61 = vpop.f32.mrf.mxu0 }
 0x51a   : > { %v4687_v15 = vadd.f32 %v4436_v54, %v1140_v61 }
 0x51b   : > { %v3627_v2 = vpop.f32.mrf.mxu0 }
 0x51c   : > { %v4682_v9 = vadd.f32 %v3627_v2, %v4436_v54 }
 0x51d   : > { %v1143_v10 = vpop.f32.mrf.mxu0 }
 0x51e   : > { %1321 = vrot.lane.b32.xlu0 %v4367_v17, %s4234_s25  ;;  %v4690_v11 = vadd.f32 %v4436_v54, %v1143_v10 }
 0x53d   : > { %1167 = vmax.xlane.f32.xlu0 %v4647_v3  ;;  %1169 = vmax.xlane.f32.xlu1 %v4650_v19 }
 0x541   : > { %1165 = vmax.xlane.f32.xlu1 %v4658_v60  ;;  %1163 = vmax.xlane.f32.xlu0 %v4655_v28 }
 0x545   : > { %1175 = vmax.xlane.f32.xlu0 %v4663_v6  ;;  %1177 = vmax.xlane.f32.xlu1 %v4666_v29 }
 0x549   : > { %1173 = vmax.xlane.f32.xlu1 %v4674_v32  ;;  %1171 = vmax.xlane.f32.xlu0 %v4671_v31 }
 0x54d   : > { %1183 = vmax.xlane.f32.xlu0 %v4679_v5  ;;  %1185 = vmax.xlane.f32.xlu1 %v4682_v9 }
 0x551   : > { %1181 = vmax.xlane.f32.xlu1 %v4690_v11  ;;  %1179 = vmax.xlane.f32.xlu0 %v4687_v15 }
 0x567   : > { %1317 = vrot.lane.b32.xlu0 %v4353_v0, %s4234_s25 }
 0x56b   : > { %1315 = vrot.lane.b32.xlu0 %v4361_v8, %s4234_s25 }
 0x56f   : > { %1313 = vrot.lane.b32.xlu0 %v4385_v25, %s4234_s25 }
 0x573   : > { %1311 = vrot.lane.b32.xlu0 %v4365_v13, %s4234_s25 }
 0x577   : > { %1307 = vrot.lane.b32.xlu0 %v4375_v22, %s4234_s25 }
 0x58b   : > { %v1160_v54 = vpop.xlane.xlu0 %1159 }
 0x58c   : > { %v1189_v18 = vsub.f32 %v1101_v57, %v1160_v54 }
 0x58d   : > { %v1156_v16 = vpop.xlane.xlu1 %1155 }
 0x58e   : > { %v1207_v14 = vmul.f32 1.442695, %v1189_v18  ;;  %v1187_v12 = vsub.f32 %v1093_v63, %v1156_v16 }
 0x590   : > { %3981 = vpow2.f32 %v1207_v14  ;;  %v1203_v27 = vmul.f32 1.442695, %v1187_v12 }
 0x591   : > { %v1162_v30 = vpop.xlane.xlu1 %1161  ;;  %v1158_v33 = vpop.xlane.xlu0 %1157 }
 0x592   : > { %v1190_v36 = vsub.f32 %v1104_v43, %v1162_v30  ;;  %3983 = vpow2.f32 %v1203_v27  ;;  %v1188_v38 = vsub.f32 %v4639_v21, %v1158_v33 }
 0x594   : > { %v1209_v37 = vmul.f32 1.442695, %v1190_v36  ;;  %v1205_v51 = vmul.f32 1.442695, %v1188_v38 }
 0x595   : > { %v1322_v40 = vpop.permute.xlu0 %1321  ;;  %v1320_v41 = vpop.permute.xlu1 %1319 }
 0x596   : > { %3628 = vmatprep.subr.bf16.mxu1 %v1322_v40  ;;  %3985 = vpow2.f32 %v1209_v37 }
 0x597   : > { %3629 = vmatpush3.bf16.msra.mxu1 %v1322_v40  ;;  %3987 = vpow2.f32 %v1205_v51 }
 0x598   : > { %3630 = vmatprep.subr.bf16.mxu1 %v1320_v41 }
 0x59b   : > { %3631 = vmatpush3.bf16.msra.mxu1 %v1320_v41 }
 0x59d   : > { %v4705_v52 = vpop.eup %3981 }
 0x59e   : > { %1239 = vadd.xlane.f32.xlu1 %v4705_v52 }
 0x59f   : > { %v4708_v49 = vpop.eup %3983 }
 0x5a2   : > { %1235 = vadd.xlane.f32.xlu1 %v4708_v49 }
 0x5a3   : > { %v4711_v55 = vpop.eup %3985 }
 0x5a4   : > { %v4714_v57 = vpop.eup %3987 }
 0x5a6   : > { %1241 = vadd.xlane.f32.xlu1 %v4711_v55 }
 0x5aa   : > { %1237 = vadd.xlane.f32.xlu1 %v4714_v57 }
 0x5bb   : > { %1309 = vrot.lane.b32.xlu1 %v4392_v26, %s4234_s25 }
 0x5c6   : > { %v1170_v58 = vpop.xlane.xlu1 %1169  ;;  %v1168_v63 = vpop.xlane.xlu0 %1167 }
 0x5c7   : > { %v1193_v43 = vsub.f32 %v4647_v3, %v1168_v63  ;;  %v1194_v45 = vsub.f32 %v4650_v19, %v1170_v58 }
 0x5c9   : > { %v1215_v50 = vmul.f32 1.442695, %v1193_v43  ;;  %v1217_v59 = vmul.f32 1.442695, %v1194_v45 }
 0x5ca   : > { %v1166_v62 = vpop.xlane.xlu1 %1165  ;;  %v1164_v34 = vpop.xlane.xlu0 %1163 }
 0x5cb   : > { %v1192_v21 = vsub.f32 %v4658_v60, %v1166_v62  ;;  %v1191_v44 = vsub.f32 %v4655_v28, %v1164_v34 }
 0x5cd   : > { %v1213_v46 = vmul.f32 1.442695, %v1192_v21  ;;  %v1211_v47 = vmul.f32 1.442695, %v1191_v44 }
 0x5ce   : > { %v1178_v48 = vpop.xlane.xlu1 %1177  ;;  %v1176_v35 = vpop.xlane.xlu0 %1175 }
 0x5cf   : > { %3989 = vpow2.f32 %v1213_v46  ;;  %v1197_v60 = vsub.f32 %v4663_v6, %v1176_v35  ;;  %v1198_v19 = vsub.f32 %v4666_v29, %v1178_v48 }
 0x5d0   : > { %3991 = vpow2.f32 %v1211_v47 }
 0x5d1   : > { %3993 = vpow2.f32 %v1215_v50  ;;  %v1223_v16 = vmul.f32 1.442695, %v1197_v60  ;;  %v1225_v14 = vmul.f32 1.442695, %v1198_v19 }
 0x5d2   : > { %v1174_v1 = vpop.xlane.xlu1 %1173  ;;  %v1172_v61 = vpop.xlane.xlu0 %1171  ;;  %3995 = vpow2.f32 %v1217_v59 }
 0x5d3   : > { %v1196_v2 = vsub.f32 %v4674_v32, %v1174_v1  ;;  %v1195_v3 = vsub.f32 %v4671_v31, %v1172_v61  ;;  %v478_v1 = vld [vmem:[%s5751_s3 + $0x4] sm:$0xf] }
 0x5d5   : > { %v1221_v28 = vmul.f32 1.442695, %v1196_v2  ;;  %v1219_v10 = vmul.f32 1.442695, %v1195_v3 }
 0x5d6   : > { %v1186_v54 = vpop.xlane.xlu1 %1185  ;;  %v1184_v18 = vpop.xlane.xlu0 %1183 }
 0x5d7   : > { %3997 = vpow2.f32 %v1219_v10  ;;  %v1201_v6 = vsub.f32 %v4679_v5, %v1184_v18  ;;  %v1202_v29 = vsub.f32 %v4682_v9, %v1186_v54 }
 0x5d8   : > { %3999 = vpow2.f32 %v1221_v28 }
 0x5d9   : > { %4001 = vpow2.f32 %v1223_v16  ;;  %v1233_v40 = vmul.f32 1.442695, %v1202_v29 }
 0x5da   : > { %v1182_v12 = vpop.xlane.xlu1 %1181  ;;  %v1180_v27 = vpop.xlane.xlu0 %1179  ;;  %4003 = vpow2.f32 %v1225_v14 }
 0x5db   : > { %v1200_v30 = vsub.f32 %v4690_v11, %v1182_v12  ;;  %v1199_v32 = vsub.f32 %v4687_v15, %v1180_v27  ;;  %v1231_v15 = vmul.f32 1.442695, %v1201_v6 }
 0x5dc   : > { %v4729_v31 = vpop.eup %3989 }
 0x5dd   : > { %v1229_v33 = vmul.f32 1.442695, %v1200_v30  ;;  %v1227_v36 = vmul.f32 1.442695, %v1199_v32  ;;  %1245 = vadd.xlane.f32.xlu0 %v4729_v31  ;;  %v4734_v37 = vpop.eup %3991 }
 0x5de   : > { %v1318_v38 = vpop.permute.xlu0 %1317  ;;  %v4737_v11 = vpop.eup %3993 }
 0x5df   : > { %1243 = vadd.xlane.f32.xlu1 %v4734_v37  ;;  %3632 = vmatprep.subr.bf16.mxu1 %v1318_v38  ;;  %4005 = vpow2.f32 %v1227_v36  ;;  %v4740_v5 = vpop.eup %3995 }
 0x5e0   : > { %3633 = vmatpush3.bf16.msra.mxu1 %v1318_v38  ;;  %4007 = vpow2.f32 %v1229_v33 }
 0x5e1   : > { %1247 = vadd.xlane.f32.xlu0 %v4737_v11  ;;  %4009 = vpow2.f32 %v1231_v15 }
 0x5e2   : > { %v1316_v9 = vpop.permute.xlu0 %1315  ;;  %4011 = vpow2.f32 %v1233_v40 }
 0x5e3   : > { %1249 = vadd.xlane.f32.xlu1 %v4740_v5  ;;  %3634 = vmatprep.subr.bf16.mxu1 %v1316_v9 }
 0x5e4   : > { %3635 = vmatpush3.bf16.msra.mxu1 %v1316_v9  ;;  %v4743_v41 = vpop.eup %3997 }
 0x5e5   : > { %v4745_v51 = vpop.eup %3999  ;;  %1251 = vadd.xlane.f32.xlu0 %v4743_v41 }
 0x5e6   : > { %v1314_v58 = vpop.permute.xlu0 %1313  ;;  %v4749_v63 = vpop.eup %4001 }
 0x5e7   : > { %1253 = vadd.xlane.f32.xlu1 %v4745_v51  ;;  %3636 = vmatprep.subr.bf16.mxu1 %v1314_v58  ;;  %v4751_v62 = vpop.eup %4003 }
 0x5e8   : > { %3637 = vmatpush3.bf16.msra.mxu1 %v1314_v58 }
 0x5e9   : > { %1255 = vadd.xlane.f32.xlu0 %v4749_v63 }
 0x5ea   : > { %v1312_v34 = vpop.permute.xlu0 %1311 }
 0x5eb   : > { %1257 = vadd.xlane.f32.xlu1 %v4751_v62  ;;  %3638 = vmatprep.subr.bf16.mxu1 %v1312_v34 }
 0x5ec   : > { %3639 = vmatpush3.bf16.msra.mxu1 %v1312_v34  ;;  %v4755_v43 = vpop.eup %4005 }
 0x5ed   : > { %v4757_v21 = vpop.eup %4007  ;;  %1259 = vadd.xlane.f32.xlu0 %v4755_v43 }
 0x5ee   : > { %v4761_v44 = vpop.eup %4009  ;;  %v1308_v59 = vpop.permute.xlu0 %1307 }
 0x5ef   : > { %1261 = vadd.xlane.f32.xlu1 %v4757_v21  ;;  %v4763_v45 = vpop.eup %4011 }
 0x5f1   : > { %1263 = vadd.xlane.f32.xlu0 %v4761_v44 }
 0x5f3   : > { %1265 = vadd.xlane.f32.xlu1 %v4763_v45 }
 0x604   : > { %1713 = vrot.lane.b32.xlu1 %v4379_v24, %s4235_s26 }
 0x607   : > { %1715 = vrot.lane.b32.xlu0 %v4367_v17, %s4235_s26 }
 0x608   : > { %1711 = vrot.lane.b32.xlu1 %v4353_v0, %s4235_s26 }
 0x60b   : > { %1709 = vrot.lane.b32.xlu0 %v4361_v8, %s4235_s26 }
 0x60c   : > { %1707 = vrot.lane.b32.xlu1 %v4385_v25, %s4235_s26 }
 0x60f   : > { %1705 = vrot.lane.b32.xlu0 %v4365_v13, %s4235_s26 }
 0x610   : > { %1703 = vrot.lane.b32.xlu1 %v4392_v26, %s4235_s26 }
 0x613   : > { %1701 = vrot.lane.b32.xlu0 %v4375_v22, %s4235_s26 }
 0x614   : > { %1685 = vrot.lane.b32.xlu1 %v4345_v42, %s4236_s29 }
 0x617   : > { %1687 = vrot.lane.b32.xlu0 %v4343_v39, %s4236_s29 }
 0x618   : > { %1689 = vrot.lane.b32.xlu1 %v4351_v56, %s4236_s29 }
 0x61b   : > { %1691 = vrot.lane.b32.xlu0 %v4349_v53, %s4236_s29 }
 0x61c   : > { %1693 = vrot.lane.b32.xlu1 %v4359_v7, %s4236_s29 }
 0x61f   : > { %1695 = vrot.lane.b32.xlu0 %v4355_v4, %s4236_s29 }
 0x620   : > { %1697 = vrot.lane.b32.xlu1 %v4377_v23, %s4236_s29 }
 0x623   : > { %1699 = vrot.lane.b32.xlu0 %v4369_v20, %s4236_s29 }
 0x624   : > { %2313 = vrot.lane.b32.xlu1 %v4367_v17, %s4237_s30 }
 0x627   : > { %v1240_v46 = vpop.xlane.xlu1 %1239  ;;  %2311 = vrot.lane.b32.xlu0 %v4379_v24, %s4237_s30 }
 0x628   : > { %2309 = vrot.lane.b32.xlu1 %v4353_v0, %s4237_s30 }
 0x62b   : > { %v1236_v47 = vpop.xlane.xlu1 %1235  ;;  %2307 = vrot.lane.b32.xlu0 %v4361_v8, %s4237_s30 }
 0x62c   : > { %2305 = vrot.lane.b32.xlu1 %v4385_v25, %s4237_s30 }
 0x62f   : > { %v1242_v48 = vpop.xlane.xlu1 %1241  ;;  %2303 = vrot.lane.b32.xlu0 %v4365_v13, %s4237_s30 }
 0x630   : > { %2301 = vrot.lane.b32.xlu1 %v4392_v26, %s4237_s30  ;;  %4013 = vrcp.f32 %v1242_v48 }
 0x631   : > { %4015 = vrcp.f32 %v1236_v47 }
 0x632   : > { %4017 = vrcp.f32 %v1240_v46 }
 0x633   : > { %v1238_v35 = vpop.xlane.xlu1 %1237  ;;  %2299 = vrot.lane.b32.xlu0 %v4375_v22, %s4237_s30 }
 0x634   : > { %4019 = vrcp.f32 %v1238_v35  ;;  %2283 = vrot.lane.b32.xlu1 %v4345_v42, %s4238_s9 }
 0x637   : > { %v1310_v50 = vpop.permute.xlu1 %1309  ;;  %2285 = vrot.lane.b32.xlu0 %v4343_v39, %s4238_s9 }
 0x638   : > { %2287 = vrot.lane.b32.xlu1 %v4351_v56, %s4238_s9  ;;  %3640 = vmatprep.subr.bf16.mxu1 %v1310_v50 }
 0x639   : > { %3641 = vmatpush3.bf16.msra.mxu1 %v1310_v50 }
 0x63a   : > { %3642 = vmatprep.subr.bf16.mxu1 %v1308_v59 }
 0x63b   : > { %2289 = vrot.lane.b32.xlu0 %v4349_v53, %s4238_s9 }
 0x63c   : > { %2291 = vrot.lane.b32.xlu1 %v4359_v7, %s4238_s9 }
 0x63d   : > { %v4014_v61 = vpop.eup %4013  ;;  %3643 = vmatpush3.bf16.msra.mxu1 %v1308_v59 }
 0x63e   : > { %v4016_v42 = vpop.eup %4015  ;;  %3876 = vmatprep.subr.msk.bf16.mxu1 %vm1460_vm2, %v478_v1  ;;  %v1286_v2 = vmul.f32 %v4014_v61, %v4711_v55 }
 0x63f   : > { %v4018_v39 = vpop.eup %4017  ;;  %2293 = vrot.lane.b32.xlu0 %v4355_v4, %s4238_s9  ;;  %v1283_v53 = vmul.f32 %v4016_v42, %v4708_v49  ;;  %v1462_v4 = vsel %vm1460_vm2, %v478_v1, 0 }
 0x640   : > { %2295 = vrot.lane.b32.xlu1 %v4377_v23, %s4238_s9  ;;  %v1285_v3 = vmul.f32 %v4018_v39, %v4705_v52 }
 0x641   : > { %v4020_v56 = vpop.eup %4019 }
 0x642   : > { %v1284_v7 = vmul.f32 %v4020_v56, %v4714_v57  ;;  %v1300_v19 = vpack.c.bf16 %v1286_v2, %v1285_v3 }
 0x643   : > { %2297 = vrot.lane.b32.xlu0 %v4369_v20, %s4238_s9  ;;  %s5665_s9 = scalar_lea.vmem %s5756_s8, %s3336_s11 }
 0x644   : > { %2026 = vrot.lane.b32.xlu1 %v4379_v24, %s4239_s13  ;;  %v1299_v60 = vpack.c.bf16 %v1284_v7, %v1283_v53 }
 0x646   : > { %3644 = vmatprep.mubr.bf16.mxu1 %v1299_v60 }
 0x647   : > { %3645 = vmatmul.mubr.bf16.vlgmr.msra.gmra.mxu1 %v1300_v19  ;;  %2028 = vrot.lane.b32.xlu0 %v4367_v17, %s4239_s13 }
 0x648   : > { %3661 = vmatpush3.bf16.msra.mxu1 %v1462_v4 }
 0x666   : > { %v1246_v23 = vpop.xlane.xlu0 %1245 }
 0x667   : > { %4021 = vrcp.f32 %v1246_v23 }
 0x668   : > { %v1244_v49 = vpop.xlane.xlu1 %1243 }
 0x669   : > { %4023 = vrcp.f32 %v1244_v49 }
 0x66a   : > { %v1248_v52 = vpop.xlane.xlu0 %1247 }
 0x66b   : > { %4025 = vrcp.f32 %v1248_v52 }
 0x66c   : > { %v1250_v20 = vpop.xlane.xlu1 %1249 }
 0x66d   : > { %4027 = vrcp.f32 %v1250_v20 }
 0x66e   : > { %v1252_v55 = vpop.xlane.xlu0 %1251 }
 0x66f   : > { %4029 = vrcp.f32 %v1252_v55 }
 0x670   : > { %v1254_v57 = vpop.xlane.xlu1 %1253 }
 0x671   : > { %4031 = vrcp.f32 %v1254_v57 }
 0x672   : > { %v1256_v28 = vpop.xlane.xlu0 %1255 }
 0x673   : > { %4033 = vrcp.f32 %v1256_v28 }
 0x674   : > { %v4022_v10 = vpop.eup %4021  ;;  %v1258_v54 = vpop.xlane.xlu1 %1257 }
 0x675   : > { %4035 = vrcp.f32 %v1258_v54  ;;  %v1288_v12 = vmul.f32 %v4022_v10, %v4729_v31 }
 0x676   : > { %v4024_v18 = vpop.eup %4023  ;;  %v1260_v16 = vpop.xlane.xlu0 %1259 }
 0x677   : > { %v1287_v14 = vmul.f32 %v4024_v18, %v4734_v37  ;;  %4037 = vrcp.f32 %v1260_v16 }
 0x678   : > { %v4026_v27 = vpop.eup %4025  ;;  %v1262_v30 = vpop.xlane.xlu1 %1261 }
 0x679   : > { %4039 = vrcp.f32 %v1262_v30  ;;  %v1301_v32 = vpack.c.bf16 %v1288_v12, %v1287_v14  ;;  %v1289_v33 = vmul.f32 %v4026_v27, %v4737_v11 }
 0x67a   : > { %v4028_v6 = vpop.eup %4027  ;;  %v1264_v29 = vpop.xlane.xlu0 %1263 }
 0x67b   : > { %3648 = vmatprep.mubr.bf16.mxu1 %v1301_v32  ;;  %v1290_v36 = vmul.f32 %v4028_v6, %v4740_v5  ;;  %4041 = vrcp.f32 %v1264_v29 }
 0x67c   : > { %v1266_v38 = vpop.xlane.xlu1 %1265  ;;  %v4030_v15 = vpop.eup %4029 }
 0x67d   : > { %4043 = vrcp.f32 %v1266_v38  ;;  %v1302_v40 = vpack.c.bf16 %v1290_v36, %v1289_v33  ;;  %v1291_v31 = vmul.f32 %v4030_v15, %v4743_v41 }
 0x67e   : > { %v4032_v37 = vpop.eup %4031  ;;  %v4816_v9 = vpop.permute.xlu0 %1715 }
 0x67f   : > { %3649 = vmatmul.mubr.bf16.gmra.mxu1 %v1302_v40  ;;  %v1292_v58 = vmul.f32 %v4032_v37, %v4745_v51  ;;  %3878 = vmatprep.subr.msk.bf16.mxu1 %vm543_vm1, %v4816_v9 }
 0x680   : > { %v4822_v34 = vpop.permute.xlu1 %1713  ;;  %v4034_v11 = vpop.eup %4033 }
 0x681   : > { %v1303_v5 = vpack.c.bf16 %v1292_v58, %v1291_v31  ;;  %v1293_v48 = vmul.f32 %v4034_v11, %v4749_v63  ;;  %v1763_v11 = vsel %vm543_vm1, %v4816_v9, 0 }
 0x682   : > { %v4036_v46 = vpop.eup %4035  ;;  %v4824_v47 = vpop.permute.xlu0 %1709 }
 0x683   : > { %3652 = vmatprep.mubr.bf16.mxu1 %v1303_v5  ;;  %v1294_v35 = vmul.f32 %v4036_v46, %v4751_v62  ;;  %v1760_v5 = vsel %vm543_vm1, %v4822_v34, 0  ;;  %v1754_v9 = vsel %vm543_vm1, %v4824_v47, 0 }
 0x684   : > { %v4828_v50 = vpop.permute.xlu1 %1711  ;;  %v4038_v41 = vpop.eup %4037 }
 0x685   : > { %v1304_v59 = vpack.c.bf16 %v1294_v35, %v1293_v48  ;;  %v1295_v61 = vmul.f32 %v4038_v41, %v4755_v43  ;;  %v1757_v46 = vsel %vm543_vm1, %v4828_v50, 0 }
 0x686   : > { %v4040_v51 = vpop.eup %4039  ;;  %v4830_v1 = vpop.permute.xlu0 %1705 }
 0x687   : > { %3653 = vmatmul.mubr.bf16.gmra.mxu1 %v1304_v59  ;;  %v1296_v42 = vmul.f32 %v4040_v51, %v4757_v21 }
 0x688   : > { %v1708_v39 = vpop.permute.xlu1 %1707  ;;  %v4042_v56 = vpop.eup %4041 }
 0x689   : > { %v1305_v2 = vpack.c.bf16 %v1296_v42, %v1295_v61  ;;  %v1297_v63 = vmul.f32 %v4042_v56, %v4761_v44  ;;  %v1751_v48 = vsel %vm543_vm1, %v1708_v39, 0 }
 0x68a   : > { %v4044_v53 = vpop.eup %4043  ;;  %v4834_v7 = vpop.permute.xlu0 %1701 }
 0x68b   : > { %3656 = vmatprep.mubr.bf16.mxu1 %v1305_v2  ;;  %v1298_v62 = vmul.f32 %v4044_v53, %v4763_v45 }
 0x68c   : > { %v1704_v3 = vpop.permute.xlu1 %1703 }
 0x68d   : > { %v1306_v60 = vpack.c.bf16 %v1298_v62, %v1297_v63  ;;  %v1745_v41 = vsel %vm543_vm1, %v1704_v3, 0 }
 0x68e   : > { %v4838_v19 = vpop.permute.xlu0 %1687 }
 0x68f   : > { %3657 = vmatmul.mubr.bf16.gmra.mxu1 %v1306_v60 }
 0x690   : > { %v4840_v4 = vpop.permute.xlu1 %1685 }
 0x692   : > { %v4842_v43 = vpop.permute.xlu0 %1691 }
 0x694   : > { %v4844_v21 = vpop.permute.xlu1 %1689 }
 0x696   : > { %v4846_v23 = vpop.permute.xlu0 %1695 }
 0x698   : > { %v4848_v49 = vpop.permute.xlu1 %1693 }
 0x69a   : > { %v4850_v52 = vpop.permute.xlu0 %1699 }
 0x69c   : > { %v4852_v44 = vpop.permute.xlu1 %1697 }
 0x69e   : > { %v4854_v45 = vpop.permute.xlu0 %2311 }
 0x6a0   : > { %v4856_v20 = vpop.permute.xlu1 %2313 }
 0x6a2   : > { %v4858_v55 = vpop.permute.xlu0 %2307 }
 0x6a4   : > { %v4860_v57 = vpop.permute.xlu1 %2309 }
 0x6a6   : > { %v4862_v28 = vpop.permute.xlu0 %2303 }
 0x6a8   : > { %v4864_v10 = vpop.permute.xlu1 %2305 }
 0x6aa   : > { %v4866_v54 = vpop.permute.xlu0 %2299 }
 0x6ac   : > { %v4868_v18 = vpop.permute.xlu1 %2301 }
 0x6ae   : > { %v4870_v16 = vpop.permute.xlu0 %2285 }
 0x6b0   : > { %v4872_v14 = vpop.permute.xlu1 %2283 }
 0x6b2   : > { %v4874_v12 = vpop.permute.xlu0 %2289 }
 0x6b4   : > { %v4876_v27 = vpop.permute.xlu1 %2287 }
 0x6b6   : > { %v4878_v30 = vpop.permute.xlu0 %2293 }
 0x6b8   : > { %v4880_v32 = vpop.permute.xlu1 %2291 }
 0x6ba   : > { %v4882_v6 = vpop.permute.xlu0 %2297 }
 0x6bc   : > { %v4884_v29 = vpop.permute.xlu1 %2295 }
 0x6be   : > { %v2029_v33 = vpop.permute.xlu0 %2028 }
 0x6bf   : > { %3728 = vmatprep.subr.bf16.mxu0 %v2029_v33 }
 0x6c0   : > { %v2027_v36 = vpop.permute.xlu1 %2026  ;;  %3729 = vmatpush3.bf16.msra.mxu0 %v2029_v33 }
 0x6c1   : > { %3730 = vmatprep.subr.bf16.mxu0 %v2027_v36 }
 0x6c4   : > { %3731 = vmatpush3.bf16.msra.mxu0 %v2027_v36 }
 0x707   : > { %v3646_v38 = vpop.f32.mrf.mxu1 }
 0x709   : > { %v1365_v15 = vpop.f32.mrf.mxu1 }
 0x70b   : > { %v3647_v40 = vpop.f32.mrf.mxu1 }
 0x70c   : > { %v1429_v58 = vpack.c.bf16 %v3647_v40, %v3646_v38 }
 0x70d   : > { %v1368_v37 = vpop.f32.mrf.mxu1 }
 0x70e   : > { %v1428_v31 = vpack.c.bf16 %v1368_v37, %v1365_v15  ;;  %v2358_v15 = vsel %vm543_vm1, %v4854_v45, 0 }
 0x710   : > { %3662 = vmatprep.mubr.msk.bf16.mxu1 %vm543_vm1, %v1428_v31 }
 0x711   : > { %3663 = vmatmul.mubr.msk.bf16.vlgmr.msra.gmra.mxu1 %vm543_vm1, %v1429_v58 }
 0x712   : > { %3697 = vmatpush3.bf16.xpose.msra.mxu1 %v1763_v11 }
 0x713   : > { %3879 = vmatprep.subr.msk.bf16.mxu1 %vm543_vm1, %v4822_v34  ;;  %v1748_v34 = vsel %vm543_vm1, %v4830_v1, 0 }
 0x71a   : > { %3699 = vmatpush3.bf16.xpose.msra.mxu1 %v1760_v5 }
 0x71b   : > { %3880 = vmatprep.subr.msk.bf16.mxu1 %vm543_vm1, %v4828_v50 }
 0x722   : > { %3701 = vmatpush3.bf16.xpose.msra.mxu1 %v1757_v46 }
 0x723   : > { %3881 = vmatprep.subr.msk.bf16.mxu1 %vm543_vm1, %v4824_v47 }
 0x72a   : > { %3703 = vmatpush3.bf16.xpose.msra.mxu1 %v1754_v9 }
 0x72b   : > { %3882 = vmatprep.subr.msk.bf16.mxu1 %vm543_vm1, %v1708_v39 }
 0x732   : > { %3705 = vmatpush3.bf16.xpose.msra.mxu1 %v1751_v48 }
 0x733   : > { %3883 = vmatprep.subr.msk.bf16.mxu1 %vm543_vm1, %v4830_v1  ;;  %v1742_v1 = vsel %vm543_vm1, %v4834_v7, 0 }
 0x73a   : > { %3707 = vmatpush3.bf16.xpose.msra.mxu1 %v1748_v34 }
 0x73b   : > { %3884 = vmatprep.subr.msk.bf16.mxu1 %vm543_vm1, %v1704_v3 }
 0x73f   : > { %v3650_v35 = vpop.f32.mrf.mxu1 }
 0x741   : > { %v1381_v50 = vpop.f32.mrf.mxu1 }
 0x742   : > { %3709 = vmatpush3.bf16.xpose.msra.mxu1 %v1745_v41 }
 0x743   : > { %3885 = vmatprep.subr.msk.bf16.mxu1 %vm543_vm1, %v4834_v7  ;;  %v3651_v47 = vpop.f32.mrf.mxu1  ;;  %v2361_v7 = vsel %vm543_vm1, %v4856_v20, 0 }
 0x744   : > { %v1431_v61 = vpack.c.bf16 %v3651_v47, %v3650_v35 }
 0x745   : > { %v1384_v59 = vpop.f32.mrf.mxu1 }
 0x746   : > { %v1430_v51 = vpack.c.bf16 %v1384_v59, %v1381_v50 }
 0x747   : > { %v3654_v42 = vpop.f32.mrf.mxu1 }
 0x748   : > { %3666 = vmatprep.mubr.msk.bf16.mxu1 %vm543_vm1, %v1430_v51 }
 0x749   : > { %v1397_v39 = vpop.f32.mrf.mxu1  ;;  %3667 = vmatmul.mubr.msk.bf16.gmra.mxu1 %vm543_vm1, %v1431_v61 }
 0x74a   : > { %3711 = vmatpush3.bf16.xpose.msra.mxu1 %v1742_v1 }
 0x74b   : > { %3887 = vmatprep.subr.msk.bf16.mxu1 %vm543_vm1, %v4856_v20  ;;  %v3655_v56 = vpop.f32.mrf.mxu1 }
 0x74c   : > { %v1433_v63 = vpack.c.bf16 %v3655_v56, %v3654_v42 }
 0x74d   : > { %v1400_v2 = vpop.f32.mrf.mxu1 }
 0x74e   : > { %v1432_v53 = vpack.c.bf16 %v1400_v2, %v1397_v39 }
 0x74f   : > { %v3658_v62 = vpop.f32.mrf.mxu1 }
 0x750   : > { %3670 = vmatprep.mubr.msk.bf16.mxu1 %vm543_vm1, %v1432_v53 }
 0x751   : > { %v1413_v3 = vpop.f32.mrf.mxu1  ;;  %3671 = vmatmul.mubr.msk.bf16.gmra.mxu1 %vm543_vm1, %v1433_v63 }
 0x753   : > { %v3659_v60 = vpop.f32.mrf.mxu1 }
 0x754   : > { %v1435_v38 = vpack.c.bf16 %v3659_v60, %v3658_v62 }
 0x755   : > { %v1416_v33 = vpop.f32.mrf.mxu1 }
 0x756   : > { %v1434_v36 = vpack.c.bf16 %v1416_v33, %v1413_v3 }
 0x758   : > { %3674 = vmatprep.mubr.msk.bf16.mxu1 %vm543_vm1, %v1434_v36 }
 0x759   : > { %3675 = vmatmul.mubr.msk.bf16.gmra.mxu1 %vm543_vm1, %v1435_v38 }
 0x75a   : > { %3712 = vmatprep.mubr.msk.bf16.mxu1 %vm543_vm1, %v4840_v4  ;;  %v2352_v4 = vsel %vm543_vm1, %v4858_v55, 0 }
 0x761   : > { %3713 = vmatmul.mubr.msk.bf16.vlgmr.msra.gmra.mxu1 %vm543_vm1, %v4838_v19  ;;  %v2355_v19 = vsel %vm543_vm1, %v4860_v57, 0 }
 0x762   : > { %3779 = vmatpush3.bf16.xpose.msra.mxu1 %v2361_v7  ;;  %3716 = vmatprep.mubr.msk.bf16.mxu1 %vm543_vm1, %v4844_v21  ;;  %v2346_v21 = vsel %vm543_vm1, %v4862_v28, 0 }
 0x763   : > { %3888 = vmatprep.subr.msk.bf16.mxu1 %vm543_vm1, %v4854_v45 }
 0x769   : > { %3717 = vmatmul.mubr.msk.bf16.gmra.mxu1 %vm543_vm1, %v4842_v43  ;;  %v2349_v43 = vsel %vm543_vm1, %v4864_v10, 0 }
 0x76a   : > { %3781 = vmatpush3.bf16.xpose.msra.mxu1 %v2358_v15  ;;  %3720 = vmatprep.mubr.msk.bf16.mxu1 %vm543_vm1, %v4848_v49  ;;  %v2340_v49 = vsel %vm543_vm1, %v4866_v54, 0 }
 0x76b   : > { %3889 = vmatprep.subr.msk.bf16.mxu1 %vm543_vm1, %v4860_v57 }
 0x771   : > { %3721 = vmatmul.mubr.msk.bf16.gmra.mxu1 %vm543_vm1, %v4846_v23  ;;  %v2343_v23 = vsel %vm543_vm1, %v4868_v18, 0 }
 0x772   : > { %3783 = vmatpush3.bf16.xpose.msra.mxu1 %v2355_v19  ;;  %3724 = vmatprep.mubr.msk.bf16.mxu1 %vm543_vm1, %v4852_v44 }
 0x773   : > { %3890 = vmatprep.subr.msk.bf16.mxu1 %vm543_vm1, %v4858_v55 }
 0x779   : > { %3725 = vmatmul.mubr.msk.bf16.gmra.mxu1 %vm543_vm1, %v4850_v52 }
 0x77a   : > { %3785 = vmatpush3.bf16.xpose.msra.mxu1 %v2352_v4  ;;  %3794 = vmatprep.mubr.msk.bf16.mxu1 %vm543_vm1, %v4872_v14 }
 0x77b   : > { %3891 = vmatprep.subr.msk.bf16.mxu1 %vm543_vm1, %v4864_v10 }
 0x782   : > { %3787 = vmatpush3.bf16.xpose.msra.mxu1 %v2349_v43 }
 0x783   : > { %3892 = vmatprep.subr.msk.bf16.mxu1 %vm543_vm1, %v4862_v28 }
 0x78a   : > { %3789 = vmatpush3.bf16.xpose.msra.mxu1 %v2346_v21 }
 0x78b   : > { %3893 = vmatprep.subr.msk.bf16.mxu1 %vm543_vm1, %v4868_v18 }
 0x792   : > { %3791 = vmatpush3.bf16.xpose.msra.mxu1 %v2343_v23 }
 0x793   : > { %3894 = vmatprep.subr.msk.bf16.mxu1 %vm543_vm1, %v4866_v54 }
 0x79a   : > { %3793 = vmatpush3.bf16.xpose.msra.mxu1 %v2340_v49 }
 0x7a1   : > { %3795 = vmatmul.mubr.msk.bf16.vlgmr.msra.gmra.mxu1 %vm543_vm1, %v4870_v16 }
 0x7a2   : > { %3798 = vmatprep.mubr.msk.bf16.mxu1 %vm543_vm1, %v4876_v27 }
 0x7a9   : > { %3799 = vmatmul.mubr.msk.bf16.gmra.mxu1 %vm543_vm1, %v4874_v12 }
 0x7aa   : > { %3802 = vmatprep.mubr.msk.bf16.mxu1 %vm543_vm1, %v4880_v32 }
 0x7b1   : > { %3803 = vmatmul.mubr.msk.bf16.gmra.mxu1 %vm543_vm1, %v4878_v30 }
 0x7b2   : > { %3806 = vmatprep.mubr.msk.bf16.mxu1 %vm543_vm1, %v4884_v29  ;;  %v5019_v29 = vld [vmem:[%s5753_s5] ss:$0 sm:$0xff] }
 0x7b9   : > { %3807 = vmatmul.mubr.msk.bf16.gmra.mxu1 %vm543_vm1, %v4882_v6 }
 0x7d1   : > { %v4984_v52 = vpop.f32.mrf.mxu1 }
 0x7d3   : > { %v4986_v44 = vpop.f32.mrf.mxu1 }
 0x7d5   : > { %v4988_v45 = vpop.f32.mrf.mxu1 }
 0x7d7   : > { %v4990_v20 = vpop.f32.mrf.mxu1 }
 0x809   : > { %v4992_v55 = vpop.f32.mrf.mxu1 }
 0x80b   : > { %v4994_v57 = vpop.f32.mrf.mxu1 }
 0x80d   : > { %v4996_v28 = vpop.f32.mrf.mxu1 }
 0x80f   : > { %v4998_v10 = vpop.f32.mrf.mxu1 }
 0x811   : > { %v5000_v54 = vpop.f32.mrf.mxu1 }
 0x813   : > { %v5002_v18 = vpop.f32.mrf.mxu1 }
 0x815   : > { %v5004_v16 = vpop.f32.mrf.mxu1 }
 0x817   : > { %v5006_v14 = vpop.f32.mrf.mxu1 }
 0x819   : > { %v5008_v12 = vpop.f32.mrf.mxu1 }
 0x81b   : > { %v5010_v27 = vpop.f32.mrf.mxu1 }
 0x81c   : > { %5757 = vst [vmem:[#allocation2_spill] sm:$0xff] %v5010_v27 }
 0x81d   : > { %v5012_v30 = vpop.f32.mrf.mxu1 }
 0x81e   : > { %5758 = vst [vmem:[#allocation3_spill] sm:$0xff] %v5012_v30 }
 0x81f   : > { %v5014_v32 = vpop.f32.mrf.mxu1 }
 0x820   : > { %5759 = vst [vmem:[#allocation4_spill] sm:$0xff] %v5014_v32 }
 0x821   : > { %v3714_v6 = vpop.f32.mrf.mxu1 }
 0x822   : > { %v1808_v40 = vadd.f32 %v5019_v29, %v3714_v6 }
 0x823   : > { %v1799_v37 = vpop.f32.mrf.mxu1 }
 0x824   : > { %v1800_v31 = vadd.f32 %v5019_v29, %v1799_v37  ;;  %1866 = vmax.xlane.f32.xlu0 %v1808_v40 }
 0x825   : > { %v3715_v58 = vpop.f32.mrf.mxu1 }
 0x826   : > { %1862 = vmax.xlane.f32.xlu1 %v1800_v31  ;;  %v1811_v5 = vadd.f32 %v5019_v29, %v3715_v58 }
 0x827   : > { %v1802_v11 = vpop.f32.mrf.mxu1 }
 0x828   : > { %v1803_v46 = vadd.f32 %v5019_v29, %v1802_v11 }
 0x829   : > { %v3718_v9 = vpop.f32.mrf.mxu1 }
 0x82a   : > { %1864 = vmax.xlane.f32.xlu0 %v1803_v46  ;;  %1868 = vmax.xlane.f32.xlu1 %v1811_v5  ;;  %v1824_v34 = vadd.f32 %v5019_v29, %v3718_v9 }
 0x82b   : > { %v1815_v48 = vpop.f32.mrf.mxu1 }
 0x82c   : > { %v1816_v47 = vadd.f32 %v5019_v29, %v1815_v48 }
 0x82d   : > { %v3719_v35 = vpop.f32.mrf.mxu1 }
 0x82e   : > { %v5027_v50 = vadd.f32 %v5019_v29, %v3719_v35  ;;  %1874 = vmax.xlane.f32.xlu0 %v1824_v34 }
 0x82f   : > { %v1818_v41 = vpop.f32.mrf.mxu1 }
 0x830   : > { %1876 = vmax.xlane.f32.xlu1 %v5027_v50  ;;  %v1819_v51 = vadd.f32 %v5019_v29, %v1818_v41 }
 0x831   : > { %v3722_v59 = vpop.f32.mrf.mxu1 }
 0x832   : > { %1870 = vmax.xlane.f32.xlu0 %v1816_v47  ;;  %v5033_v42 = vadd.f32 %v5019_v29, %v3722_v59 }
 0x833   : > { %v1831_v61 = vpop.f32.mrf.mxu1 }
 0x834   : > { %1872 = vmax.xlane.f32.xlu1 %v1819_v51  ;;  %v5040_v2 = vadd.f32 %v5019_v29, %v1831_v61 }
 0x835   : > { %v3723_v39 = vpop.f32.mrf.mxu1 }
 0x836   : > { %v5036_v1 = vadd.f32 %v5019_v29, %v3723_v39  ;;  %1882 = vmax.xlane.f32.xlu0 %v5033_v42 }
 0x837   : > { %v1834_v56 = vpop.f32.mrf.mxu1 }
 0x838   : > { %1884 = vmax.xlane.f32.xlu1 %v5036_v1  ;;  %v5044_v63 = vadd.f32 %v5019_v29, %v1834_v56 }
 0x839   : > { %v3726_v53 = vpop.f32.mrf.mxu1 }
 0x83a   : > { %1878 = vmax.xlane.f32.xlu0 %v5040_v2  ;;  %v5048_v62 = vadd.f32 %v5019_v29, %v3726_v53 }
 0x83b   : > { %v1847_v3 = vpop.f32.mrf.mxu1 }
 0x83c   : > { %1880 = vmax.xlane.f32.xlu1 %v5044_v63  ;;  %v5053_v60 = vadd.f32 %v5019_v29, %v1847_v3 }
 0x83d   : > { %v3727_v33 = vpop.f32.mrf.mxu1 }
 0x83e   : > { %1890 = vmax.xlane.f32.xlu0 %v5048_v62  ;;  %v5065_v36 = vadd.f32 %v5019_v29, %v3727_v33 }
 0x83f   : > { %v1850_v38 = vpop.f32.mrf.mxu1 }
 0x840   : > { %v5069_v7 = vadd.f32 %v5019_v29, %v1850_v38 }
 0x842   : > { %1886 = vmax.xlane.f32.xlu0 %v5053_v60 }
 0x84d   : > { %2020 = vrot.lane.b32.xlu1 %v4385_v25, %s4239_s13 }
 0x858   : > { %2024 = vrot.lane.b32.xlu0 %v4353_v0, %s4239_s13 }
 0x85c   : > { %2022 = vrot.lane.b32.xlu0 %v4361_v8, %s4239_s13 }
 0x860   : > { %2016 = vrot.lane.b32.xlu0 %v4392_v26, %s4239_s13 }
 0x871   : > { %1892 = vmax.xlane.f32.xlu1 %v5065_v36 }
 0x875   : > { %1888 = vmax.xlane.f32.xlu1 %v5069_v7 }
 0x886   : > { %2018 = vrot.lane.b32.xlu1 %v4365_v13, %s4239_s13 }
 0x8ad   : > { %v1867_v15 = vpop.xlane.xlu0 %1866 }
 0x8ae   : > { %v1896_v19 = vsub.f32 %v1808_v40, %v1867_v15 }
 0x8af   : > { %v1863_v4 = vpop.xlane.xlu1 %1862 }
 0x8b0   : > { %v1914_v43 = vmul.f32 1.442695, %v1896_v19  ;;  %v1894_v21 = vsub.f32 %v1800_v31, %v1863_v4 }
 0x8b2   : > { %4045 = vpow2.f32 %v1914_v43  ;;  %v1910_v23 = vmul.f32 1.442695, %v1894_v21 }
 0x8b3   : > { %v1869_v49 = vpop.xlane.xlu1 %1868  ;;  %v1865_v6 = vpop.xlane.xlu0 %1864 }
 0x8b4   : > { %v1897_v37 = vsub.f32 %v1811_v5, %v1869_v49  ;;  %4047 = vpow2.f32 %v1910_v23  ;;  %v1895_v11 = vsub.f32 %v1803_v46, %v1865_v6 }
 0x8b6   : > { %v1916_v58 = vmul.f32 1.442695, %v1897_v37  ;;  %v1912_v41 = vmul.f32 1.442695, %v1895_v11 }
 0x8b7   : > { %v1875_v9 = vpop.xlane.xlu0 %1874 }
 0x8b8   : > { %v1900_v48 = vsub.f32 %v1824_v34, %v1875_v9  ;;  %4049 = vpow2.f32 %v1916_v58 }
 0x8b9   : > { %v1877_v35 = vpop.xlane.xlu1 %1876 }
 0x8ba   : > { %v1922_v59 = vmul.f32 1.442695, %v1900_v48  ;;  %v1901_v40 = vsub.f32 %v5027_v50, %v1877_v35 }
 0x8bb   : > { %v1871_v61 = vpop.xlane.xlu0 %1870 }
 0x8bc   : > { %4051 = vpow2.f32 %v1922_v59  ;;  %v1898_v39 = vsub.f32 %v1816_v47, %v1871_v61  ;;  %v1924_v33 = vmul.f32 1.442695, %v1901_v40 }
 0x8bd   : > { %v1873_v31 = vpop.xlane.xlu1 %1872  ;;  %4053 = vpow2.f32 %v1912_v41 }
 0x8be   : > { %v1918_v56 = vmul.f32 1.442695, %v1898_v39  ;;  %v1899_v53 = vsub.f32 %v1819_v51, %v1873_v31 }
 0x8bf   : > { %v5075_v3 = vpop.eup %4045  ;;  %v1883_v5 = vpop.xlane.xlu0 %1882 }
 0x8c0   : > { %4055 = vpow2.f32 %v1918_v56  ;;  %v1920_v46 = vmul.f32 1.442695, %v1899_v53  ;;  %v1904_v34 = vsub.f32 %v5033_v42, %v1883_v5  ;;  %1946 = vadd.xlane.f32.xlu1 %v5075_v3  ;;  %v3796_v5 = vpop.f32.mrf.mxu1 }
 0x8c1   : > { %v1885_v38 = vpop.xlane.xlu1 %1884  ;;  %v5079_v15 = vpop.eup %4047 }
 0x8c2   : > { %4057 = vpow2.f32 %v1920_v46  ;;  %v1930_v47 = vmul.f32 1.442695, %v1904_v34  ;;  %v1905_v42 = vsub.f32 %v5036_v1, %v1885_v38 }
 0x8c3   : > { %v1879_v50 = vpop.xlane.xlu0 %1878  ;;  %4059 = vpow2.f32 %v1924_v33  ;;  %v2397_v33 = vpop.f32.mrf.mxu1 }
 0x8c4   : > { %v1902_v19 = vsub.f32 %v5040_v2, %v1879_v50  ;;  %1942 = vadd.xlane.f32.xlu1 %v5079_v15  ;;  %4061 = vpow2.f32 %v1930_v47  ;;  %v1932_v11 = vmul.f32 1.442695, %v1905_v42 }
 0x8c5   : > { %v1881_v51 = vpop.xlane.xlu1 %1880  ;;  %v5084_v43 = vpop.eup %4049 }
 0x8c6   : > { %v1903_v4 = vsub.f32 %v5044_v63, %v1881_v51  ;;  %v1926_v23 = vmul.f32 1.442695, %v1902_v19  ;;  %v3797_v46 = vpop.f32.mrf.mxu1 }
 0x8c7   : > { %v1891_v21 = vpop.xlane.xlu0 %1890 }
 0x8c8   : > { %v1928_v49 = vmul.f32 1.442695, %v1903_v4  ;;  %v1908_v6 = vsub.f32 %v5048_v62, %v1891_v21  ;;  %1948 = vadd.xlane.f32.xlu1 %v5084_v43  ;;  %v2400_v34 = vpop.f32.mrf.mxu1 }
 0x8c9   : > { %v5089_v37 = vpop.eup %4051  ;;  %v2021_v61 = vpop.permute.xlu1 %2020 }
 0x8ca   : > { %4063 = vpow2.f32 %v1928_v49  ;;  %v1938_v2 = vmul.f32 1.442695, %v1908_v6  ;;  %1954 = vadd.xlane.f32.xlu0 %v5089_v37  ;;  %v5092_v58 = vpop.eup %4053  ;;  %v3800_v38 = vpop.f32.mrf.mxu1 }
 0x8cb   : > { %v1887_v63 = vpop.xlane.xlu0 %1886  ;;  %4065 = vpow2.f32 %v1926_v23 }
 0x8cc   : > { %v1906_v1 = vsub.f32 %v5053_v60, %v1887_v63  ;;  %1944 = vadd.xlane.f32.xlu1 %v5092_v58  ;;  %4067 = vpow2.f32 %v1938_v2  ;;  %v2413_v50 = vpop.f32.mrf.mxu1 }
 0x8cd   : > { %v5096_v9 = vpop.eup %4055  ;;  %4069 = vpow2.f32 %v1932_v11 }
 0x8ce   : > { %v1934_v62 = vmul.f32 1.442695, %v1906_v1  ;;  %1950 = vadd.xlane.f32.xlu0 %v5096_v9  ;;  %v3801_v19 = vpop.f32.mrf.mxu1 }
 0x8cf   : > { %v5099_v48 = vpop.eup %4057  ;;  %v2025_v35 = vpop.permute.xlu0 %2024 }
 0x8d0   : > { %1952 = vadd.xlane.f32.xlu1 %v5099_v48  ;;  %3732 = vmatprep.subr.bf16.mxu0 %v2025_v35  ;;  %v5102_v41 = vpop.eup %4059  ;;  %4071 = vpow2.f32 %v1934_v62  ;;  %v2416_v21 = vpop.f32.mrf.mxu1 }
 0x8d1   : > { %3733 = vmatpush3.bf16.msra.mxu0 %v2025_v35  ;;  %v5105_v59 = vpop.eup %4061 }
 0x8d2   : > { %1956 = vadd.xlane.f32.xlu0 %v5102_v41  ;;  %v3804_v2 = vpop.f32.mrf.mxu1 }
 0x8d3   : > { %v2023_v60 = vpop.permute.xlu0 %2022 }
 0x8d4   : > { %3734 = vmatprep.subr.bf16.mxu0 %v2023_v60  ;;  %v2429_v11 = vpop.f32.mrf.mxu1 }
 0x8d5   : > { %3735 = vmatpush3.bf16.msra.mxu0 %v2023_v60 }
 0x8d6   : > { %1962 = vadd.xlane.f32.xlu0 %v5105_v59  ;;  %3736 = vmatprep.subr.bf16.mxu0 %v2021_v61  ;;  %v3805_v1 = vpop.f32.mrf.mxu1 }
 0x8d7   : > { %v5108_v40 = vpop.eup %4063  ;;  %v2017_v63 = vpop.permute.xlu0 %2016 }
 0x8d8   : > { %1960 = vadd.xlane.f32.xlu1 %v5108_v40  ;;  %v5111_v39 = vpop.eup %4065  ;;  %v2432_v35 = vpop.f32.mrf.mxu1 }
 0x8d9   : > { %3737 = vmatpush3.bf16.msra.mxu0 %v2021_v61  ;;  %v5114_v31 = vpop.eup %4067  ;;  %v5138_v61 = vadd.f32 %v5019_v29, %v2397_v33  ;;  %v5154_v33 = vadd.f32 %v5019_v29, %v3797_v46  ;;  %v5176_v46 = vadd.f32 %v5019_v29, %v2429_v11 }
 0x8da   : > { %1958 = vadd.xlane.f32.xlu0 %v5111_v39  ;;  %v5117_v56 = vpop.eup %4069  ;;  %v3808_v60 = vpop.f32.mrf.mxu1 }
 0x8dc   : > { %1970 = vadd.xlane.f32.xlu1 %v5114_v31 }
 0x8dd   : > { %v5120_v53 = vpop.eup %4071 }
 0x8de   : > { %1964 = vadd.xlane.f32.xlu0 %v5117_v56 }
 0x8e0   : > { %1966 = vadd.xlane.f32.xlu1 %v5120_v53 }
 0x8f1   : > { %2014 = vrot.lane.b32.xlu1 %v4375_v22, %s4239_s13 }
 0x8fa   : > { %v1893_v47 = vpop.xlane.xlu1 %1892 }
 0x8fb   : > { %v1909_v4 = vsub.f32 %v5065_v36, %v1893_v47  ;;  %v5131_v36 = vadd.f32 %v5019_v29, %v2413_v50  ;;  %v5141_v47 = vadd.f32 %v5019_v29, %v3808_v60  ;;  %v5146_v50 = vadd.f32 %v5019_v29, %v2400_v34 }
 0x8fc   : > { %v5164_v34 = vadd.f32 %v5019_v29, %v3800_v38  ;;  %v2445_v38 = vpop.f32.mrf.mxu1 }
 0x8fd   : > { %v1940_v6 = vmul.f32 1.442695, %v1909_v4  ;;  %v5158_v4 = vadd.f32 %v5019_v29, %v2416_v21 }
 0x8fe   : > { %v1889_v51 = vpop.xlane.xlu1 %1888 }
 0x8ff   : > { %v1907_v42 = vsub.f32 %v5069_v7, %v1889_v51  ;;  %v5150_v51 = vadd.f32 %v5019_v29, %v3796_v5  ;;  %v5170_v5 = vadd.f32 %v5019_v29, %v3801_v19  ;;  %v3809_v19 = vpop.f32.mrf.mxu1 }
 0x901   : > { %v1936_v23 = vmul.f32 1.442695, %v1907_v42  ;;  %v5194_v42 = vadd.f32 %v5019_v29, %v2445_v38 }
 0x902   : > { %v2019_v49 = vpop.permute.xlu1 %2018 }
 0x903   : > { %4073 = vpow2.f32 %v1936_v23  ;;  %3738 = vmatprep.subr.bf16.mxu0 %v2019_v49 }
 0x904   : > { %3739 = vmatpush3.bf16.msra.mxu0 %v2019_v49  ;;  %4075 = vpow2.f32 %v1940_v6  ;;  %v5202_v49 = vadd.f32 %v5019_v29, %v3809_v19 }
 0x905   : > { %3740 = vmatprep.subr.bf16.mxu0 %v2017_v63 }
 0x908   : > { %3741 = vmatpush3.bf16.msra.mxu0 %v2017_v63 }
 0x910   : > { %v5127_v62 = vpop.eup %4073 }
 0x911   : > { %1968 = vadd.xlane.f32.xlu0 %v5127_v62  ;;  %v5133_v7 = vpop.eup %4075 }
 0x915   : > { %1972 = vadd.xlane.f32.xlu0 %v5133_v7  ;;  %2468 = vmax.xlane.f32.xlu1 %v5131_v36 }
 0x919   : > { %2460 = vmax.xlane.f32.xlu0 %v5138_v61  ;;  %2488 = vmax.xlane.f32.xlu1 %v5141_v47 }
 0x91d   : > { %2462 = vmax.xlane.f32.xlu0 %v5146_v50 }
 0x921   : > { %2464 = vmax.xlane.f32.xlu0 %v5150_v51 }
 0x925   : > { %2466 = vmax.xlane.f32.xlu0 %v5154_v33 }
 0x929   : > { %2470 = vmax.xlane.f32.xlu0 %v5158_v4 }
 0x92a   : > { %2626 = vrot.lane.b32.xlu1 %v4367_v17, %s4240_s17  ;;  %v5182_v17 = vadd.f32 %v5019_v29, %v2432_v35 }
 0x92d   : > { %2472 = vmax.xlane.f32.xlu0 %v5164_v34 }
 0x92e   : > { %2622 = vrot.lane.b32.xlu1 %v4353_v0, %s4240_s17  ;;  %v5186_v0 = vadd.f32 %v5019_v29, %v3804_v2 }
 0x931   : > { %2474 = vmax.xlane.f32.xlu0 %v5170_v5 }
 0x932   : > { %2620 = vrot.lane.b32.xlu1 %v4361_v8, %s4240_s17  ;;  %v5190_v8 = vadd.f32 %v5019_v29, %v3805_v1 }
 0x935   : > { %2476 = vmax.xlane.f32.xlu0 %v5176_v46 }
 0x936   : > { %2614 = vrot.lane.b32.xlu1 %v4392_v26, %s4240_s17  ;;  %v2448_v26 = vpop.f32.mrf.mxu1 }
 0x937   : > { %v5198_v21 = vadd.f32 %v5019_v29, %v2448_v26 }
 0x939   : > { %2478 = vmax.xlane.f32.xlu0 %v5182_v17 }
 0x93d   : > { %2480 = vmax.xlane.f32.xlu0 %v5186_v0 }
 0x941   : > { %2482 = vmax.xlane.f32.xlu0 %v5190_v8 }
 0x945   : > { %2484 = vmax.xlane.f32.xlu0 %v5194_v42 }
 0x949   : > { %v1947_v23 = vpop.xlane.xlu1 %1946  ;;  %2486 = vmax.xlane.f32.xlu0 %v5198_v21 }
 0x94d   : > { %v1943_v6 = vpop.xlane.xlu1 %1942  ;;  %2490 = vmax.xlane.f32.xlu0 %v5202_v49 }
 0x94e   : > { %4077 = vrcp.f32 %v1943_v6 }
 0x951   : > { %v1949_v2 = vpop.xlane.xlu1 %1948 }
 0x953   : > { %v1955_v63 = vpop.xlane.xlu0 %1954 }
 0x955   : > { %v1945_v11 = vpop.xlane.xlu1 %1944 }
 0x956   : > { %4079 = vrcp.f32 %v1945_v11 }
 0x957   : > { %v1951_v1 = vpop.xlane.xlu0 %1950  ;;  %4081 = vrcp.f32 %v1949_v2 }
 0x959   : > { %v1953_v35 = vpop.xlane.xlu1 %1952 }
 0x95a   : > { %4083 = vrcp.f32 %v1953_v35 }
 0x95b   : > { %v1957_v60 = vpop.xlane.xlu0 %1956  ;;  %4085 = vrcp.f32 %v1947_v23  ;;  %v4078_v26 = vpop.eup %4077 }
 0x95c   : > { %4087 = vrcp.f32 %v1951_v1  ;;  %v1990_v6 = vmul.f32 %v4078_v26, %v5079_v15 }
 0x95d   : > { %4089 = vrcp.f32 %v1957_v60 }
 0x95f   : > { %v1963_v38 = vpop.xlane.xlu0 %1962 }
 0x961   : > { %v1961_v32 = vpop.xlane.xlu1 %1960 }
 0x963   : > { %v4080_v29 = vpop.eup %4079  ;;  %2624 = vrot.lane.b32.xlu0 %v4379_v24, %s4240_s17  ;;  %v1959_v19 = vpop.xlane.xlu0 %1958 }
 0x964   : > { %v1991_v11 = vmul.f32 %v4080_v29, %v5092_v58  ;;  %4091 = vrcp.f32 %v1959_v19  ;;  %v4082_v23 = vpop.eup %4081 }
 0x965   : > { %v1971_v30 = vpop.xlane.xlu1 %1970  ;;  %4093 = vrcp.f32 %v1955_v63  ;;  %v1993_v58 = vmul.f32 %v4082_v23, %v5084_v43 }
 0x966   : > { %v2006_v2 = vpack.c.bf16 %v1991_v11, %v1990_v6  ;;  %4095 = vrcp.f32 %v1961_v32 }
 0x967   : > { %2618 = vrot.lane.b32.xlu0 %v4385_v25, %s4240_s17  ;;  %v1965_v1 = vpop.xlane.xlu0 %1964  ;;  %v4084_v27 = vpop.eup %4083  ;;  %v479_v25 = vld [vmem:[%s5751_s3 + $0x8] sm:$0xf] }
 0x968   : > { %3744 = vmatprep.mubr.bf16.mxu0 %v2006_v2  ;;  %v4086_v24 = vpop.eup %4085  ;;  %4097 = vrcp.f32 %v1965_v1  ;;  %v1995_v63 = vmul.f32 %v4084_v27, %v5099_v48 }
 0x969   : > { %v1967_v35 = vpop.xlane.xlu1 %1966  ;;  %v4088_v15 = vpop.eup %4087  ;;  %4099 = vrcp.f32 %v1963_v38  ;;  %v1992_v32 = vmul.f32 %v4086_v24, %v5075_v3 }
 0x96a   : > { %v1994_v26 = vmul.f32 %v4088_v15, %v5096_v9  ;;  %v4090_v43 = vpop.eup %4089  ;;  %4101 = vrcp.f32 %v1967_v35 }
 0x96b   : > { %2616 = vrot.lane.b32.xlu0 %v4365_v13, %s4240_s17  ;;  %v2007_v29 = vpack.c.bf16 %v1993_v58, %v1992_v32  ;;  %v2168_v13 = vsel %vm1460_vm2, %v479_v25, 0  ;;  %v1997_v38 = vmul.f32 %v4090_v43, %v5102_v41 }
 0x96c   : > { %v2008_v19 = vpack.c.bf16 %v1995_v63, %v1994_v26 }
 0x96d   : > { %v2015_v60 = vpop.permute.xlu1 %2014 }
 0x96e   : > { %3742 = vmatprep.subr.bf16.mxu0 %v2015_v60 }
 0x96f   : > { %3743 = vmatpush3.bf16.msra.mxu0 %v2015_v60 }
 0x970   : > { %3886 = vmatprep.subr.msk.bf16.mxu0 %vm1460_vm2, %v479_v25 }
 0x971   : > { %v4092_v6 = vpop.eup %4091 }
 0x972   : > { %3745 = vmatmul.mubr.bf16.vlgmr.msra.gmra.mxu0 %v2007_v29  ;;  %v4094_v27 = vpop.eup %4093  ;;  %v1998_v3 = vmul.f32 %v4092_v6, %v5111_v39 }
 0x973   : > { %3748 = vmatprep.mubr.bf16.mxu0 %v2008_v19  ;;  %3761 = vmatpush3.bf16.msra.mxu0 %v2168_v13  ;;  %v4096_v48 = vpop.eup %4095  ;;  %v1996_v11 = vmul.f32 %v4094_v27, %v5089_v37 }
 0x974   : > { %v1999_v9 = vmul.f32 %v4096_v48, %v5108_v40 }
 0x975   : > { %v2009_v2 = vpack.c.bf16 %v1997_v38, %v1996_v11  ;;  %v4098_v23 = vpop.eup %4097 }
 0x976   : > { %v2010_v1 = vpack.c.bf16 %v1999_v9, %v1998_v3  ;;  %v4100_v24 = vpop.eup %4099  ;;  %v2001_v15 = vmul.f32 %v4098_v23, %v5117_v56 }
 0x977   : > { %v2000_v58 = vmul.f32 %v4100_v24, %v5105_v59  ;;  %v4102_v25 = vpop.eup %4101 }
 0x978   : > { %v2002_v59 = vmul.f32 %v4102_v25, %v5120_v53 }
 0x979   : > { %v2011_v60 = vpack.c.bf16 %v2001_v15, %v2000_v58 }
 0x97a   : > { %3749 = vmatmul.mubr.bf16.gmra.mxu0 %v2009_v2 }
 0x97b   : > { %3752 = vmatprep.mubr.bf16.mxu0 %v2010_v1 }
 0x982   : > { %3753 = vmatmul.mubr.bf16.gmra.mxu0 %v2011_v60 }
 0x99a   : > { %v1969_v41 = vpop.xlane.xlu0 %1968 }
 0x99b   : > { %4103 = vrcp.f32 %v1969_v41 }
 0x99c   : > { %4105 = vrcp.f32 %v1971_v30 }
 0x99e   : > { %v2469_v39 = vpop.xlane.xlu1 %2468  ;;  %v1973_v37 = vpop.xlane.xlu0 %1972 }
 0x99f   : > { %4107 = vrcp.f32 %v1973_v37  ;;  %v2496_v2 = vsub.f32 %v5131_v36, %v2469_v39 }
 0x9a1   : > { %v2516_v15 = vmul.f32 1.442695, %v2496_v2 }
 0x9a2   : > { %v2489_v40 = vpop.xlane.xlu1 %2488  ;;  %v2461_v63 = vpop.xlane.xlu0 %2460 }
 0x9a3   : > { %v2492_v30 = vsub.f32 %v5138_v61, %v2461_v63 }
 0x9a5   : > { %v2508_v11 = vmul.f32 1.442695, %v2492_v30 }
 0x9a6   : > { %v5228_v32 = vpop.permute.xlu1 %2626  ;;  %v2463_v26 = vpop.xlane.xlu0 %2462 }
 0x9a7   : > { %3810 = vmatprep.subr.bf16.mxu0 %v5228_v32  ;;  %v2493_v9 = vsub.f32 %v5146_v50, %v2463_v26 }
 0x9a8   : > { %v4104_v56 = vpop.eup %4103 }
 0x9a9   : > { %v2003_v29 = vmul.f32 %v4104_v56, %v5127_v62  ;;  %v4106_v35 = vpop.eup %4105  ;;  %v2510_v23 = vmul.f32 1.442695, %v2493_v9 }
 0x9aa   : > { %v2465_v13 = vpop.xlane.xlu0 %2464  ;;  %v2004_v48 = vmul.f32 %v4106_v35, %v5114_v31 }
 0x9ab   : > { %v2494_v43 = vsub.f32 %v5150_v51, %v2465_v13  ;;  %v2012_v19 = vpack.c.bf16 %v2003_v29, %v2002_v59 }
 0x9ac   : > { %v4108_v6 = vpop.eup %4107 }
 0x9ad   : > { %v2512_v27 = vmul.f32 1.442695, %v2494_v43  ;;  %3756 = vmatprep.mubr.bf16.mxu0 %v2012_v19  ;;  %v2005_v38 = vmul.f32 %v4108_v6, %v5133_v7 }
 0x9ae   : > { %v2467_v3 = vpop.xlane.xlu0 %2466 }
 0x9af   : > { %4109 = vpow2.f32 %v2512_v27  ;;  %v2495_v53 = vsub.f32 %v5154_v33, %v2467_v3  ;;  %v2013_v62 = vpack.c.bf16 %v2005_v38, %v2004_v48 }
 0x9b0   : > { %4111 = vpow2.f32 %v2508_v11 }
 0x9b1   : > { %3757 = vmatmul.mubr.bf16.gmra.mxu0 %v2013_v62  ;;  %v2514_v51 = vmul.f32 1.442695, %v2495_v53 }
 0x9b2   : > { %v2471_v61 = vpop.xlane.xlu0 %2470 }
 0x9b3   : > { %4113 = vpow2.f32 %v2514_v51  ;;  %v2497_v31 = vsub.f32 %v5158_v4, %v2471_v61  ;;  %v2506_v4 = vsub.f32 %v5141_v47, %v2489_v40 }
 0x9b4   : > { %4115 = vpow2.f32 %v2510_v23  ;;  %v5299_v23 = vpop.f32.mrf.mxu0 }
 0x9b5   : > { %v2518_v58 = vmul.f32 1.442695, %v2497_v31  ;;  %v2536_v25 = vmul.f32 1.442695, %v2506_v4 }
 0x9b6   : > { %v2473_v1 = vpop.xlane.xlu0 %2472 }
 0x9b7   : > { %v2498_v7 = vsub.f32 %v5164_v34, %v2473_v1  ;;  %v5303_v1 = vpop.f32.mrf.mxu0 }
 0x9b9   : > { %v2520_v24 = vmul.f32 1.442695, %v2498_v7  ;;  %v5305_v31 = vpop.f32.mrf.mxu0 }
 0x9ba   : > { %v2475_v33 = vpop.xlane.xlu0 %2474 }
 0x9bb   : > { %4117 = vpow2.f32 %v2520_v24  ;;  %v2499_v50 = vsub.f32 %v5170_v5, %v2475_v33  ;;  %v5307_v7 = vpop.f32.mrf.mxu0 }
 0x9bc   : > { %v5243_v60 = vpop.eup %4109  ;;  %4119 = vpow2.f32 %v2516_v15 }
 0x9bd   : > { %2544 = vadd.xlane.f32.xlu0 %v5243_v60  ;;  %4121 = vpow2.f32 %v2518_v58  ;;  %v2522_v41 = vmul.f32 1.442695, %v2499_v50  ;;  %v5246_v39 = vpop.eup %4111  ;;  %v5309_v24 = vpop.f32.mrf.mxu0 }
 0x9be   : > { %v2477_v36 = vpop.xlane.xlu0 %2476 }
 0x9bf   : > { %4123 = vpow2.f32 %v2522_v41  ;;  %v2500_v59 = vsub.f32 %v5176_v46, %v2477_v36  ;;  %v5311_v15 = vpop.f32.mrf.mxu0 }
 0x9c0   : > { %v5251_v63 = vpop.eup %4113 }
 0x9c1   : > { %2540 = vadd.xlane.f32.xlu0 %v5246_v39  ;;  %v5254_v56 = vpop.eup %4115  ;;  %v2524_v13 = vmul.f32 1.442695, %v2500_v59  ;;  %v5313_v33 = vpop.f32.mrf.mxu0 }
 0x9c2   : > { %v2479_v34 = vpop.xlane.xlu0 %2478 }
 0x9c3   : > { %v2501_v37 = vsub.f32 %v5182_v17, %v2479_v34  ;;  %v5315_v58 = vpop.f32.mrf.mxu0 }
 0x9c5   : > { %v2526_v5 = vmul.f32 1.442695, %v2501_v37  ;;  %2546 = vadd.xlane.f32.xlu0 %v5251_v63  ;;  %v5317_v50 = vpop.f32.mrf.mxu0 }
 0x9c6   : > { %v2481_v26 = vpop.xlane.xlu0 %2480 }
 0x9c7   : > { %4125 = vpow2.f32 %v2526_v5  ;;  %v2502_v29 = vsub.f32 %v5186_v0, %v2481_v26  ;;  %v5319_v36 = vpop.f32.mrf.mxu0 }
 0x9c8   : > { %v5258_v35 = vpop.eup %4117  ;;  %4127 = vpow2.f32 %v2536_v25 }
 0x9c9   : > { %v2528_v47 = vmul.f32 1.442695, %v2502_v29  ;;  %2542 = vadd.xlane.f32.xlu0 %v5254_v56  ;;  %2552 = vadd.xlane.f32.xlu1 %v5258_v35  ;;  %v5262_v40 = vpop.eup %4119  ;;  %v5321_v41 = vpop.f32.mrf.mxu0 }
 0x9ca   : > { %v2483_v17 = vpop.xlane.xlu0 %2482  ;;  %v5265_v43 = vpop.eup %4121 }
 0x9cb   : > { %4129 = vpow2.f32 %v2528_v47  ;;  %v2503_v30 = vsub.f32 %v5190_v8, %v2483_v17 }
 0x9cc   : > { %4131 = vpow2.f32 %v2524_v13  ;;  %v5270_v6 = vpop.eup %4123 }
 0x9cd   : > { %2550 = vadd.xlane.f32.xlu0 %v5265_v43  ;;  %2548 = vadd.xlane.f32.xlu1 %v5262_v40  ;;  %v2530_v0 = vmul.f32 1.442695, %v2503_v30 }
 0x9ce   : > { %v2485_v46 = vpop.xlane.xlu0 %2484 }
 0x9cf   : > { %v2504_v19 = vsub.f32 %v5194_v42, %v2485_v46  ;;  %4133 = vpow2.f32 %v2530_v0 }
 0x9d1   : > { %2554 = vadd.xlane.f32.xlu1 %v5270_v6  ;;  %v2532_v27 = vmul.f32 1.442695, %v2504_v19 }
 0x9d2   : > { %v2487_v48 = vpop.xlane.xlu0 %2486 }
 0x9d3   : > { %v2505_v8 = vsub.f32 %v5198_v21, %v2487_v48  ;;  %4135 = vpow2.f32 %v2532_v27  ;;  %v2623_v27 = vpop.permute.xlu1 %2622 }
 0x9d4   : > { %v5274_v38 = vpop.eup %4125 }
 0x9d5   : > { %v2534_v3 = vmul.f32 1.442695, %v2505_v8  ;;  %2558 = vadd.xlane.f32.xlu0 %v5274_v38  ;;  %v5277_v53 = vpop.eup %4127 }
 0x9d6   : > { %v2491_v11 = vpop.xlane.xlu0 %2490 }
 0x9d7   : > { %4137 = vpow2.f32 %v2534_v3  ;;  %v2507_v42 = vsub.f32 %v5202_v49, %v2491_v11 }
 0x9d8   : > { %v5280_v62 = vpop.eup %4129 }
 0x9d9   : > { %v2538_v9 = vmul.f32 1.442695, %v2507_v42  ;;  %2568 = vadd.xlane.f32.xlu0 %v5277_v53  ;;  %2560 = vadd.xlane.f32.xlu1 %v5280_v62  ;;  %v5284_v21 = vpop.eup %4131 }
 0x9da   : > { %v2625_v29 = vpop.permute.xlu0 %2624 }
 0x9db   : > { %4139 = vpow2.f32 %v2538_v9 }
 0x9dc   : > { %v5287_v61 = vpop.eup %4133 }
 0x9dd   : > { %2556 = vadd.xlane.f32.xlu1 %v5284_v21 }
 0x9de   : > { %v2619_v0 = vpop.permute.xlu0 %2618 }
 0x9e0   : > { %v5290_v51 = vpop.eup %4135 }
 0x9e1   : > { %2562 = vadd.xlane.f32.xlu1 %v5287_v61 }
 0x9e2   : > { %v2617_v42 = vpop.permute.xlu0 %2616 }
 0x9e4   : > { %v5292_v2 = vpop.eup %4137 }
 0x9e5   : > { %2564 = vadd.xlane.f32.xlu1 %v5290_v51  ;;  %2566 = vadd.xlane.f32.xlu0 %v5292_v2 }
 0x9e8   : > { %v5296_v49 = vpop.eup %4139 }
 0x9e9   : > { %2570 = vadd.xlane.f32.xlu1 %v5296_v49 }
 0x9fb   : > { %2612 = vrot.lane.b32.xlu0 %v4375_v22, %s4240_s17  ;;  %v5323_v22 = vpop.f32.mrf.mxu0 }
 0x9fd   : > { %v5325_v4 = vpop.f32.mrf.mxu0 }
 0x9fe   : > { %5760 = vst [vmem:[#allocation5_spill] sm:$0xff] %v5325_v4 }
 0x9ff   : > { %v5327_v34 = vpop.f32.mrf.mxu0 }
 0xa00   : > { %5761 = vst [vmem:[#allocation6_spill] sm:$0xff] %v5327_v34 }
 0xa01   : > { %v5329_v37 = vpop.f32.mrf.mxu0 }
 0xa02   : > { %5762 = vst [vmem:[#allocation7_spill] sm:$0xff] %v5329_v37 }
 0xa03   : > { %v5331_v5 = vpop.f32.mrf.mxu0 }
 0xa04   : > { %5763 = vst [vmem:[#allocation8_spill] sm:$0xff] %v5331_v5 }
 0xa32   : > { %v3746_v25 = vpop.f32.mrf.mxu0 }
 0xa34   : > { %v2072_v26 = vpop.f32.mrf.mxu0 }
 0xa36   : > { %v3747_v59 = vpop.f32.mrf.mxu0 }
 0xa37   : > { %v2136_v13 = vpack.c.bf16 %v3747_v59, %v3746_v25  ;;  %v2621_v25 = vpop.permute.xlu1 %2620 }
 0xa38   : > { %v2075_v47 = vpop.f32.mrf.mxu0 }
 0xa39   : > { %v2135_v17 = vpack.c.bf16 %v2075_v47, %v2072_v26 }
 0xa3a   : > { %v3750_v30 = vpop.f32.mrf.mxu0 }
 0xa3b   : > { %3762 = vmatprep.mubr.msk.bf16.mxu0 %vm543_vm1, %v2135_v17 }
 0xa3c   : > { %v2088_v46 = vpop.f32.mrf.mxu0  ;;  %3763 = vmatmul.mubr.msk.bf16.vlgmr.msra.gmra.mxu0 %vm543_vm1, %v2136_v13  ;;  %v2615_v13 = vpop.permute.xlu1 %2614 }
 0xa3d   : > { %3811 = vmatpush3.bf16.msra.mxu0 %v5228_v32 }
 0xa3e   : > { %3812 = vmatprep.subr.bf16.mxu0 %v2625_v29  ;;  %v3751_v19 = vpop.f32.mrf.mxu0 }
 0xa3f   : > { %v2138_v3 = vpack.c.bf16 %v3751_v19, %v3750_v30 }
 0xa40   : > { %v2091_v48 = vpop.f32.mrf.mxu0 }
 0xa41   : > { %v2137_v8 = vpack.c.bf16 %v2091_v48, %v2088_v46  ;;  %3813 = vmatpush3.bf16.msra.mxu0 %v2625_v29 }
 0xa42   : > { %3814 = vmatprep.subr.bf16.mxu0 %v2623_v27  ;;  %v3754_v11 = vpop.f32.mrf.mxu0 }
 0xa43   : > { %3766 = vmatprep.mubr.msk.bf16.mxu0 %vm543_vm1, %v2137_v8 }
 0xa44   : > { %v2104_v9 = vpop.f32.mrf.mxu0  ;;  %3767 = vmatmul.mubr.msk.bf16.gmra.mxu0 %vm543_vm1, %v2138_v3 }
 0xa45   : > { %3815 = vmatpush3.bf16.msra.mxu0 %v2623_v27 }
 0xa46   : > { %3816 = vmatprep.subr.bf16.mxu0 %v2621_v25  ;;  %v3755_v32 = vpop.f32.mrf.mxu0  ;;  %v2545_v26 = vpop.xlane.xlu0 %2544 }
 0xa47   : > { %v2140_v17 = vpack.c.bf16 %v3755_v32, %v3754_v11 }
 0xa48   : > { %v2107_v59 = vpop.f32.mrf.mxu0 }
 0xa49   : > { %v2139_v47 = vpack.c.bf16 %v2107_v59, %v2104_v9  ;;  %3817 = vmatpush3.bf16.msra.mxu0 %v2621_v25 }
 0xa4a   : > { %3818 = vmatprep.subr.bf16.mxu0 %v2619_v0  ;;  %v2541_v29 = vpop.xlane.xlu0 %2540 }
 0xa4b   : > { %3770 = vmatprep.mubr.msk.bf16.mxu0 %vm543_vm1, %v2139_v47 }
 0xa4c   : > { %3771 = vmatmul.mubr.msk.bf16.gmra.mxu0 %vm543_vm1, %v2140_v17 }
 0xa4d   : > { %3819 = vmatpush3.bf16.msra.mxu0 %v2619_v0 }
 0xa4e   : > { %3820 = vmatprep.subr.bf16.mxu0 %v2617_v42  ;;  %v2547_v30 = vpop.xlane.xlu0 %2546 }
 0xa51   : > { %3821 = vmatpush3.bf16.msra.mxu0 %v2617_v42 }
 0xa52   : > { %3822 = vmatprep.subr.bf16.mxu0 %v2615_v13  ;;  %v2553_v46 = vpop.xlane.xlu1 %2552  ;;  %v2543_v19 = vpop.xlane.xlu0 %2542 }
 0xa53   : > { %4141 = vrcp.f32 %v2543_v19 }
 0xa54   : > { %4143 = vrcp.f32 %v2541_v29 }
 0xa55   : > { %3823 = vmatpush3.bf16.msra.mxu0 %v2615_v13  ;;  %4145 = vrcp.f32 %v2547_v30 }
 0xa56   : > { %v2549_v27 = vpop.xlane.xlu1 %2548  ;;  %v2551_v48 = vpop.xlane.xlu0 %2550 }
 0xa57   : > { %4147 = vrcp.f32 %v2549_v27 }
 0xa58   : > { %4149 = vrcp.f32 %v2551_v48 }
 0xa59   : > { %4151 = vrcp.f32 %v2545_v26 }
 0xa5a   : > { %v2555_v8 = vpop.xlane.xlu1 %2554 }
 0xa5b   : > { %4153 = vrcp.f32 %v2555_v8 }
 0xa5e   : > { %v2559_v3 = vpop.xlane.xlu0 %2558 }
 0xa60   : > { %v4142_v59 = vpop.eup %4141 }
 0xa61   : > { %v4144_v13 = vpop.eup %4143  ;;  %v2589_v29 = vmul.f32 %v4142_v59, %v5254_v56 }
 0xa62   : > { %v2561_v11 = vpop.xlane.xlu1 %2560  ;;  %v2569_v9 = vpop.xlane.xlu0 %2568  ;;  %v2588_v27 = vmul.f32 %v4144_v13, %v5246_v39 }
 0xa63   : > { %v4146_v26 = vpop.eup %4145 }
 0xa64   : > { %v4148_v37 = vpop.eup %4147  ;;  %v2604_v4 = vpack.c.bf16 %v2589_v29, %v2588_v27  ;;  %v2591_v56 = vmul.f32 %v4146_v26, %v5251_v63 }
 0xa66   : > { %v2557_v0 = vpop.xlane.xlu1 %2556 }
 0xa67   : > { %4155 = vrcp.f32 %v2557_v0 }
 0xa68   : > { %4157 = vrcp.f32 %v2553_v46  ;;  %v2592_v46 = vmul.f32 %v4148_v37, %v5262_v40 }
 0xa69   : > { %4159 = vrcp.f32 %v2559_v3 }
 0xa6a   : > { %v2563_v17 = vpop.xlane.xlu1 %2562 }
 0xa6b   : > { %4161 = vrcp.f32 %v2563_v17 }
 0xa6e   : > { %v2567_v25 = vpop.xlane.xlu0 %2566  ;;  %v2565_v34 = vpop.xlane.xlu1 %2564 }
 0xa6f   : > { %4163 = vrcp.f32 %v2565_v34 }
 0xa70   : > { %4165 = vrcp.f32 %v2567_v25 }
 0xa71   : > { %v3758_v42 = vpop.f32.mrf.mxu0  ;;  %4167 = vrcp.f32 %v2561_v11 }
 0xa72   : > { %v2613_v32 = vpop.permute.xlu0 %2612 }
 0xa73   : > { %v2120_v47 = vpop.f32.mrf.mxu0  ;;  %3824 = vmatprep.subr.bf16.mxu0 %v2613_v32 }
 0xa74   : > { %3825 = vmatpush3.bf16.msra.mxu0 %v2613_v32  ;;  %v4150_v32 = vpop.eup %4149 }
 0xa75   : > { %v3759_v5 = vpop.f32.mrf.mxu0  ;;  %v4152_v8 = vpop.eup %4151  ;;  %v2593_v39 = vmul.f32 %v4150_v32, %v5265_v43 }
 0xa76   : > { %v2142_v48 = vpack.c.bf16 %v3759_v5, %v3758_v42  ;;  %v2590_v5 = vmul.f32 %v4152_v8, %v5243_v60  ;;  %v4154_v0 = vpop.eup %4153  ;;  %v2571_v42 = vpop.xlane.xlu1 %2570  ;;  %v1623_v8 = vadd.f32 %v5303_v1, %v4986_v44  ;;  %v1639_v1 = vadd.f32 %v5311_v15, %v4994_v57 }
 0xa77   : > { %v2123_v30 = vpop.f32.mrf.mxu0  ;;  %v2606_v59 = vpack.c.bf16 %v2593_v39, %v2592_v46  ;;  %4169 = vrcp.f32 %v2571_v42  ;;  %v2595_v63 = vmul.f32 %v4154_v0, %v5270_v6  ;;  %v1634_v39 = vadd.f32 %v5305_v31, %v4988_v45 }
 0xa78   : > { %v2141_v19 = vpack.c.bf16 %v2123_v30, %v2120_v47  ;;  %v2605_v3 = vpack.c.bf16 %v2591_v56, %v2590_v5  ;;  %v4156_v47 = vpop.eup %4155  ;;  %4171 = vrcp.f32 %v2569_v9  ;;  %v1650_v31 = vadd.f32 %v5313_v33, %v4996_v28 }
 0xa79   : > { %v4158_v13 = vpop.eup %4157  ;;  %v2596_v34 = vmul.f32 %v4156_v47, %v5284_v21  ;;  %v1655_v15 = vadd.f32 %v5319_v36, %v5002_v18  ;;  %v1666_v33 = vadd.f32 %v5321_v41, %v5004_v16  ;;  %v5767_v41 = vld [vmem:[#allocation3_spill] sm:$0xff] }
 0xa7a   : > { %3774 = vmatprep.mubr.msk.bf16.mxu0 %vm543_vm1, %v2141_v19  ;;  %v2594_v40 = vmul.f32 %v4158_v13, %v5258_v35 }
 0xa7b   : > { %3775 = vmatmul.mubr.msk.bf16.gmra.mxu0 %vm543_vm1, %v2142_v48  ;;  %v1631_v48 = vadd.f32 %v5299_v23, %v4984_v52  ;;  %v1647_v52 = vadd.f32 %v5309_v24, %v4992_v55  ;;  %v1663_v24 = vadd.f32 %v5317_v50, %v5000_v54 }
 0xa7c   : > { %3826 = vmatprep.mubr.bf16.mxu0 %v2604_v4  ;;  %v4160_v4 = vpop.eup %4159  ;;  %v2607_v37 = vpack.c.bf16 %v2595_v63, %v2594_v40  ;;  %v5764_v40 = vld [vmem:[#allocation5_spill] sm:$0xff] }
 0xa7d   : > { %v2597_v43 = vmul.f32 %v4160_v4, %v5274_v38  ;;  %v4162_v60 = vpop.eup %4161  ;;  %v480_v38 = vld [vmem:[%s5751_s3 + $0xc] sm:$0xf]  ;;  %v1679_v18 = vadd.f32 %v5764_v40, %v5008_v12  ;;  %v4206_v40 = vld [vmem:[%s4308_s14 + $0x10] sm:$0xff] }
 0xa7e   : > { %v4164_v11 = vpop.eup %4163  ;;  %v2599_v30 = vmul.f32 %v4162_v60, %v5287_v61  ;;  %3895 = vmatprep.subr.msk.bf16.mxu0 %vm1460_vm2, %v480_v38  ;;  %v2766_v61 = vsel %vm1460_vm2, %v480_v38, 0  ;;  %v5766_v60 = vld [vmem:[#allocation6_spill] sm:$0xff] }
 0xa7f   : > { %v2608_v25 = vpack.c.bf16 %v2597_v43, %v2596_v34  ;;  %v4166_v17 = vpop.eup %4165  ;;  %v2600_v19 = vmul.f32 %v4164_v11, %v5290_v51  ;;  %v5765_v43 = vld [vmem:[#allocation2_spill] sm:$0xff] }
 0xa80   : > { %v4168_v29 = vpop.eup %4167  ;;  %v2601_v6 = vmul.f32 %v4166_v17, %v5292_v2 }
 0xa81   : > { %v2598_v21 = vmul.f32 %v4168_v29, %v5280_v62 }
 0xa82   : > { %v2610_v27 = vpack.c.bf16 %v2601_v6, %v2600_v19 }
 0xa83   : > { %3827 = vmatmul.mubr.bf16.vlgmr.msra.gmra.mxu0 %v2605_v3  ;;  %v2609_v9 = vpack.c.bf16 %v2599_v30, %v2598_v21  ;;  %v5770_v30 = vld [vmem:[#allocation8_spill] sm:$0xff] }
 0xa84   : > { %3830 = vmatprep.mubr.bf16.mxu0 %v2606_v59  ;;  %v4170_v35 = vpop.eup %4169  ;;  %3843 = vmatpush3.bf16.msra.mxu0 %v2766_v61 }
 0xa85   : > { %v4172_v26 = vpop.eup %4171  ;;  %v2603_v51 = vmul.f32 %v4170_v35, %v5296_v49 }
 0xa86   : > { %v2602_v2 = vmul.f32 %v4172_v26, %v5277_v53  ;;  %v1626_v53 = vadd.f32 %v5307_v7, %v4990_v20  ;;  %v1642_v7 = vadd.f32 %v5315_v58, %v4998_v10  ;;  %v1658_v58 = vadd.f32 %v5323_v22, %v5006_v14  ;;  %v5769_v22 = vld [vmem:[#allocation4_spill] sm:$0xff] }
 0xa87   : > { %v1674_v19 = vadd.f32 %v5770_v30, %v5769_v22 }
 0xa88   : > { %v2611_v62 = vpack.c.bf16 %v2603_v51, %v2602_v2 }
 0xa8b   : > { %3831 = vmatmul.mubr.bf16.gmra.mxu0 %v2607_v37  ;;  %v1671_v37 = vadd.f32 %v5766_v60, %v5765_v43 }
 0xa8c   : > { %3834 = vmatprep.mubr.bf16.mxu0 %v2608_v25  ;;  %v5768_v25 = vld [vmem:[#allocation7_spill] sm:$0xff] }
 0xa8d   : > { %v1682_v17 = vadd.f32 %v5768_v25, %v5767_v41 }
 0xa93   : > { %3835 = vmatmul.mubr.bf16.gmra.mxu0 %v2609_v9 }
 0xa94   : > { %3838 = vmatprep.mubr.bf16.mxu0 %v2610_v27 }
 0xa9b   : > { %3839 = vmatmul.mubr.bf16.gmra.mxu0 %v2611_v62 }
 0xafc   : > { %v3764_v32 = vpop.f32.mrf.mxu0 }
 0xafd   : > { %v5367_v56 = vadd.f32 %v3764_v32, %v1631_v48 }
 0xafe   : > { %v2204_v46 = vpop.f32.mrf.mxu0 }
 0xaff   : > { %v5371_v5 = vadd.f32 %v2204_v46, %v1623_v8 }
 0xb00   : > { %v3765_v49 = vpop.f32.mrf.mxu0 }
 0xb01   : > { %v5375_v3 = vadd.f32 %v3765_v49, %v1634_v39 }
 0xb02   : > { %v2207_v0 = vpop.f32.mrf.mxu0 }
 0xb03   : > { %v5379_v23 = vadd.f32 %v2207_v0, %v1626_v53 }
 0xb04   : > { %v3768_v44 = vpop.f32.mrf.mxu0 }
 0xb05   : > { %v5383_v42 = vadd.f32 %v3768_v44, %v1647_v52 }
 0xb06   : > { %v2220_v45 = vpop.f32.mrf.mxu0 }
 0xb07   : > { %v5387_v59 = vadd.f32 %v2220_v45, %v1639_v1 }
 0xb08   : > { %v3769_v20 = vpop.f32.mrf.mxu0 }
 0xb09   : > { %v5391_v47 = vadd.f32 %v3769_v20, %v1650_v31 }
 0xb0a   : > { %v2223_v55 = vpop.f32.mrf.mxu0 }
 0xb0b   : > { %v5395_v13 = vadd.f32 %v2223_v55, %v1642_v7 }
 0xb0c   : > { %v3772_v57 = vpop.f32.mrf.mxu0 }
 0xb0d   : > { %v5399_v4 = vadd.f32 %v3772_v57, %v1663_v24  ;;  %v5438_v24 = vld [vmem:[%s5752_s4] ss:$0 sm:$0xff] }
 0xb0e   : > { %v2236_v28 = vpop.f32.mrf.mxu0 }
 0xb0f   : > { %v5403_v63 = vadd.f32 %v2236_v28, %v1655_v15 }
 0xb10   : > { %v3773_v10 = vpop.f32.mrf.mxu0 }
 0xb11   : > { %v5407_v34 = vadd.f32 %v3773_v10, %v1666_v33 }
 0xb12   : > { %v2239_v54 = vpop.f32.mrf.mxu0 }
 0xb13   : > { %v5409_v50 = vadd.f32 %v2239_v54, %v1658_v58 }
 0xb3b   : > { %v3776_v36 = vpop.f32.mrf.mxu0 }
 0xb3c   : > { %v5415_v11 = vadd.f32 %v3776_v36, %v1679_v18 }
 0xb3d   : > { %v2252_v16 = vpop.f32.mrf.mxu0 }
 0xb3e   : > { %v5419_v29 = vadd.f32 %v2252_v16, %v1671_v37  ;;  %v4207_v37 = vld [vmem:[%s4308_s14] sm:$0xff] }
 0xb3f   : > { %v3777_v14 = vpop.f32.mrf.mxu0 }
 0xb40   : > { %v5423_v6 = vadd.f32 %v3777_v14, %v1682_v17  ;;  %v4208_v14 = vld [vmem:[%s4308_s14 + $0x18] sm:$0xff] }
 0xb41   : > { %v2255_v21 = vpop.f32.mrf.mxu0 }
 0xb42   : > { %v5425_v12 = vadd.f32 %v2255_v21, %v1674_v19 }
 0xb43   : > { %v3828_v9 = vpop.f32.mrf.mxu0 }
 0xb45   : > { %v2670_v35 = vpop.f32.mrf.mxu0 }
 0xb47   : > { %v3829_v27 = vpop.f32.mrf.mxu0 }
 0xb48   : > { %v2734_v61 = vpack.c.bf16 %v3829_v27, %v3828_v9 }
 0xb49   : > { %v2673_v38 = vpop.f32.mrf.mxu0 }
 0xb4a   : > { %v2733_v26 = vpack.c.bf16 %v2673_v38, %v2670_v35  ;;  %v4209_v35 = vld [vmem:[%s4308_s14 + $0x8] sm:$0xff] }
 0xb4b   : > { %v3832_v51 = vpop.f32.mrf.mxu0 }
 0xb4c   : > { %3844 = vmatprep.mubr.msk.bf16.mxu0 %vm543_vm1, %v2733_v26 }
 0xb4d   : > { %v2686_v2 = vpop.f32.mrf.mxu0  ;;  %3845 = vmatmul.mubr.msk.bf16.vlgmr.msra.gmra.mxu0 %vm543_vm1, %v2734_v61 }
 0xb4f   : > { %v3833_v62 = vpop.f32.mrf.mxu0 }
 0xb50   : > { %v2736_v8 = vpack.c.bf16 %v3833_v62, %v3832_v51 }
 0xb51   : > { %v2689_v48 = vpop.f32.mrf.mxu0 }
 0xb52   : > { %v2735_v32 = vpack.c.bf16 %v2689_v48, %v2686_v2  ;;  %v4211_v48 = vld [vmem:[%s4308_s14 + $0x30] sm:$0xff] }
 0xb53   : > { %v3836_v46 = vpop.f32.mrf.mxu0 }
 0xb54   : > { %3848 = vmatprep.mubr.msk.bf16.mxu0 %vm543_vm1, %v2735_v32 }
 0xb55   : > { %v2702_v39 = vpop.f32.mrf.mxu0  ;;  %3849 = vmatmul.mubr.msk.bf16.gmra.mxu0 %vm543_vm1, %v2736_v8 }
 0xb57   : > { %v3837_v49 = vpop.f32.mrf.mxu0 }
 0xb58   : > { %v2738_v52 = vpack.c.bf16 %v3837_v49, %v3836_v46 }
 0xb59   : > { %v2705_v53 = vpop.f32.mrf.mxu0 }
 0xb5a   : > { %v2737_v0 = vpack.c.bf16 %v2705_v53, %v2702_v39 }
 0xb5b   : > { %v3840_v44 = vpop.f32.mrf.mxu0 }
 0xb5c   : > { %3852 = vmatprep.mubr.msk.bf16.mxu0 %vm543_vm1, %v2737_v0  ;;  %v4212_v0 = vld [vmem:[%s4308_s14 + $0x20] sm:$0xff] }
 0xb5d   : > { %v2718_v1 = vpop.f32.mrf.mxu0  ;;  %3853 = vmatmul.mubr.msk.bf16.gmra.mxu0 %vm543_vm1, %v2738_v52 }
 0xb5f   : > { %v3841_v45 = vpop.f32.mrf.mxu0 }
 0xb60   : > { %v2740_v7 = vpack.c.bf16 %v3841_v45, %v3840_v44  ;;  %v4213_v45 = vld [vmem:[%s4308_s14 + $0x38] sm:$0xff] }
 0xb61   : > { %v2721_v31 = vpop.f32.mrf.mxu0 }
 0xb62   : > { %v2739_v20 = vpack.c.bf16 %v2721_v31, %v2718_v1 }
 0xb64   : > { %3856 = vmatprep.mubr.msk.bf16.mxu0 %vm543_vm1, %v2739_v20 }
 0xb65   : > { %3857 = vmatmul.mubr.msk.bf16.gmra.mxu0 %vm543_vm1, %v2740_v7 }
 0xc0d   : > { %v3846_v55 = vpop.f32.mrf.mxu0 }
 0xc0e   : > { %v2867_v57 = vadd.f32 %v3846_v55, %v5367_v56 }
 0xc0f   : > { %v2802_v15 = vpop.f32.mrf.mxu0 }
 0xc10   : > { %v2890_v28 = vadd.f32 %v5438_v24, %v2867_v57  ;;  %v2865_v33 = vadd.f32 %v2802_v15, %v5371_v5  ;;  %v4214_v57 = vld [vmem:[%s4308_s14 + $0x70] sm:$0xff] }
 0xc11   : > { %v3847_v10 = vpop.f32.mrf.mxu0 }
 0xc12   : > { %v2888_v58 = vadd.f32 %v5438_v24, %v2865_v33  ;;  %v2868_v54 = vadd.f32 %v3847_v10, %v5375_v3  ;;  %v5446_v18 = vadd.f32 %v4206_v40, %v2890_v28  ;;  %v4215_v10 = vld [vmem:[%s4308_s14 + $0x50] sm:$0xff] }
 0xc13   : > { %v2805_v36 = vpop.f32.mrf.mxu0 }
 0xc14   : > { %v2891_v43 = vadd.f32 %v5438_v24, %v2868_v54  ;;  %v2866_v60 = vadd.f32 %v2805_v36, %v5379_v23  ;;  %v2928_v56 = vsel %vm355_vm0, %v5446_v18, 0.0  ;;  %v5453_v16 = vadd.f32 %v4207_v37, %v2888_v58 }
 0xc15   : > { %2929 = vadd.xlane.f32.xlu1 %v2928_v56  ;;  %v3850_v5 = vpop.f32.mrf.mxu0 }
 0xc16   : > { %v2871_v41 = vadd.f32 %v3850_v5, %v5383_v42  ;;  %v2889_v25 = vadd.f32 %v5438_v24, %v2866_v60  ;;  %v2922_v17 = vsel %vm355_vm0, %v5453_v16, 0.0  ;;  %v5460_v22 = vadd.f32 %v4208_v14, %v2891_v43  ;;  %v4216_v60 = vld [vmem:[%s4308_s14 + $0x40] sm:$0xff] }
 0xc17   : > { %v2818_v3 = vpop.f32.mrf.mxu0 }
 0xc18   : > { %v2894_v30 = vadd.f32 %v5438_v24, %v2871_v41  ;;  %v2869_v21 = vadd.f32 %v2818_v3, %v5387_v59  ;;  %v2931_v9 = vsel %vm355_vm0, %v5460_v22, 0.0  ;;  %v5468_v27 = vadd.f32 %v4209_v35, %v2889_v25  ;;  %v4217_v3 = vld [vmem:[%s4308_s14 + $0x58] sm:$0xff] }
 0xc19   : > { %2923 = vadd.xlane.f32.xlu1 %v2922_v17  ;;  %v3851_v23 = vpop.f32.mrf.mxu0 }
 0xc1a   : > { %v2872_v61 = vadd.f32 %v3851_v23, %v5391_v47  ;;  %v2892_v2 = vadd.f32 %v5438_v24, %v2869_v21  ;;  %v2925_v59 = vsel %vm355_vm0, %v5468_v27, 0.0  ;;  %v5479_v32 = vadd.f32 %v4211_v48, %v2894_v30  ;;  %v4218_v30 = vld [vmem:[%s4308_s14 + $0x48] sm:$0xff] }
 0xc1b   : > { %v2821_v19 = vpop.f32.mrf.mxu0 }
 0xc1c   : > { %v2870_v42 = vadd.f32 %v2821_v19, %v5395_v13  ;;  %v4210_v13 = vld [vmem:[%s4308_s14 + $0x28] sm:$0xff]  ;;  %v2895_v47 = vadd.f32 %v5438_v24, %v2872_v61  ;;  %v2940_v53 = vsel %vm355_vm0, %v5479_v32, 0.0  ;;  %v5488_v52 = vadd.f32 %v4212_v0, %v2892_v2 }
 0xc1d   : > { %2932 = vadd.xlane.f32.xlu1 %v2931_v9  ;;  %v3854_v38 = vpop.f32.mrf.mxu0  ;;  %v4219_v9 = vld [vmem:[%s4308_s14 + $0x60] sm:$0xff] }
 0xc1e   : > { %v2893_v26 = vadd.f32 %v5438_v24, %v2870_v42  ;;  %v2875_v49 = vadd.f32 %v3854_v38, %v5399_v4  ;;  %v5492_v31 = vadd.f32 %v4213_v45, %v2895_v47  ;;  %v2934_v55 = vsel %vm355_vm0, %v5488_v52, 0.0 }
 0xc1f   : > { %v2834_v51 = vpop.f32.mrf.mxu0 }
 0xc20   : > { %v5476_v62 = vadd.f32 %v4210_v13, %v2893_v26  ;;  %v2898_v20 = vadd.f32 %v5438_v24, %v2875_v49  ;;  %v2873_v7 = vadd.f32 %v2834_v51, %v5403_v63  ;;  %v4220_v26 = vld [vmem:[%s4308_s14 + $0x68] sm:$0xff]  ;;  %v4221_v51 = vld [vmem:[%s4308_s14 + $0x78] sm:$0xff] }
 0xc21   : > { %2926 = vadd.xlane.f32.xlu1 %v2925_v59  ;;  %v3855_v8 = vpop.f32.mrf.mxu0 }
 0xc22   : > { %v2937_v46 = vsel %vm355_vm0, %v5476_v62, 0.0  ;;  %v2896_v28 = vadd.f32 %v5438_v24, %v2873_v7  ;;  %v2876_v33 = vadd.f32 %v3855_v8, %v5407_v34  ;;  %v5509_v58 = vadd.f32 %v4215_v10, %v2898_v20 }
 0xc23   : > { %2938 = vadd.xlane.f32.xlu0 %v2937_v46  ;;  %v2837_v39 = vpop.f32.mrf.mxu0 }
 0xc24   : > { %v2899_v40 = vadd.f32 %v5438_v24, %v2876_v33  ;;  %v2874_v36 = vadd.f32 %v2837_v39, %v5409_v50  ;;  %v2952_v43 = vsel %vm355_vm0, %v5509_v58, 0.0  ;;  %v5516_v34 = vadd.f32 %v4216_v60, %v2896_v28 }
 0xc25   : > { %2941 = vadd.xlane.f32.xlu1 %v2940_v53  ;;  %v3858_v44 = vpop.f32.mrf.mxu0 }
 0xc26   : > { %v2879_v1 = vadd.f32 %v3858_v44, %v5415_v11  ;;  %v2943_v11 = vsel %vm355_vm0, %v5492_v31, 0.0  ;;  %v2897_v37 = vadd.f32 %v5438_v24, %v2874_v36  ;;  %v2946_v41 = vsel %vm355_vm0, %v5516_v34, 0.0 }
 0xc27   : > { %v2850_v54 = vpop.f32.mrf.mxu0  ;;  %v5523_v25 = vadd.f32 %v4217_v3, %v2899_v40 }
 0xc28   : > { %v2902_v4 = vadd.f32 %v5438_v24, %v2879_v1  ;;  %v2877_v5 = vadd.f32 %v2850_v54, %v5419_v29  ;;  %v5530_v19 = vadd.f32 %v4218_v30, %v2897_v37 }
 0xc29   : > { %2935 = vadd.xlane.f32.xlu1 %v2934_v55  ;;  %v3859_v56 = vpop.f32.mrf.mxu0  ;;  %v2955_v23 = vsel %vm355_vm0, %v5523_v25, 0.0 }
 0xc2a   : > { %v5500_v15 = vadd.f32 %v4214_v57, %v2902_v4  ;;  %v2900_v17 = vadd.f32 %v5438_v24, %v2877_v5  ;;  %v2880_v29 = vadd.f32 %v3859_v56, %v5423_v6  ;;  %v2949_v42 = vsel %vm355_vm0, %v5530_v19, 0.0 }
 0xc2b   : > { %v2853_v50 = vpop.f32.mrf.mxu0 }
 0xc2c   : > { %v2964_v63 = vsel %vm355_vm0, %v5500_v15, 0.0  ;;  %v2878_v14 = vadd.f32 %v2853_v50, %v5425_v12  ;;  %v5537_v35 = vadd.f32 %v4219_v9, %v2900_v17  ;;  %v2903_v12 = vadd.f32 %v5438_v24, %v2880_v29 }
 0xc2d   : > { %2944 = vadd.xlane.f32.xlu1 %v2943_v11  ;;  %2965 = vadd.xlane.f32.xlu0 %v2964_v63 }
 0xc2e   : > { %v2901_v21 = vadd.f32 %v5438_v24, %v2878_v14  ;;  %v2958_v38 = vsel %vm355_vm0, %v5537_v35, 0.0  ;;  %v5548_v2 = vadd.f32 %v4221_v51, %v2903_v12 }
 0xc30   : > { %v5543_v61 = vadd.f32 %v4220_v26, %v2901_v21  ;;  %v2967_v59 = vsel %vm355_vm0, %v5548_v2, 0.0 }
 0xc31   : > { %2953 = vadd.xlane.f32.xlu1 %v2952_v43 }
 0xc32   : > { %v2961_v6 = vsel %vm355_vm0, %v5543_v61, 0.0 }
 0xc35   : > { %2947 = vadd.xlane.f32.xlu1 %v2946_v41 }
 0xc39   : > { %2956 = vadd.xlane.f32.xlu1 %v2955_v23 }
 0xc3d   : > { %2950 = vadd.xlane.f32.xlu1 %v2949_v42 }
 0xc41   : > { %2959 = vadd.xlane.f32.xlu1 %v2958_v38 }
 0xc45   : > { %2962 = vadd.xlane.f32.xlu1 %v2961_v6 }
 0xc49   : > { %2968 = vadd.xlane.f32.xlu1 %v2967_v59 }
 0xc9e   : > { %v2930_v13 = vpop.xlane.xlu1 %2929 }
 0xc9f   : > { %v2973_v24 = vmul.f32 0.03125, %v2930_v13 }
 0xca1   : > { %v5553_v48 = vsub.f32 %v5446_v18, %v2973_v24 }
 0xca2   : > { %v2924_v8 = vpop.xlane.xlu1 %2923 }
 0xca3   : > { %v2971_v46 = vmul.f32 0.03125, %v2924_v8  ;;  %v3005_v47 = vmul.f32 %v5553_v48, %v5553_v48 }
 0xca5   : > { %v5558_v39 = vsub.f32 %v5453_v16, %v2971_v46  ;;  %v3025_v49 = vsel %vm355_vm0, %v3005_v47, 0.0 }
 0xca6   : > { %v2933_v53 = vpop.xlane.xlu1 %2932  ;;  %3026 = vadd.xlane.f32.xlu0 %v3025_v49 }
 0xca7   : > { %v2974_v0 = vmul.f32 0.03125, %v2933_v53  ;;  %v3003_v44 = vmul.f32 %v5558_v39, %v5558_v39 }
 0xca9   : > { %v5564_v1 = vsub.f32 %v5460_v22, %v2974_v0  ;;  %v3019_v18 = vsel %vm355_vm0, %v3003_v44, 0.0 }
 0xcaa   : > { %v2927_v45 = vpop.xlane.xlu1 %2926  ;;  %3020 = vadd.xlane.f32.xlu0 %v3019_v18 }
 0xcab   : > { %v2972_v20 = vmul.f32 0.03125, %v2927_v45  ;;  %v3006_v16 = vmul.f32 %v5564_v1, %v5564_v1 }
 0xcac   : > { %v2939_v33 = vpop.xlane.xlu0 %2938 }
 0xcad   : > { %v5570_v7 = vsub.f32 %v5468_v27, %v2972_v20  ;;  %v3028_v4 = vsel %vm355_vm0, %v3006_v16, 0.0  ;;  %v2976_v54 = vmul.f32 0.03125, %v2939_v33 }
 0xcae   : > { %v2942_v55 = vpop.xlane.xlu1 %2941  ;;  %3029 = vadd.xlane.f32.xlu1 %v3028_v4 }
 0xcaf   : > { %v2977_v57 = vmul.f32 0.03125, %v2942_v55  ;;  %v3004_v22 = vmul.f32 %v5570_v7, %v5570_v7  ;;  %v5588_v56 = vsub.f32 %v5476_v62, %v2976_v54 }
 0xcb1   : > { %v5576_v11 = vsub.f32 %v5479_v32, %v2977_v57  ;;  %v3022_v28 = vsel %vm355_vm0, %v3004_v22, 0.0  ;;  %v3008_v62 = vmul.f32 %v5588_v56, %v5588_v56 }
 0xcb2   : > { %v2936_v63 = vpop.xlane.xlu1 %2935  ;;  %3023 = vadd.xlane.f32.xlu1 %v3022_v28 }
 0xcb3   : > { %v2975_v10 = vmul.f32 0.03125, %v2936_v63  ;;  %v3009_v27 = vmul.f32 %v5576_v11, %v5576_v11  ;;  %v3034_v21 = vsel %vm355_vm0, %v3008_v62, 0.0 }
 0xcb5   : > { %v5582_v40 = vsub.f32 %v5488_v52, %v2975_v10  ;;  %v3037_v36 = vsel %vm355_vm0, %v3009_v27, 0.0 }
 0xcb6   : > { %v2945_v43 = vpop.xlane.xlu1 %2944  ;;  %3038 = vadd.xlane.f32.xlu0 %v3037_v36  ;;  %v2966_v26 = vpop.xlane.xlu0 %2965 }
 0xcb7   : > { %v2978_v60 = vmul.f32 0.03125, %v2945_v43  ;;  %v3007_v32 = vmul.f32 %v5582_v40, %v5582_v40  ;;  %v2985_v59 = vmul.f32 0.03125, %v2966_v26 }
 0xcb9   : > { %v5591_v37 = vsub.f32 %v5492_v31, %v2978_v60  ;;  %v3031_v5 = vsel %vm355_vm0, %v3007_v32, 0.0  ;;  %v5624_v47 = vsub.f32 %v5500_v15, %v2985_v59 }
 0xcba   : > { %v2954_v41 = vpop.xlane.xlu1 %2953  ;;  %3032 = vadd.xlane.f32.xlu0 %v3031_v5 }
 0xcbb   : > { %v2981_v52 = vmul.f32 0.03125, %v2954_v41  ;;  %v3010_v3 = vmul.f32 %v5591_v37, %v5591_v37  ;;  %v3017_v15 = vmul.f32 %v5624_v47, %v5624_v47 }
 0xcbd   : > { %v5597_v50 = vsub.f32 %v5509_v58, %v2981_v52  ;;  %v3040_v17 = vsel %vm355_vm0, %v3010_v3, 0.0  ;;  %v3061_v55 = vsel %vm355_vm0, %v3017_v15, 0.0 }
 0xcbe   : > { %v2948_v14 = vpop.xlane.xlu1 %2947  ;;  %3041 = vadd.xlane.f32.xlu1 %v3040_v17  ;;  %v5651_v17 = vld [vmem:[%s5754_s6] ss:$0 sm:$0xff] }
 0xcbf   : > { %v2979_v31 = vmul.f32 0.03125, %v2948_v14  ;;  %v3013_v23 = vmul.f32 %v5597_v50, %v5597_v50 }
 0xcc1   : > { %v5605_v30 = vsub.f32 %v5516_v34, %v2979_v31  ;;  %v3049_v29 = vsel %vm355_vm0, %v3013_v23, 0.0  ;;  %v5657_v31 = vld [vmem:[%s5755_s7] ss:$0 sm:$0xff] }
 0xcc2   : > { %v2957_v58 = vpop.xlane.xlu1 %2956  ;;  %3050 = vadd.xlane.f32.xlu0 %v3049_v29  ;;  %3035 = vadd.xlane.f32.xlu1 %v3034_v21 }
 0xcc3   : > { %v2982_v42 = vmul.f32 0.03125, %v2957_v58  ;;  %v3011_v9 = vmul.f32 %v5605_v30, %v5605_v30 }
 0xcc5   : > { %v5612_v12 = vsub.f32 %v5523_v25, %v2982_v42  ;;  %v3043_v38 = vsel %vm355_vm0, %v3011_v9, 0.0 }
 0xcc6   : > { %v2951_v6 = vpop.xlane.xlu1 %2950  ;;  %3044 = vadd.xlane.f32.xlu0 %v3043_v38 }
 0xcc7   : > { %v2980_v34 = vmul.f32 0.03125, %v2951_v6  ;;  %v3014_v51 = vmul.f32 %v5612_v12, %v5612_v12 }
 0xcc9   : > { %v5618_v13 = vsub.f32 %v5530_v19, %v2980_v34  ;;  %v3052_v24 = vsel %vm355_vm0, %v3014_v51, 0.0 }
 0xcca   : > { %v2960_v8 = vpop.xlane.xlu1 %2959  ;;  %3053 = vadd.xlane.f32.xlu1 %v3052_v24 }
 0xccb   : > { %v2983_v46 = vmul.f32 0.03125, %v2960_v8  ;;  %v3012_v25 = vmul.f32 %v5618_v13, %v5618_v13 }
 0xccd   : > { %v5627_v49 = vsub.f32 %v5537_v35, %v2983_v46  ;;  %v3046_v53 = vsel %vm355_vm0, %v3012_v25, 0.0 }
 0xcce   : > { %3047 = vadd.xlane.f32.xlu1 %v3046_v53  ;;  %v2963_v0 = vpop.xlane.xlu1 %2962 }
 0xccf   : > { %v2984_v19 = vmul.f32 0.03125, %v2963_v0  ;;  %v3015_v44 = vmul.f32 %v5627_v49, %v5627_v49 }
 0xcd1   : > { %v5633_v18 = vsub.f32 %v5543_v61, %v2984_v19  ;;  %v3055_v45 = vsel %vm355_vm0, %v3015_v44, 0.0 }
 0xcd2   : > { %3056 = vadd.xlane.f32.xlu0 %v3055_v45  ;;  %v2969_v20 = vpop.xlane.xlu1 %2968 }
 0xcd3   : > { %v2986_v35 = vmul.f32 0.03125, %v2969_v20  ;;  %v3016_v16 = vmul.f32 %v5633_v18, %v5633_v18 }
 0xcd5   : > { %v5641_v4 = vsub.f32 %v5548_v2, %v2986_v35  ;;  %v3058_v57 = vsel %vm355_vm0, %v3016_v16, 0.0 }
 0xcd6   : > { %3062 = vadd.xlane.f32.xlu0 %v3061_v55  ;;  %3059 = vadd.xlane.f32.xlu1 %v3058_v57 }
 0xcd7   : > { %v3018_v61 = vmul.f32 %v5641_v4, %v5641_v4 }
 0xcd9   : > { %v3064_v22 = vsel %vm355_vm0, %v3018_v61, 0.0 }
 0xcda   : > { %3065 = vadd.xlane.f32.xlu1 %v3064_v22 }
 0xd2f   : > { %v3027_v28 = vpop.xlane.xlu0 %3026 }
 0xd30   : > { %v3069_v33 = vmul.f32 0.03125, %v3027_v28 }
 0xd32   : > { %v3085_v63 = vadd.f32 1e-05, %v3069_v33 }
 0xd33   : > { %v3021_v10 = vpop.xlane.xlu0 %3020 }
 0xd34   : > { %4173 = vrsqrt.f32 %v3085_v63  ;;  %v3067_v27 = vmul.f32 0.03125, %v3021_v10 }
 0xd36   : > { %v3083_v2 = vadd.f32 1e-05, %v3067_v27 }
 0xd37   : > { %v3030_v54 = vpop.xlane.xlu1 %3029 }
 0xd38   : > { %4175 = vrsqrt.f32 %v3083_v2  ;;  %v3070_v36 = vmul.f32 0.03125, %v3030_v54 }
 0xd3a   : > { %v3086_v43 = vadd.f32 1e-05, %v3070_v36 }
 0xd3b   : > { %v3024_v60 = vpop.xlane.xlu1 %3023 }
 0xd3c   : > { %4177 = vrsqrt.f32 %v3086_v43  ;;  %v3068_v32 = vmul.f32 0.03125, %v3024_v60 }
 0xd3e   : > { %v3084_v5 = vadd.f32 1e-05, %v3068_v32 }
 0xd3f   : > { %v3039_v41 = vpop.xlane.xlu0 %3038 }
 0xd40   : > { %4179 = vrsqrt.f32 %v3084_v5  ;;  %v3073_v52 = vmul.f32 0.03125, %v3039_v41 }
 0xd41   : > { %v4174_v3 = vpop.eup %4173 }
 0xd42   : > { %v3117_v62 = vmul.f32 %v4174_v3, %v5553_v48  ;;  %v3089_v14 = vadd.f32 1e-05, %v3073_v52 }
 0xd43   : > { %v3033_v23 = vpop.xlane.xlu0 %3032 }
 0xd44   : > { %v3139_v29 = vmul.f32 %v5651_v17, %v3117_v62  ;;  %4181 = vrsqrt.f32 %v3089_v14  ;;  %v3071_v21 = vmul.f32 0.03125, %v3033_v23 }
 0xd45   : > { %v4176_v58 = vpop.eup %4175 }
 0xd46   : > { %v3161_v48 = vadd.f32 %v5657_v31, %v3139_v29  ;;  %v3115_v42 = vmul.f32 %v4176_v58, %v5558_v39  ;;  %v3087_v9 = vadd.f32 1e-05, %v3071_v21 }
 0xd47   : > { %v3042_v38 = vpop.xlane.xlu1 %3041 }
 0xd48   : > { %3177 = vst.msk [vmem:[%s5665_s9 + $0x10] sm:$0xff] %vm355_vm0, %v3161_v48  ;;  %v3137_v26 = vmul.f32 %v5651_v17, %v3115_v42  ;;  %4183 = vrsqrt.f32 %v3087_v9  ;;  %v3074_v6 = vmul.f32 0.03125, %v3042_v38 }
 0xd49   : > { %v4178_v34 = vpop.eup %4177 }
 0xd4a   : > { %v3159_v51 = vadd.f32 %v5657_v31, %v3137_v26  ;;  %v3118_v59 = vmul.f32 %v4178_v34, %v5564_v1  ;;  %v3090_v24 = vadd.f32 1e-05, %v3074_v6 }
 0xd4b   : > { %v3051_v8 = vpop.xlane.xlu0 %3050  ;;  %v3036_v46 = vpop.xlane.xlu1 %3035 }
 0xd4c   : > { %3175 = vst.msk [vmem:[%s5665_s9] sm:$0xff] %vm355_vm0, %v3159_v51  ;;  %v3140_v39 = vmul.f32 %v5651_v17, %v3118_v59  ;;  %4185 = vrsqrt.f32 %v3090_v24  ;;  %v3077_v25 = vmul.f32 0.03125, %v3051_v8  ;;  %v3072_v53 = vmul.f32 0.03125, %v3036_v46 }
 0xd4d   : > { %v4180_v0 = vpop.eup %4179 }
 0xd4e   : > { %v3162_v19 = vadd.f32 %v5657_v31, %v3140_v39  ;;  %v3116_v44 = vmul.f32 %v4180_v0, %v5570_v7  ;;  %v3093_v45 = vadd.f32 1e-05, %v3077_v25  ;;  %v3088_v15 = vadd.f32 1e-05, %v3072_v53 }
 0xd4f   : > { %v3045_v20 = vpop.xlane.xlu0 %3044 }
 0xd50   : > { %3178 = vst.msk [vmem:[%s5665_s9 + $0x18] sm:$0xff] %vm355_vm0, %v3162_v19  ;;  %v3138_v1 = vmul.f32 %v5651_v17, %v3116_v44  ;;  %4187 = vrsqrt.f32 %v3093_v45  ;;  %v3075_v35 = vmul.f32 0.03125, %v3045_v20 }
 0xd51   : > { %v4182_v16 = vpop.eup %4181  ;;  %4189 = vrsqrt.f32 %v3088_v15 }
 0xd52   : > { %v3160_v55 = vadd.f32 %v5657_v31, %v3138_v1  ;;  %v3121_v57 = vmul.f32 %v4182_v16, %v5576_v11  ;;  %v3091_v61 = vadd.f32 1e-05, %v3075_v35 }
 0xd53   : > { %v3054_v22 = vpop.xlane.xlu1 %3053 }
 0xd54   : > { %3176 = vst.msk [vmem:[%s5665_s9 + $0x8] sm:$0xff] %vm355_vm0, %v3160_v55  ;;  %v3143_v7 = vmul.f32 %v5651_v17, %v3121_v57  ;;  %4191 = vrsqrt.f32 %v3091_v61  ;;  %v3078_v28 = vmul.f32 0.03125, %v3054_v22 }
 0xd55   : > { %v4184_v33 = vpop.eup %4183 }
 0xd56   : > { %v3165_v63 = vadd.f32 %v5657_v31, %v3143_v7  ;;  %v3119_v10 = vmul.f32 %v4184_v33, %v5582_v40  ;;  %v3094_v27 = vadd.f32 1e-05, %v3078_v28 }
 0xd57   : > { %v3048_v2 = vpop.xlane.xlu1 %3047 }
 0xd58   : > { %3181 = vst.msk [vmem:[%s5665_s9 + $0x30] sm:$0xff] %vm355_vm0, %v3165_v63  ;;  %v3141_v11 = vmul.f32 %v5651_v17, %v3119_v10  ;;  %4193 = vrsqrt.f32 %v3094_v27  ;;  %v3076_v54 = vmul.f32 0.03125, %v3048_v2 }
 0xd59   : > { %v4186_v36 = vpop.eup %4185 }
 0xd5a   : > { %v3163_v43 = vadd.f32 %v5657_v31, %v3141_v11  ;;  %v3122_v60 = vmul.f32 %v4186_v36, %v5591_v37  ;;  %v3092_v32 = vadd.f32 1e-05, %v3076_v54 }
 0xd5b   : > { %v3057_v5 = vpop.xlane.xlu0 %3056 }
 0xd5c   : > { %3179 = vst.msk [vmem:[%s5665_s9 + $0x20] sm:$0xff] %vm355_vm0, %v3163_v43  ;;  %v3144_v40 = vmul.f32 %v5651_v17, %v3122_v60  ;;  %4195 = vrsqrt.f32 %v3092_v32  ;;  %v3079_v41 = vmul.f32 0.03125, %v3057_v5 }
 0xd5d   : > { %v4188_v52 = vpop.eup %4187 }
 0xd5e   : > { %v4190_v3 = vpop.eup %4189  ;;  %v3166_v62 = vadd.f32 %v5657_v31, %v3144_v40  ;;  %v3125_v14 = vmul.f32 %v4188_v52, %v5597_v50  ;;  %v3095_v23 = vadd.f32 1e-05, %v3079_v41 }
 0xd5f   : > { %v3120_v29 = vmul.f32 %v4190_v3, %v5588_v56  ;;  %v3063_v21 = vpop.xlane.xlu0 %3062  ;;  %v3060_v37 = vpop.xlane.xlu1 %3059 }
 0xd60   : > { %3182 = vst.msk [vmem:[%s5665_s9 + $0x38] sm:$0xff] %vm355_vm0, %v3166_v62  ;;  %v3147_v58 = vmul.f32 %v5651_v17, %v3125_v14  ;;  %4197 = vrsqrt.f32 %v3095_v23  ;;  %v3081_v48 = vmul.f32 0.03125, %v3063_v21  ;;  %v3080_v42 = vmul.f32 0.03125, %v3060_v37 }
 0xd61   : > { %v4192_v9 = vpop.eup %4191  ;;  %v3142_v38 = vmul.f32 %v5651_v17, %v3120_v29 }
 0xd62   : > { %v3169_v26 = vadd.f32 %v5657_v31, %v3147_v58  ;;  %v3123_v50 = vmul.f32 %v4192_v9, %v5605_v30  ;;  %v3097_v56 = vadd.f32 1e-05, %v3081_v48  ;;  %v3096_v6 = vadd.f32 1e-05, %v3080_v42 }
 0xd63   : > { %v3164_v34 = vadd.f32 %v5657_v31, %v3142_v38  ;;  %v3066_v51 = vpop.xlane.xlu1 %3065 }
 0xd64   : > { %3185 = vst.msk [vmem:[%s5665_s9 + $0x50] sm:$0xff] %vm355_vm0, %v3169_v26  ;;  %v3145_v59 = vmul.f32 %v5651_v17, %v3123_v50  ;;  %4199 = vrsqrt.f32 %v3097_v56  ;;  %v3082_v24 = vmul.f32 0.03125, %v3066_v51 }
 0xd65   : > { %v4194_v8 = vpop.eup %4193  ;;  %3180 = vst.msk [vmem:[%s5665_s9 + $0x28] sm:$0xff] %vm355_vm0, %v3164_v34  ;;  %4201 = vrsqrt.f32 %v3096_v6 }
 0xd66   : > { %v3167_v46 = vadd.f32 %v5657_v31, %v3145_v59  ;;  %v3126_v30 = vmul.f32 %v4194_v8, %v5612_v12  ;;  %v3098_v39 = vadd.f32 1e-05, %v3082_v24 }
 0xd68   : > { %3183 = vst.msk [vmem:[%s5665_s9 + $0x40] sm:$0xff] %vm355_vm0, %v3167_v46  ;;  %v3148_v25 = vmul.f32 %v5651_v17, %v3126_v30  ;;  %4203 = vrsqrt.f32 %v3098_v39 }
 0xd69   : > { %v4196_v53 = vpop.eup %4195 }
 0xd6a   : > { %v3170_v0 = vadd.f32 %v5657_v31, %v3148_v25  ;;  %v3124_v19 = vmul.f32 %v4196_v53, %v5618_v13 }
 0xd6c   : > { %3186 = vst.msk [vmem:[%s5665_s9 + $0x58] sm:$0xff] %vm355_vm0, %v3170_v0  ;;  %v3146_v44 = vmul.f32 %v5651_v17, %v3124_v19 }
 0xd6d   : > { %v4198_v45 = vpop.eup %4197 }
 0xd6e   : > { %v3168_v15 = vadd.f32 %v5657_v31, %v3146_v44  ;;  %v3127_v12 = vmul.f32 %v4198_v45, %v5627_v49 }
 0xd70   : > { %3184 = vst.msk [vmem:[%s5665_s9 + $0x48] sm:$0xff] %vm355_vm0, %v3168_v15  ;;  %v3149_v20 = vmul.f32 %v5651_v17, %v3127_v12 }
 0xd71   : > { %v4200_v1 = vpop.eup %4199 }
 0xd72   : > { %v4202_v35 = vpop.eup %4201  ;;  %v3171_v13 = vadd.f32 %v5657_v31, %v3149_v20  ;;  %v3129_v16 = vmul.f32 %v4200_v1, %v5624_v47 }
 0xd73   : > { %v3128_v55 = vmul.f32 %v4202_v35, %v5633_v18 }
 0xd74   : > { %3187 = vst.msk [vmem:[%s5665_s9 + $0x60] sm:$0xff] %vm355_vm0, %v3171_v13  ;;  %v3151_v57 = vmul.f32 %v5651_v17, %v3129_v16 }
 0xd75   : > { %v4204_v61 = vpop.eup %4203  ;;  %v3150_v49 = vmul.f32 %v5651_v17, %v3128_v55 }
 0xd76   : > { %v3173_v22 = vadd.f32 %v5657_v31, %v3151_v57  ;;  %v3130_v7 = vmul.f32 %v4204_v61, %v5641_v4 }
 0xd77   : > { %v3172_v28 = vadd.f32 %v5657_v31, %v3150_v49 }
 0xd78   : > { %3189 = vst.msk [vmem:[%s5665_s9 + $0x70] sm:$0xff] %vm355_vm0, %v3173_v22  ;;  %v3152_v33 = vmul.f32 %v5651_v17, %v3130_v7 }
 0xd79   : > { %3188 = vst.msk [vmem:[%s5665_s9 + $0x68] sm:$0xff] %vm355_vm0, %v3172_v28 }
 0xd7a   : > { %v3174_v47 = vadd.f32 %v5657_v31, %v3152_v33 }
 0xd7c   : > { %3190 = vst.msk [vmem:[%s5665_s9 + $0x78] sm:$0xff] %vm355_vm0, %v3174_v47 }
 0xd7d PF: > { %s18_s27 = sadd.s32 1, %s4228_s27  }
 0xd7e   : > { %p15_p4 = scmp.ge.s32.totalorder %s18_s27, 4  }
 0xd80   :  { %17 = sbr.rel (!%p15_p4) target bundleno = 1 (0x1), region = 82 }

// kernel: vit_forward.8
= control target key start
LH: loop header
LB: loop body
LE: loop exit
PB: predicated region body
PF: predicated region fallthrough
CT: control target
= control target key end

     0   :  { %vm102_vm0 = vcmask 261120   ;;  %s4318_s1 = inlined_call_operand.vmem [shape: bf16[32,128], index: 1, kind: input, shape index: {}]   ;;  %s4319_s0 = inlined_call_operand.vmem [shape: f32[256,32], index: 0, kind: input, shape index: {}]   ;;  %s4320_s4 = inlined_call_operand.vmem [shape: f32[1,32], index: 4, kind: input, shape index: {}]   ;;  %s4321_s3 = inlined_call_operand.vmem [shape: bf16[128,32], index: 3, kind: input, shape index: {}]   ;;  %s4322_s2 = inlined_call_operand.vmem [shape: f32[1,128], index: 2, kind: input, shape index: {}]   ;;  %s4323_s5 = inlined_call_operand.vmem [shape: f32[1,32], index: 5, kind: input, shape index: {}]   ;;  %s4324_s6 = inlined_call_operand.vmem [shape: f32[1,32], index: 6, kind: input, shape index: {}]   ;;  %s4325_s7 = inlined_call_operand.vmem [shape: f32[256,32], index: 7, kind: output, shape index: {}]  }
   0x1   :  { %v2323_v0 = vld [vmem:[%s4318_s1 + $0x8] sm:$0xff]   ;;  %v2324_v1 = vld [vmem:[%s4318_s1] sm:$0xff]   ;;  %v29_v8 = vld [vmem:[%s4319_s0 + $0x10] sm:$0xff] }
   0x2   :  { %2223 = vmatprep.subr.bf16.mxu0 %v2323_v0  ;;  %v27_v2 = vld [vmem:[%s4319_s0] sm:$0xff]  ;;  %v28_v3 = vld [vmem:[%s4319_s0 + $0x8] sm:$0xff]  ;;  %v30_v9 = vld [vmem:[%s4319_s0 + $0x18] sm:$0xff] }
   0x3   :  { %v2581_v4 = vld [vmem:[%s4320_s4] ss:$0 sm:$0xff]  ;;  %2224 = vmatpush3.bf16.msra.mxu0 %v2323_v0  ;;  %v139_v7 = vpack.c.bf16 %v28_v3, %v27_v2  ;;  %v32_v13 = vld [vmem:[%s4319_s0 + $0x28] sm:$0xff]  ;;  %v2603_v15 = vld [vmem:[%s4319_s0 + $0x30] sm:$0xff]  ;;  %v140_v22 = vpack.c.bf16 %v30_v9, %v29_v8 }
   0x4   :  { %v70_v5 = vadd.f32 %v2581_v4, %v27_v2  ;;  %v71_v6 = vadd.f32 %v2581_v4, %v28_v3  ;;  %v31_v10 = vld [vmem:[%s4319_s0 + $0x20] sm:$0xff]  ;;  %2225 = vmatprep.subr.bf16.mxu0 %v2324_v1  ;;  %v72_v11 = vadd.f32 %v2581_v4, %v29_v8  ;;  %v73_v12 = vadd.f32 %v2581_v4, %v30_v9  ;;  %v2608_v16 = vld [vmem:[%s4319_s0 + $0x38] sm:$0xff]  ;;  %v2626_v21 = vld [vmem:[%s4319_s0 + $0x48] sm:$0xff] }
   0x5   :  { %v74_v14 = vadd.f32 %v2581_v4, %v31_v10  ;;  %2227 = vmatprep.mubr.msk.bf16.mxu0 %vm102_vm0, %v139_v7  ;;  %v75_v17 = vadd.f32 %v2581_v4, %v32_v13  ;;  %v76_v18 = vadd.f32 %v2581_v4, %v2603_v15  ;;  %v77_v19 = vadd.f32 %v2581_v4, %v2608_v16  ;;  %v2621_v20 = vld [vmem:[%s4319_s0 + $0x40] sm:$0xff]  ;;  %v2638_v25 = vld [vmem:[%s4319_s0 + $0x50] sm:$0xff]  ;;  %v2643_v26 = vld [vmem:[%s4319_s0 + $0x58] sm:$0xff] }
   0x6   :  { %103 = vst.msk [vmem:[#allocation2] sm:$0xff] %vm102_vm0, %v70_v5  ;;  %104 = vst.msk [vmem:[#allocation2 + $0x8] sm:$0xff] %vm102_vm0, %v71_v6  ;;  %v78_v23 = vadd.f32 %v2581_v4, %v2621_v20  ;;  %v79_v24 = vadd.f32 %v2581_v4, %v2626_v21  ;;  %v2648_v27 = vld [vmem:[%s4319_s0 + $0x60] sm:$0xff]  ;;  %v141_v28 = vpack.c.bf16 %v32_v13, %v31_v10  ;;  %v2660_v31 = vld [vmem:[%s4319_s0 + $0x68] sm:$0xff] }
   0x7   :  { %105 = vst.msk [vmem:[#allocation2 + $0x10] sm:$0xff] %vm102_vm0, %v72_v11  ;;  %106 = vst.msk [vmem:[#allocation2 + $0x18] sm:$0xff] %vm102_vm0, %v73_v12  ;;  %2226 = vmatpush3.bf16.msra.mxu0 %v2324_v1  ;;  %v80_v29 = vadd.f32 %v2581_v4, %v2638_v25  ;;  %v81_v30 = vadd.f32 %v2581_v4, %v2643_v26  ;;  %v82_v32 = vadd.f32 %v2581_v4, %v2648_v27  ;;  %v2667_v33 = vld [vmem:[%s4319_s0 + $0x70] sm:$0xff]  ;;  %v2672_v34 = vld [vmem:[%s4319_s0 + $0x78] sm:$0xff] }
   0x8   :  { %107 = vst.msk [vmem:[#allocation2 + $0x20] sm:$0xff] %vm102_vm0, %v74_v14  ;;  %108 = vst.msk [vmem:[#allocation2 + $0x28] sm:$0xff] %vm102_vm0, %v75_v17  ;;  %v83_v35 = vadd.f32 %v2581_v4, %v2660_v31  ;;  %v84_v36 = vadd.f32 %v2581_v4, %v2667_v33  ;;  %v85_v37 = vadd.f32 %v2581_v4, %v2672_v34  ;;  %v2685_v38 = vld [vmem:[%s4319_s0 + $0x80] sm:$0xff]  ;;  %v2690_v39 = vld [vmem:[%s4319_s0 + $0x88] sm:$0xff] }
   0x9   :  { %109 = vst.msk [vmem:[#allocation2 + $0x30] sm:$0xff] %vm102_vm0, %v76_v18  ;;  %110 = vst.msk [vmem:[#allocation2 + $0x38] sm:$0xff] %vm102_vm0, %v77_v19  ;;  %v86_v40 = vadd.f32 %v2581_v4, %v2685_v38  ;;  %v87_v41 = vadd.f32 %v2581_v4, %v2690_v39  ;;  %v2702_v42 = vld [vmem:[%s4319_s0 + $0x90] sm:$0xff]  ;;  %v2707_v43 = vld [vmem:[%s4319_s0 + $0x98] sm:$0xff]  ;;  %v142_v3 = vpack.c.bf16 %v2608_v16, %v2603_v15 }
   0xa   :  { %111 = vst.msk [vmem:[#allocation2 + $0x40] sm:$0xff] %vm102_vm0, %v78_v23  ;;  %112 = vst.msk [vmem:[#allocation2 + $0x48] sm:$0xff] %vm102_vm0, %v79_v24  ;;  %v2712_v44 = vld [vmem:[%s4319_s0 + $0xa0] sm:$0xff]  ;;  %2228 = vmatmul.mubr.msk.bf16.vlgmr.msra.gmra.mxu0 %vm102_vm0, %v140_v22  ;;  %v88_v45 = vadd.f32 %v2581_v4, %v2702_v42  ;;  %v89_v46 = vadd.f32 %v2581_v4, %v2707_v43  ;;  %v48_v47 = vld [vmem:[%s4319_s0 + $0xa8] sm:$0xff]  ;;  %v143_v8 = vpack.c.bf16 %v2626_v21, %v2621_v20 }
   0xb   :  { %113 = vst.msk [vmem:[#allocation2 + $0x50] sm:$0xff] %vm102_vm0, %v80_v29  ;;  %114 = vst.msk [vmem:[#allocation2 + $0x58] sm:$0xff] %vm102_vm0, %v81_v30  ;;  %v90_v48 = vadd.f32 %v2581_v4, %v2712_v44  ;;  %v49_v49 = vld [vmem:[%s4319_s0 + $0xb0] sm:$0xff]  ;;  %v50_v50 = vld [vmem:[%s4319_s0 + $0xb8] sm:$0xff]  ;;  %2231 = vmatprep.mubr.msk.bf16.mxu0 %vm102_vm0, %v141_v28  ;;  %v91_v51 = vadd.f32 %v2581_v4, %v48_v47  ;;  %v145_v9 = vpack.c.bf16 %v2660_v31, %v2648_v27 }
   0xc   :  { %115 = vst.msk [vmem:[#allocation2 + $0x60] sm:$0xff] %vm102_vm0, %v82_v32  ;;  %116 = vst.msk [vmem:[#allocation2 + $0x68] sm:$0xff] %vm102_vm0, %v83_v35  ;;  %v92_v52 = vadd.f32 %v2581_v4, %v49_v49  ;;  %v93_v53 = vadd.f32 %v2581_v4, %v50_v50  ;;  %v51_v54 = vld [vmem:[%s4319_s0 + $0xc0] sm:$0xff]  ;;  %v52_v55 = vld [vmem:[%s4319_s0 + $0xc8] sm:$0xff]  ;;  %v146_v10 = vpack.c.bf16 %v2672_v34, %v2667_v33 }
   0xd   :  { %117 = vst.msk [vmem:[#allocation2 + $0x70] sm:$0xff] %vm102_vm0, %v84_v36  ;;  %118 = vst.msk [vmem:[#allocation2 + $0x78] sm:$0xff] %vm102_vm0, %v85_v37  ;;  %v94_v56 = vadd.f32 %v2581_v4, %v51_v54  ;;  %v95_v57 = vadd.f32 %v2581_v4, %v52_v55  ;;  %v53_v58 = vld [vmem:[%s4319_s0 + $0xd0] sm:$0xff]  ;;  %v54_v59 = vld [vmem:[%s4319_s0 + $0xd8] sm:$0xff]  ;;  %v147_v11 = vpack.c.bf16 %v2690_v39, %v2685_v38 }
   0xe   :  { %119 = vst.msk [vmem:[#allocation2 + $0x80] sm:$0xff] %vm102_vm0, %v86_v40  ;;  %120 = vst.msk [vmem:[#allocation2 + $0x88] sm:$0xff] %vm102_vm0, %v87_v41  ;;  %v55_v60 = vld [vmem:[%s4319_s0 + $0xe0] sm:$0xff]  ;;  %v96_v61 = vadd.f32 %v2581_v4, %v53_v58  ;;  %v97_v62 = vadd.f32 %v2581_v4, %v54_v59  ;;  %v56_v63 = vld [vmem:[%s4319_s0 + $0xe8] sm:$0xff]  ;;  %v148_v12 = vpack.c.bf16 %v2707_v43, %v2702_v42 }
   0xf   :  { %121 = vst.msk [vmem:[#allocation2 + $0x90] sm:$0xff] %vm102_vm0, %v88_v45  ;;  %122 = vst.msk [vmem:[#allocation2 + $0x98] sm:$0xff] %vm102_vm0, %v89_v46  ;;  %v98_v0 = vadd.f32 %v2581_v4, %v55_v60  ;;  %v57_v1 = vld [vmem:[%s4319_s0 + $0xf0] sm:$0xff]  ;;  %v58_v2 = vld [vmem:[%s4319_s0 + $0xf8] sm:$0xff]  ;;  %v99_v5 = vadd.f32 %v2581_v4, %v56_v63  ;;  %v149_v13 = vpack.c.bf16 %v48_v47, %v2712_v44 }
  0x10   :  { %123 = vst.msk [vmem:[#allocation2 + $0xa0] sm:$0xff] %vm102_vm0, %v90_v48  ;;  %124 = vst.msk [vmem:[#allocation2 + $0xa8] sm:$0xff] %vm102_vm0, %v91_v51  ;;  %v100_v6 = vadd.f32 %v2581_v4, %v57_v1  ;;  %v101_v7 = vadd.f32 %v2581_v4, %v58_v2  ;;  %v144_v4 = vpack.c.bf16 %v2643_v26, %v2638_v25  ;;  %v2325_v19 = vld [vmem:[%s4321_s3 + $0x38] sm:$0xff]   ;;  %v2326_v20 = vld [vmem:[%s4321_s3 + $0x30] sm:$0xff]  }
  0x11   :  { %125 = vst.msk [vmem:[#allocation2 + $0xb0] sm:$0xff] %vm102_vm0, %v92_v52  ;;  %126 = vst.msk [vmem:[#allocation2 + $0xb8] sm:$0xff] %vm102_vm0, %v93_v53  ;;  %v150_v14 = vpack.c.bf16 %v50_v50, %v49_v49  ;;  %v151_v15 = vpack.c.bf16 %v52_v55, %v51_v54  ;;  %v152_v16 = vpack.c.bf16 %v54_v59, %v53_v58  ;;  %2259 = vmatprep.subr.bf16.mxu0 %v2325_v19  ;;  %v2327_v21 = vld [vmem:[%s4321_s3 + $0x28] sm:$0xff]   ;;  %v2328_v22 = vld [vmem:[%s4321_s3 + $0x20] sm:$0xff]  }
  0x12   :  { %127 = vst.msk [vmem:[#allocation2 + $0xc0] sm:$0xff] %vm102_vm0, %v94_v56  ;;  %128 = vst.msk [vmem:[#allocation2 + $0xc8] sm:$0xff] %vm102_vm0, %v95_v57  ;;  %2232 = vmatmul.mubr.msk.bf16.gmra.mxu0 %vm102_vm0, %v142_v3  ;;  %v153_v17 = vpack.c.bf16 %v56_v63, %v55_v60  ;;  %v154_v18 = vpack.c.bf16 %v58_v2, %v57_v1  ;;  %2307 = vmatprep.subr.bf16.mxu1 %v2325_v19  ;;  %v2329_v23 = vld [vmem:[%s4321_s3 + $0x18] sm:$0xff]   ;;  %v2330_v24 = vld [vmem:[%s4321_s3 + $0x10] sm:$0xff]  }
  0x13   :  { %129 = vst.msk [vmem:[#allocation2 + $0xd0] sm:$0xff] %vm102_vm0, %v96_v61  ;;  %130 = vst.msk [vmem:[#allocation2 + $0xd8] sm:$0xff] %vm102_vm0, %v97_v62  ;;  %2235 = vmatprep.mubr.msk.bf16.mxu0 %vm102_vm0, %v143_v8  ;;  %2260 = vmatpush3.bf16.msra.mxu0 %v2325_v19  ;;  %v2331_v27 = vld [vmem:[%s4321_s3 + $0x8] sm:$0xff]   ;;  %v2837_v28 = vld [vmem:[%s4322_s2] ss:$0 sm:$0xff] }
  0x14   :  { %131 = vst.msk [vmem:[#allocation2 + $0xe0] sm:$0xff] %vm102_vm0, %v98_v0  ;;  %132 = vst.msk [vmem:[#allocation2 + $0xe8] sm:$0xff] %vm102_vm0, %v99_v5  ;;  %2315 = vmatpush3.bf16.msra.mxu1 %v2325_v19  ;;  %2261 = vmatprep.subr.bf16.mxu0 %v2326_v20  ;;  %v2332_v50 = vld [vmem:[%s4321_s3] sm:$0xff]  }
  0x15   :  { %133 = vst.msk [vmem:[#allocation2 + $0xf0] sm:$0xff] %vm102_vm0, %v100_v6  ;;  %134 = vst.msk [vmem:[#allocation2 + $0xf8] sm:$0xff] %vm102_vm0, %v101_v7  ;;  %2308 = vmatprep.subr.bf16.mxu1 %v2326_v20 }
  0x17   :  { %2262 = vmatpush3.bf16.msra.mxu0 %v2326_v20 }
  0x18   :  { %2316 = vmatpush3.bf16.msra.mxu1 %v2326_v20  ;;  %2263 = vmatprep.subr.bf16.mxu0 %v2327_v21 }
  0x19   :  { %2309 = vmatprep.subr.bf16.mxu1 %v2327_v21 }
  0x1a   :  { %2236 = vmatmul.mubr.msk.bf16.gmra.mxu0 %vm102_vm0, %v144_v4 }
  0x1b   :  { %2239 = vmatprep.mubr.msk.bf16.mxu0 %vm102_vm0, %v145_v9  ;;  %2264 = vmatpush3.bf16.msra.mxu0 %v2327_v21 }
  0x1c   :  { %2317 = vmatpush3.bf16.msra.mxu1 %v2327_v21  ;;  %2265 = vmatprep.subr.bf16.mxu0 %v2328_v22 }
  0x1d   :  { %2310 = vmatprep.subr.bf16.mxu1 %v2328_v22 }
  0x1f   :  { %2266 = vmatpush3.bf16.msra.mxu0 %v2328_v22 }
  0x20   :  { %2318 = vmatpush3.bf16.msra.mxu1 %v2328_v22  ;;  %2267 = vmatprep.subr.bf16.mxu0 %v2329_v23 }
  0x21   :  { %2311 = vmatprep.subr.bf16.mxu1 %v2329_v23 }
  0x22   :  { %2240 = vmatmul.mubr.msk.bf16.gmra.mxu0 %vm102_vm0, %v146_v10 }
  0x23   :  { %2243 = vmatprep.mubr.msk.bf16.mxu0 %vm102_vm0, %v147_v11  ;;  %2268 = vmatpush3.bf16.msra.mxu0 %v2329_v23 }
  0x24   :  { %2319 = vmatpush3.bf16.msra.mxu1 %v2329_v23  ;;  %2269 = vmatprep.subr.bf16.mxu0 %v2330_v24 }
  0x25   :  { %2312 = vmatprep.subr.bf16.mxu1 %v2330_v24 }
  0x27   :  { %2270 = vmatpush3.bf16.msra.mxu0 %v2330_v24 }
  0x28   :  { %2320 = vmatpush3.bf16.msra.mxu1 %v2330_v24  ;;  %2271 = vmatprep.subr.bf16.mxu0 %v2331_v27 }
  0x29   :  { %2313 = vmatprep.subr.bf16.mxu1 %v2331_v27 }
  0x2a   :  { %2244 = vmatmul.mubr.msk.bf16.gmra.mxu0 %vm102_vm0, %v148_v12 }
  0x2b   :  { %2247 = vmatprep.mubr.msk.bf16.mxu0 %vm102_vm0, %v149_v13  ;;  %2272 = vmatpush3.bf16.msra.mxu0 %v2331_v27 }
  0x2c   :  { %2321 = vmatpush3.bf16.msra.mxu1 %v2331_v27  ;;  %2273 = vmatprep.subr.bf16.mxu0 %v2332_v50 }
  0x2d   :  { %2314 = vmatprep.subr.bf16.mxu1 %v2332_v50 }
  0x2f   :  { %2274 = vmatpush3.bf16.msra.mxu0 %v2332_v50 }
  0x30   :  { %2322 = vmatpush3.bf16.msra.mxu1 %v2332_v50 }
  0x32   :  { %2248 = vmatmul.mubr.msk.bf16.gmra.mxu0 %vm102_vm0, %v150_v14 }
  0x33   :  { %2251 = vmatprep.mubr.msk.bf16.mxu0 %vm102_vm0, %v151_v15 }
  0x3a   :  { %2252 = vmatmul.mubr.msk.bf16.gmra.mxu0 %vm102_vm0, %v152_v16 }
  0x3b   :  { %2255 = vmatprep.mubr.msk.bf16.mxu0 %vm102_vm0, %v153_v17 }
  0x42   :  { %2256 = vmatmul.mubr.msk.bf16.gmra.mxu0 %vm102_vm0, %v154_v18 }
  0xca   :  { %v2229_v25 = vpop.f32.mrf.mxu0 }
  0xcb   :  { %v2840_v30 = vadd.f32 %v2229_v25, %v2837_v28 }
  0xcc   :  { %v257_v26 = vpop.f32.mrf.mxu0 }
  0xcd   :  { %v2843_v31 = vadd.f32 %v2837_v28, %v257_v26  ;;  %v2849_v34 = vmul.f32 0.70710677, %v2840_v30 }
  0xce   :  { %v2230_v29 = vpop.f32.mrf.mxu0 }
  0xcf   :  { %v2846_v33 = vadd.f32 %v2230_v29, %v2837_v28  ;;  %v2852_v35 = vmul.f32 0.70710677, %v2843_v31  ;;  %v450_v39 = vand.u32 2147483647, %v2849_v34  ;;  %vm1090_vm1 = vcmp.ge.f32.partialorder %v2849_v34, 0.0 }
  0xd0   :  { %v260_v32 = vpop.f32.mrf.mxu0 }
  0xd1   :  { %v2855_v37 = vmul.f32 0.70710677, %v2846_v33  ;;  %v2858_v38 = vadd.f32 %v2837_v28, %v260_v32  ;;  %v2862_v40 = vand.u32 2147483647, %v2852_v35  ;;  %v482_v44 = vmul.f32 0.3275911, %v450_v39 }
  0xd2   :  { %v2233_v36 = vpop.f32.mrf.mxu0  ;;  %v898_v11 = vsub.f32 0.0, %v450_v39  ;;  %vm1088_vm2 = vcmp.ge.f32.partialorder %v2852_v35, 0.0 }
  0xd3   :  { %v2865_v42 = vand.u32 2147483647, %v2855_v37  ;;  %v2868_v43 = vmul.f32 0.70710677, %v2858_v38  ;;  %v2871_v45 = vadd.f32 %v2233_v36, %v2837_v28  ;;  %v480_v46 = vmul.f32 0.3275911, %v2862_v40 }
  0xd4   :  { %v273_v41 = vpop.f32.mrf.mxu0  ;;  %v514_v51 = vadd.f32 1.0, %v482_v44  ;;  %v896_v18 = vsub.f32 0.0, %v2862_v40  ;;  %v930_v21 = vmul.f32 %v898_v11, %v450_v39  ;;  %v2940_v36 = vmul.f32 0.5, %v2840_v30 }
  0xd5   :  { %v483_v48 = vmul.f32 0.3275911, %v2865_v42  ;;  %v2876_v49 = vand.u32 2147483647, %v2868_v43  ;;  %v2882_v52 = vmul.f32 0.70710677, %v2871_v45  ;;  %v274_v22 = vadd.f32 %v2837_v28, %v273_v41 }
  0xd6   :  { %v2234_v47 = vpop.f32.mrf.mxu0  ;;  %v512_v53 = vadd.f32 1.0, %v480_v46  ;;  %2333 = vrcp.f32 %v514_v51  ;;  %v899_v24 = vsub.f32 0.0, %v2865_v42  ;;  %v928_v32 = vmul.f32 %v896_v18, %v2862_v40 }
  0xd7   :  { %v515_v55 = vadd.f32 1.0, %v483_v48  ;;  %v481_v56 = vmul.f32 0.3275911, %v2876_v49  ;;  %v2888_v57 = vadd.f32 %v2234_v47, %v2837_v28  ;;  %v2891_v58 = vand.u32 2147483647, %v2882_v52 }
  0xd8   :  { %v2884_v54 = vpop.f32.mrf.mxu0  ;;  %2335 = vrcp.f32 %v512_v53  ;;  %v2943_v39 = vmul.f32 0.5, %v2843_v31  ;;  %v964_v46 = vmul.f32 1.442695, %v930_v21  ;;  %v2946_v47 = vmul.f32 0.70710677, %v274_v22 }
  0xd9   :  { %2337 = vrcp.f32 %v515_v55  ;;  %v513_v60 = vadd.f32 1.0, %v481_v56  ;;  %v2894_v61 = vmul.f32 0.70710677, %v2888_v57  ;;  %v486_v62 = vmul.f32 0.3275911, %v2891_v58 }
  0xda   :  { %v2237_v59 = vpop.f32.mrf.mxu0  ;;  %4368 = vst [vmem:[#allocation3_spill] sm:$0xff] %v2946_v47  ;;  %v931_v50 = vmul.f32 %v899_v24, %v2865_v42  ;;  %v897_v51 = vsub.f32 0.0, %v2876_v49  ;;  %v960_v55 = vmul.f32 1.442695, %v928_v32  ;;  %v2958_v56 = vmul.f32 0.5, %v2846_v33 }
  0xdb   :  { %v2898_v63 = vadd.f32 %v2237_v59, %v2837_v28  ;;  %2339 = vrcp.f32 %v513_v60  ;;  %v2901_v1 = vand.u32 2147483647, %v2894_v61  ;;  %v518_v2 = vadd.f32 1.0, %v486_v62 }
  0xdc   :  { %v289_v0 = vpop.f32.mrf.mxu0  ;;  %v2962_v60 = vmul.f32 0.5, %v2858_v38  ;;  %v902_v62 = vsub.f32 0.0, %v2891_v58  ;;  %v966_v33 = vmul.f32 1.442695, %v931_v50  ;;  %v2981_v21 = vmul.f32 0.5, %v274_v22 }
  0xdd   :  { %v2904_v3 = vmul.f32 0.70710677, %v2898_v63  ;;  %v2907_v5 = vadd.f32 %v2837_v28, %v289_v0  ;;  %v487_v6 = vmul.f32 0.3275911, %v2901_v1  ;;  %2341 = vrcp.f32 %v518_v2 }
  0xde   :  { %v2238_v15 = vpop.f32.mrf.mxu0  ;;  %v452_v2 = vand.u32 2147483647, %v2946_v47  ;;  %4369 = vst [vmem:[#allocation4_spill] sm:$0xff] %v2981_v21  ;;  %vm1091_vm3 = vcmp.ge.f32.partialorder %v2855_v37, 0.0  ;;  %vm1089_vm4 = vcmp.ge.f32.partialorder %v2868_v43, 0.0  ;;  %vm1094_vm5 = vcmp.ge.f32.partialorder %v2882_v52, 0.0 }
  0xdf   :  { %v2911_v7 = vand.u32 2147483647, %v2904_v3  ;;  %v2914_v8 = vmul.f32 0.70710677, %v2907_v5  ;;  %v519_v12 = vadd.f32 1.0, %v487_v6  ;;  %v2934_v23 = vadd.f32 %v2238_v15, %v2837_v28 }
  0xe0   :  { %v292_v0 = vpop.f32.mrf.mxu0  ;;  %v277_v6 = vadd.f32 %v2837_v28, %v2884_v54  ;;  %v2978_v54 = vmul.f32 0.5, %v2871_v45  ;;  %v484_v32 = vmul.f32 0.3275911, %v452_v2  ;;  %vm1095_vm6 = vcmp.ge.f32.partialorder %v2894_v61, 0.0 }
  0xe1   :  { %v490_v13 = vmul.f32 0.3275911, %v2911_v7  ;;  %v2924_v14 = vand.u32 2147483647, %v2914_v8  ;;  %2343 = vrcp.f32 %v519_v12  ;;  %v2949_v48 = vmul.f32 0.70710677, %v2934_v23 }
  0xe2   :  { %v929_v12 = vmul.f32 %v897_v51, %v2876_v49  ;;  %v900_v49 = vsub.f32 0.0, %v452_v2  ;;  %v2983_v24 = vmul.f32 0.70710677, %v277_v6  ;;  %v2241_v22 = vpop.f32.mrf.mxu0  ;;  %vm1098_vm7 = vcmp.ge.f32.partialorder %v2904_v3, 0.0 }
  0xe3   :  { %v2916_v4 = vpop.eup %2333  ;;  %v522_v25 = vadd.f32 1.0, %v490_v13  ;;  %v488_v26 = vmul.f32 0.3275911, %v2924_v14  ;;  %v2969_v11 = vand.u32 2147483647, %v2949_v48  ;;  %vm1096_vm8 = vcmp.ge.f32.partialorder %v2914_v8, 0.0 }
  0xe4   :  { %v610_v16 = vmul.f32 1.0614054, %v2916_v4  ;;  %4370 = vst [vmem:[#allocation5_spill] sm:$0xff] %v2983_v24  ;;  %vm1099_vm9 = vcmp.ge.f32.partialorder %v2949_v48, 0.0 }
  0xe5   :  { %v2918_v9 = vpop.eup %2335  ;;  %2345 = vrcp.f32 %v522_v25  ;;  %v520_v40 = vadd.f32 1.0, %v488_v26  ;;  %v491_v25 = vmul.f32 0.3275911, %v2969_v11 }
  0xe6   :  { %v2920_v10 = vpop.eup %2337  ;;  %v608_v17 = vmul.f32 1.0614054, %v2918_v9  ;;  %v642_v27 = vadd.f32 -1.4531521, %v610_v16  ;;  %2347 = vpow2.f32 %v964_v46  ;;  %v2974_v16 = vadd.f32 %v2837_v28, %v292_v0 }
  0xe7   :  { %v611_v19 = vmul.f32 1.0614054, %v2920_v10  ;;  %2349 = vrcp.f32 %v520_v40  ;;  %v2996_v40 = vmul.f32 0.5, %v2888_v57  ;;  %v3001_v0 = vmul.f32 0.5, %v277_v6 }
  0xe8   :  { %v2930_v20 = vpop.eup %2339  ;;  %v640_v29 = vadd.f32 -1.4531521, %v608_v17  ;;  %v674_v31 = vmul.f32 %v2916_v4, %v642_v27  ;;  %2351 = vpow2.f32 %v960_v55  ;;  %v962_v27 = vmul.f32 1.442695, %v929_v12 }
  0xe9   :  { %v643_v41 = vadd.f32 -1.4531521, %v611_v19  ;;  %v609_v44 = vmul.f32 1.0614054, %v2930_v20  ;;  %v934_v19 = vmul.f32 %v902_v62, %v2891_v58  ;;  %2353 = vpow2.f32 %v966_v33  ;;  %4372 = vst [vmem:[#allocation7_spill] sm:$0xff] %v3001_v0 }
  0xea   :  { %v2953_v30 = vpop.eup %2341  ;;  %v672_v53 = vmul.f32 %v2918_v9, %v640_v29  ;;  %v706_v38 = vadd.f32 1.4214138, %v674_v31  ;;  %v2992_v58 = vmul.f32 0.70710677, %v2974_v16  ;;  %v932_v31 = vmul.f32 %v900_v49, %v452_v2  ;;  %v305_v2 = vpop.f32.mrf.mxu0 }
  0xeb   :  { %v675_v59 = vmul.f32 %v2920_v10, %v643_v41  ;;  %v641_v42 = vadd.f32 -1.4531521, %v609_v44  ;;  %v614_v13 = vmul.f32 1.0614054, %v2953_v30  ;;  %v903_v44 = vsub.f32 0.0, %v2901_v1 }
  0xec   :  { %v704_v15 = vadd.f32 1.4214138, %v672_v53  ;;  %v738_v41 = vmul.f32 %v2916_v4, %v706_v38  ;;  %4371 = vst [vmem:[#allocation6_spill] sm:$0xff] %v2992_v58  ;;  %v972_v51 = vmul.f32 1.442695, %v934_v19  ;;  %2355 = vpow2.f32 %v962_v27 }
  0xed   :  { %v707_v17 = vadd.f32 1.4214138, %v675_v59  ;;  %v673_v18 = vmul.f32 %v2930_v20, %v641_v42  ;;  %v646_v29 = vadd.f32 -1.4531521, %v614_v13  ;;  %v453_v55 = vand.u32 2147483647, %v2983_v24 }
  0xee   :  { %v2986_v26 = vpop.eup %2343  ;;  %v736_v45 = vmul.f32 %v2918_v9, %v704_v15  ;;  %v523_v59 = vadd.f32 1.0, %v491_v25  ;;  %v516_v62 = vadd.f32 1.0, %v484_v32  ;;  %v770_v12 = vadd.f32 -0.28449672, %v738_v41 }
  0xef   :  { %v739_v46 = vmul.f32 %v2920_v10, %v707_v17  ;;  %v705_v50 = vadd.f32 1.4214138, %v673_v18  ;;  %v615_v53 = vmul.f32 1.0614054, %v2986_v26  ;;  %v678_v42 = vmul.f32 %v2953_v30, %v646_v29 }
  0xf0   :  { %v768_v13 = vadd.f32 -0.28449672, %v736_v45  ;;  %v935_v38 = vmul.f32 %v903_v44, %v2901_v1  ;;  %v3007_v57 = vand.u32 2147483647, %v2992_v58  ;;  %2357 = vpow2.f32 %v972_v51 }
  0xf1   :  { %v771_v15 = vadd.f32 -0.28449672, %v739_v46  ;;  %v737_v17 = vmul.f32 %v2930_v20, %v705_v50  ;;  %v3011_v18 = vadd.f32 %v2241_v22, %v2837_v28  ;;  %v968_v19 = vmul.f32 1.442695, %v932_v31  ;;  %v2242_v46 = vpop.f32.mrf.mxu0 }
  0xf2   :  { %v3003_v33 = vpop.eup %2345  ;;  %v647_v6 = vadd.f32 -1.4531521, %v615_v53  ;;  %v485_v49 = vmul.f32 0.3275911, %v453_v55  ;;  %2359 = vrcp.f32 %v523_v59  ;;  %v710_v27 = vadd.f32 1.4214138, %v678_v42 }
  0xf3   :  { %v3013_v25 = vpop.eup %2347  ;;  %2361 = vrcp.f32 %v516_v62  ;;  %v3016_v1 = vmul.f32 0.5, %v2898_v63  ;;  %v618_v29 = vmul.f32 1.0614054, %v3003_v33  ;;  %v802_v41 = vmul.f32 %v2916_v4, %v770_v12 }
  0xf4   :  { %v3019_v32 = vpop.eup %2349  ;;  %v800_v45 = vmul.f32 %v2918_v9, %v768_v13  ;;  %v974_v44 = vmul.f32 1.442695, %v935_v38  ;;  %v489_v22 = vmul.f32 0.3275911, %v3007_v57  ;;  %v803_v51 = vmul.f32 %v2920_v10, %v771_v15 }
  0xf5   :  { %4373 = vst [vmem:[#allocation8_spill] sm:$0xff] %v3016_v1  ;;  %v2352_v50 = vpop.eup %2351  ;;  %v769_v31 = vadd.f32 -0.28449672, %v737_v17  ;;  %v3026_v53 = vmul.f32 0.70710677, %v3011_v18  ;;  %v3029_v63 = vadd.f32 %v2837_v28, %v305_v2  ;;  %2363 = vpow2.f32 %v968_v19 }
  0xf6   :  { %v679_v59 = vmul.f32 %v2986_v26, %v647_v6  ;;  %v517_v42 = vadd.f32 1.0, %v485_v49  ;;  %v901_v62 = vsub.f32 0.0, %v453_v55  ;;  %v742_v12 = vmul.f32 %v2953_v30, %v710_v27  ;;  %v2354_v15 = vpop.eup %2353  ;;  %v308_v27 = vpop.f32.mrf.mxu0 }
  0xf7   :  { %4374 = vst [vmem:[#allocation9_spill] sm:$0xff] %v3026_v53  ;;  %v650_v13 = vadd.f32 -1.4531521, %v618_v29  ;;  %v616_v38 = vmul.f32 1.0614054, %v3019_v32  ;;  %v3035_v0 = vadd.f32 %v2242_v46, %v2837_v28  ;;  %2365 = vpow2.f32 %v974_v44 }
  0xf8   :  { %v834_v17 = vadd.f32 0.2548296, %v802_v41  ;;  %v832_v21 = vadd.f32 0.2548296, %v800_v45  ;;  %v521_v24 = vadd.f32 1.0, %v489_v22  ;;  %v801_v19 = vmul.f32 %v2930_v20, %v769_v31 }
  0xf9   :  { %4375 = vst [vmem:[#allocation10_spill] sm:$0xff] %v3035_v0  ;;  %v835_v2 = vadd.f32 0.2548296, %v803_v51  ;;  %v3039_v6 = vand.u32 2147483647, %v3026_v53  ;;  %2367 = vrcp.f32 %v517_v42  ;;  %v933_v47 = vmul.f32 %v901_v62, %v453_v55  ;;  %v2356_v22 = vpop.eup %2355 }
  0xfa   :  { %v3042_v49 = vmul.f32 0.70710677, %v3029_v63  ;;  %v711_v29 = vadd.f32 1.4214138, %v679_v59  ;;  %v906_v46 = vsub.f32 0.0, %v2911_v7  ;;  %v682_v41 = vmul.f32 %v3003_v33, %v650_v13 }
  0xfb   :  { %v774_v58 = vadd.f32 -0.28449672, %v742_v12  ;;  %v648_v45 = vadd.f32 -1.4531521, %v616_v38  ;;  %v3047_v44 = vmul.f32 0.70710677, %v3035_v0  ;;  %v866_v51 = vmul.f32 %v2916_v4, %v834_v17  ;;  %v2245_v12 = vpop.f32.mrf.mxu0 }
  0xfc   :  { %4376 = vst [vmem:[#allocation11_spill] sm:$0xff] %v3042_v49  ;;  %v864_v31 = vmul.f32 %v2918_v9, %v832_v21  ;;  %2369 = vrcp.f32 %v521_v24  ;;  %v3052_v53 = vadd.f32 %v2837_v28, %v308_v27  ;;  %v867_v55 = vmul.f32 %v2920_v10, %v835_v2 }
  0xfd   :  { %4377 = vst [vmem:[#allocation12_spill] sm:$0xff] %v3047_v44  ;;  %v833_v59 = vadd.f32 0.2548296, %v801_v19  ;;  %v494_v42 = vmul.f32 0.3275911, %v3039_v6  ;;  %v3059_v13 = vpop.eup %2357  ;;  %v743_v38 = vmul.f32 %v2986_v26, %v711_v29  ;;  %v938_v9 = vmul.f32 %v906_v46, %v2911_v7 }
  0xfe   :  { %4378 = vst [vmem:[#allocation13_spill] sm:$0xff] %v3052_v53  ;;  %v3057_v62 = vand.u32 2147483647, %v3042_v49  ;;  %v3062_v4 = vmul.f32 1.442695, %v933_v47  ;;  %v904_v21 = vsub.f32 0.0, %v2924_v14  ;;  %v806_v10 = vmul.f32 %v2953_v30, %v774_v58 }
  0xff   :  { %v3066_v24 = vpop.eup %2359  ;;  %v714_v17 = vadd.f32 1.4214138, %v682_v41  ;;  %v680_v2 = vmul.f32 %v3019_v32, %v648_v45  ;;  %v3071_v19 = vand.u32 2147483647, %v3047_v44  ;;  %v3076_v29 = vmul.f32 %v3013_v25, %v866_v51 }
 0x100   :  { %v3073_v27 = vpop.eup %2361  ;;  %v3078_v47 = vmul.f32 %v2352_v50, %v864_v31  ;;  %v3081_v7 = vmul.f32 0.70710677, %v3052_v53  ;;  %v3084_v46 = vadd.f32 %v2245_v12, %v2837_v28  ;;  %v3086_v58 = vmul.f32 %v2354_v15, %v867_v55  ;;  %v321_v55 = vpop.f32.mrf.mxu0 }
 0x101   :  { %4379 = vst [vmem:[#allocation14_spill] sm:$0xff] %v3073_v27  ;;  %v865_v41 = vmul.f32 %v2930_v20, %v833_v59  ;;  %v526_v45 = vadd.f32 1.0, %v494_v42  ;;  %v492_v44 = vmul.f32 0.3275911, %v3057_v62  ;;  %v775_v49 = vadd.f32 -0.28449672, %v743_v38 }
 0x102   :  { %4380 = vst [vmem:[#allocation15_spill] sm:$0xff] %v3081_v7  ;;  %4381 = vst [vmem:[#allocation16_spill] sm:$0xff] %v3084_v46  ;;  %v980_v27 = vmul.f32 1.442695, %v938_v9  ;;  %v936_v25 = vmul.f32 %v904_v21, %v2924_v14  ;;  %v619_v50 = vmul.f32 1.0614054, %v3066_v24  ;;  %v3092_v51 = vpop.eup %2363  ;;  %v746_v53 = vmul.f32 %v3003_v33, %v714_v17 }
 0x103   :  { %4382 = vst [vmem:[#allocation17_spill] sm:$0xff] %v3092_v51  ;;  %v838_v31 = vadd.f32 0.2548296, %v806_v10  ;;  %v712_v12 = vadd.f32 1.4214138, %v680_v2  ;;  %v1058_v20 = vsub.f32 1.0, %v3076_v29  ;;  %v3108_v21 = vmul.f32 %v2356_v22, %v865_v41 }
 0x104   :  { %v495_v15 = vmul.f32 0.3275911, %v3071_v19  ;;  %v1056_v59 = vsub.f32 1.0, %v3078_v47  ;;  %v3101_v14 = vand.u32 2147483647, %v3081_v7  ;;  %v2366_v38 = vpop.eup %2365  ;;  %v1059_v9 = vsub.f32 1.0, %v3086_v58 }
 0x105   :  { %v3104_v42 = vmul.f32 0.70710677, %v3084_v46  ;;  %2371 = vrcp.f32 %v526_v45  ;;  %v524_v10 = vadd.f32 1.0, %v492_v44  ;;  %v807_v17 = vmul.f32 %v2986_v26, %v775_v49 }
 0x106   :  { %v976_v2 = vmul.f32 1.442695, %v936_v25  ;;  %v651_v29 = vadd.f32 -1.4531521, %v619_v50  ;;  %v3112_v47 = vadd.f32 %v2837_v28, %v321_v55  ;;  %v3114_v51 = vpop.eup %2367  ;;  %v870_v7 = vmul.f32 %v2953_v30, %v838_v31  ;;  %v2246_v55 = vpop.f32.mrf.mxu0 }
 0x107   :  { %4383 = vst [vmem:[#allocation18_spill] sm:$0xff] %v3114_v51  ;;  %v778_v46 = vadd.f32 -0.28449672, %v746_v53  ;;  %v744_v58 = vmul.f32 %v3019_v32, %v712_v12  ;;  %v527_v1 = vadd.f32 1.0, %v495_v15  ;;  %v1122_v0 = vsub.f32 0.0, %v1058_v20 }
 0x108   :  { %2373 = vpow2.f32 %v980_v27  ;;  %v493_v22 = vmul.f32 0.3275911, %v3101_v14  ;;  %v3120_v44 = vand.u32 2147483647, %v3104_v42  ;;  %v1120_v41 = vsub.f32 0.0, %v1056_v59 }
 0x109   :  { %v3122_v49 = vpop.eup %2369  ;;  %v1123_v45 = vsub.f32 0.0, %v1059_v9  ;;  %v1057_v25 = vsub.f32 1.0, %v3108_v21  ;;  %2375 = vrcp.f32 %v524_v10  ;;  %v839_v30 = vadd.f32 0.2548296, %v807_v17 }
 0x10a   :  { %v683_v53 = vmul.f32 %v3066_v24, %v651_v29  ;;  %v907_v50 = vsub.f32 0.0, %v2969_v11  ;;  %v3129_v27 = vmul.f32 0.70710677, %v3112_v47  ;;  %v1030_v31 = vmul.f32 %v3059_v13, %v870_v7 }
 0x10b   :  { %v810_v12 = vmul.f32 %v3003_v33, %v778_v46  ;;  %v776_v15 = vadd.f32 -0.28449672, %v744_v58  ;;  %2377 = vrcp.f32 %v527_v1  ;;  %v617_v21 = vmul.f32 1.0614054, %v3122_v49 }
 0x10c   :  { %2379 = vpow2.f32 %v3062_v4  ;;  %v525_v10 = vadd.f32 1.0, %v493_v22  ;;  %v498_v17 = vmul.f32 0.3275911, %v3120_v44  ;;  %v1154_v29 = vsel %vm1090_vm1, %v1058_v20, %v1122_v0  ;;  %v324_v0 = vpop.f32.mrf.mxu0 }
 0x10d   :  { %v1152_v51 = vsel %vm1088_vm2, %v1056_v59, %v1120_v41  ;;  %v3141_v13 = vmul.f32 0.5, %v2907_v5  ;;  %2381 = vpow2.f32 %v976_v2  ;;  %v1155_v1 = vsel %vm1091_vm3, %v1059_v9, %v1123_v45 }
 0x10e   :  { %v871_v4 = vmul.f32 %v2986_v26, %v839_v30  ;;  %v715_v7 = vadd.f32 1.4214138, %v683_v53  ;;  %v3147_v46 = vand.u32 2147483647, %v3129_v27  ;;  %v1121_v58 = vsub.f32 0.0, %v1057_v25 }
 0x10f   :  { %v1062_v22 = vsub.f32 1.0, %v1030_v31  ;;  %v842_v34 = vadd.f32 0.2548296, %v810_v12  ;;  %v939_v35 = vmul.f32 %v907_v50, %v2969_v11  ;;  %v808_v5 = vmul.f32 %v3019_v32, %v776_v15 }
 0x110   :  { %v649_v20 = vadd.f32 -1.4531521, %v617_v21  ;;  %2383 = vrcp.f32 %v525_v10  ;;  %v530_v37 = vadd.f32 1.0, %v498_v17  ;;  %v1186_v59 = vadd.f32 1.0, %v1154_v29 }
 0x111   :  { %v1184_v9 = vadd.f32 1.0, %v1152_v51  ;;  %v3153_v26 = vmul.f32 0.5, %v2934_v23  ;;  %v3156_v2 = vadd.f32 %v2246_v55, %v2837_v28  ;;  %v1031_v45 = vmul.f32 %v2366_v38, %v871_v4 }
 0x112   :  { %v3158_v41 = vpop.eup %2371  ;;  %v747_v30 = vmul.f32 %v3066_v24, %v715_v7  ;;  %v496_v11 = vmul.f32 0.3275911, %v3147_v46  ;;  %v3163_v53 = vadd.f32 %v2837_v28, %v324_v0  ;;  %v1187_v50 = vadd.f32 1.0, %v1155_v1 }
 0x113   :  { %v1153_v51 = vsel %vm1089_vm4, %v1057_v25, %v1121_v58  ;;  %v1126_v31 = vsub.f32 0.0, %v1062_v22  ;;  %v874_v23 = vmul.f32 %v3003_v33, %v842_v34  ;;  %v840_v12 = vadd.f32 0.2548296, %v808_v5 }
 0x114   :  { %v982_v15 = vmul.f32 1.442695, %v939_v35  ;;  %v681_v55 = vmul.f32 %v3122_v49, %v649_v20  ;;  %2385 = vrcp.f32 %v530_v37  ;;  %v3170_v21 = vmul.f32 %v1186_v59, %v2940_v36 }
 0x115   :  { %v2374_v38 = vpop.eup %2373  ;;  %v905_v10 = vsub.f32 0.0, %v3007_v57  ;;  %v622_v17 = vmul.f32 1.0614054, %v3158_v41  ;;  %v3176_v43 = vmul.f32 0.70710677, %v3156_v2  ;;  %v1063_v33 = vsub.f32 1.0, %v1031_v45 }
 0x116   :  { %v3178_v25 = vpop.eup %2375  ;;  %v779_v29 = vadd.f32 -0.28449672, %v747_v30  ;;  %v528_v1 = vadd.f32 1.0, %v496_v11  ;;  %v3181_v4 = vmul.f32 0.70710677, %v3163_v53  ;;  %v3184_v36 = vmul.f32 %v1184_v9, %v2943_v39 }
 0x117   :  { %v3187_v7 = vmul.f32 %v1187_v50, %v2958_v56  ;;  %v1185_v58 = vadd.f32 1.0, %v1153_v51  ;;  %v1034_v34 = vmul.f32 %v2374_v38, %v874_v23  ;;  %v1158_v0 = vsel %vm1094_vm5, %v1062_v22, %v1126_v31 }
 0x118   :  { %v3189_v35 = vpop.eup %2377  ;;  %v872_v5 = vmul.f32 %v3019_v32, %v840_v12  ;;  %2387 = vpow2.f32 %v982_v15  ;;  %v713_v20 = vadd.f32 1.4214138, %v681_v55  ;;  %v937_v59 = vmul.f32 %v905_v10, %v3007_v57 }
 0x119   :  { %v3194_v37 = vpop.eup %2379  ;;  %v654_v39 = vadd.f32 -1.4531521, %v622_v17  ;;  %v620_v9 = vmul.f32 1.0614054, %v3178_v25  ;;  %v3199_v56 = vand.u32 2147483647, %v3176_v43  ;;  %v811_v52 = vmul.f32 %v3066_v24, %v779_v29 }
 0x11a   :  { %v2382_v45 = vpop.eup %2381  ;;  %v1127_v30 = vsub.f32 0.0, %v1063_v33  ;;  %2389 = vrcp.f32 %v528_v1  ;;  %v3204_v32 = vand.u32 2147483647, %v3181_v4  ;;  %v1066_v22 = vsub.f32 1.0, %v1034_v34 }
 0x11b   :  { %v3207_v11 = vmul.f32 0.5, %v2974_v16  ;;  %v910_v57 = vsub.f32 0.0, %v3039_v6  ;;  %v623_v50 = vmul.f32 1.0614054, %v3189_v35  ;;  %v1190_v31 = vadd.f32 1.0, %v1158_v0 }
 0x11c   :  { %v1032_v23 = vmul.f32 %v2382_v45, %v872_v5  ;;  %v745_v12 = vmul.f32 %v3122_v49, %v713_v20  ;;  %v3217_v55 = vmul.f32 %v1185_v58, %v2962_v60  ;;  %v686_v38 = vmul.f32 %v3158_v41, %v654_v39 }
 0x11d   :  { %v3214_v15 = vpop.eup %2383  ;;  %v652_v16 = vadd.f32 -1.4531521, %v620_v9  ;;  %v499_v10 = vmul.f32 0.3275911, %v3199_v56  ;;  %v1159_v17 = vsel %vm1095_vm6, %v1063_v33, %v1127_v30  ;;  %v843_v29 = vadd.f32 0.2548296, %v811_v52 }
 0x11e   :  { %v978_v1 = vmul.f32 1.442695, %v937_v59  ;;  %v497_v34 = vmul.f32 0.3275911, %v3204_v32  ;;  %v1130_v0 = vsub.f32 0.0, %v1066_v22  ;;  %v942_v5 = vmul.f32 %v910_v57, %v3039_v6 }
 0x11f   :  { %v908_v20 = vsub.f32 0.0, %v3057_v62  ;;  %v655_v45 = vadd.f32 -1.4531521, %v623_v50  ;;  %v3227_v60 = vmul.f32 %v1190_v31, %v2978_v54  ;;  %v1064_v58 = vsub.f32 1.0, %v1032_v23 }
 0x120   :  { %v777_v39 = vadd.f32 -0.28449672, %v745_v12  ;;  %v621_v61 = vmul.f32 1.0614054, %v3214_v15  ;;  %v3234_v59 = vmul.f32 0.5, %v3011_v18  ;;  %v684_v6 = vmul.f32 %v3178_v25, %v652_v16 }
 0x121   :  { %v3231_v33 = vpop.eup %2385  ;;  %v718_v9 = vadd.f32 1.4214138, %v686_v38  ;;  %v531_v30 = vadd.f32 1.0, %v499_v10  ;;  %v1191_v52 = vadd.f32 1.0, %v1159_v17  ;;  %v875_v57 = vmul.f32 %v3066_v24, %v843_v29  ;;  %v2249_v10 = vpop.f32.mrf.mxu0 }
 0x122   :  { %2391 = vpow2.f32 %v978_v1  ;;  %v529_v54 = vadd.f32 1.0, %v497_v34  ;;  %v1162_v50 = vsel %vm1098_vm7, %v1066_v22, %v1130_v0  ;;  %v988_v31 = vmul.f32 1.442695, %v942_v5 }
 0x123   :  { %v940_v23 = vmul.f32 %v908_v20, %v3057_v62  ;;  %v687_v12 = vmul.f32 %v3189_v35, %v655_v45  ;;  %v1128_v51 = vsub.f32 0.0, %v1064_v58  ;;  %v809_v18 = vmul.f32 %v3122_v49, %v777_v39 }
 0x124   :  { %v653_v38 = vadd.f32 -1.4531521, %v621_v61  ;;  %v626_v16 = vmul.f32 1.0614054, %v3231_v33  ;;  %v750_v24 = vmul.f32 %v3158_v41, %v718_v9  ;;  %v716_v29 = vadd.f32 1.4214138, %v684_v6  ;;  %v337_v6 = vpop.f32.mrf.mxu0 }
 0x125   :  { %v2388_v17 = vpop.eup %2387  ;;  %v911_v1 = vsub.f32 0.0, %v3071_v19  ;;  %2393 = vrcp.f32 %v531_v30  ;;  %v3247_v22 = vmul.f32 0.5, %v3029_v63  ;;  %v909_v62 = vsub.f32 0.0, %v3101_v14 }
 0x126   :  { %v1035_v3 = vmul.f32 %v2388_v17, %v875_v57  ;;  %2395 = vrcp.f32 %v529_v54  ;;  %v3253_v0 = vmul.f32 %v1191_v52, %v2996_v40  ;;  %v1194_v5 = vadd.f32 1.0, %v1162_v50  ;;  %v4384_v54 = vld [vmem:[#allocation10_spill] sm:$0xff]  ;;  %v2250_v17 = vpop.f32.mrf.mxu0 }
 0x127   :  { %v3250_v34 = vpop.eup %2389  ;;  %v984_v20 = vmul.f32 1.442695, %v940_v23  ;;  %v719_v45 = vadd.f32 1.4214138, %v687_v12  ;;  %v841_v39 = vadd.f32 0.2548296, %v809_v18  ;;  %2397 = vpow2.f32 %v988_v31 }
 0x128   :  { %v685_v61 = vmul.f32 %v3214_v15, %v653_v38  ;;  %v658_v9 = vadd.f32 -1.4531521, %v626_v16  ;;  %v1160_v63 = vsel %vm1096_vm8, %v1064_v58, %v1128_v51  ;;  %v782_v30 = vadd.f32 -0.28449672, %v750_v24  ;;  %v4385_v12 = vld [vmem:[#allocation8_spill] sm:$0xff] }
 0x129   :  { %v748_v57 = vmul.f32 %v3178_v25, %v716_v29  ;;  %v943_v40 = vmul.f32 %v911_v1, %v3071_v19  ;;  %v1067_v52 = vsub.f32 1.0, %v1035_v3  ;;  %v3262_v50 = vmul.f32 0.5, %v4384_v54 }
 0x12a   :  { %v941_v31 = vmul.f32 %v909_v62, %v3101_v14  ;;  %v624_v23 = vmul.f32 1.0614054, %v3250_v34  ;;  %v3267_v18 = vmul.f32 %v1194_v5, %v4385_v12  ;;  %2399 = vpow2.f32 %v984_v20  ;;  %v4387_v62 = vld [vmem:[#allocation13_spill] sm:$0xff]  ;;  %v4388_v12 = vld [vmem:[#allocation16_spill] sm:$0xff] }
 0x12b   :  { %v751_v8 = vmul.f32 %v3189_v35, %v719_v45  ;;  %v914_v51 = vsub.f32 0.0, %v3120_v44  ;;  %v1192_v58 = vadd.f32 1.0, %v1160_v63  ;;  %v873_v38 = vmul.f32 %v3122_v49, %v841_v39 }
 0x12c   :  { %4386 = vst [vmem:[#allocation10_spill] sm:$0xff] %v3267_v18  ;;  %v717_v19 = vadd.f32 1.4214138, %v685_v61  ;;  %v690_v16 = vmul.f32 %v3231_v33, %v658_v9  ;;  %v814_v24 = vmul.f32 %v3158_v41, %v782_v30  ;;  %v780_v14 = vadd.f32 -0.28449672, %v748_v57 }
 0x12d   :  { %v990_v29 = vmul.f32 1.442695, %v943_v40  ;;  %v912_v1 = vsub.f32 0.0, %v3147_v46  ;;  %v1131_v3 = vsub.f32 0.0, %v1067_v52  ;;  %v3276_v5 = vmul.f32 0.5, %v4387_v62  ;;  %v340_v62 = vpop.f32.mrf.mxu0 }
 0x12e   :  { %v986_v20 = vmul.f32 1.442695, %v941_v31  ;;  %v656_v45 = vadd.f32 -1.4531521, %v624_v23  ;;  %v783_v63 = vadd.f32 -0.28449672, %v751_v8  ;;  %v946_v39 = vmul.f32 %v914_v51, %v3120_v44 }
 0x12f   :  { %v2392_v54 = vpop.eup %2391  ;;  %v3279_v49 = vmul.f32 0.5, %v4388_v12  ;;  %v3283_v61 = vadd.f32 %v2249_v10, %v2837_v28  ;;  %v3286_v9 = vmul.f32 %v1192_v58, %v3141_v13  ;;  %v749_v57 = vmul.f32 %v3214_v15, %v717_v19  ;;  %v4391_v58 = vld [vmem:[#allocation6_spill] sm:$0xff] }
 0x130   :  { %v1033_v30 = vmul.f32 %v2392_v54, %v873_v38  ;;  %v722_v40 = vadd.f32 1.4214138, %v690_v16  ;;  %v846_v31 = vadd.f32 0.2548296, %v814_v24  ;;  %v812_v23 = vmul.f32 %v3178_v25, %v780_v14  ;;  %v3313_v14 = vpop.f32.mrf.mxu0 }
 0x131   :  { %4389 = vst [vmem:[#allocation8_spill] sm:$0xff] %v3279_v49  ;;  %4390 = vst [vmem:[#allocation13_spill] sm:$0xff] %v3283_v61  ;;  %2401 = vpow2.f32 %v990_v29  ;;  %v944_v8 = vmul.f32 %v912_v1, %v3147_v46  ;;  %v1163_v44 = vsel %vm1099_vm9, %v1067_v52, %v1131_v3  ;;  %v3296_v13 = vmul.f32 0.5, %v3112_v47 }
 0x132   :  { %v3291_v12 = vpop.eup %2393  ;;  %2403 = vpow2.f32 %v986_v20  ;;  %v688_v10 = vmul.f32 %v3250_v34, %v656_v45  ;;  %vm1097_vm10 = vcmp.ge.f32.partialorder %v4391_v58, 0.0  ;;  %v815_v38 = vmul.f32 %v3189_v35, %v783_v63 }
 0x133   :  { %v3299_v51 = vpop.eup %2395  ;;  %v996_v19 = vmul.f32 1.442695, %v946_v39  ;;  %v3304_v46 = vmul.f32 0.70710677, %v3283_v61  ;;  %v3307_v16 = vadd.f32 %v2837_v28, %v337_v6  ;;  %v1065_v48 = vsub.f32 1.0, %v1033_v30 }
 0x134   :  { %v781_v52 = vadd.f32 -0.28449672, %v749_v57  ;;  %v754_v47 = vmul.f32 %v3231_v33, %v722_v40  ;;  %v3311_v24 = vmul.f32 0.5, %v3156_v2  ;;  %v2398_v29 = vpop.eup %2397  ;;  %v1195_v1 = vadd.f32 1.0, %v1163_v44  ;;  %v353_v44 = vpop.f32.mrf.mxu0 }
 0x135   :  { %4392 = vst [vmem:[#allocation16_spill] sm:$0xff] %v3304_v46  ;;  %v878_v3 = vmul.f32 %v3158_v41, %v846_v31  ;;  %v844_v20 = vadd.f32 0.2548296, %v812_v23  ;;  %v992_v45 = vmul.f32 1.442695, %v944_v8  ;;  %v3319_v39 = vadd.f32 %v2837_v28, %v340_v62 }
 0x136   :  { %4393 = vst [vmem:[#allocation6_spill] sm:$0xff] %v3311_v24  ;;  %v720_v54 = vadd.f32 1.4214138, %v688_v10  ;;  %v627_v63 = vmul.f32 1.0614054, %v3291_v12  ;;  %2405 = vpow2.f32 %v996_v19  ;;  %v1129_v41 = vsub.f32 0.0, %v1065_v48 }
 0x137   :  { %v625_v6 = vmul.f32 1.0614054, %v3299_v51  ;;  %v847_v30 = vadd.f32 0.2548296, %v815_v38  ;;  %v3322_v2 = vand.u32 2147483647, %v3304_v46  ;;  %v2400_v40 = vpop.eup %2399  ;;  %v813_v31 = vmul.f32 %v3214_v15, %v781_v52 }
 0x138   :  { %v3325_v57 = vmul.f32 0.70710677, %v3307_v16  ;;  %v786_v23 = vadd.f32 -0.28449672, %v754_v47  ;;  %v915_v8 = vsub.f32 0.0, %v3199_v56  ;;  %v3330_v10 = vmul.f32 %v1195_v1, %v3153_v26 }
 0x139   :  { %v1038_v62 = vmul.f32 %v2398_v29, %v878_v3  ;;  %v876_v38 = vmul.f32 %v3178_v25, %v844_v20  ;;  %v3334_v19 = vadd.f32 %v2250_v17, %v2837_v28  ;;  %v752_v61 = vmul.f32 %v3250_v34, %v720_v54  ;;  %v4397_v28 = vld [vmem:[#allocation9_spill] sm:$0xff]  ;;  %v3350_v3 = vpop.f32.mrf.mxu0 }
 0x13a   :  { %4394 = vst [vmem:[#allocation19_spill] sm:$0xff] %v3325_v57  ;;  %4395 = vst [vmem:[#allocation20_spill] sm:$0xff] %v3330_v10  ;;  %v659_v49 = vadd.f32 -1.4531521, %v627_v63  ;;  %v657_v24 = vadd.f32 -1.4531521, %v625_v6  ;;  %v879_v52 = vmul.f32 %v3189_v35, %v847_v30  ;;  %2407 = vpow2.f32 %v992_v45 }
 0x13b   :  { %4396 = vst [vmem:[#allocation21_spill] sm:$0xff] %v3334_v19  ;;  %v3338_v46 = vmul.f32 0.70710677, %v3319_v39  ;;  %v502_v47 = vmul.f32 0.3275911, %v3322_v2  ;;  %v1161_v25 = vsel %vm1097_vm10, %v1065_v48, %v1129_v41  ;;  %vm1102_vm11 = vcmp.ge.f32.partialorder %v4397_v28, 0.0 }
 0x13c   :  { %v3343_v26 = vand.u32 2147483647, %v3325_v57  ;;  %v845_v17 = vadd.f32 0.2548296, %v813_v31  ;;  %v818_v29 = vmul.f32 %v3231_v33, %v786_v23  ;;  %v947_v1 = vmul.f32 %v915_v8, %v3199_v56 }
 0x13d   :  { %v1070_v20 = vsub.f32 1.0, %v1038_v62  ;;  %v1036_v35 = vmul.f32 %v2400_v40, %v876_v38  ;;  %v913_v45 = vsub.f32 0.0, %v3204_v32  ;;  %v3354_v54 = vmul.f32 0.70710677, %v3334_v19  ;;  %v4400_v62 = vld [vmem:[#allocation11_spill] sm:$0xff]  ;;  %v356_v19 = vpop.f32.mrf.mxu0 }
 0x13e   :  { %v2402_v63 = vpop.eup %2401  ;;  %v784_v6 = vadd.f32 -0.28449672, %v752_v61  ;;  %v691_v58 = vmul.f32 %v3291_v12, %v659_v49  ;;  %v689_v48 = vmul.f32 %v3299_v51, %v657_v24  ;;  %v3359_v30 = vand.u32 2147483647, %v3338_v46 }
 0x13f   :  { %4398 = vst [vmem:[#allocation9_spill] sm:$0xff] %v3354_v54  ;;  %v2404_v41 = vpop.eup %2403  ;;  %v1039_v56 = vmul.f32 %v2402_v63, %v879_v52  ;;  %v3362_v31 = vmul.f32 0.5, %v3163_v53  ;;  %v534_v40 = vadd.f32 1.0, %v502_v47  ;;  %v500_v23 = vmul.f32 0.3275911, %v3343_v26  ;;  %v4401_v53 = vld [vmem:[#allocation12_spill] sm:$0xff] }
 0x140   :  { %v1193_v8 = vadd.f32 1.0, %v1161_v25  ;;  %vm1100_vm12 = vcmp.ge.f32.partialorder %v4400_v62, 0.0  ;;  %v877_v61 = vmul.f32 %v3214_v15, %v845_v17  ;;  %v850_v38 = vadd.f32 0.2548296, %v818_v29  ;;  %v3377_v17 = vld [vmem:[%s4322_s2] ss:$0 sm:$0xff] }
 0x141   :  { %4399 = vst [vmem:[#allocation22_spill] sm:$0xff] %v3362_v31  ;;  %v998_v49 = vmul.f32 1.442695, %v947_v1  ;;  %v1134_v24 = vsub.f32 0.0, %v1070_v20  ;;  %v1068_v10 = vsub.f32 1.0, %v1036_v35  ;;  %v945_v18 = vmul.f32 %v913_v45, %v3204_v32 }
 0x142   :  { %v3369_v52 = vand.u32 2147483647, %v3354_v54  ;;  %vm1103_vm13 = vcmp.ge.f32.partialorder %v4401_v53, 0.0  ;;  %v816_v47 = vmul.f32 %v3250_v34, %v784_v6  ;;  %v723_v63 = vadd.f32 1.4214138, %v691_v58 }
 0x143   :  { %v721_v25 = vadd.f32 1.4214138, %v689_v48  ;;  %v501_v31 = vmul.f32 0.3275911, %v3359_v30  ;;  %v1071_v57 = vsub.f32 1.0, %v1039_v56  ;;  %2409 = vrcp.f32 %v534_v40  ;;  %v2406_v29 = vpop.eup %2405 }
 0x144   :  { %v532_v15 = vadd.f32 1.0, %v500_v23  ;;  %v3380_v32 = vadd.f32 %v3377_v17, %v356_v19  ;;  %v1037_v1 = vmul.f32 %v2404_v41, %v877_v61  ;;  %v882_v35 = vmul.f32 %v3231_v33, %v850_v38  ;;  %v3394_v33 = vpop.f32.mrf.mxu0 }
 0x145   :  { %2411 = vpow2.f32 %v998_v49  ;;  %v3384_v45 = vadd.f32 %v3377_v17, %v353_v44  ;;  %v3387_v6 = vmul.f32 %v1193_v8, %v3207_v11  ;;  %v1166_v58 = vsel %vm1102_vm11, %v1070_v20, %v1134_v24  ;;  %v4404_v44 = vld [vmem:[#allocation15_spill] sm:$0xff] }
 0x146   :  { %4402 = vst [vmem:[#allocation11_spill] sm:$0xff] %v3380_v32  ;;  %v1132_v48 = vsub.f32 0.0, %v1068_v10  ;;  %v503_v56 = vmul.f32 0.3275911, %v3369_v52  ;;  %v848_v40 = vadd.f32 0.2548296, %v816_v47  ;;  %v755_v19 = vmul.f32 %v3291_v12, %v723_v63 }
 0x147   :  { %4403 = vst [vmem:[#allocation12_spill] sm:$0xff] %v3384_v45  ;;  %v753_v41 = vmul.f32 %v3299_v51, %v721_v25  ;;  %v533_v23 = vadd.f32 1.0, %v501_v31  ;;  %v1135_v61 = vsub.f32 0.0, %v1071_v57  ;;  %vm1101_vm14 = vcmp.ge.f32.partialorder %v4404_v44, 0.0  ;;  %v2408_v28 = vpop.eup %2407 }
 0x148   :  { %v994_v38 = vmul.f32 1.442695, %v945_v18  ;;  %2413 = vrcp.f32 %v532_v15  ;;  %v3398_v11 = vmul.f32 0.70710677, %v3380_v32  ;;  %v1069_v20 = vsub.f32 1.0, %v1037_v1 }
 0x149   :  { %v1042_v8 = vmul.f32 %v2406_v29, %v882_v35  ;;  %v918_v49 = vsub.f32 0.0, %v3322_v2  ;;  %v3402_v24 = vmul.f32 0.70710677, %v3384_v45  ;;  %v1198_v47 = vadd.f32 1.0, %v1166_v58  ;;  %v369_v29 = vpop.f32.mrf.mxu0 }
 0x14a   :  { %4405 = vst [vmem:[#allocation15_spill] sm:$0xff] %v3398_v11  ;;  %v1164_v31 = vsel %vm1100_vm12, %v1068_v10, %v1132_v48  ;;  %v535_v63 = vadd.f32 1.0, %v503_v56  ;;  %v3408_v18 = vadd.f32 %v3377_v17, %v3313_v14  ;;  %v880_v25 = vmul.f32 %v3250_v34, %v848_v40 }
 0x14b   :  { %4406 = vst [vmem:[#allocation23_spill] sm:$0xff] %v3402_v24  ;;  %v787_v15 = vadd.f32 -0.28449672, %v755_v19  ;;  %v785_v32 = vadd.f32 -0.28449672, %v753_v41  ;;  %2415 = vrcp.f32 %v533_v23  ;;  %v1167_v1 = vsel %vm1103_vm13, %v1071_v57, %v1135_v61 }
 0x14c   :  { %4407 = vst [vmem:[#allocation24_spill] sm:$0xff] %v3408_v18  ;;  %2417 = vpow2.f32 %v994_v38  ;;  %v3415_v35 = vadd.f32 %v3377_v17, %v3350_v3  ;;  %v3418_v10 = vand.u32 2147483647, %v3398_v11  ;;  %v1133_v62 = vsub.f32 0.0, %v1069_v20 }
 0x14d   :  { %v1074_v14 = vsub.f32 1.0, %v1042_v8  ;;  %vm1106_vm15 = vcmp.ge.f32.partialorder %v3104_v42, 0.0  ;;  %v950_v34 = vmul.f32 %v918_v49, %v3322_v2  ;;  %v3423_v58 = vand.u32 2147483647, %v3402_v24 }
 0x14e   :  { %4408 = vst [vmem:[#allocation25_spill] sm:$0xff] %v3415_v35  ;;  %v916_v53 = vsub.f32 0.0, %v3343_v26  ;;  %2419 = vrcp.f32 %v535_v63  ;;  %v3427_v57 = vmul.f32 0.70710677, %v3408_v18  ;;  %v3430_v3 = vadd.f32 %v3377_v17, %v369_v29 }
 0x14f   :  { %v1196_v48 = vadd.f32 1.0, %v1164_v31  ;;  %v1040_v56 = vmul.f32 %v2408_v28, %v880_v25  ;;  %v819_v40 = vmul.f32 %v3291_v12, %v787_v15  ;;  %v817_v19 = vmul.f32 %v3299_v51, %v785_v32  ;;  %v2258_v15 = vpop.f32.mrf.mxu0 }
 0x150   :  { %4409 = vst [vmem:[#allocation26_spill] sm:$0xff] %v3427_v57  ;;  %4410 = vst [vmem:[#allocation27_spill] sm:$0xff] %v3430_v3  ;;  %v3435_v2 = vmul.f32 %v1198_v47, %v3234_v59  ;;  %v1199_v41 = vadd.f32 1.0, %v1167_v1  ;;  %v3438_v23 = vmul.f32 0.70710677, %v3415_v35  ;;  %v3441_v38 = vpop.eup %2409  ;;  %v1165_v8 = vsel %vm1101_vm14, %v1069_v20, %v1133_v62 }
 0x151   :  { %v505_v61 = vmul.f32 0.3275911, %v3418_v10  ;;  %v1004_v49 = vmul.f32 1.442695, %v950_v34  ;;  %v3446_v28 = vmul.f32 0.5, %v3307_v16  ;;  %v1138_v59 = vsub.f32 0.0, %v1074_v14 }
 0x152   :  { %4411 = vst [vmem:[#allocation28_spill] sm:$0xff] %v3435_v2  ;;  %4412 = vst [vmem:[#allocation29_spill] sm:$0xff] %v3438_v23  ;;  %v504_v32 = vmul.f32 0.3275911, %v3423_v58  ;;  %v2412_v31 = vpop.eup %2411  ;;  %v948_v47 = vmul.f32 %v916_v53, %v3343_v26  ;;  %v3451_v63 = vand.u32 2147483647, %v3427_v57  ;;  %v3457_v44 = vmul.f32 %v1196_v48, %v3247_v22 }
 0x153   :  { %4413 = vst [vmem:[#allocation30_spill] sm:$0xff] %v3446_v28  ;;  %v3454_v25 = vmul.f32 0.70710677, %v3430_v3  ;;  %v1072_v20 = vsub.f32 1.0, %v1040_v56  ;;  %vm1104_vm1 = vcmp.ge.f32.partialorder %v3129_v27, 0.0  ;;  %v3461_v1 = vmul.f32 %v1199_v41, %v3262_v50 }
 0x154   :  { %v851_v16 = vadd.f32 0.2548296, %v819_v40  ;;  %v849_v29 = vadd.f32 0.2548296, %v817_v19  ;;  %v630_v26 = vmul.f32 1.0614054, %v3441_v38  ;;  %2421 = vpow2.f32 %v1004_v49 }
 0x155   :  { %4414 = vst [vmem:[#allocation31_spill] sm:$0xff] %v3454_v25  ;;  %4415 = vst [vmem:[#allocation32_spill] sm:$0xff] %v3461_v1  ;;  %v3465_v62 = vand.u32 2147483647, %v3438_v23  ;;  %v537_v34 = vadd.f32 1.0, %v505_v61  ;;  %v3467_v53 = vpop.eup %2413  ;;  %v1197_v18 = vadd.f32 1.0, %v1165_v8  ;;  %v3470_v48 = vadd.f32 %v3377_v17, %v2258_v15 }
 0x156   :  { %v536_v22 = vadd.f32 1.0, %v504_v32  ;;  %v1170_v56 = vsel %vm1106_vm15, %v1074_v14, %v1138_v59  ;;  %v1000_v40 = vmul.f32 1.442695, %v948_v47  ;;  %v506_v50 = vmul.f32 0.3275911, %v3451_v63 }
 0x157   :  { %4416 = vst [vmem:[#allocation33_spill] sm:$0xff] %v3470_v48  ;;  %v3476_v19 = vand.u32 2147483647, %v3454_v25  ;;  %v1136_v41 = vsub.f32 0.0, %v1072_v20  ;;  %v883_v61 = vmul.f32 %v3291_v12, %v851_v16  ;;  %v881_v3 = vmul.f32 %v3299_v51, %v849_v29 }
 0x158   :  { %v3482_v8 = vadd.f32 %v3377_v17, %v3394_v33  ;;  %v3484_v49 = vpop.eup %2415  ;;  %v662_v32 = vadd.f32 -1.4531521, %v630_v26  ;;  %v628_v42 = vmul.f32 1.0614054, %v3467_v53  ;;  %v507_v14 = vmul.f32 0.3275911, %v3465_v62 }
 0x159   :  { %2423 = vrcp.f32 %v537_v34  ;;  %v2418_v59 = vpop.eup %2417  ;;  %v3489_v47 = vmul.f32 %v1197_v18, %v3276_v5  ;;  %v919_v12 = vsub.f32 0.0, %v3369_v52  ;;  %v3493_v51 = vmul.f32 0.70710677, %v3470_v48 }
 0x15a   :  { %4417 = vst [vmem:[#allocation34_spill] sm:$0xff] %v3482_v8  ;;  %2425 = vrcp.f32 %v536_v22  ;;  %v3495_v33 = vadd.f32 1.0, %v1170_v56  ;;  %v538_v15 = vadd.f32 1.0, %v506_v50  ;;  %v508_v16 = vmul.f32 0.3275911, %v3476_v19  ;;  %v372_v22 = vpop.f32.mrf.mxu0 }
 0x15b   :  { %4418 = vst [vmem:[#allocation35_spill] sm:$0xff] %v3493_v51  ;;  %2427 = vpow2.f32 %v1000_v40  ;;  %v3498_v29 = vpop.eup %2419  ;;  %v3500_v26 = vmul.f32 %v2412_v31, %v883_v61  ;;  %v1041_v34 = vmul.f32 %v2418_v59, %v881_v3  ;;  %v629_v5 = vmul.f32 1.0614054, %v3484_v49 }
 0x15c   :  { %4419 = vst [vmem:[#allocation36_spill] sm:$0xff] %v3495_v33  ;;  %v3504_v18 = vmul.f32 0.70710677, %v3482_v8  ;;  %v1168_v48 = vsel %vm1104_vm1, %v1072_v20, %v1136_v41  ;;  %v694_v56 = vmul.f32 %v3441_v38, %v662_v32  ;;  %v660_v40 = vadd.f32 -1.4531521, %v628_v42 }
 0x15d   :  { %v539_v50 = vadd.f32 1.0, %v507_v14  ;;  %v951_v35 = vmul.f32 %v919_v12, %v3369_v52  ;;  %v3511_v57 = vmul.f32 0.5, %v3319_v39  ;;  %v917_v3 = vsub.f32 0.0, %v3359_v30 }
 0x15e   :  { %4420 = vst [vmem:[#allocation37_spill] sm:$0xff] %v3504_v18  ;;  %v3515_v31 = vand.u32 2147483647, %v3493_v51  ;;  %vm1105_vm2 = vcmp.ge.f32.partialorder %v3181_v4, 0.0  ;;  %v631_v61 = vmul.f32 1.0614054, %v3498_v29  ;;  %2429 = vrcp.f32 %v538_v15 }
 0x15f   :  { %4421 = vst [vmem:[#allocation38_spill] sm:$0xff] %v3511_v57  ;;  %v540_v27 = vadd.f32 1.0, %v508_v16  ;;  %v3520_v20 = vadd.f32 %v3377_v17, %v372_v22  ;;  %v1200_v41 = vadd.f32 1.0, %v1168_v48  ;;  %v1073_v32 = vsub.f32 1.0, %v1041_v34 }
 0x160   :  { %v661_v52 = vadd.f32 -1.4531521, %v629_v5  ;;  %v3523_v39 = vand.u32 2147483647, %v3504_v18  ;;  %v726_v14 = vadd.f32 1.4214138, %v694_v56  ;;  %v692_v59 = vmul.f32 %v3467_v53, %v660_v40 }
 0x161   :  { %4422 = vst [vmem:[#allocation39_spill] sm:$0xff] %v3520_v20  ;;  %2431 = vrcp.f32 %v539_v50  ;;  %v1006_v12 = vmul.f32 1.442695, %v951_v35  ;;  %v949_v8 = vmul.f32 %v917_v3, %v3359_v30  ;;  %v511_v15 = vmul.f32 0.3275911, %v3515_v31  ;;  %v3531_v48 = vpop.eup %2421  ;;  %v4424_v5 = vld [vmem:[#allocation14_spill] sm:$0xff] }
 0x162   :  { %v1280_v17 = vpack.c.bf16 %v3217_v55, %v3184_v36  ;;  %v663_v16 = vadd.f32 -1.4531521, %v631_v61  ;;  %2433 = vrcp.f32 %v540_v27  ;;  %v3534_v34 = vmul.f32 0.70710677, %v3520_v20  ;;  %v4425_v30 = vld [vmem:[#allocation18_spill] sm:$0xff] }
 0x163   :  { %v612_v22 = vmul.f32 1.0614054, %v4424_v5  ;;  %v1137_v56 = vsub.f32 0.0, %v1073_v32  ;;  %v693_v40 = vmul.f32 %v3484_v49, %v661_v52  ;;  %v510_v35 = vmul.f32 0.3275911, %v3523_v39 }
 0x164   :  { %4423 = vst [vmem:[#allocation40_spill] sm:$0xff] %v3534_v34  ;;  %2275 = vmatprep.mubr.bf16.mxu0 %v1280_v17  ;;  %v613_v50 = vmul.f32 1.0614054, %v4425_v30  ;;  %v3541_v3 = vmul.f32 %v1200_v41, %v3296_v13  ;;  %v758_v36 = vmul.f32 %v3441_v38, %v726_v14  ;;  %v724_v55 = vadd.f32 1.4214138, %v692_v59 }
 0x165   :  { %v3545_v61 = vand.u32 2147483647, %v3534_v34  ;;  %v4427_v27 = vpack.c.bf16 %v3187_v7, %v3170_v21  ;;  %v4428_v52 = vsub.f32 1.0, %v3500_v26  ;;  %2435 = vpow2.f32 %v1006_v12 }
 0x166   :  { %4426 = vst [vmem:[#allocation14_spill] sm:$0xff] %v3541_v3  ;;  %v3550_v42 = vpop.eup %2423  ;;  %v543_v18 = vadd.f32 1.0, %v511_v15  ;;  %v644_v13 = vadd.f32 -1.4531521, %v612_v22  ;;  %v695_v14 = vmul.f32 %v3498_v29, %v663_v16  ;;  %v1002_v59 = vmul.f32 1.442695, %v949_v8 }
 0x167   :  { %2276 = vmatmul.mubr.bf16.vlgmr.msra.gmra.mxu0 %v4427_v27  ;;  %v3554_v17 = vsub.f32 0.0, %v4428_v52  ;;  %v3556_v41 = vpop.eup %2425  ;;  %v922_v51 = vsub.f32 0.0, %v3451_v63  ;;  %v509_v20 = vmul.f32 0.3275911, %v3545_v61  ;;  %v1169_v7 = vsel %vm1105_vm2, %v1073_v32, %v1137_v56 }
 0x168   :  { %v3561_v21 = vpop.eup %2427  ;;  %v725_v27 = vadd.f32 1.4214138, %v693_v40  ;;  %v542_v52 = vadd.f32 1.0, %v510_v35  ;;  %v645_v25 = vadd.f32 -1.4531521, %v613_v50  ;;  %v756_v15 = vmul.f32 %v3467_v53, %v724_v55 }
 0x169   :  { %v790_v12 = vadd.f32 -0.28449672, %v758_v36  ;;  %v633_v22 = vmul.f32 1.0614054, %v3550_v42  ;;  %v541_v23 = vadd.f32 1.0, %v509_v20  ;;  %2437 = vrcp.f32 %v543_v18 }
 0x16a   :  { %v632_v8 = vmul.f32 1.0614054, %v3556_v41  ;;  %v676_v16 = vmul.f32 %v4424_v5, %v644_v13  ;;  %v677_v34 = vmul.f32 %v4425_v30, %v645_v25  ;;  %v727_v45 = vadd.f32 1.4214138, %v695_v14 }
 0x16b   :  { %v954_v4 = vmul.f32 %v922_v51, %v3451_v63  ;;  %v920_v32 = vsub.f32 0.0, %v3423_v58  ;;  %2439 = vrcp.f32 %v541_v23  ;;  %v3572_v56 = vpop.eup %2429  ;;  %v757_v40 = vmul.f32 %v3484_v49, %v725_v27 }
 0x16c   :  { %2441 = vrcp.f32 %v542_v52  ;;  %v708_v35 = vadd.f32 1.4214138, %v676_v16  ;;  %v709_v20 = vadd.f32 1.4214138, %v677_v34  ;;  %v3575_v50 = vadd.f32 1.0, %v1169_v7 }
 0x16d   :  { %v822_v18 = vmul.f32 %v3441_v38, %v790_v12  ;;  %v665_v36 = vadd.f32 -1.4531521, %v633_v22  ;;  %v921_v25 = vsub.f32 0.0, %v3418_v10  ;;  %v788_v63 = vadd.f32 -0.28449672, %v756_v15 }
 0x16e   :  { %v3579_v55 = vpop.eup %2431  ;;  %v664_v51 = vadd.f32 -1.4531521, %v632_v8  ;;  %v740_v23 = vmul.f32 %v4424_v5, %v708_v35  ;;  %v741_v13 = vmul.f32 %v4425_v30, %v709_v20  ;;  %v634_v14 = vmul.f32 1.0614054, %v3572_v56 }
 0x16f   :  { %v3584_v27 = vmul.f32 1.442695, %v954_v4  ;;  %v952_v34 = vmul.f32 %v920_v32, %v3423_v58  ;;  %v923_v7 = vsub.f32 0.0, %v3465_v62  ;;  %v3588_v52 = vpop.eup %2433  ;;  %v759_v12 = vmul.f32 %v3498_v29, %v727_v45 }
 0x170   :  { %v789_v22 = vadd.f32 -0.28449672, %v757_v40  ;;  %v772_v16 = vadd.f32 -0.28449672, %v740_v23  ;;  %v773_v15 = vadd.f32 -0.28449672, %v741_v13  ;;  %v697_v20 = vmul.f32 %v3550_v42, %v665_v36 }
 0x171   :  { %v3591_v8 = vadd.f32 0.2548296, %v822_v18  ;;  %v635_v35 = vmul.f32 1.0614054, %v3579_v55  ;;  %v953_v4 = vmul.f32 %v921_v25, %v3418_v10  ;;  %v820_v33 = vmul.f32 %v3467_v53, %v788_v63  ;;  %v4429_v63 = vld [vmem:[#allocation3_spill] sm:$0xff] }
 0x172   :  { %v696_v58 = vmul.f32 %v3556_v41, %v664_v51  ;;  %v804_v32 = vmul.f32 %v4424_v5, %v772_v16  ;;  %v805_v28 = vmul.f32 %v4425_v30, %v773_v15  ;;  %v3600_v45 = vpop.eup %2435  ;;  %v666_v40 = vadd.f32 -1.4531521, %v634_v14  ;;  %v4430_v51 = vld [vmem:[#allocation5_spill] sm:$0xff] }
 0x173   :  { %v1008_v23 = vmul.f32 1.442695, %v952_v34  ;;  %v955_v18 = vmul.f32 %v923_v7, %v3465_v62  ;;  %v636_v13 = vmul.f32 1.0614054, %v3588_v52  ;;  %v791_v24 = vadd.f32 -0.28449672, %v759_v12 }
 0x174   :  { %v821_v36 = vmul.f32 %v3484_v49, %v789_v22  ;;  %v836_v10 = vadd.f32 0.2548296, %v804_v32  ;;  %v837_v25 = vadd.f32 0.2548296, %v805_v28  ;;  %vm1092_vm3 = vcmp.ge.f32.partialorder %v4429_v63, 0.0 }
 0x175   :  { %vm1093_vm4 = vcmp.ge.f32.partialorder %v4430_v51, 0.0  ;;  %2443 = vpow2.f32 %v1002_v59  ;;  %v667_v16 = vadd.f32 -1.4531521, %v635_v35  ;;  %v729_v15 = vadd.f32 1.4214138, %v697_v20  ;;  %v4431_v20 = vld [vmem:[#allocation17_spill] sm:$0xff] }
 0x176   :  { %v1010_v11 = vmul.f32 1.442695, %v953_v4  ;;  %v852_v57 = vadd.f32 0.2548296, %v820_v33  ;;  %v728_v14 = vadd.f32 1.4214138, %v696_v58  ;;  %v868_v34 = vmul.f32 %v4424_v5, %v836_v10  ;;  %v3609_v7 = vpop.eup %2437 }
 0x177   :  { %v869_v62 = vmul.f32 %v4425_v30, %v837_v25  ;;  %v698_v12 = vmul.f32 %v3572_v56, %v666_v40  ;;  %2445 = vpow2.f32 %v1008_v23  ;;  %v3612_v28 = vmul.f32 1.442695, %v955_v18 }
 0x178   :  { %v668_v22 = vadd.f32 -1.4531521, %v636_v13  ;;  %v3614_v32 = vpop.eup %2439  ;;  %v823_v59 = vmul.f32 %v3498_v29, %v791_v24  ;;  %v853_v35 = vadd.f32 0.2548296, %v821_v36  ;;  %v1028_v33 = vmul.f32 %v4431_v20, %v868_v34 }
 0x179   :  { %v1029_v4 = vmul.f32 %v3194_v37, %v869_v62  ;;  %v3619_v5 = vpop.eup %2441  ;;  %v699_v30 = vmul.f32 %v3579_v55, %v667_v16  ;;  %v761_v58 = vmul.f32 %v3550_v42, %v729_v15  ;;  %2447 = vpow2.f32 %v1010_v11 }
 0x17a   :  { %v637_v40 = vmul.f32 1.0614054, %v3614_v32  ;;  %v760_v23 = vmul.f32 %v3556_v41, %v728_v14  ;;  %v639_v18 = vmul.f32 1.0614054, %v3609_v7  ;;  %v1060_v13 = vsub.f32 1.0, %v1028_v33 }
 0x17b   :  { %v1061_v24 = vsub.f32 1.0, %v1029_v4  ;;  %v730_v36 = vadd.f32 1.4214138, %v698_v12  ;;  %v700_v10 = vmul.f32 %v3588_v52, %v668_v22  ;;  %v925_v37 = vsub.f32 0.0, %v3545_v61 }
 0x17c   :  { %v669_v25 = vadd.f32 -1.4531521, %v637_v40  ;;  %v885_v34 = vmul.f32 %v3484_v49, %v853_v35  ;;  %v638_v16 = vmul.f32 1.0614054, %v3619_v5  ;;  %v1124_v15 = vsub.f32 0.0, %v1060_v13 }
 0x17d   :  { %v1125_v11 = vsub.f32 0.0, %v1061_v24  ;;  %v731_v62 = vadd.f32 1.4214138, %v699_v30  ;;  %v793_v20 = vadd.f32 -0.28449672, %v761_v58  ;;  %v924_v14 = vsub.f32 0.0, %v3476_v19 }
 0x17e   :  { %v701_v54 = vmul.f32 %v3614_v32, %v669_v25  ;;  %v792_v33 = vadd.f32 -0.28449672, %v760_v23  ;;  %v671_v4 = vadd.f32 -1.4531521, %v639_v18  ;;  %v1156_v12 = vsel %vm1092_vm3, %v1060_v13, %v1124_v15 }
 0x17f   :  { %v1157_v22 = vsel %vm1093_vm4, %v1061_v24, %v1125_v11  ;;  %v732_v40 = vadd.f32 1.4214138, %v700_v10  ;;  %v957_v35 = vmul.f32 %v925_v37, %v3545_v61  ;;  %v1188_v1 = vadd.f32 1.0, %v1156_v12  ;;  %v4432_v61 = vld [vmem:[#allocation4_spill] sm:$0xff]  ;;  %v4433_v10 = vld [vmem:[#allocation7_spill] sm:$0xff] }
 0x180   :  { %v733_v49 = vadd.f32 1.4214138, %v701_v54  ;;  %v884_v30 = vmul.f32 %v3467_v53, %v852_v57  ;;  %v855_v58 = vadd.f32 0.2548296, %v823_v59  ;;  %v670_v2 = vadd.f32 -1.4531521, %v638_v16 }
 0x181   :  { %v1189_v3 = vadd.f32 1.0, %v1157_v22  ;;  %v762_v25 = vmul.f32 %v3572_v56, %v730_v36  ;;  %v825_v23 = vmul.f32 %v3550_v42, %v793_v20  ;;  %v956_v63 = vmul.f32 %v924_v14, %v3476_v19 }
 0x182   :  { %v765_v18 = vmul.f32 %v3614_v32, %v733_v49  ;;  %v2444_v51 = vpop.eup %2443  ;;  %v763_v13 = vmul.f32 %v3579_v55, %v731_v62  ;;  %v703_v54 = vmul.f32 %v3609_v7, %v671_v4  ;;  %v1220_v24 = vmul.f32 %v1188_v1, %v4432_v61  ;;  %v4434_v49 = vld [vmem:[#allocation19_spill] sm:$0xff]  ;;  %v4435_v61 = vld [vmem:[#allocation10_spill] sm:$0xff] }
 0x183   :  { %v1221_v57 = vmul.f32 %v1189_v3, %v4433_v10  ;;  %v3646_v53 = vmul.f32 %v2444_v51, %v885_v34  ;;  %v824_v59 = vmul.f32 %v3556_v41, %v792_v33  ;;  %v764_v36 = vmul.f32 %v3588_v52, %v732_v40 }
 0x184   :  { %v1018_v37 = vmul.f32 1.442695, %v957_v35  ;;  %v2446_v16 = vpop.eup %2445  ;;  %v702_v19 = vmul.f32 %v3619_v5, %v670_v2  ;;  %v927_v15 = vsub.f32 0.0, %v3515_v31  ;;  %v1284_v62 = vpack.c.bf16 %v3387_v6, %v3286_v9 }
 0x185   :  { %v1282_v11 = vpack.c.bf16 %v1221_v57, %v1220_v24  ;;  %v857_v20 = vadd.f32 0.2548296, %v825_v23  ;;  %v1016_v1 = vmul.f32 1.442695, %v956_v63  ;;  %v797_v14 = vadd.f32 -0.28449672, %v765_v18 }
 0x186   :  { %v1283_v3 = vpack.c.bf16 %v3253_v0, %v3227_v60  ;;  %v2448_v34 = vpop.eup %2447  ;;  %2449 = vpow2.f32 %v3584_v27  ;;  %v795_v33 = vadd.f32 -0.28449672, %v763_v13  ;;  %v926_v4 = vsub.f32 0.0, %v3523_v39  ;;  %v4436_v24 = vld [vmem:[#allocation20_spill] sm:$0xff] }
 0x187   :  { %v735_v12 = vadd.f32 1.4214138, %v703_v54  ;;  %2279 = vmatprep.mubr.bf16.mxu1 %v1282_v11  ;;  %v1044_v2 = vmul.f32 %v3561_v21, %v884_v30  ;;  %v856_v22 = vadd.f32 0.2548296, %v824_v59  ;;  %v796_v40 = vadd.f32 -0.28449672, %v764_v36 }
 0x188   :  { %2451 = vpow2.f32 %v1018_v37  ;;  %2280 = vmatmul.mubr.bf16.vlgmr.msra.gmra.mxu1 %v1283_v3  ;;  %vm1107_vm5 = vcmp.ge.f32.partialorder %v3176_v43, 0.0  ;;  %vm1109_vm6 = vcmp.ge.f32.partialorder %v3338_v46, 0.0  ;;  %v794_v9 = vadd.f32 -0.28449672, %v762_v25 }
 0x189   :  { %2453 = vpow2.f32 %v3612_v28  ;;  %v734_v60 = vadd.f32 1.4214138, %v702_v19  ;;  %v959_v0 = vmul.f32 %v927_v15, %v3515_v31  ;;  %2283 = vmatprep.mubr.bf16.mxu1 %v1284_v62  ;;  %v1077_v6 = vsub.f32 1.0, %v3646_v53  ;;  %v4437_v19 = vld [vmem:[#allocation22_spill] sm:$0xff] }
 0x18a   :  { %v889_v27 = vmul.f32 %v3550_v42, %v857_v20  ;;  %2455 = vpow2.f32 %v1016_v1  ;;  %v829_v21 = vmul.f32 %v3614_v32, %v797_v14  ;;  %vm1108_vm7 = vcmp.ge.f32.partialorder %v4434_v49, 0.0  ;;  %v4439_v20 = vld [vmem:[#allocation16_spill] sm:$0xff] }
 0x18b   :  { %v887_v35 = vmul.f32 %v3498_v29, %v855_v58  ;;  %v827_v30 = vmul.f32 %v3579_v55, %v795_v33  ;;  %v958_v25 = vmul.f32 %v926_v4, %v3523_v39  ;;  %v767_v28 = vmul.f32 %v3609_v7, %v735_v12  ;;  %v4440_v12 = vld [vmem:[#allocation14_spill] sm:$0xff] }
 0x18c   :  { %v886_v31 = vmul.f32 %v3441_v38, %v3591_v8  ;;  %v1076_v23 = vsub.f32 1.0, %v1044_v2  ;;  %v888_v63 = vmul.f32 %v3556_v41, %v856_v22  ;;  %v828_v42 = vmul.f32 %v3588_v52, %v796_v40 }
 0x18d   :  { %v826_v18 = vmul.f32 %v3572_v56, %v794_v9  ;;  %v766_v51 = vmul.f32 %v3619_v5, %v734_v60  ;;  %v1022_v13 = vmul.f32 1.442695, %v959_v0  ;;  %v1286_v29 = vpack.c.bf16 %v3489_v47, %v3457_v44  ;;  %v4441_v60 = vld [vmem:[#allocation28_spill] sm:$0xff] }
 0x18e   :  { %v1141_v58 = vsub.f32 0.0, %v1077_v6  ;;  %v1049_v39 = vmul.f32 %v2448_v34, %v889_v27  ;;  %v861_v54 = vadd.f32 0.2548296, %v829_v21  ;;  %v1285_v10 = vpack.c.bf16 %v4436_v24, %v4435_v61  ;;  %v4442_v0 = vld [vmem:[#allocation32_spill] sm:$0xff] }
 0x18f   :  { %v1047_v38 = vmul.f32 %v3600_v45, %v887_v35  ;;  %v859_v8 = vadd.f32 0.2548296, %v827_v30  ;;  %v1020_v41 = vmul.f32 1.442695, %v958_v25  ;;  %v799_v57 = vadd.f32 -0.28449672, %v767_v28 }
 0x190   :  { %v1046_v53 = vmul.f32 %v3531_v48, %v886_v31  ;;  %v1140_v59 = vsub.f32 0.0, %v1076_v23  ;;  %v1048_v36 = vmul.f32 %v2446_v16, %v888_v63  ;;  %v860_v37 = vadd.f32 0.2548296, %v828_v42  ;;  %2284 = vmatmul.mubr.bf16.gmra.mxu1 %v1285_v10  ;;  %v4443_v25 = vld [vmem:[#allocation9_spill] sm:$0xff]  ;;  %v4444_v31 = vld [vmem:[#allocation38_spill] sm:$0xff]  ;;  %v4445_v42 = vld [vmem:[#allocation15_spill] sm:$0xff] }
 0x191   :  { %v1233_v44 = vmul.f32 %v3575_v50, %v4437_v19  ;;  %v858_v47 = vadd.f32 0.2548296, %v826_v18  ;;  %v798_v15 = vadd.f32 -0.28449672, %v766_v51  ;;  %2457 = vpow2.f32 %v1022_v13  ;;  %2287 = vmatprep.mubr.bf16.mxu1 %v1286_v29  ;;  %v4446_v51 = vld [vmem:[#allocation6_spill] sm:$0xff]  ;;  %v4447_v29 = vld [vmem:[#allocation23_spill] sm:$0xff] }
 0x192   :  { %v4438_v11 = vsub.f32 1.0, %v3500_v26  ;;  %v1173_v48 = vsel %vm1109_vm6, %v1077_v6, %v1141_v58  ;;  %v1081_v62 = vsub.f32 1.0, %v1049_v39  ;;  %v893_v16 = vmul.f32 %v3614_v32, %v861_v54  ;;  %v4448_v54 = vld [vmem:[#allocation30_spill] sm:$0xff] }
 0x193   :  { %vm1110_vm8 = vcmp.ge.f32.partialorder %v4439_v20, 0.0  ;;  %v1079_v1 = vsub.f32 1.0, %v1047_v38  ;;  %v891_v50 = vmul.f32 %v3579_v55, %v859_v8  ;;  %2459 = vpow2.f32 %v1020_v41  ;;  %v2450_v3 = vpop.eup %2449  ;;  %v4449_v8 = vld [vmem:[#allocation8_spill] sm:$0xff]  ;;  %v4452_v20 = vld [vmem:[#allocation21_spill] sm:$0xff] }
 0x194   :  { %v1171_v45 = vsel %vm1107_vm5, %v4438_v11, %v3554_v17  ;;  %v831_v14 = vmul.f32 %v3609_v7, %v799_v57  ;;  %v1078_v34 = vsub.f32 1.0, %v1046_v53  ;;  %v1172_v43 = vsel %vm1108_vm7, %v1076_v23, %v1140_v59  ;;  %v4450_v41 = vld [vmem:[#allocation36_spill] sm:$0xff] }
 0x195   :  { %v1080_v26 = vsub.f32 1.0, %v1048_v36  ;;  %v892_v46 = vmul.f32 %v3588_v52, %v860_v37  ;;  %v2452_v17 = vpop.eup %2451  ;;  %v1205_v33 = vadd.f32 1.0, %v1173_v48  ;;  %v890_v32 = vmul.f32 %v3572_v56, %v858_v47 }
 0x196   :  { %v830_v4 = vmul.f32 %v3619_v5, %v798_v15  ;;  %v1288_v2 = vpack.c.bf16 %v1233_v44, %v4440_v12  ;;  %v2454_v55 = vpop.eup %2453  ;;  %v1203_v22 = vadd.f32 1.0, %v1171_v45  ;;  %v1145_v40 = vsub.f32 0.0, %v1081_v62 }
 0x197   :  { %v1053_v9 = vmul.f32 %v2452_v17, %v893_v16  ;;  %v1287_v6 = vpack.c.bf16 %v4442_v0, %v4441_v60  ;;  %v2456_v27 = vpop.eup %2455  ;;  %v1204_v21 = vadd.f32 1.0, %v1172_v43  ;;  %v1143_v49 = vsub.f32 0.0, %v1079_v1  ;;  %v4453_v43 = vld [vmem:[#allocation12_spill] sm:$0xff]  ;;  %v4457_v60 = vld [vmem:[#allocation31_spill] sm:$0xff] }
 0x198   :  { %v1051_v35 = vmul.f32 %v2454_v55, %v891_v50  ;;  %v863_v52 = vadd.f32 0.2548296, %v831_v14  ;;  %v1142_v30 = vsub.f32 0.0, %v1078_v34  ;;  %vm1111_vm9 = vcmp.ge.f32.partialorder %v4443_v25, 0.0  ;;  %v4456_v55 = vld [vmem:[#allocation29_spill] sm:$0xff] }
 0x199   :  { %v1144_v56 = vsub.f32 0.0, %v1080_v26  ;;  %v1052_v28 = vmul.f32 %v2456_v27, %v892_v46  ;;  %2288 = vmatmul.mubr.bf16.gmra.mxu1 %v1287_v6  ;;  %v1237_v23 = vmul.f32 %v1205_v33, %v4444_v31  ;;  %v1050_v63 = vmul.f32 %v2450_v3, %v890_v32  ;;  %v4454_v32 = vld [vmem:[#allocation40_spill] sm:$0xff]  ;;  %v4458_v27 = vld [vmem:[#allocation26_spill] sm:$0xff] }
 0x19a   :  { %vm1113_vm10 = vcmp.ge.f32.partialorder %v4445_v42, 0.0  ;;  %v862_v18 = vadd.f32 0.2548296, %v830_v4  ;;  %2291 = vmatprep.mubr.bf16.mxu1 %v1288_v2  ;;  %v1235_v13 = vmul.f32 %v1203_v22, %v4446_v51  ;;  %vm1112_vm11 = vcmp.ge.f32.partialorder %v4447_v29, 0.0  ;;  %v4455_v4 = vld [vmem:[#allocation13_spill] sm:$0xff]  ;;  %v4461_v29 = vld [vmem:[#allocation27_spill] sm:$0xff] }
 0x19b   :  { %v1177_v58 = vsel %vm1113_vm10, %v1081_v62, %v1145_v40  ;;  %v1085_v39 = vsub.f32 1.0, %v1053_v9  ;;  %v1236_v61 = vmul.f32 %v1204_v21, %v4448_v54  ;;  %v1175_v24 = vsel %vm1111_vm9, %v1079_v1, %v1143_v49  ;;  %v4462_v54 = vld [vmem:[#allocation24_spill] sm:$0xff] }
 0x19c   :  { %v1083_v10 = vsub.f32 1.0, %v1051_v35  ;;  %v895_v38 = vmul.f32 %v3609_v7, %v863_v52  ;;  %v1234_v57 = vmul.f32 %v4450_v41, %v4449_v8  ;;  %v1174_v53 = vsel %vm1110_vm8, %v1078_v34, %v1142_v30  ;;  %v4451_v7 = vld [vmem:[#allocation11_spill] sm:$0xff] }
 0x19d   :  { %v1176_v59 = vsel %vm1112_vm11, %v1080_v26, %v1144_v56  ;;  %v1084_v36 = vsub.f32 1.0, %v1052_v28  ;;  %v1082_v37 = vsub.f32 1.0, %v1050_v63  ;;  %v1209_v19 = vadd.f32 1.0, %v1177_v58 }
 0x19e   :  { %v894_v44 = vmul.f32 %v3619_v5, %v862_v18  ;;  %v1290_v47 = vpack.c.bf16 %v1237_v23, %v1236_v61  ;;  %v2458_v15 = vpop.eup %2457  ;;  %v1207_v11 = vadd.f32 1.0, %v1175_v24  ;;  %v1149_v45 = vsub.f32 0.0, %v1085_v39  ;;  %v4459_v23 = vld [vmem:[#allocation39_spill] sm:$0xff]  ;;  %v4460_v18 = vld [vmem:[#allocation25_spill] sm:$0xff] }
 0x19f   :  { %v1289_v48 = vpack.c.bf16 %v1235_v13, %v1234_v57  ;;  %v1208_v62 = vadd.f32 1.0, %v1176_v59  ;;  %v1147_v16 = vsub.f32 0.0, %v1083_v10  ;;  %v409_v1 = vmul.f32 0.5, %v4451_v7  ;;  %v4464_v57 = vld [vmem:[#allocation37_spill] sm:$0xff] }
 0x1a0   :  { %v1055_v50 = vmul.f32 %v2458_v15, %v895_v38  ;;  %v2460_v14 = vpop.eup %2459  ;;  %v1206_v3 = vadd.f32 1.0, %v1174_v53  ;;  %v407_v34 = vmul.f32 0.5, %v4452_v20  ;;  %v408_v26 = vmul.f32 0.5, %v4453_v43  ;;  %v4466_v15 = vld [vmem:[#allocation34_spill] sm:$0xff]  ;;  %v1249_v43 = vld [vmem:[#allocation2 + $0x8] sm:$0xff] }
 0x1a1   :  { %v1148_v46 = vsub.f32 0.0, %v1084_v36  ;;  %2292 = vmatmul.mubr.bf16.gmra.mxu1 %v1289_v48  ;;  %v1146_v17 = vsub.f32 0.0, %v1082_v37  ;;  %v1241_v5 = vmul.f32 %v1209_v19, %v409_v1  ;;  %v1054_v33 = vmul.f32 %v2460_v14, %v894_v44  ;;  %v4465_v44 = vld [vmem:[#allocation33_spill] sm:$0xff]  ;;  %v1248_v1 = vld [vmem:[#allocation2] sm:$0xff] }
 0x1a2   :  { %vm1117_vm12 = vcmp.ge.f32.partialorder %v4454_v32, 0.0  ;;  %2295 = vmatprep.mubr.bf16.mxu1 %v1290_v47  ;;  %v406_v12 = vmul.f32 0.5, %v4455_v4  ;;  %v1239_v2 = vmul.f32 %v1207_v11, %v407_v34  ;;  %vm1115_vm13 = vcmp.ge.f32.partialorder %v4456_v55, 0.0 }
 0x1a3   :  { %v1181_v22 = vsel %vm1117_vm12, %v1085_v39, %v1149_v45  ;;  %v1240_v40 = vmul.f32 %v1208_v62, %v408_v26  ;;  %v1179_v9 = vsel %vm1115_vm13, %v1083_v10, %v1147_v16  ;;  %vm1116_vm14 = vcmp.ge.f32.partialorder %v4457_v60, 0.0  ;;  %v4463_v10 = vld [vmem:[#allocation35_spill] sm:$0xff]  ;;  %v1250_v16 = vld [vmem:[#allocation2 + $0x10] sm:$0xff] }
 0x1a4   :  { %v1087_v0 = vsub.f32 1.0, %v1055_v50  ;;  %v1238_v6 = vmul.f32 %v1206_v3, %v406_v12  ;;  %vm1114_vm15 = vcmp.ge.f32.partialorder %v4458_v27, 0.0  ;;  %v1180_v21 = vsel %vm1116_vm14, %v1084_v36, %v1148_v46  ;;  %v1251_v3 = vld [vmem:[#allocation2 + $0x18] sm:$0xff]  ;;  %v1252_v60 = vld [vmem:[#allocation2 + $0x20] sm:$0xff] }
 0x1a5   :  { %v1178_v49 = vsel %vm1114_vm15, %v1082_v37, %v1146_v17  ;;  %v1086_v35 = vsub.f32 1.0, %v1054_v33  ;;  %v1213_v52 = vadd.f32 1.0, %v1181_v22  ;;  %v1292_v30 = vpack.c.bf16 %v1241_v5, %v1240_v40  ;;  %v1254_v40 = vld [vmem:[#allocation2 + $0x30] sm:$0xff]  ;;  %v1255_v27 = vld [vmem:[#allocation2 + $0x38] sm:$0xff] }
 0x1a6   :  { %v1211_v25 = vadd.f32 1.0, %v1179_v9  ;;  %v1291_v56 = vpack.c.bf16 %v1239_v2, %v1238_v6  ;;  %v1212_v28 = vadd.f32 1.0, %v1180_v21  ;;  %v1151_v31 = vsub.f32 0.0, %v1087_v0 }
 0x1a7   :  { %v413_v63 = vmul.f32 0.5, %v4459_v23  ;;  %v1210_v42 = vadd.f32 1.0, %v1178_v49  ;;  %v411_v51 = vmul.f32 0.5, %v4460_v18  ;;  %v1150_v13 = vsub.f32 0.0, %v1086_v35 }
 0x1a8   :  { %v412_v58 = vmul.f32 0.5, %v4461_v29  ;;  %v410_v61 = vmul.f32 0.5, %v4462_v54  ;;  %vm1119_vm1 = vcmp.ge.f32.partialorder %v4463_v10, 0.0  ;;  %vm1118_vm2 = vcmp.ge.f32.partialorder %v4464_v57, 0.0 }
 0x1a9   :  { %2296 = vmatmul.mubr.bf16.gmra.mxu1 %v1291_v56  ;;  %v1245_v39 = vmul.f32 %v1213_v52, %v413_v63  ;;  %v1243_v24 = vmul.f32 %v1211_v25, %v411_v51  ;;  %v1183_v8 = vsel %vm1119_vm1, %v1087_v0, %v1151_v31  ;;  %v1182_v53 = vsel %vm1118_vm2, %v1086_v35, %v1150_v13  ;;  %v1253_v35 = vld [vmem:[#allocation2 + $0x28] sm:$0xff]  ;;  %v1258_v25 = vld [vmem:[#allocation2 + $0x50] sm:$0xff]  ;;  %v1256_v31 = vld [vmem:[#allocation2 + $0x40] sm:$0xff] }
 0x1aa   :  { %2299 = vmatprep.mubr.bf16.mxu1 %v1292_v30  ;;  %v1244_v38 = vmul.f32 %v1212_v28, %v412_v58  ;;  %v1242_v41 = vmul.f32 %v1210_v42, %v410_v61  ;;  %v1215_v36 = vadd.f32 1.0, %v1183_v8  ;;  %v1214_v19 = vadd.f32 1.0, %v1182_v53  ;;  %v1259_v42 = vld [vmem:[#allocation2 + $0x58] sm:$0xff]  ;;  %v1257_v58 = vld [vmem:[#allocation2 + $0x48] sm:$0xff]  ;;  %v1260_v53 = vld [vmem:[#allocation2 + $0x60] sm:$0xff] }
 0x1ab   :  { %v415_v47 = vmul.f32 0.5, %v4465_v44  ;;  %v414_v11 = vmul.f32 0.5, %v4466_v15 }
 0x1ac   :  { %v1294_v59 = vpack.c.bf16 %v1245_v39, %v1244_v38  ;;  %v1293_v37 = vpack.c.bf16 %v1243_v24, %v1242_v41  ;;  %v1262_v24 = vld [vmem:[#allocation2 + $0x70] sm:$0xff] }
 0x1ad   :  { %v1247_v45 = vmul.f32 %v1215_v36, %v415_v47  ;;  %v1246_v48 = vmul.f32 %v1214_v19, %v414_v11  ;;  %v1263_v19 = vld [vmem:[#allocation2 + $0x78] sm:$0xff] }
 0x1af   :  { %v1295_v62 = vpack.c.bf16 %v1247_v45, %v1246_v48  ;;  %v1261_v48 = vld [vmem:[#allocation2 + $0x68] sm:$0xff] }
 0x1b1   :  { %2300 = vmatmul.mubr.bf16.gmra.mxu1 %v1293_v37 }
 0x1b2   :  { %2303 = vmatprep.mubr.bf16.mxu1 %v1294_v59 }
 0x1b9   :  { %2304 = vmatmul.mubr.bf16.gmra.mxu1 %v1295_v62 }
 0x227   :  { %v2277_v7 = vpop.f32.mrf.mxu0 }
 0x228   :  { %v1523_v50 = vadd.f32 %v2277_v7, %v1250_v16 }
 0x229   :  { %v1394_v14 = vpop.f32.mrf.mxu0 }
 0x22a   :  { %1555 = vst.msk [vmem:[#allocation2 + $0x10] sm:$0xff] %vm102_vm0, %v1523_v50  ;;  %v1521_v20 = vadd.f32 %v1394_v14, %v1248_v1  ;;  %v1266_v1 = vld [vmem:[#allocation2 + $0x90] sm:$0xff] }
 0x22b   :  { %v2278_v34 = vpop.f32.mrf.mxu0 }
 0x22c   :  { %1553 = vst.msk [vmem:[#allocation2] sm:$0xff] %vm102_vm0, %v1521_v20  ;;  %v1524_v26 = vadd.f32 %v2278_v34, %v1251_v3 }
 0x22d   :  { %v1397_v46 = vpop.f32.mrf.mxu0 }
 0x22e   :  { %1556 = vst.msk [vmem:[#allocation2 + $0x18] sm:$0xff] %vm102_vm0, %v1524_v26  ;;  %v1522_v17 = vadd.f32 %v1397_v46, %v1249_v43  ;;  %v1264_v43 = vld [vmem:[#allocation2 + $0x80] sm:$0xff] }
 0x230   :  { %1554 = vst.msk [vmem:[#allocation2 + $0x8] sm:$0xff] %vm102_vm0, %v1522_v17 }
 0x231   :  { %v3736_v5 = vld [vmem:[#allocation2 + $0x10] sm:$0xff] }
 0x232   :  { %v1628_v33 = vsel %vm102_vm0, %v3736_v5, 0.0 }
 0x233   :  { %1629 = vadd.xlane.f32.xlu1 %v1628_v33  ;;  %v3740_v32 = vld [vmem:[#allocation2] sm:$0xff]  ;;  %v1267_v33 = vld [vmem:[#allocation2 + $0x98] sm:$0xff] }
 0x234   :  { %v1622_v4 = vsel %vm102_vm0, %v3740_v32, 0.0 }
 0x235   :  { %1623 = vadd.xlane.f32.xlu0 %v1622_v4  ;;  %v3744_v12 = vld [vmem:[#allocation2 + $0x18] sm:$0xff] }
 0x236   :  { %v1631_v2 = vsel %vm102_vm0, %v3744_v12, 0.0 }
 0x237   :  { %1632 = vadd.xlane.f32.xlu1 %v1631_v2  ;;  %v3748_v55 = vld [vmem:[#allocation2 + $0x8] sm:$0xff] }
 0x238   :  { %v1625_v22 = vsel %vm102_vm0, %v3748_v55, 0.0 }
 0x239   :  { %1626 = vadd.xlane.f32.xlu0 %v1625_v22 }
 0x248   :  { %v2281_v9 = vpop.f32.mrf.mxu1 }
 0x249   :  { %v1527_v0 = vadd.f32 %v2281_v9, %v1254_v40 }
 0x24a   :  { %v1410_v6 = vpop.f32.mrf.mxu1 }
 0x24b   :  { %1559 = vst.msk [vmem:[#allocation2 + $0x30] sm:$0xff] %vm102_vm0, %v1527_v0  ;;  %v1525_v21 = vadd.f32 %v1410_v6, %v1252_v60  ;;  %v1265_v60 = vld [vmem:[#allocation2 + $0x88] sm:$0xff] }
 0x24c   :  { %v2282_v49 = vpop.f32.mrf.mxu1 }
 0x24d   :  { %1557 = vst.msk [vmem:[#allocation2 + $0x20] sm:$0xff] %vm102_vm0, %v1525_v21  ;;  %v1528_v52 = vadd.f32 %v2282_v49, %v1255_v27  ;;  %v1270_v21 = vld [vmem:[#allocation2 + $0xb0] sm:$0xff] }
 0x24e   :  { %v1413_v30 = vpop.f32.mrf.mxu1 }
 0x24f   :  { %1560 = vst.msk [vmem:[#allocation2 + $0x38] sm:$0xff] %vm102_vm0, %v1528_v52  ;;  %v1526_v56 = vadd.f32 %v1413_v30, %v1253_v35 }
 0x250   :  { %v2285_v28 = vpop.f32.mrf.mxu1 }
 0x251   :  { %1558 = vst.msk [vmem:[#allocation2 + $0x28] sm:$0xff] %vm102_vm0, %v1526_v56  ;;  %v1531_v23 = vadd.f32 %v2285_v28, %v1258_v25  ;;  %v1268_v56 = vld [vmem:[#allocation2 + $0xa0] sm:$0xff] }
 0x252   :  { %v1426_v63 = vpop.f32.mrf.mxu1  ;;  %v3756_v18 = vld [vmem:[#allocation2 + $0x30] sm:$0xff] }
 0x253   :  { %1563 = vst.msk [vmem:[#allocation2 + $0x50] sm:$0xff] %vm102_vm0, %v1531_v23  ;;  %v1529_v51 = vadd.f32 %v1426_v63, %v1256_v31  ;;  %v1640_v13 = vsel %vm102_vm0, %v3756_v18, 0.0  ;;  %v1271_v63 = vld [vmem:[#allocation2 + $0xb8] sm:$0xff] }
 0x254   :  { %v2286_v29 = vpop.f32.mrf.mxu1  ;;  %1641 = vadd.xlane.f32.xlu0 %v1640_v13  ;;  %v3761_v39 = vld [vmem:[#allocation2 + $0x20] sm:$0xff] }
 0x255   :  { %1561 = vst.msk [vmem:[#allocation2 + $0x40] sm:$0xff] %vm102_vm0, %v1529_v51  ;;  %v1532_v54 = vadd.f32 %v2286_v29, %v1259_v42  ;;  %v1634_v41 = vsel %vm102_vm0, %v3761_v39, 0.0 }
 0x256   :  { %v1429_v61 = vpop.f32.mrf.mxu1  ;;  %v3764_v10 = vld [vmem:[#allocation2 + $0x38] sm:$0xff] }
 0x257   :  { %1564 = vst.msk [vmem:[#allocation2 + $0x58] sm:$0xff] %vm102_vm0, %v1532_v54  ;;  %v1530_v38 = vadd.f32 %v1429_v61, %v1257_v58  ;;  %v1643_v8 = vsel %vm102_vm0, %v3764_v10, 0.0  ;;  %v1269_v54 = vld [vmem:[#allocation2 + $0xa8] sm:$0xff] }
 0x258   :  { %1644 = vadd.xlane.f32.xlu1 %v1643_v8  ;;  %1635 = vadd.xlane.f32.xlu0 %v1634_v41  ;;  %v3771_v59 = vld [vmem:[#allocation2 + $0x28] sm:$0xff]  ;;  %v1274_v8 = vld [vmem:[#allocation2 + $0xd0] sm:$0xff] }
 0x259   :  { %v2289_v57 = vpop.f32.mrf.mxu1  ;;  %1562 = vst.msk [vmem:[#allocation2 + $0x48] sm:$0xff] %vm102_vm0, %v1530_v38  ;;  %v1637_v15 = vsel %vm102_vm0, %v3771_v59, 0.0 }
 0x25a   :  { %v1535_v36 = vadd.f32 %v2289_v57, %v1262_v24  ;;  %v3774_v44 = vld [vmem:[#allocation2 + $0x50] sm:$0xff] }
 0x25b   :  { %v1442_v37 = vpop.f32.mrf.mxu1  ;;  %v1652_v11 = vsel %vm102_vm0, %v3774_v44, 0.0 }
 0x25c   :  { %1567 = vst.msk [vmem:[#allocation2 + $0x70] sm:$0xff] %vm102_vm0, %v1535_v36  ;;  %v1533_v47 = vadd.f32 %v1442_v37, %v1260_v53  ;;  %1638 = vadd.xlane.f32.xlu1 %v1637_v15  ;;  %1653 = vadd.xlane.f32.xlu0 %v1652_v11  ;;  %v3781_v62 = vld [vmem:[#allocation2 + $0x40] sm:$0xff] }
 0x25d   :  { %v2290_v45 = vpop.f32.mrf.mxu1  ;;  %v1646_v20 = vsel %vm102_vm0, %v3781_v62, 0.0 }
 0x25e   :  { %1565 = vst.msk [vmem:[#allocation2 + $0x60] sm:$0xff] %vm102_vm0, %v1533_v47  ;;  %v1536_v16 = vadd.f32 %v2290_v45, %v1263_v19  ;;  %v3784_v50 = vld [vmem:[#allocation2 + $0x58] sm:$0xff]  ;;  %v1272_v19 = vld [vmem:[#allocation2 + $0xc0] sm:$0xff] }
 0x25f   :  { %v1445_v7 = vpop.f32.mrf.mxu1  ;;  %v1655_v3 = vsel %vm102_vm0, %v3784_v50, 0.0  ;;  %v1275_v45 = vld [vmem:[#allocation2 + $0xd8] sm:$0xff] }
 0x260   :  { %1568 = vst.msk [vmem:[#allocation2 + $0x78] sm:$0xff] %vm102_vm0, %v1536_v16  ;;  %v1534_v14 = vadd.f32 %v1445_v7, %v1261_v48  ;;  %1656 = vadd.xlane.f32.xlu1 %v1655_v3  ;;  %1647 = vadd.xlane.f32.xlu0 %v1646_v20  ;;  %v3791_v26 = vld [vmem:[#allocation2 + $0x48] sm:$0xff] }
 0x261   :  { %v2293_v34 = vpop.f32.mrf.mxu1  ;;  %v1649_v22 = vsel %vm102_vm0, %v3791_v26, 0.0  ;;  %v1273_v3 = vld [vmem:[#allocation2 + $0xc8] sm:$0xff] }
 0x262   :  { %1566 = vst.msk [vmem:[#allocation2 + $0x68] sm:$0xff] %vm102_vm0, %v1534_v14  ;;  %v1539_v46 = vadd.f32 %v2293_v34, %v1266_v1 }
 0x263   :  { %v1458_v17 = vpop.f32.mrf.mxu1  ;;  %v3794_v4 = vld [vmem:[#allocation2 + $0x70] sm:$0xff] }
 0x264   :  { %1571 = vst.msk [vmem:[#allocation2 + $0x90] sm:$0xff] %vm102_vm0, %v1539_v46  ;;  %v1537_v2 = vadd.f32 %v1458_v17, %v1264_v43  ;;  %v1664_v40 = vsel %vm102_vm0, %v3794_v4, 0.0  ;;  %1650 = vadd.xlane.f32.xlu1 %v1649_v22  ;;  %v1278_v46 = vld [vmem:[#allocation2 + $0xf0] sm:$0xff] }
 0x265   :  { %v2294_v9 = vpop.f32.mrf.mxu1  ;;  %1665 = vadd.xlane.f32.xlu0 %v1664_v40  ;;  %v3801_v0 = vld [vmem:[#allocation2 + $0x60] sm:$0xff] }
 0x266   :  { %1569 = vst.msk [vmem:[#allocation2 + $0x80] sm:$0xff] %vm102_vm0, %v1537_v2  ;;  %v1540_v6 = vadd.f32 %v2294_v9, %v1267_v33  ;;  %v1658_v30 = vsel %vm102_vm0, %v3801_v0, 0.0  ;;  %v1276_v9 = vld [vmem:[#allocation2 + $0xe0] sm:$0xff] }
 0x267   :  { %v1461_v27 = vpop.f32.mrf.mxu1  ;;  %v3804_v49 = vld [vmem:[#allocation2 + $0x78] sm:$0xff] }
 0x268   :  { %1572 = vst.msk [vmem:[#allocation2 + $0x98] sm:$0xff] %vm102_vm0, %v1540_v6  ;;  %v1538_v35 = vadd.f32 %v1461_v27, %v1265_v60  ;;  %v1667_v52 = vsel %vm102_vm0, %v3804_v49, 0.0 }
 0x269   :  { %v2297_v25 = vpop.f32.mrf.mxu1  ;;  %1668 = vadd.xlane.f32.xlu1 %v1667_v52  ;;  %1659 = vadd.xlane.f32.xlu0 %v1658_v30  ;;  %v3811_v28 = vld [vmem:[#allocation2 + $0x68] sm:$0xff] }
 0x26a   :  { %1570 = vst.msk [vmem:[#allocation2 + $0x88] sm:$0xff] %vm102_vm0, %v1538_v35  ;;  %v1543_v31 = vadd.f32 %v2297_v25, %v1270_v21  ;;  %v1661_v13 = vsel %vm102_vm0, %v3811_v28, 0.0  ;;  %v1279_v21 = vld [vmem:[#allocation2 + $0xf8] sm:$0xff] }
 0x26b   :  { %v1474_v23 = vpop.f32.mrf.mxu1  ;;  %v3814_v42 = vld [vmem:[#allocation2 + $0x90] sm:$0xff] }
 0x26c   :  { %1575 = vst.msk [vmem:[#allocation2 + $0xb0] sm:$0xff] %vm102_vm0, %v1543_v31  ;;  %v1541_v51 = vadd.f32 %v1474_v23, %v1268_v56  ;;  %v1676_v29 = vsel %vm102_vm0, %v3814_v42, 0.0  ;;  %v1277_v31 = vld [vmem:[#allocation2 + $0xe8] sm:$0xff] }
 0x26d   :  { %v2298_v58 = vpop.f32.mrf.mxu1  ;;  %1662 = vadd.xlane.f32.xlu1 %v1661_v13  ;;  %1677 = vadd.xlane.f32.xlu0 %v1676_v29  ;;  %v3821_v61 = vld [vmem:[#allocation2 + $0x80] sm:$0xff] }
 0x26e   :  { %1573 = vst.msk [vmem:[#allocation2 + $0xa0] sm:$0xff] %vm102_vm0, %v1541_v51  ;;  %v1544_v24 = vadd.f32 %v2298_v58, %v1271_v63  ;;  %v1670_v36 = vsel %vm102_vm0, %v3821_v61, 0.0 }
 0x26f   :  { %v1477_v38 = vpop.f32.mrf.mxu1  ;;  %v3824_v41 = vld [vmem:[#allocation2 + $0x98] sm:$0xff] }
 0x270   :  { %1576 = vst.msk [vmem:[#allocation2 + $0xb8] sm:$0xff] %vm102_vm0, %v1544_v24  ;;  %v1542_v57 = vadd.f32 %v1477_v38, %v1269_v54  ;;  %v1679_v53 = vsel %vm102_vm0, %v3824_v41, 0.0 }
 0x271   :  { %v2301_v37 = vpop.f32.mrf.mxu1  ;;  %1680 = vadd.xlane.f32.xlu1 %v1679_v53  ;;  %1671 = vadd.xlane.f32.xlu0 %v1670_v36  ;;  %v3831_v47 = vld [vmem:[#allocation2 + $0x88] sm:$0xff] }
 0x272   :  { %1574 = vst.msk [vmem:[#allocation2 + $0xa8] sm:$0xff] %vm102_vm0, %v1542_v57  ;;  %v1547_v15 = vadd.f32 %v2301_v37, %v1274_v8  ;;  %v1673_v7 = vsel %vm102_vm0, %v3831_v47, 0.0 }
 0x273   :  { %v1490_v11 = vpop.f32.mrf.mxu1  ;;  %v3834_v48 = vld [vmem:[#allocation2 + $0xb0] sm:$0xff] }
 0x274   :  { %1579 = vst.msk [vmem:[#allocation2 + $0xd0] sm:$0xff] %vm102_vm0, %v1547_v15  ;;  %v1545_v16 = vadd.f32 %v1490_v11, %v1272_v19  ;;  %v1688_v1 = vsel %vm102_vm0, %v3834_v48, 0.0 }
 0x275   :  { %v2302_v14 = vpop.f32.mrf.mxu1  ;;  %1674 = vadd.xlane.f32.xlu1 %v1673_v7  ;;  %1689 = vadd.xlane.f32.xlu0 %v1688_v1  ;;  %v3841_v20 = vld [vmem:[#allocation2 + $0xa0] sm:$0xff] }
 0x276   :  { %1577 = vst.msk [vmem:[#allocation2 + $0xc0] sm:$0xff] %vm102_vm0, %v1545_v16  ;;  %v1548_v34 = vadd.f32 %v2302_v14, %v1275_v45  ;;  %v1682_v22 = vsel %vm102_vm0, %v3841_v20, 0.0 }
 0x277   :  { %v1493_v43 = vpop.f32.mrf.mxu1  ;;  %v3844_v17 = vld [vmem:[#allocation2 + $0xb8] sm:$0xff] }
 0x278   :  { %1580 = vst.msk [vmem:[#allocation2 + $0xd8] sm:$0xff] %vm102_vm0, %v1548_v34  ;;  %v1546_v33 = vadd.f32 %v1493_v43, %v1273_v3  ;;  %v1691_v2 = vsel %vm102_vm0, %v3844_v17, 0.0 }
 0x279   :  { %v2305_v40 = vpop.f32.mrf.mxu1  ;;  %1692 = vadd.xlane.f32.xlu1 %v1691_v2  ;;  %1683 = vadd.xlane.f32.xlu0 %v1682_v22  ;;  %v3851_v60 = vld [vmem:[#allocation2 + $0xa8] sm:$0xff] }
 0x27a   :  { %1578 = vst.msk [vmem:[#allocation2 + $0xc8] sm:$0xff] %vm102_vm0, %v1546_v33  ;;  %v1551_v6 = vadd.f32 %v2305_v40, %v1278_v46  ;;  %v1685_v30 = vsel %vm102_vm0, %v3851_v60, 0.0 }
 0x27b   :  { %v1506_v27 = vpop.f32.mrf.mxu1  ;;  %v3854_v35 = vld [vmem:[#allocation2 + $0xd0] sm:$0xff] }
 0x27c   :  { %1583 = vst.msk [vmem:[#allocation2 + $0xf0] sm:$0xff] %vm102_vm0, %v1551_v6  ;;  %v1549_v52 = vadd.f32 %v1506_v27, %v1276_v9  ;;  %v1700_v25 = vsel %vm102_vm0, %v3854_v35, 0.0 }
 0x27d   :  { %v2306_v56 = vpop.f32.mrf.mxu1  ;;  %1686 = vadd.xlane.f32.xlu1 %v1685_v30  ;;  %1701 = vadd.xlane.f32.xlu0 %v1700_v25  ;;  %v3861_v23 = vld [vmem:[#allocation2 + $0xc0] sm:$0xff] }
 0x27e   :  { %1581 = vst.msk [vmem:[#allocation2 + $0xe0] sm:$0xff] %vm102_vm0, %v1549_v52  ;;  %v1552_v63 = vadd.f32 %v2306_v56, %v1279_v21  ;;  %v1694_v54 = vsel %vm102_vm0, %v3861_v23, 0.0 }
 0x27f   :  { %v1509_v51 = vpop.f32.mrf.mxu1  ;;  %v3864_v13 = vld [vmem:[#allocation2 + $0xd8] sm:$0xff] }
 0x280   :  { %1584 = vst.msk [vmem:[#allocation2 + $0xf8] sm:$0xff] %vm102_vm0, %v1552_v63  ;;  %v1550_v29 = vadd.f32 %v1509_v51, %v1277_v31  ;;  %v1703_v58 = vsel %vm102_vm0, %v3864_v13, 0.0 }
 0x281   :  { %1704 = vadd.xlane.f32.xlu1 %v1703_v58  ;;  %1695 = vadd.xlane.f32.xlu0 %v1694_v54  ;;  %v3871_v24 = vld [vmem:[#allocation2 + $0xc8] sm:$0xff] }
 0x282   :  { %1582 = vst.msk [vmem:[#allocation2 + $0xe8] sm:$0xff] %vm102_vm0, %v1550_v29  ;;  %v1697_v38 = vsel %vm102_vm0, %v3871_v24, 0.0 }
 0x283   :  { %v3880_v53 = vld [vmem:[#allocation2 + $0xf0] sm:$0xff] }
 0x284   :  { %v1712_v19 = vsel %vm102_vm0, %v3880_v53, 0.0 }
 0x285   :  { %1698 = vadd.xlane.f32.xlu1 %v1697_v38  ;;  %v3876_v8 = vld [vmem:[#allocation2 + $0xe0] sm:$0xff] }
 0x286   :  { %v1706_v57 = vsel %vm102_vm0, %v3876_v8, 0.0 }
 0x287   :  { %1707 = vadd.xlane.f32.xlu0 %v1706_v57  ;;  %v3888_v15 = vld [vmem:[#allocation2 + $0xf8] sm:$0xff] }
 0x288   :  { %v1715_v11 = vsel %vm102_vm0, %v3888_v15, 0.0 }
 0x289   :  { %v3882_v36 = vld [vmem:[#allocation2 + $0xe8] sm:$0xff] }
 0x28a   :  { %v1709_v37 = vsel %vm102_vm0, %v3882_v36, 0.0 }
 0x28b   :  { %1710 = vadd.xlane.f32.xlu1 %v1709_v37  ;;  %1713 = vadd.xlane.f32.xlu0 %v1712_v19 }
 0x28f   :  { %1716 = vadd.xlane.f32.xlu1 %v1715_v11 }
 0x2bc   :  { %v1630_v45 = vpop.xlane.xlu1 %1629 }
 0x2bd   :  { %v1721_v16 = vmul.f32 0.03125, %v1630_v45 }
 0x2be   :  { %v1624_v7 = vpop.xlane.xlu0 %1623 }
 0x2bf   :  { %v3893_v1 = vsub.f32 %v3736_v5, %v1721_v16  ;;  %v1719_v14 = vmul.f32 0.03125, %v1624_v7 }
 0x2c0   :  { %v1633_v3 = vpop.xlane.xlu1 %1632 }
 0x2c1   :  { %v3896_v34 = vsub.f32 %v3740_v32, %v1719_v14  ;;  %v1722_v43 = vmul.f32 0.03125, %v1633_v3  ;;  %v1785_v46 = vmul.f32 %v3893_v1, %v3893_v1 }
 0x2c2   :  { %v1627_v33 = vpop.xlane.xlu0 %1626 }
 0x2c3   :  { %v3901_v2 = vsub.f32 %v3744_v12, %v1722_v43  ;;  %v1720_v22 = vmul.f32 0.03125, %v1627_v33  ;;  %v1821_v40 = vsel %vm102_vm0, %v1785_v46, 0.0  ;;  %v1783_v5 = vmul.f32 %v3896_v34, %v3896_v34 }
 0x2c4   :  { %1822 = vadd.xlane.f32.xlu0 %v1821_v40 }
 0x2c5   :  { %v3907_v9 = vsub.f32 %v3748_v55, %v1720_v22  ;;  %v1786_v32 = vmul.f32 %v3901_v2, %v3901_v2  ;;  %v1815_v27 = vsel %vm102_vm0, %v1783_v5, 0.0 }
 0x2c7   :  { %v1824_v6 = vsel %vm102_vm0, %v1786_v32, 0.0  ;;  %v1784_v12 = vmul.f32 %v3907_v9, %v3907_v9 }
 0x2c8   :  { %1825 = vadd.xlane.f32.xlu1 %v1824_v6  ;;  %1816 = vadd.xlane.f32.xlu0 %v1815_v27 }
 0x2c9   :  { %v1818_v21 = vsel %vm102_vm0, %v1784_v12, 0.0 }
 0x2cc   :  { %1819 = vadd.xlane.f32.xlu1 %v1818_v21 }
 0x2dd   :  { %v1642_v52 = vpop.xlane.xlu0 %1641 }
 0x2de   :  { %v1725_v30 = vmul.f32 0.03125, %v1642_v52 }
 0x2e0   :  { %v3917_v55 = vsub.f32 %v3756_v18, %v1725_v30 }
 0x2e1   :  { %v1645_v25 = vpop.xlane.xlu1 %1644  ;;  %v1636_v56 = vpop.xlane.xlu0 %1635 }
 0x2e2   :  { %v1726_v31 = vmul.f32 0.03125, %v1645_v25  ;;  %v1723_v63 = vmul.f32 0.03125, %v1636_v56  ;;  %v1789_v51 = vmul.f32 %v3917_v55, %v3917_v55 }
 0x2e4   :  { %v3922_v29 = vsub.f32 %v3764_v10, %v1726_v31  ;;  %v3925_v58 = vsub.f32 %v3761_v39, %v1723_v63  ;;  %v1833_v54 = vsel %vm102_vm0, %v1789_v51, 0.0 }
 0x2e5   :  { %v1639_v38 = vpop.xlane.xlu1 %1638  ;;  %1834 = vadd.xlane.f32.xlu0 %v1833_v54  ;;  %v1654_v57 = vpop.xlane.xlu0 %1653 }
 0x2e6   :  { %v1724_v18 = vmul.f32 0.03125, %v1639_v38  ;;  %v1729_v37 = vmul.f32 0.03125, %v1654_v57  ;;  %v1790_v19 = vmul.f32 %v3922_v29, %v3922_v29  ;;  %v1787_v11 = vmul.f32 %v3925_v58, %v3925_v58 }
 0x2e8   :  { %v3933_v45 = vsub.f32 %v3771_v59, %v1724_v18  ;;  %v3936_v10 = vsub.f32 %v3774_v44, %v1729_v37  ;;  %v1836_v39 = vsel %vm102_vm0, %v1790_v19, 0.0  ;;  %v1827_v16 = vsel %vm102_vm0, %v1787_v11, 0.0 }
 0x2e9   :  { %v1657_v7 = vpop.xlane.xlu1 %1656  ;;  %1837 = vadd.xlane.f32.xlu1 %v1836_v39  ;;  %1828 = vadd.xlane.f32.xlu0 %v1827_v16  ;;  %v1648_v14 = vpop.xlane.xlu0 %1647 }
 0x2ea   :  { %v1730_v3 = vmul.f32 0.03125, %v1657_v7  ;;  %v1727_v43 = vmul.f32 0.03125, %v1648_v14  ;;  %v1788_v46 = vmul.f32 %v3933_v45, %v3933_v45  ;;  %v1793_v59 = vmul.f32 %v3936_v10, %v3936_v10 }
 0x2ec   :  { %v3945_v33 = vsub.f32 %v3784_v50, %v1730_v3  ;;  %v3948_v44 = vsub.f32 %v3781_v62, %v1727_v43  ;;  %v1830_v22 = vsel %vm102_vm0, %v1788_v46, 0.0  ;;  %v1845_v40 = vsel %vm102_vm0, %v1793_v59, 0.0 }
 0x2ed   :  { %v1651_v5 = vpop.xlane.xlu1 %1650  ;;  %1831 = vadd.xlane.f32.xlu1 %v1830_v22  ;;  %1846 = vadd.xlane.f32.xlu0 %v1845_v40 }
 0x2ee   :  { %v1666_v32 = vpop.xlane.xlu0 %1665  ;;  %v1728_v6 = vmul.f32 0.03125, %v1651_v5  ;;  %v1794_v12 = vmul.f32 %v3945_v33, %v3945_v33  ;;  %v1791_v50 = vmul.f32 %v3948_v44, %v3948_v44 }
 0x2ef   :  { %v1733_v27 = vmul.f32 0.03125, %v1666_v32 }
 0x2f0   :  { %v3957_v21 = vsub.f32 %v3791_v26, %v1728_v6  ;;  %v1848_v52 = vsel %vm102_vm0, %v1794_v12, 0.0  ;;  %v1839_v30 = vsel %vm102_vm0, %v1791_v50, 0.0 }
 0x2f1   :  { %v3960_v62 = vsub.f32 %v3794_v4, %v1733_v27  ;;  %1849 = vadd.xlane.f32.xlu1 %v1848_v52  ;;  %1840 = vadd.xlane.f32.xlu0 %v1839_v30 }
 0x2f2   :  { %v1669_v25 = vpop.xlane.xlu1 %1668  ;;  %v1660_v56 = vpop.xlane.xlu0 %1659  ;;  %v1792_v51 = vmul.f32 %v3957_v21, %v3957_v21 }
 0x2f3   :  { %v1734_v31 = vmul.f32 0.03125, %v1669_v25  ;;  %v1731_v63 = vmul.f32 0.03125, %v1660_v56  ;;  %v1797_v26 = vmul.f32 %v3960_v62, %v3960_v62 }
 0x2f4   :  { %v1842_v38 = vsel %vm102_vm0, %v1792_v51, 0.0 }
 0x2f5   :  { %v3969_v54 = vsub.f32 %v3804_v49, %v1734_v31  ;;  %v3972_v4 = vsub.f32 %v3801_v0, %v1731_v63  ;;  %v1857_v57 = vsel %vm102_vm0, %v1797_v26, 0.0  ;;  %1843 = vadd.xlane.f32.xlu1 %v1842_v38 }
 0x2f6   :  { %v1663_v18 = vpop.xlane.xlu1 %1662  ;;  %1858 = vadd.xlane.f32.xlu0 %v1857_v57  ;;  %v1678_v37 = vpop.xlane.xlu0 %1677 }
 0x2f7   :  { %v1732_v19 = vmul.f32 0.03125, %v1663_v18  ;;  %v1737_v11 = vmul.f32 0.03125, %v1678_v37  ;;  %v1798_v39 = vmul.f32 %v3969_v54, %v3969_v54  ;;  %v1795_v49 = vmul.f32 %v3972_v4, %v3972_v4 }
 0x2f9   :  { %v3981_v16 = vsub.f32 %v3811_v28, %v1732_v19  ;;  %v3984_v0 = vsub.f32 %v3814_v42, %v1737_v11  ;;  %v1860_v7 = vsel %vm102_vm0, %v1798_v39, 0.0  ;;  %v1851_v14 = vsel %vm102_vm0, %v1795_v49, 0.0 }
 0x2fa   :  { %v1681_v3 = vpop.xlane.xlu1 %1680  ;;  %1861 = vadd.xlane.f32.xlu1 %v1860_v7  ;;  %1852 = vadd.xlane.f32.xlu0 %v1851_v14  ;;  %v1672_v43 = vpop.xlane.xlu0 %1671 }
 0x2fb   :  { %v1738_v46 = vmul.f32 0.03125, %v1681_v3  ;;  %v1735_v59 = vmul.f32 0.03125, %v1672_v43  ;;  %v1796_v22 = vmul.f32 %v3981_v16, %v3981_v16  ;;  %v1801_v28 = vmul.f32 %v3984_v0, %v3984_v0 }
 0x2fd   :  { %v3993_v40 = vsub.f32 %v3824_v41, %v1738_v46  ;;  %v3996_v42 = vsub.f32 %v3821_v61, %v1735_v59  ;;  %v1854_v5 = vsel %vm102_vm0, %v1796_v22, 0.0  ;;  %v1869_v32 = vsel %vm102_vm0, %v1801_v28, 0.0 }
 0x2fe   :  { %v1675_v6 = vpop.xlane.xlu1 %1674  ;;  %1855 = vadd.xlane.f32.xlu1 %v1854_v5  ;;  %1870 = vadd.xlane.f32.xlu0 %v1869_v32  ;;  %v1690_v27 = vpop.xlane.xlu0 %1689 }
 0x2ff   :  { %v1736_v12 = vmul.f32 0.03125, %v1675_v6  ;;  %v1741_v50 = vmul.f32 0.03125, %v1690_v27  ;;  %v1802_v52 = vmul.f32 %v3993_v40, %v3993_v40  ;;  %v1799_v41 = vmul.f32 %v3996_v42, %v3996_v42 }
 0x301   :  { %v4005_v30 = vsub.f32 %v3831_v47, %v1736_v12  ;;  %v4008_v61 = vsub.f32 %v3834_v48, %v1741_v50  ;;  %v1872_v25 = vsel %vm102_vm0, %v1802_v52, 0.0  ;;  %v1863_v56 = vsel %vm102_vm0, %v1799_v41, 0.0 }
 0x302   :  { %v1693_v31 = vpop.xlane.xlu1 %1692  ;;  %1873 = vadd.xlane.f32.xlu1 %v1872_v25  ;;  %1864 = vadd.xlane.f32.xlu0 %v1863_v56  ;;  %v1684_v63 = vpop.xlane.xlu0 %1683 }
 0x303   :  { %v1742_v51 = vmul.f32 0.03125, %v1693_v31  ;;  %v1739_v26 = vmul.f32 0.03125, %v1684_v63  ;;  %v1800_v38 = vmul.f32 %v4005_v30, %v4005_v30  ;;  %v1805_v47 = vmul.f32 %v4008_v61, %v4008_v61 }
 0x305   :  { %v4017_v57 = vsub.f32 %v3844_v17, %v1742_v51  ;;  %v4020_v48 = vsub.f32 %v3841_v20, %v1739_v26  ;;  %v1866_v18 = vsel %vm102_vm0, %v1800_v38, 0.0  ;;  %v1881_v37 = vsel %vm102_vm0, %v1805_v47, 0.0 }
 0x306   :  { %v1687_v19 = vpop.xlane.xlu1 %1686  ;;  %1867 = vadd.xlane.f32.xlu1 %v1866_v18  ;;  %1882 = vadd.xlane.f32.xlu0 %v1881_v37  ;;  %v1702_v11 = vpop.xlane.xlu0 %1701 }
 0x307   :  { %v1740_v39 = vmul.f32 0.03125, %v1687_v19  ;;  %v1745_v49 = vmul.f32 0.03125, %v1702_v11  ;;  %v1806_v7 = vmul.f32 %v4017_v57, %v4017_v57  ;;  %v1803_v17 = vmul.f32 %v4020_v48, %v4020_v48 }
 0x309   :  { %v4029_v14 = vsub.f32 %v3851_v60, %v1740_v39  ;;  %v4032_v20 = vsub.f32 %v3854_v35, %v1745_v49  ;;  %v1884_v3 = vsel %vm102_vm0, %v1806_v7, 0.0  ;;  %v1875_v43 = vsel %vm102_vm0, %v1803_v17, 0.0 }
 0x30a   :  { %v1705_v46 = vpop.xlane.xlu1 %1704  ;;  %1885 = vadd.xlane.f32.xlu1 %v1884_v3  ;;  %1876 = vadd.xlane.f32.xlu0 %v1875_v43  ;;  %v1696_v59 = vpop.xlane.xlu0 %1695 }
 0x30b   :  { %v1746_v22 = vmul.f32 0.03125, %v1705_v46  ;;  %v1743_v28 = vmul.f32 0.03125, %v1696_v59  ;;  %v1804_v5 = vmul.f32 %v4029_v14, %v4029_v14  ;;  %v1809_v60 = vmul.f32 %v4032_v20, %v4032_v20 }
 0x30d   :  { %v4041_v32 = vsub.f32 %v3864_v13, %v1746_v22  ;;  %v4044_v35 = vsub.f32 %v3861_v23, %v1743_v28  ;;  %v1878_v6 = vsel %vm102_vm0, %v1804_v5, 0.0  ;;  %v1893_v27 = vsel %vm102_vm0, %v1809_v60, 0.0 }
 0x30e   :  { %v1699_v12 = vpop.xlane.xlu1 %1698  ;;  %1879 = vadd.xlane.f32.xlu1 %v1878_v6  ;;  %1894 = vadd.xlane.f32.xlu0 %v1893_v27 }
 0x30f   :  { %v1744_v50 = vmul.f32 0.03125, %v1699_v12  ;;  %v1810_v52 = vmul.f32 %v4041_v32, %v4041_v32  ;;  %v1807_v41 = vmul.f32 %v4044_v35, %v4044_v35 }
 0x310   :  { %v1708_v25 = vpop.xlane.xlu0 %1707 }
 0x311   :  { %v4053_v13 = vsub.f32 %v3871_v24, %v1744_v50  ;;  %v1747_v23 = vmul.f32 0.03125, %v1708_v25  ;;  %v1896_v56 = vsel %vm102_vm0, %v1810_v52, 0.0  ;;  %v1887_v31 = vsel %vm102_vm0, %v1807_v41, 0.0 }
 0x312   :  { %1897 = vadd.xlane.f32.xlu1 %v1896_v56  ;;  %1888 = vadd.xlane.f32.xlu0 %v1887_v31  ;;  %v4093_v31 = vld [vmem:[%s4324_s6] ss:$0 sm:$0xff] }
 0x313   :  { %v4058_v63 = vsub.f32 %v3876_v8, %v1747_v23  ;;  %v1808_v51 = vmul.f32 %v4053_v13, %v4053_v13  ;;  %v4087_v23 = vld [vmem:[%s4323_s5] ss:$0 sm:$0xff] }
 0x314   :  { %v1711_v26 = vpop.xlane.xlu1 %1710  ;;  %v1714_v38 = vpop.xlane.xlu0 %1713 }
 0x315   :  { %v1748_v47 = vmul.f32 0.03125, %v1711_v26  ;;  %v1749_v18 = vmul.f32 0.03125, %v1714_v38  ;;  %v1890_v24 = vsel %vm102_vm0, %v1808_v51, 0.0  ;;  %v1811_v37 = vmul.f32 %v4058_v63, %v4058_v63 }
 0x316   :  { %1891 = vadd.xlane.f32.xlu1 %v1890_v24 }
 0x317   :  { %v4066_v19 = vsub.f32 %v3882_v36, %v1748_v47  ;;  %v4069_v11 = vsub.f32 %v3880_v53, %v1749_v18  ;;  %v1899_v8 = vsel %vm102_vm0, %v1811_v37, 0.0 }
 0x318   :  { %v1717_v39 = vpop.xlane.xlu1 %1716  ;;  %1900 = vadd.xlane.f32.xlu0 %v1899_v8 }
 0x319   :  { %v1750_v49 = vmul.f32 0.03125, %v1717_v39  ;;  %v1812_v7 = vmul.f32 %v4066_v19, %v4066_v19  ;;  %v1813_v17 = vmul.f32 %v4069_v11, %v4069_v11 }
 0x31b   :  { %v4077_v3 = vsub.f32 %v3888_v15, %v1750_v49  ;;  %v1902_v36 = vsel %vm102_vm0, %v1812_v7, 0.0  ;;  %v1905_v43 = vsel %vm102_vm0, %v1813_v17, 0.0 }
 0x31c   :  { %1903 = vadd.xlane.f32.xlu1 %v1902_v36  ;;  %1906 = vadd.xlane.f32.xlu0 %v1905_v43 }
 0x31d   :  { %v1814_v53 = vmul.f32 %v4077_v3, %v4077_v3 }
 0x31f   :  { %v1908_v46 = vsel %vm102_vm0, %v1814_v53, 0.0 }
 0x320   :  { %1909 = vadd.xlane.f32.xlu1 %v1908_v46 }
 0x34d   :  { %v1823_v59 = vpop.xlane.xlu0 %1822 }
 0x34e   :  { %v1913_v22 = vmul.f32 0.03125, %v1823_v59 }
 0x350   :  { %v1945_v28 = vadd.f32 1e-05, %v1913_v22 }
 0x351   :  { %v1826_v5 = vpop.xlane.xlu1 %1825  ;;  %v1817_v60 = vpop.xlane.xlu0 %1816 }
 0x352   :  { %2461 = vrsqrt.f32 %v1945_v28  ;;  %v1914_v15 = vmul.f32 0.03125, %v1826_v5  ;;  %v1911_v6 = vmul.f32 0.03125, %v1817_v60 }
 0x354   :  { %v1946_v27 = vadd.f32 1e-05, %v1914_v15  ;;  %v1943_v12 = vadd.f32 1e-05, %v1911_v6 }
 0x355   :  { %v1820_v50 = vpop.xlane.xlu1 %1819 }
 0x356   :  { %2463 = vrsqrt.f32 %v1946_v27  ;;  %v1912_v52 = vmul.f32 0.03125, %v1820_v50 }
 0x357   :  { %2465 = vrsqrt.f32 %v1943_v12 }
 0x358   :  { %v1944_v41 = vadd.f32 1e-05, %v1912_v52 }
 0x35a   :  { %2467 = vrsqrt.f32 %v1944_v41 }
 0x35f   :  { %v2462_v25 = vpop.eup %2461 }
 0x360   :  { %v2009_v56 = vmul.f32 %v2462_v25, %v3893_v1 }
 0x362   :  { %v2047_v51 = vmul.f32 %v4087_v23, %v2009_v56 }
 0x363   :  { %v2464_v26 = vpop.eup %2463 }
 0x364   :  { %v2466_v38 = vpop.eup %2465  ;;  %v2085_v47 = vadd.f32 %v4093_v31, %v2047_v51  ;;  %v2010_v18 = vmul.f32 %v2464_v26, %v3901_v2 }
 0x365   :  { %v2007_v24 = vmul.f32 %v2466_v38, %v3896_v34 }
 0x366   :  { %2117 = vst.msk [vmem:[%s4325_s7 + $0x10] sm:$0xff] %vm102_vm0, %v2085_v47  ;;  %v2048_v1 = vmul.f32 %v4087_v23, %v2010_v18 }
 0x367   :  { %v2468_v37 = vpop.eup %2467  ;;  %v2045_v8 = vmul.f32 %v4087_v23, %v2007_v24 }
 0x368   :  { %v2086_v39 = vadd.f32 %v4093_v31, %v2048_v1  ;;  %v2008_v49 = vmul.f32 %v2468_v37, %v3907_v9 }
 0x369   :  { %v2083_v7 = vadd.f32 %v4093_v31, %v2045_v8 }
 0x36a   :  { %2118 = vst.msk [vmem:[%s4325_s7 + $0x18] sm:$0xff] %vm102_vm0, %v2086_v39  ;;  %v2046_v34 = vmul.f32 %v4087_v23, %v2008_v49 }
 0x36b   :  { %2115 = vst.msk [vmem:[%s4325_s7] sm:$0xff] %vm102_vm0, %v2083_v7 }
 0x36c   :  { %v2084_v2 = vadd.f32 %v4093_v31, %v2046_v34 }
 0x36e   :  { %2116 = vst.msk [vmem:[%s4325_s7 + $0x8] sm:$0xff] %vm102_vm0, %v2084_v2  ;;  %v1835_v9 = vpop.xlane.xlu0 %1834 }
 0x36f   :  { %v1917_v17 = vmul.f32 0.03125, %v1835_v9 }
 0x371   :  { %v1949_v36 = vadd.f32 1e-05, %v1917_v17 }
 0x372   :  { %v1838_v43 = vpop.xlane.xlu1 %1837  ;;  %v1829_v53 = vpop.xlane.xlu0 %1828 }
 0x373   :  { %2469 = vrsqrt.f32 %v1949_v36  ;;  %v1918_v46 = vmul.f32 0.03125, %v1838_v43  ;;  %v1915_v59 = vmul.f32 0.03125, %v1829_v53 }
 0x375   :  { %v1950_v22 = vadd.f32 1e-05, %v1918_v46  ;;  %v1947_v28 = vadd.f32 1e-05, %v1915_v59 }
 0x376   :  { %v1832_v5 = vpop.xlane.xlu1 %1831  ;;  %v1847_v60 = vpop.xlane.xlu0 %1846 }
 0x377   :  { %2471 = vrsqrt.f32 %v1950_v22  ;;  %v1916_v15 = vmul.f32 0.03125, %v1832_v5  ;;  %v1921_v6 = vmul.f32 0.03125, %v1847_v60 }
 0x378   :  { %2473 = vrsqrt.f32 %v1947_v28 }
 0x379   :  { %v1948_v27 = vadd.f32 1e-05, %v1916_v15  ;;  %v1953_v12 = vadd.f32 1e-05, %v1921_v6 }
 0x37a   :  { %v1850_v50 = vpop.xlane.xlu1 %1849  ;;  %v1841_v52 = vpop.xlane.xlu0 %1840 }
 0x37b   :  { %2475 = vrsqrt.f32 %v1948_v27  ;;  %v1922_v41 = vmul.f32 0.03125, %v1850_v50  ;;  %v1919_v25 = vmul.f32 0.03125, %v1841_v52 }
 0x37c   :  { %2477 = vrsqrt.f32 %v1953_v12 }
 0x37d   :  { %v1954_v56 = vadd.f32 1e-05, %v1922_v41  ;;  %v1951_v51 = vadd.f32 1e-05, %v1919_v25 }
 0x37e   :  { %v1844_v26 = vpop.xlane.xlu1 %1843 }
 0x37f   :  { %v1859_v38 = vpop.xlane.xlu0 %1858  ;;  %2479 = vrsqrt.f32 %v1954_v56  ;;  %v1920_v47 = vmul.f32 0.03125, %v1844_v26 }
 0x380   :  { %v1925_v18 = vmul.f32 0.03125, %v1859_v38  ;;  %v2470_v24 = vpop.eup %2469  ;;  %2481 = vrsqrt.f32 %v1951_v51 }
 0x381   :  { %v2013_v1 = vmul.f32 %v2470_v24, %v3917_v55  ;;  %v1952_v37 = vadd.f32 1e-05, %v1920_v47 }
 0x382   :  { %v1957_v8 = vadd.f32 1e-05, %v1925_v18 }
 0x383   :  { %v1862_v39 = vpop.xlane.xlu1 %1861  ;;  %v1853_v49 = vpop.xlane.xlu0 %1852  ;;  %v2051_v7 = vmul.f32 %v4087_v23, %v2013_v1  ;;  %2483 = vrsqrt.f32 %v1952_v37 }
 0x384   :  { %v1926_v34 = vmul.f32 0.03125, %v1862_v39  ;;  %v1923_v2 = vmul.f32 0.03125, %v1853_v49  ;;  %v2472_v9 = vpop.eup %2471  ;;  %2485 = vrsqrt.f32 %v1957_v8 }
 0x385   :  { %v2474_v17 = vpop.eup %2473  ;;  %v2089_v36 = vadd.f32 %v4093_v31, %v2051_v7  ;;  %v2014_v43 = vmul.f32 %v2472_v9, %v3922_v29 }
 0x386   :  { %v1958_v53 = vadd.f32 1e-05, %v1926_v34  ;;  %v1955_v46 = vadd.f32 1e-05, %v1923_v2  ;;  %v2011_v55 = vmul.f32 %v2474_v17, %v3925_v58 }
 0x387   :  { %v1856_v59 = vpop.xlane.xlu1 %1855  ;;  %v1871_v22 = vpop.xlane.xlu0 %1870  ;;  %2121 = vst.msk [vmem:[%s4325_s7 + $0x30] sm:$0xff] %vm102_vm0, %v2089_v36  ;;  %v2052_v28 = vmul.f32 %v4087_v23, %v2014_v43 }
 0x388   :  { %2487 = vrsqrt.f32 %v1958_v53  ;;  %v1924_v5 = vmul.f32 0.03125, %v1856_v59  ;;  %v1929_v60 = vmul.f32 0.03125, %v1871_v22  ;;  %v2476_v15 = vpop.eup %2475  ;;  %v2049_v6 = vmul.f32 %v4087_v23, %v2011_v55 }
 0x389   :  { %2489 = vrsqrt.f32 %v1955_v46  ;;  %v2478_v29 = vpop.eup %2477  ;;  %v2090_v27 = vadd.f32 %v4093_v31, %v2052_v28  ;;  %v2012_v58 = vmul.f32 %v2476_v15, %v3933_v45 }
 0x38a   :  { %v1956_v12 = vadd.f32 1e-05, %v1924_v5  ;;  %v1961_v50 = vadd.f32 1e-05, %v1929_v60  ;;  %v2087_v52 = vadd.f32 %v4093_v31, %v2049_v6  ;;  %v2017_v41 = vmul.f32 %v2478_v29, %v3936_v10 }
 0x38b   :  { %v1874_v25 = vpop.xlane.xlu1 %1873  ;;  %v1865_v56 = vpop.xlane.xlu0 %1864  ;;  %2122 = vst.msk [vmem:[%s4325_s7 + $0x38] sm:$0xff] %vm102_vm0, %v2090_v27  ;;  %v2050_v51 = vmul.f32 %v4087_v23, %v2012_v58 }
 0x38c   :  { %2491 = vrsqrt.f32 %v1956_v12  ;;  %v1930_v26 = vmul.f32 0.03125, %v1874_v25  ;;  %v1927_v38 = vmul.f32 0.03125, %v1865_v56  ;;  %v2480_v47 = vpop.eup %2479  ;;  %2119 = vst.msk [vmem:[%s4325_s7 + $0x20] sm:$0xff] %vm102_vm0, %v2087_v52  ;;  %v2055_v45 = vmul.f32 %v4087_v23, %v2017_v41 }
 0x38d   :  { %2493 = vrsqrt.f32 %v1961_v50  ;;  %v2482_v10 = vpop.eup %2481  ;;  %v2088_v18 = vadd.f32 %v4093_v31, %v2050_v51  ;;  %v2018_v24 = vmul.f32 %v2480_v47, %v3945_v33 }
 0x38e   :  { %v1962_v1 = vadd.f32 1e-05, %v1930_v26  ;;  %v1959_v37 = vadd.f32 1e-05, %v1927_v38  ;;  %v2093_v8 = vadd.f32 %v4093_v31, %v2055_v45  ;;  %v2015_v39 = vmul.f32 %v2482_v10, %v3948_v44 }
 0x38f   :  { %v1868_v49 = vpop.xlane.xlu1 %1867  ;;  %v1883_v7 = vpop.xlane.xlu0 %1882  ;;  %2120 = vst.msk [vmem:[%s4325_s7 + $0x28] sm:$0xff] %vm102_vm0, %v2088_v18  ;;  %v2056_v34 = vmul.f32 %v4087_v23, %v2018_v24 }
 0x390   :  { %2495 = vrsqrt.f32 %v1962_v1  ;;  %v1928_v2 = vmul.f32 0.03125, %v1868_v49  ;;  %v1933_v9 = vmul.f32 0.03125, %v1883_v7  ;;  %v2484_v17 = vpop.eup %2483  ;;  %2125 = vst.msk [vmem:[%s4325_s7 + $0x50] sm:$0xff] %vm102_vm0, %v2093_v8  ;;  %v2053_v33 = vmul.f32 %v4087_v23, %v2015_v39 }
 0x391   :  { %2497 = vrsqrt.f32 %v1959_v37  ;;  %v2486_v44 = vpop.eup %2485  ;;  %v2094_v36 = vadd.f32 %v4093_v31, %v2056_v34  ;;  %v2016_v43 = vmul.f32 %v2484_v17, %v3957_v21 }
 0x392   :  { %v1960_v53 = vadd.f32 1e-05, %v1928_v2  ;;  %v1965_v46 = vadd.f32 1e-05, %v1933_v9  ;;  %v2091_v55 = vadd.f32 %v4093_v31, %v2053_v33  ;;  %v2021_v59 = vmul.f32 %v2486_v44, %v3960_v62 }
 0x393   :  { %v1886_v22 = vpop.xlane.xlu1 %1885  ;;  %v1877_v28 = vpop.xlane.xlu0 %1876  ;;  %2126 = vst.msk [vmem:[%s4325_s7 + $0x58] sm:$0xff] %vm102_vm0, %v2094_v36  ;;  %v2054_v5 = vmul.f32 %v4087_v23, %v2016_v43 }
 0x394   :  { %2499 = vrsqrt.f32 %v1960_v53  ;;  %v1934_v60 = vmul.f32 0.03125, %v1886_v22  ;;  %v1931_v15 = vmul.f32 0.03125, %v1877_v28  ;;  %2123 = vst.msk [vmem:[%s4325_s7 + $0x40] sm:$0xff] %vm102_vm0, %v2091_v55  ;;  %v2059_v21 = vmul.f32 %v4087_v23, %v2021_v59 }
 0x395   :  { %v2488_v6 = vpop.eup %2487  ;;  %2501 = vrsqrt.f32 %v1965_v46  ;;  %v2092_v29 = vadd.f32 %v4093_v31, %v2054_v5 }
 0x396   :  { %v2490_v62 = vpop.eup %2489  ;;  %v2022_v27 = vmul.f32 %v2488_v6, %v3969_v54  ;;  %v1966_v58 = vadd.f32 1e-05, %v1934_v60  ;;  %v1963_v12 = vadd.f32 1e-05, %v1931_v15  ;;  %v2097_v50 = vadd.f32 %v4093_v31, %v2059_v21 }
 0x397   :  { %v2019_v52 = vmul.f32 %v2490_v62, %v3972_v4  ;;  %v1880_v41 = vpop.xlane.xlu1 %1879  ;;  %v1895_v25 = vpop.xlane.xlu0 %1894  ;;  %2124 = vst.msk [vmem:[%s4325_s7 + $0x48] sm:$0xff] %vm102_vm0, %v2092_v29 }
 0x398   :  { %v2060_v56 = vmul.f32 %v4087_v23, %v2022_v27  ;;  %2503 = vrsqrt.f32 %v1966_v58  ;;  %v1932_v51 = vmul.f32 0.03125, %v1880_v41  ;;  %v1937_v26 = vmul.f32 0.03125, %v1895_v25  ;;  %2129 = vst.msk [vmem:[%s4325_s7 + $0x70] sm:$0xff] %vm102_vm0, %v2097_v50 }
 0x399   :  { %v2492_v38 = vpop.eup %2491  ;;  %v2057_v54 = vmul.f32 %v4087_v23, %v2019_v52  ;;  %2505 = vrsqrt.f32 %v1963_v12 }
 0x39a   :  { %v2494_v4 = vpop.eup %2493  ;;  %v2098_v47 = vadd.f32 %v4093_v31, %v2060_v56  ;;  %v2020_v45 = vmul.f32 %v2492_v38, %v3981_v16  ;;  %v1964_v10 = vadd.f32 1e-05, %v1932_v51  ;;  %v1969_v18 = vadd.f32 1e-05, %v1937_v26 }
 0x39b   :  { %v2095_v24 = vadd.f32 %v4093_v31, %v2057_v54  ;;  %v2025_v1 = vmul.f32 %v2494_v4, %v3984_v0  ;;  %v1898_v37 = vpop.xlane.xlu1 %1897  ;;  %v1889_v8 = vpop.xlane.xlu0 %1888 }
 0x39c   :  { %2130 = vst.msk [vmem:[%s4325_s7 + $0x78] sm:$0xff] %vm102_vm0, %v2098_v47  ;;  %v2058_v39 = vmul.f32 %v4087_v23, %v2020_v45  ;;  %2507 = vrsqrt.f32 %v1964_v10  ;;  %v1938_v49 = vmul.f32 0.03125, %v1898_v37  ;;  %v1935_v7 = vmul.f32 0.03125, %v1889_v8 }
 0x39d   :  { %v2496_v34 = vpop.eup %2495  ;;  %2127 = vst.msk [vmem:[%s4325_s7 + $0x60] sm:$0xff] %vm102_vm0, %v2095_v24  ;;  %v2063_v16 = vmul.f32 %v4087_v23, %v2025_v1  ;;  %2509 = vrsqrt.f32 %v1969_v18 }
 0x39e   :  { %v2498_v0 = vpop.eup %2497  ;;  %v2096_v2 = vadd.f32 %v4093_v31, %v2058_v39  ;;  %v2026_v9 = vmul.f32 %v2496_v34, %v3993_v40  ;;  %v1970_v17 = vadd.f32 1e-05, %v1938_v49  ;;  %v1967_v33 = vadd.f32 1e-05, %v1935_v7 }
 0x39f   :  { %v2101_v44 = vadd.f32 %v4093_v31, %v2063_v16  ;;  %v2023_v36 = vmul.f32 %v2498_v0, %v3996_v42  ;;  %v1892_v43 = vpop.xlane.xlu1 %1891 }
 0x3a0   :  { %2128 = vst.msk [vmem:[%s4325_s7 + $0x68] sm:$0xff] %vm102_vm0, %v2096_v2  ;;  %v2064_v53 = vmul.f32 %v4087_v23, %v2026_v9  ;;  %2511 = vrsqrt.f32 %v1970_v17  ;;  %v1936_v46 = vmul.f32 0.03125, %v1892_v43 }
 0x3a1   :  { %v2500_v55 = vpop.eup %2499  ;;  %2133 = vst.msk [vmem:[%s4325_s7 + $0x90] sm:$0xff] %vm102_vm0, %v2101_v44  ;;  %v2061_v40 = vmul.f32 %v4087_v23, %v2023_v36  ;;  %2513 = vrsqrt.f32 %v1967_v33  ;;  %v1901_v42 = vpop.xlane.xlu0 %1900 }
 0x3a2   :  { %v2502_v59 = vpop.eup %2501  ;;  %v2102_v22 = vadd.f32 %v4093_v31, %v2064_v53  ;;  %v2024_v28 = vmul.f32 %v2500_v55, %v4005_v30  ;;  %v1968_v5 = vadd.f32 1e-05, %v1936_v46  ;;  %v1939_v60 = vmul.f32 0.03125, %v1901_v42 }
 0x3a3   :  { %v2099_v15 = vadd.f32 %v4093_v31, %v2061_v40  ;;  %v2029_v6 = vmul.f32 %v2502_v59, %v4008_v61 }
 0x3a4   :  { %2134 = vst.msk [vmem:[%s4325_s7 + $0x98] sm:$0xff] %vm102_vm0, %v2102_v22  ;;  %v2062_v21 = vmul.f32 %v4087_v23, %v2024_v28  ;;  %2515 = vrsqrt.f32 %v1968_v5  ;;  %v1971_v62 = vadd.f32 1e-05, %v1939_v60 }
 0x3a5   :  { %v2504_v29 = vpop.eup %2503  ;;  %2131 = vst.msk [vmem:[%s4325_s7 + $0x80] sm:$0xff] %vm102_vm0, %v2099_v15  ;;  %v2067_v30 = vmul.f32 %v4087_v23, %v2029_v6  ;;  %v1904_v27 = vpop.xlane.xlu1 %1903 }
 0x3a6   :  { %v1907_v58 = vpop.xlane.xlu0 %1906  ;;  %v2506_v61 = vpop.eup %2505  ;;  %v2100_v12 = vadd.f32 %v4093_v31, %v2062_v21  ;;  %v2030_v50 = vmul.f32 %v2504_v29, %v4017_v57  ;;  %2517 = vrsqrt.f32 %v1971_v62  ;;  %v1940_v52 = vmul.f32 0.03125, %v1904_v27 }
 0x3a7   :  { %v2105_v41 = vadd.f32 %v4093_v31, %v2067_v30  ;;  %v2027_v25 = vmul.f32 %v2506_v61, %v4020_v48  ;;  %v1941_v56 = vmul.f32 0.03125, %v1907_v58 }
 0x3a8   :  { %2132 = vst.msk [vmem:[%s4325_s7 + $0x88] sm:$0xff] %vm102_vm0, %v2100_v12  ;;  %v2068_v51 = vmul.f32 %v4087_v23, %v2030_v50  ;;  %v1972_v26 = vadd.f32 1e-05, %v1940_v52 }
 0x3a9   :  { %v2508_v38 = vpop.eup %2507  ;;  %2137 = vst.msk [vmem:[%s4325_s7 + $0xb0] sm:$0xff] %vm102_vm0, %v2105_v41  ;;  %v2065_v57 = vmul.f32 %v4087_v23, %v2027_v25  ;;  %v1973_v54 = vadd.f32 1e-05, %v1941_v56  ;;  %v1910_v4 = vpop.xlane.xlu1 %1909 }
 0x3aa   :  { %v2510_v48 = vpop.eup %2509  ;;  %v2106_v47 = vadd.f32 %v4093_v31, %v2068_v51  ;;  %v2028_v45 = vmul.f32 %v2508_v38, %v4029_v14  ;;  %2519 = vrsqrt.f32 %v1972_v26  ;;  %v1942_v10 = vmul.f32 0.03125, %v1910_v4 }
 0x3ab   :  { %v2103_v18 = vadd.f32 %v4093_v31, %v2065_v57  ;;  %v2033_v24 = vmul.f32 %v2510_v48, %v4032_v20  ;;  %2521 = vrsqrt.f32 %v1973_v54 }
 0x3ac   :  { %2138 = vst.msk [vmem:[%s4325_s7 + $0xb8] sm:$0xff] %vm102_vm0, %v2106_v47  ;;  %v2066_v1 = vmul.f32 %v4087_v23, %v2028_v45  ;;  %v1974_v37 = vadd.f32 1e-05, %v1942_v10 }
 0x3ad   :  { %v2512_v8 = vpop.eup %2511  ;;  %2135 = vst.msk [vmem:[%s4325_s7 + $0xa0] sm:$0xff] %vm102_vm0, %v2103_v18  ;;  %v2071_v14 = vmul.f32 %v4087_v23, %v2033_v24 }
 0x3ae   :  { %v2514_v39 = vpop.eup %2513  ;;  %v2104_v20 = vadd.f32 %v4093_v31, %v2066_v1  ;;  %v2034_v49 = vmul.f32 %v2512_v8, %v4041_v32  ;;  %2523 = vrsqrt.f32 %v1974_v37 }
 0x3af   :  { %v2109_v7 = vadd.f32 %v4093_v31, %v2071_v14  ;;  %v2031_v34 = vmul.f32 %v2514_v39, %v4044_v35 }
 0x3b0   :  { %2136 = vst.msk [vmem:[%s4325_s7 + $0xa8] sm:$0xff] %vm102_vm0, %v2104_v20  ;;  %v2072_v16 = vmul.f32 %v4087_v23, %v2034_v49 }
 0x3b1   :  { %v2516_v0 = vpop.eup %2515  ;;  %2141 = vst.msk [vmem:[%s4325_s7 + $0xd0] sm:$0xff] %vm102_vm0, %v2109_v7  ;;  %v2069_v32 = vmul.f32 %v4087_v23, %v2031_v34 }
 0x3b2   :  { %v2110_v2 = vadd.f32 %v4093_v31, %v2072_v16  ;;  %v2032_v9 = vmul.f32 %v2516_v0, %v4053_v13 }
 0x3b3   :  { %v2518_v35 = vpop.eup %2517  ;;  %v2107_v17 = vadd.f32 %v4093_v31, %v2069_v32 }
 0x3b4   :  { %2142 = vst.msk [vmem:[%s4325_s7 + $0xd8] sm:$0xff] %vm102_vm0, %v2110_v2  ;;  %v2070_v33 = vmul.f32 %v4087_v23, %v2032_v9  ;;  %v2035_v44 = vmul.f32 %v2518_v35, %v4058_v63 }
 0x3b5   :  { %2139 = vst.msk [vmem:[%s4325_s7 + $0xc0] sm:$0xff] %vm102_vm0, %v2107_v17 }
 0x3b6   :  { %v2108_v36 = vadd.f32 %v4093_v31, %v2070_v33  ;;  %v2073_v13 = vmul.f32 %v4087_v23, %v2035_v44 }
 0x3b7   :  { %v2520_v43 = vpop.eup %2519 }
 0x3b8   :  { %v2522_v53 = vpop.eup %2521  ;;  %2140 = vst.msk [vmem:[%s4325_s7 + $0xc8] sm:$0xff] %vm102_vm0, %v2108_v36  ;;  %v2111_v46 = vadd.f32 %v4093_v31, %v2073_v13  ;;  %v2036_v63 = vmul.f32 %v2520_v43, %v4066_v19 }
 0x3b9   :  { %v2037_v55 = vmul.f32 %v2522_v53, %v4069_v11 }
 0x3ba   :  { %2143 = vst.msk [vmem:[%s4325_s7 + $0xe0] sm:$0xff] %vm102_vm0, %v2111_v46  ;;  %v2074_v40 = vmul.f32 %v4087_v23, %v2036_v63 }
 0x3bb   :  { %v2524_v42 = vpop.eup %2523  ;;  %v2075_v59 = vmul.f32 %v4087_v23, %v2037_v55 }
 0x3bc   :  { %v2112_v22 = vadd.f32 %v4093_v31, %v2074_v40  ;;  %v2038_v28 = vmul.f32 %v2524_v42, %v4077_v3 }
 0x3bd   :  { %v2113_v5 = vadd.f32 %v4093_v31, %v2075_v59 }
 0x3be   :  { %2144 = vst.msk [vmem:[%s4325_s7 + $0xe8] sm:$0xff] %vm102_vm0, %v2112_v22  ;;  %v2076_v19 = vmul.f32 %v4087_v23, %v2038_v28 }
 0x3bf   :  { %2145 = vst.msk [vmem:[%s4325_s7 + $0xf0] sm:$0xff] %vm102_vm0, %v2113_v5 }
 0x3c0   :  { %v2114_v11 = vadd.f32 %v4093_v31, %v2076_v19 }
 0x3c2   :  { %2146 = vst.msk [vmem:[%s4325_s7 + $0xf8] sm:$0xff] %vm102_vm0, %v2114_v11 }

</bundles_post_ra>
